<compile_context>
chip_gen: v6e
topology: v6e:2x2x1
jax: 0.10.0
libtpu: 0.0.40
codegen_flags: <defaults>
</compile_context>

<pallas_src>
import math
import jax
import jax.numpy as jnp
from jax.experimental import pallas as pl
from jax.experimental.pallas import tpu as pltpu

# ---------------- config ----------------
B = 2          # batch
S_SRC = 8      # source sequence length
S_TGT = 8      # target sequence length
D_MODEL = 32
D_FF = 64
H = 4          # attention heads
DK = D_MODEL // H
N_LAYERS = 2
VOCAB = 11
EPS = 1e-6
NEG_INF = -1e9


# ---------------- in-kernel building blocks (operate on values in vregs) ----
def _layer_norm(x, a, b):
    # Annotated-Transformer LayerNorm: unbiased std, eps added to std
    # (keep the (std + EPS) form; reciprocal goes to the EUP slot).
    mean = jnp.mean(x, axis=-1, keepdims=True)
    var = jnp.sum((x - mean) ** 2, axis=-1, keepdims=True) / (x.shape[-1] - 1)
    inv = pl.reciprocal(jnp.sqrt(var) + EPS, approx=True)
    return a * (x - mean) * inv + b


def _softmax_lastdim(s):
    s = s - jnp.max(s, axis=-1, keepdims=True)
    e = jnp.exp(s)
    return e * pl.reciprocal(jnp.sum(e, axis=-1, keepdims=True), approx=True)


def _mha(ap, q_in, kv_in, mask):
    """Multi-head attention on one batch element.
    q_in: (S_q, D), kv_in: (S_k, D), mask: broadcastable to (S_q, S_k)."""
    w = ap['qkv_w'][...]        # (D, 3D)  stacked Wq|Wk|Wv -> one wide MXU matmul
    bias = ap['qkv_b'][...]     # (1, 3D)
    if q_in is kv_in:           # self-attention: single fused QKV projection
        qkv = jnp.dot(q_in, w, preferred_element_type=jnp.float32) + bias
        q = qkv[:, :D_MODEL]
        k = qkv[:, D_MODEL:2 * D_MODEL]
        v = qkv[:, 2 * D_MODEL:]
    else:                       # cross-attention: q from decoder, k/v from memory
        q = jnp.dot(q_in, w[:, :D_MODEL],
                    preferred_element_type=jnp.float32) + bias[:, :D_MODEL]
        kv = jnp.dot(kv_in, w[:, D_MODEL:],
                     preferred_element_type=jnp.float32) + bias[:, D_MODEL:]
        k = kv[:, :D_MODEL]
        v = kv[:, D_MODEL:]

    inv_sqrt_dk = 1.0 / math.sqrt(DK)
    keep = mask > 0.5           # in-register broadcast; robust to non-exact 0/1
    heads = []
    for h in range(H):          # static unroll; everything stays in vregs
        sl = slice(h * DK, (h + 1) * DK)
        scores = jnp.dot(q[:, sl], k[:, sl].T,
                         preferred_element_type=jnp.float32) * inv_sqrt_dk
        scores = jnp.where(keep, scores, NEG_INF)
        p_attn = _softmax_lastdim(scores)                      # dropout: identity
        heads.append(jnp.dot(p_attn, v[:, sl],
                             preferred_element_type=jnp.float32))
    o = jnp.concatenate(heads, axis=-1)                        # lane-dense (S_q, D)
    return jnp.dot(o, ap['o_w'][...],
                   preferred_element_type=jnp.float32) + ap['o_b'][...]


def _ffn(fp, x):
    h = jnp.dot(x, fp['w1'][...], preferred_element_type=jnp.float32) + fp['b1'][...]
    h = jnp.maximum(h, 0.0)     # ReLU
    return jnp.dot(h, fp['w2'][...], preferred_element_type=jnp.float32) + fp['b2'][...]


# ---------------- the single fused kernel ----------------
def _make_fused_kernel(treedef, n_weights):
    def kernel(*refs):
        src_x_ref, tgt_x_ref, src_m_ref, tgt_m_ref = refs[:4]
        w_refs = refs[4:4 + n_weights]
        out_ref = refs[4 + n_weights]
        p = jax.tree_util.tree_unflatten(treedef, w_refs)

        src_x = src_x_ref[0]    # (S_SRC, D)   one batch element per grid step
        tgt_x = tgt_x_ref[0]    # (S_TGT, D)
        src_m = src_m_ref[0]    # (1, S_SRC)   compact padding mask
        tgt_m = tgt_m_ref[0]    # (S_TGT, S_TGT) compact causal mask

        # ---- encoder ----
        x = src_x
        for lp in p['enc_layers']:
            y = _layer_norm(x, lp['ln1_a'][...], lp['ln1_b'][...])
            x = x + _mha(lp['self_attn'], y, y, src_m)
            y = _layer_norm(x, lp['ln2_a'][...], lp['ln2_b'][...])
            x = x + _ffn(lp['ffn'], y)
        memory = _layer_norm(x, p['enc_norm_a'][...], p['enc_norm_b'][...])

        # ---- decoder ----
        x = tgt_x
        for lp in p['dec_layers']:
            y = _layer_norm(x, lp['ln1_a'][...], lp['ln1_b'][...])
            x = x + _mha(lp['self_attn'], y, y, tgt_m)
            y = _layer_norm(x, lp['ln2_a'][...], lp['ln2_b'][...])
            x = x + _mha(lp['src_attn'], y, memory, src_m)
            y = _layer_norm(x, lp['ln3_a'][...], lp['ln3_b'][...])
            x = x + _ffn(lp['ffn'], y)
        x = _layer_norm(x, p['dec_norm_a'][...], p['dec_norm_b'][...])

        out_ref[0] = x
    return kernel


# ---------------- wrapper ----------------
def _batch_spec(shape):
    nd = len(shape)

    def imap(b):
        return (b,) + (0,) * (nd - 1)

    return pl.BlockSpec((1,) + tuple(shape[1:]), imap)


def _full_spec(shape):
    nd = len(shape)

    def imap(b):
        return (0,) * nd

    return pl.BlockSpec(tuple(shape), imap)


def encoder_decoder_forward(params, src, tgt, src_mask, tgt_mask):
    emb = params['embed']
    scale = math.sqrt(D_MODEL)
    # Embedding lookup as a plain gather in the wrapper (no one-hot matmul),
    # plus positional encoding.  Dropout: eval-mode identity.
    src_x = jnp.take(emb['src_lut'], src, axis=0) * scale + emb['pe'][None, :src.shape[1], :]
    tgt_x = jnp.take(emb['tgt_lut'], tgt, axis=0) * scale + emb['pe'][None, :tgt.shape[1], :]
    src_mask = src_mask.astype(jnp.float32)
    tgt_mask = tgt_mask.astype(jnp.float32)

    w_leaves, treedef = jax.tree_util.tree_flatten(params['model'])
    kernel = _make_fused_kernel(treedef, len(w_leaves))

    bsz, s_tgt = tgt.shape
    act_args = [src_x, tgt_x, src_mask, tgt_mask]
    in_specs = ([_batch_spec(a.shape) for a in act_args] +
                [_full_spec(w.shape) for w in w_leaves])   # weights: VMEM-resident, never re-fetched

    return pl.pallas_call(
        kernel,
        grid=(bsz,),                                        # batch elements are independent
        in_specs=in_specs,
        out_specs=_batch_spec((bsz, s_tgt, D_MODEL)),
        out_shape=jax.ShapeDtypeStruct((bsz, s_tgt, D_MODEL), jnp.float32),
        compiler_params=pltpu.CompilerParams(
            dimension_semantics=("parallel",)),             # shard across TCs on v7x
    )(*act_args, *w_leaves)
    # TODO(synk): matmuls kept in f32 (not bf16) to preserve reference numerics
    # and v5e VPU compatibility; switch operands to bf16 if the model is scaled up.


# ---------------- deterministic parameter init ----------------
def positional_encoding(max_len, d_model):
    position = jnp.arange(max_len, dtype=jnp.float32)[:, None]
    div_term = jnp.exp(jnp.arange(0, d_model, 2, dtype=jnp.float32)
                       * -(math.log(10000.0) / d_model))
    pe = jnp.zeros((max_len, d_model), jnp.float32)
    pe = pe.at[:, 0::2].set(jnp.sin(position * div_term))
    pe = pe.at[:, 1::2].set(jnp.cos(position * div_term))
    return pe


def init_params(key):
    keys = iter(jax.random.split(key, 64))

    def dense(din, dout, scale=0.05):
        return (scale * jax.random.normal(next(keys), (din, dout), jnp.float32),
                jnp.zeros((1, dout), jnp.float32))

    def attn():
        wq, bq = dense(D_MODEL, D_MODEL)
        wk, bk = dense(D_MODEL, D_MODEL)
        wv, bv = dense(D_MODEL, D_MODEL)
        wo, bo = dense(D_MODEL, D_MODEL)
        return {'qkv_w': jnp.concatenate([wq, wk, wv], axis=1),   # (D, 3D)
                'qkv_b': jnp.concatenate([bq, bk, bv], axis=1),   # (1, 3D)
                'o_w': wo, 'o_b': bo}

    def ffn():
        w1, b1 = dense(D_MODEL, D_FF)
        w2, b2 = dense(D_FF, D_MODEL)
        return {'w1': w1, 'b1': b1, 'w2': w2, 'b2': b2}

    def norm_pair():
        return (jnp.ones((1, D_MODEL), jnp.float32),
                jnp.zeros((1, D_MODEL), jnp.float32))

    enc_layers = []
    for _ in range(N_LAYERS):
        ln1_a, ln1_b = norm_pair()
        ln2_a, ln2_b = norm_pair()
        enc_layers.append({'self_attn': attn(), 'ffn': ffn(),
                           'ln1_a': ln1_a, 'ln1_b': ln1_b,
                           'ln2_a': ln2_a, 'ln2_b': ln2_b})
    dec_layers = []
    for _ in range(N_LAYERS):
        ln1_a, ln1_b = norm_pair()
        ln2_a, ln2_b = norm_pair()
        ln3_a, ln3_b = norm_pair()
        dec_layers.append({'self_attn': attn(), 'src_attn': attn(), 'ffn': ffn(),
                           'ln1_a': ln1_a, 'ln1_b': ln1_b,
                           'ln2_a': ln2_a, 'ln2_b': ln2_b,
                           'ln3_a': ln3_a, 'ln3_b': ln3_b})
    enc_a, enc_b = norm_pair()
    dec_a, dec_b = norm_pair()

    return {
        'embed': {
            'src_lut': 0.05 * jax.random.normal(next(keys), (VOCAB, D_MODEL), jnp.float32),
            'tgt_lut': 0.05 * jax.random.normal(next(keys), (VOCAB, D_MODEL), jnp.float32),
            'pe': positional_encoding(64, D_MODEL),
        },
        'model': {
            'enc_layers': enc_layers,
            'dec_layers': dec_layers,
            'enc_norm_a': enc_a, 'enc_norm_b': enc_b,
            'dec_norm_a': dec_a, 'dec_norm_b': dec_b,
        },
    }


if __name__ == "__main__":
    key = jax.random.PRNGKey(0)
    pkey, skey, tkey = jax.random.split(key, 3)
    params = init_params(pkey)

    src = jax.random.randint(skey, (B, S_SRC), 1, VOCAB, dtype=jnp.int32)
    tgt = jax.random.randint(tkey, (B, S_TGT), 1, VOCAB, dtype=jnp.int32)
    src_mask = jnp.ones((B, 1, S_SRC), jnp.float32)                  # padding mask (all valid)
    subseq = jnp.tril(jnp.ones((S_TGT, S_TGT), jnp.float32))         # causal mask
    tgt_mask = jnp.broadcast_to(subseq[None, :, :], (B, S_TGT, S_TGT))

    out = jax.jit(encoder_decoder_forward)(params, src, tgt, src_mask, tgt_mask)
    out = jax.block_until_ready(out)

    assert out.shape == (B, S_TGT, D_MODEL), out.shape
    assert bool(jnp.all(jnp.isfinite(out)))
    print("KERNEL_OK")
</pallas_src>

<mosaic_0001>
module attributes {stable_mosaic.version = 11 : i64} {
  func.func @kernel(%arg0: i32, %arg1: memref<1x8x32xf32, #tpu.memory_space<vmem>>, %arg2: memref<1x8x32xf32, #tpu.memory_space<vmem>>, %arg3: memref<1x1x8xf32, #tpu.memory_space<vmem>>, %arg4: memref<1x8x8xf32, #tpu.memory_space<vmem>>, %arg5: memref<1x64xf32, #tpu.memory_space<vmem>>, %arg6: memref<1x32xf32, #tpu.memory_space<vmem>>, %arg7: memref<32x64xf32, #tpu.memory_space<vmem>>, %arg8: memref<64x32xf32, #tpu.memory_space<vmem>>, %arg9: memref<1x32xf32, #tpu.memory_space<vmem>>, %arg10: memref<1x32xf32, #tpu.memory_space<vmem>>, %arg11: memref<1x32xf32, #tpu.memory_space<vmem>>, %arg12: memref<1x32xf32, #tpu.memory_space<vmem>>, %arg13: memref<1x32xf32, #tpu.memory_space<vmem>>, %arg14: memref<1x32xf32, #tpu.memory_space<vmem>>, %arg15: memref<1x32xf32, #tpu.memory_space<vmem>>, %arg16: memref<32x32xf32, #tpu.memory_space<vmem>>, %arg17: memref<1x96xf32, #tpu.memory_space<vmem>>, %arg18: memref<32x96xf32, #tpu.memory_space<vmem>>, %arg19: memref<1x32xf32, #tpu.memory_space<vmem>>, %arg20: memref<32x32xf32, #tpu.memory_space<vmem>>, %arg21: memref<1x96xf32, #tpu.memory_space<vmem>>, %arg22: memref<32x96xf32, #tpu.memory_space<vmem>>, %arg23: memref<1x64xf32, #tpu.memory_space<vmem>>, %arg24: memref<1x32xf32, #tpu.memory_space<vmem>>, %arg25: memref<32x64xf32, #tpu.memory_space<vmem>>, %arg26: memref<64x32xf32, #tpu.memory_space<vmem>>, %arg27: memref<1x32xf32, #tpu.memory_space<vmem>>, %arg28: memref<1x32xf32, #tpu.memory_space<vmem>>, %arg29: memref<1x32xf32, #tpu.memory_space<vmem>>, %arg30: memref<1x32xf32, #tpu.memory_space<vmem>>, %arg31: memref<1x32xf32, #tpu.memory_space<vmem>>, %arg32: memref<1x32xf32, #tpu.memory_space<vmem>>, %arg33: memref<1x32xf32, #tpu.memory_space<vmem>>, %arg34: memref<32x32xf32, #tpu.memory_space<vmem>>, %arg35: memref<1x96xf32, #tpu.memory_space<vmem>>, %arg36: memref<32x96xf32, #tpu.memory_space<vmem>>, %arg37: memref<1x32xf32, #tpu.memory_space<vmem>>, %arg38: memref<32x32xf32, #tpu.memory_space<vmem>>, %arg39: memref<1x96xf32, #tpu.memory_space<vmem>>, %arg40: memref<32x96xf32, #tpu.memory_space<vmem>>, %arg41: memref<1x32xf32, #tpu.memory_space<vmem>>, %arg42: memref<1x32xf32, #tpu.memory_space<vmem>>, %arg43: memref<1x64xf32, #tpu.memory_space<vmem>>, %arg44: memref<1x32xf32, #tpu.memory_space<vmem>>, %arg45: memref<32x64xf32, #tpu.memory_space<vmem>>, %arg46: memref<64x32xf32, #tpu.memory_space<vmem>>, %arg47: memref<1x32xf32, #tpu.memory_space<vmem>>, %arg48: memref<1x32xf32, #tpu.memory_space<vmem>>, %arg49: memref<1x32xf32, #tpu.memory_space<vmem>>, %arg50: memref<1x32xf32, #tpu.memory_space<vmem>>, %arg51: memref<1x32xf32, #tpu.memory_space<vmem>>, %arg52: memref<32x32xf32, #tpu.memory_space<vmem>>, %arg53: memref<1x96xf32, #tpu.memory_space<vmem>>, %arg54: memref<32x96xf32, #tpu.memory_space<vmem>>, %arg55: memref<1x64xf32, #tpu.memory_space<vmem>>, %arg56: memref<1x32xf32, #tpu.memory_space<vmem>>, %arg57: memref<32x64xf32, #tpu.memory_space<vmem>>, %arg58: memref<64x32xf32, #tpu.memory_space<vmem>>, %arg59: memref<1x32xf32, #tpu.memory_space<vmem>>, %arg60: memref<1x32xf32, #tpu.memory_space<vmem>>, %arg61: memref<1x32xf32, #tpu.memory_space<vmem>>, %arg62: memref<1x32xf32, #tpu.memory_space<vmem>>, %arg63: memref<1x32xf32, #tpu.memory_space<vmem>>, %arg64: memref<32x32xf32, #tpu.memory_space<vmem>>, %arg65: memref<1x96xf32, #tpu.memory_space<vmem>>, %arg66: memref<32x96xf32, #tpu.memory_space<vmem>>, %arg67: memref<1x32xf32, #tpu.memory_space<vmem>>, %arg68: memref<1x32xf32, #tpu.memory_space<vmem>>, %arg69: memref<1x8x32xf32, #tpu.memory_space<vmem>>) attributes {dimension_semantics = [#tpu.dimension_semantics<parallel>], iteration_bounds = array<i64: 2>, scalar_prefetch = 0 : i64, scratch_operands = 0 : i64, tpu.core_type = #tpu.core_type<tc>, window_params = [{transform_indices = @transform_0, window_bounds = array<i64: 1, 8, 32>}, {transform_indices = @transform_1, window_bounds = array<i64: 1, 8, 32>}, {transform_indices = @transform_2, window_bounds = array<i64: 1, 1, 8>}, {transform_indices = @transform_3, window_bounds = array<i64: 1, 8, 8>}, {pipeline_mode = #tpu.pipeline_mode<synchronous>, transform_indices = @transform_4, window_bounds = array<i64: 1, 64>}, {pipeline_mode = #tpu.pipeline_mode<synchronous>, transform_indices = @transform_5, window_bounds = array<i64: 1, 32>}, {pipeline_mode = #tpu.pipeline_mode<synchronous>, transform_indices = @transform_6, window_bounds = array<i64: 32, 64>}, {pipeline_mode = #tpu.pipeline_mode<synchronous>, transform_indices = @transform_7, window_bounds = array<i64: 64, 32>}, {pipeline_mode = #tpu.pipeline_mode<synchronous>, transform_indices = @transform_8, window_bounds = array<i64: 1, 32>}, {pipeline_mode = #tpu.pipeline_mode<synchronous>, transform_indices = @transform_9, window_bounds = array<i64: 1, 32>}, {pipeline_mode = #tpu.pipeline_mode<synchronous>, transform_indices = @transform_10, window_bounds = array<i64: 1, 32>}, {pipeline_mode = #tpu.pipeline_mode<synchronous>, transform_indices = @transform_11, window_bounds = array<i64: 1, 32>}, {pipeline_mode = #tpu.pipeline_mode<synchronous>, transform_indices = @transform_12, window_bounds = array<i64: 1, 32>}, {pipeline_mode = #tpu.pipeline_mode<synchronous>, transform_indices = @transform_13, window_bounds = array<i64: 1, 32>}, {pipeline_mode = #tpu.pipeline_mode<synchronous>, transform_indices = @transform_14, window_bounds = array<i64: 1, 32>}, {pipeline_mode = #tpu.pipeline_mode<synchronous>, transform_indices = @transform_15, window_bounds = array<i64: 32, 32>}, {pipeline_mode = #tpu.pipeline_mode<synchronous>, transform_indices = @transform_16, window_bounds = array<i64: 1, 96>}, {pipeline_mode = #tpu.pipeline_mode<synchronous>, transform_indices = @transform_17, window_bounds = array<i64: 32, 96>}, {pipeline_mode = #tpu.pipeline_mode<synchronous>, transform_indices = @transform_18, window_bounds = array<i64: 1, 32>}, {pipeline_mode = #tpu.pipeline_mode<synchronous>, transform_indices = @transform_19, window_bounds = array<i64: 32, 32>}, {pipeline_mode = #tpu.pipeline_mode<synchronous>, transform_indices = @transform_20, window_bounds = array<i64: 1, 96>}, {pipeline_mode = #tpu.pipeline_mode<synchronous>, transform_indices = @transform_21, window_bounds = array<i64: 32, 96>}, {pipeline_mode = #tpu.pipeline_mode<synchronous>, transform_indices = @transform_22, window_bounds = array<i64: 1, 64>}, {pipeline_mode = #tpu.pipeline_mode<synchronous>, transform_indices = @transform_23, window_bounds = array<i64: 1, 32>}, {pipeline_mode = #tpu.pipeline_mode<synchronous>, transform_indices = @transform_24, window_bounds = array<i64: 32, 64>}, {pipeline_mode = #tpu.pipeline_mode<synchronous>, transform_indices = @transform_25, window_bounds = array<i64: 64, 32>}, {pipeline_mode = #tpu.pipeline_mode<synchronous>, transform_indices = @transform_26, window_bounds = array<i64: 1, 32>}, {pipeline_mode = #tpu.pipeline_mode<synchronous>, transform_indices = @transform_27, window_bounds = array<i64: 1, 32>}, {pipeline_mode = #tpu.pipeline_mode<synchronous>, transform_indices = @transform_28, window_bounds = array<i64: 1, 32>}, {pipeline_mode = #tpu.pipeline_mode<synchronous>, transform_indices = @transform_29, window_bounds = array<i64: 1, 32>}, {pipeline_mode = #tpu.pipeline_mode<synchronous>, transform_indices = @transform_30, window_bounds = array<i64: 1, 32>}, {pipeline_mode = #tpu.pipeline_mode<synchronous>, transform_indices = @transform_31, window_bounds = array<i64: 1, 32>}, {pipeline_mode = #tpu.pipeline_mode<synchronous>, transform_indices = @transform_32, window_bounds = array<i64: 1, 32>}, {pipeline_mode = #tpu.pipeline_mode<synchronous>, transform_indices = @transform_33, window_bounds = array<i64: 32, 32>}, {pipeline_mode = #tpu.pipeline_mode<synchronous>, transform_indices = @transform_34, window_bounds = array<i64: 1, 96>}, {pipeline_mode = #tpu.pipeline_mode<synchronous>, transform_indices = @transform_35, window_bounds = array<i64: 32, 96>}, {pipeline_mode = #tpu.pipeline_mode<synchronous>, transform_indices = @transform_36, window_bounds = array<i64: 1, 32>}, {pipeline_mode = #tpu.pipeline_mode<synchronous>, transform_indices = @transform_37, window_bounds = array<i64: 32, 32>}, {pipeline_mode = #tpu.pipeline_mode<synchronous>, transform_indices = @transform_38, window_bounds = array<i64: 1, 96>}, {pipeline_mode = #tpu.pipeline_mode<synchronous>, transform_indices = @transform_39, window_bounds = array<i64: 32, 96>}, {pipeline_mode = #tpu.pipeline_mode<synchronous>, transform_indices = @transform_40, window_bounds = array<i64: 1, 32>}, {pipeline_mode = #tpu.pipeline_mode<synchronous>, transform_indices = @transform_41, window_bounds = array<i64: 1, 32>}, {pipeline_mode = #tpu.pipeline_mode<synchronous>, transform_indices = @transform_42, window_bounds = array<i64: 1, 64>}, {pipeline_mode = #tpu.pipeline_mode<synchronous>, transform_indices = @transform_43, window_bounds = array<i64: 1, 32>}, {pipeline_mode = #tpu.pipeline_mode<synchronous>, transform_indices = @transform_44, window_bounds = array<i64: 32, 64>}, {pipeline_mode = #tpu.pipeline_mode<synchronous>, transform_indices = @transform_45, window_bounds = array<i64: 64, 32>}, {pipeline_mode = #tpu.pipeline_mode<synchronous>, transform_indices = @transform_46, window_bounds = array<i64: 1, 32>}, {pipeline_mode = #tpu.pipeline_mode<synchronous>, transform_indices = @transform_47, window_bounds = array<i64: 1, 32>}, {pipeline_mode = #tpu.pipeline_mode<synchronous>, transform_indices = @transform_48, window_bounds = array<i64: 1, 32>}, {pipeline_mode = #tpu.pipeline_mode<synchronous>, transform_indices = @transform_49, window_bounds = array<i64: 1, 32>}, {pipeline_mode = #tpu.pipeline_mode<synchronous>, transform_indices = @transform_50, window_bounds = array<i64: 1, 32>}, {pipeline_mode = #tpu.pipeline_mode<synchronous>, transform_indices = @transform_51, window_bounds = array<i64: 32, 32>}, {pipeline_mode = #tpu.pipeline_mode<synchronous>, transform_indices = @transform_52, window_bounds = array<i64: 1, 96>}, {pipeline_mode = #tpu.pipeline_mode<synchronous>, transform_indices = @transform_53, window_bounds = array<i64: 32, 96>}, {pipeline_mode = #tpu.pipeline_mode<synchronous>, transform_indices = @transform_54, window_bounds = array<i64: 1, 64>}, {pipeline_mode = #tpu.pipeline_mode<synchronous>, transform_indices = @transform_55, window_bounds = array<i64: 1, 32>}, {pipeline_mode = #tpu.pipeline_mode<synchronous>, transform_indices = @transform_56, window_bounds = array<i64: 32, 64>}, {pipeline_mode = #tpu.pipeline_mode<synchronous>, transform_indices = @transform_57, window_bounds = array<i64: 64, 32>}, {pipeline_mode = #tpu.pipeline_mode<synchronous>, transform_indices = @transform_58, window_bounds = array<i64: 1, 32>}, {pipeline_mode = #tpu.pipeline_mode<synchronous>, transform_indices = @transform_59, window_bounds = array<i64: 1, 32>}, {pipeline_mode = #tpu.pipeline_mode<synchronous>, transform_indices = @transform_60, window_bounds = array<i64: 1, 32>}, {pipeline_mode = #tpu.pipeline_mode<synchronous>, transform_indices = @transform_61, window_bounds = array<i64: 1, 32>}, {pipeline_mode = #tpu.pipeline_mode<synchronous>, transform_indices = @transform_62, window_bounds = array<i64: 1, 32>}, {pipeline_mode = #tpu.pipeline_mode<synchronous>, transform_indices = @transform_63, window_bounds = array<i64: 32, 32>}, {pipeline_mode = #tpu.pipeline_mode<synchronous>, transform_indices = @transform_64, window_bounds = array<i64: 1, 96>}, {pipeline_mode = #tpu.pipeline_mode<synchronous>, transform_indices = @transform_65, window_bounds = array<i64: 32, 96>}, {pipeline_mode = #tpu.pipeline_mode<synchronous>, transform_indices = @transform_66, window_bounds = array<i64: 1, 32>}, {pipeline_mode = #tpu.pipeline_mode<synchronous>, transform_indices = @transform_67, window_bounds = array<i64: 1, 32>}, {transform_indices = @transform_68, window_bounds = array<i64: 1, 8, 32>}]} {
    %c0 = arith.constant 0 : index
    %c0_0 = arith.constant 0 : index
    %c0_1 = arith.constant 0 : index
    %0 = vector.load %arg1[%c0, %c0_0, %c0_1] : memref<1x8x32xf32, #tpu.memory_space<vmem>>, vector<1x8x32xf32>
    %1 = vector.shape_cast %0 : vector<1x8x32xf32> to vector<8x32xf32>
    %c0_2 = arith.constant 0 : index
    %c0_3 = arith.constant 0 : index
    %c0_4 = arith.constant 0 : index
    %2 = vector.load %arg2[%c0_2, %c0_3, %c0_4] : memref<1x8x32xf32, #tpu.memory_space<vmem>>, vector<1x8x32xf32>
    %3 = vector.shape_cast %2 : vector<1x8x32xf32> to vector<8x32xf32>
    %c0_5 = arith.constant 0 : index
    %c0_6 = arith.constant 0 : index
    %c0_7 = arith.constant 0 : index
    %4 = vector.load %arg3[%c0_5, %c0_6, %c0_7] : memref<1x1x8xf32, #tpu.memory_space<vmem>>, vector<1x1x8xf32>
    %5 = vector.shape_cast %4 : vector<1x1x8xf32> to vector<1x8xf32>
    %c0_8 = arith.constant 0 : index
    %c0_9 = arith.constant 0 : index
    %c0_10 = arith.constant 0 : index
    %6 = vector.load %arg4[%c0_8, %c0_9, %c0_10] : memref<1x8x8xf32, #tpu.memory_space<vmem>>, vector<1x8x8xf32>
    %7 = vector.shape_cast %6 : vector<1x8x8xf32> to vector<8x8xf32>
    %c0_11 = arith.constant 0 : index
    %c0_12 = arith.constant 0 : index
    %8 = vector.load %arg47[%c0_11, %c0_12] : memref<1x32xf32, #tpu.memory_space<vmem>>, vector<1x32xf32>
    %c0_13 = arith.constant 0 : index
    %c0_14 = arith.constant 0 : index
    %9 = vector.load %arg48[%c0_13, %c0_14] : memref<1x32xf32, #tpu.memory_space<vmem>>, vector<1x32xf32>
    %cst = arith.constant dense<0.000000e+00> : vector<8xf32>
    %10 = vector.multi_reduction <add>, %1, %cst [1] : vector<8x32xf32> to vector<8xf32>
    %11 = vector.shape_cast %10 : vector<8xf32> to vector<8x1xf32>
    %cst_15 = arith.constant 3.200000e+01 : f32
    %12 = vector.broadcast %cst_15 : f32 to vector<8x1xf32>
    %13 = arith.divf %11, %12 : vector<8x1xf32>
    %14 = vector.broadcast %13 : vector<8x1xf32> to vector<8x32xf32>
    %15 = arith.subf %1, %14 : vector<8x32xf32>
    %16 = arith.mulf %15, %15 : vector<8x32xf32>
    %cst_16 = arith.constant dense<0.000000e+00> : vector<8xf32>
    %17 = vector.multi_reduction <add>, %16, %cst_16 [1] : vector<8x32xf32> to vector<8xf32>
    %18 = vector.shape_cast %17 : vector<8xf32> to vector<8x1xf32>
    %cst_17 = arith.constant 3.100000e+01 : f32
    %19 = vector.broadcast %cst_17 : f32 to vector<8x1xf32>
    %20 = arith.divf %18, %19 : vector<8x1xf32>
    %21 = math.sqrt %20 : vector<8x1xf32>
    %cst_18 = arith.constant 9.99999997E-7 : f32
    %22 = vector.broadcast %cst_18 : f32 to vector<8x1xf32>
    %23 = arith.addf %21, %22 : vector<8x1xf32>
    %24 = tpu.reciprocal %23 {approx = true} : vector<8x1xf32> -> vector<8x1xf32>
    %25 = vector.broadcast %13 : vector<8x1xf32> to vector<8x32xf32>
    %26 = arith.subf %1, %25 : vector<8x32xf32>
    %27 = vector.broadcast %8 : vector<1x32xf32> to vector<8x32xf32>
    %28 = arith.mulf %27, %26 : vector<8x32xf32>
    %29 = vector.broadcast %24 : vector<8x1xf32> to vector<8x32xf32>
    %30 = arith.mulf %28, %29 : vector<8x32xf32>
    %31 = vector.broadcast %9 : vector<1x32xf32> to vector<8x32xf32>
    %32 = arith.addf %30, %31 : vector<8x32xf32>
    %c0_19 = arith.constant 0 : index
    %c0_20 = arith.constant 0 : index
    %33 = vector.load %arg54[%c0_19, %c0_20] : memref<32x96xf32, #tpu.memory_space<vmem>>, vector<32x96xf32>
    %c0_21 = arith.constant 0 : index
    %c0_22 = arith.constant 0 : index
    %34 = vector.load %arg53[%c0_21, %c0_22] : memref<1x96xf32, #tpu.memory_space<vmem>>, vector<1x96xf32>
    %cst_23 = arith.constant dense<0.000000e+00> : vector<8x96xf32>
    %35 = tpu.matmul %32, %33, %cst_23 {dimension_numbers = #tpu.dot_dimension_numbers<[1], [0], [0], [1], [0, 0, 1, 1], [], []>} : vector<8x32xf32>, vector<32x96xf32>, vector<8x96xf32> -> vector<8x96xf32>
    %36 = vector.broadcast %34 : vector<1x96xf32> to vector<8x96xf32>
    %37 = arith.addf %35, %36 : vector<8x96xf32>
    %38 = vector.extract_strided_slice %37 {offsets = [0, 0], sizes = [8, 32], strides = [1, 1]} : vector<8x96xf32> to vector<8x32xf32>
    %39 = vector.extract_strided_slice %37 {offsets = [0, 32], sizes = [8, 32], strides = [1, 1]} : vector<8x96xf32> to vector<8x32xf32>
    %40 = vector.extract_strided_slice %37 {offsets = [0, 64], sizes = [8, 32], strides = [1, 1]} : vector<8x96xf32> to vector<8x32xf32>
    %cst_24 = arith.constant 5.000000e-01 : f32
    %41 = vector.broadcast %cst_24 : f32 to vector<1x8xf32>
    %42 = arith.cmpf ogt, %5, %41 : vector<1x8xf32>
    %43 = vector.extract_strided_slice %38 {offsets = [0, 0], sizes = [8, 8], strides = [1, 1]} : vector<8x32xf32> to vector<8x8xf32>
    %44 = vector.extract_strided_slice %39 {offsets = [0, 0], sizes = [8, 8], strides = [1, 1]} : vector<8x32xf32> to vector<8x8xf32>
    %45 = tpu.transpose %44, [1, 0] : vector<8x8xf32> -> vector<8x8xf32>
    %cst_25 = arith.constant dense<0.000000e+00> : vector<8x8xf32>
    %46 = tpu.matmul %43, %45, %cst_25 {dimension_numbers = #tpu.dot_dimension_numbers<[1], [0], [0], [1], [0, 0, 1, 1], [], []>} : vector<8x8xf32>, vector<8x8xf32>, vector<8x8xf32> -> vector<8x8xf32>
    %cst_26 = arith.constant 0.353553385 : f32
    %47 = vector.broadcast %cst_26 : f32 to vector<8x8xf32>
    %48 = arith.mulf %46, %47 : vector<8x8xf32>
    %cst_27 = arith.constant -1.000000e+09 : f32
    %49 = vector.shape_cast %42 : vector<1x8xi1> to vector<1x8xi1>
    %50 = vector.broadcast %49 : vector<1x8xi1> to vector<8x8xi1>
    %51 = vector.broadcast %cst_27 : f32 to vector<8x8xf32>
    %52 = arith.select %50, %48, %51 : vector<8x8xi1>, vector<8x8xf32>
    %cst_28 = arith.constant dense<0xFF800000> : vector<8xf32>
    %53 = vector.multi_reduction <maximumf>, %52, %cst_28 [1] : vector<8x8xf32> to vector<8xf32>
    %54 = vector.shape_cast %53 : vector<8xf32> to vector<8x1xf32>
    %55 = vector.broadcast %54 : vector<8x1xf32> to vector<8x8xf32>
    %56 = arith.subf %52, %55 : vector<8x8xf32>
    %57 = math.exp %56 : vector<8x8xf32>
    %cst_29 = arith.constant dense<0.000000e+00> : vector<8xf32>
    %58 = vector.multi_reduction <add>, %57, %cst_29 [1] : vector<8x8xf32> to vector<8xf32>
    %59 = vector.shape_cast %58 : vector<8xf32> to vector<8x1xf32>
    %60 = tpu.reciprocal %59 {approx = true} : vector<8x1xf32> -> vector<8x1xf32>
    %61 = vector.broadcast %60 : vector<8x1xf32> to vector<8x8xf32>
    %62 = arith.mulf %57, %61 : vector<8x8xf32>
    %63 = vector.extract_strided_slice %40 {offsets = [0, 0], sizes = [8, 8], strides = [1, 1]} : vector<8x32xf32> to vector<8x8xf32>
    %cst_30 = arith.constant dense<0.000000e+00> : vector<8x8xf32>
    %64 = tpu.matmul %62, %63, %cst_30 {dimension_numbers = #tpu.dot_dimension_numbers<[1], [0], [0], [1], [0, 0, 1, 1], [], []>} : vector<8x8xf32>, vector<8x8xf32>, vector<8x8xf32> -> vector<8x8xf32>
    %65 = vector.extract_strided_slice %38 {offsets = [0, 8], sizes = [8, 8], strides = [1, 1]} : vector<8x32xf32> to vector<8x8xf32>
    %66 = vector.extract_strided_slice %39 {offsets = [0, 8], sizes = [8, 8], strides = [1, 1]} : vector<8x32xf32> to vector<8x8xf32>
    %67 = tpu.transpose %66, [1, 0] : vector<8x8xf32> -> vector<8x8xf32>
    %cst_31 = arith.constant dense<0.000000e+00> : vector<8x8xf32>
    %68 = tpu.matmul %65, %67, %cst_31 {dimension_numbers = #tpu.dot_dimension_numbers<[1], [0], [0], [1], [0, 0, 1, 1], [], []>} : vector<8x8xf32>, vector<8x8xf32>, vector<8x8xf32> -> vector<8x8xf32>
    %cst_32 = arith.constant 0.353553385 : f32
    %69 = vector.broadcast %cst_32 : f32 to vector<8x8xf32>
    %70 = arith.mulf %68, %69 : vector<8x8xf32>
    %cst_33 = arith.constant -1.000000e+09 : f32
    %71 = vector.shape_cast %42 : vector<1x8xi1> to vector<1x8xi1>
    %72 = vector.broadcast %71 : vector<1x8xi1> to vector<8x8xi1>
    %73 = vector.broadcast %cst_33 : f32 to vector<8x8xf32>
    %74 = arith.select %72, %70, %73 : vector<8x8xi1>, vector<8x8xf32>
    %cst_34 = arith.constant dense<0xFF800000> : vector<8xf32>
    %75 = vector.multi_reduction <maximumf>, %74, %cst_34 [1] : vector<8x8xf32> to vector<8xf32>
    %76 = vector.shape_cast %75 : vector<8xf32> to vector<8x1xf32>
    %77 = vector.broadcast %76 : vector<8x1xf32> to vector<8x8xf32>
    %78 = arith.subf %74, %77 : vector<8x8xf32>
    %79 = math.exp %78 : vector<8x8xf32>
    %cst_35 = arith.constant dense<0.000000e+00> : vector<8xf32>
    %80 = vector.multi_reduction <add>, %79, %cst_35 [1] : vector<8x8xf32> to vector<8xf32>
    %81 = vector.shape_cast %80 : vector<8xf32> to vector<8x1xf32>
    %82 = tpu.reciprocal %81 {approx = true} : vector<8x1xf32> -> vector<8x1xf32>
    %83 = vector.broadcast %82 : vector<8x1xf32> to vector<8x8xf32>
    %84 = arith.mulf %79, %83 : vector<8x8xf32>
    %85 = vector.extract_strided_slice %40 {offsets = [0, 8], sizes = [8, 8], strides = [1, 1]} : vector<8x32xf32> to vector<8x8xf32>
    %cst_36 = arith.constant dense<0.000000e+00> : vector<8x8xf32>
    %86 = tpu.matmul %84, %85, %cst_36 {dimension_numbers = #tpu.dot_dimension_numbers<[1], [0], [0], [1], [0, 0, 1, 1], [], []>} : vector<8x8xf32>, vector<8x8xf32>, vector<8x8xf32> -> vector<8x8xf32>
    %87 = vector.extract_strided_slice %38 {offsets = [0, 16], sizes = [8, 8], strides = [1, 1]} : vector<8x32xf32> to vector<8x8xf32>
    %88 = vector.extract_strided_slice %39 {offsets = [0, 16], sizes = [8, 8], strides = [1, 1]} : vector<8x32xf32> to vector<8x8xf32>
    %89 = tpu.transpose %88, [1, 0] : vector<8x8xf32> -> vector<8x8xf32>
    %cst_37 = arith.constant dense<0.000000e+00> : vector<8x8xf32>
    %90 = tpu.matmul %87, %89, %cst_37 {dimension_numbers = #tpu.dot_dimension_numbers<[1], [0], [0], [1], [0, 0, 1, 1], [], []>} : vector<8x8xf32>, vector<8x8xf32>, vector<8x8xf32> -> vector<8x8xf32>
    %cst_38 = arith.constant 0.353553385 : f32
    %91 = vector.broadcast %cst_38 : f32 to vector<8x8xf32>
    %92 = arith.mulf %90, %91 : vector<8x8xf32>
    %cst_39 = arith.constant -1.000000e+09 : f32
    %93 = vector.shape_cast %42 : vector<1x8xi1> to vector<1x8xi1>
    %94 = vector.broadcast %93 : vector<1x8xi1> to vector<8x8xi1>
    %95 = vector.broadcast %cst_39 : f32 to vector<8x8xf32>
    %96 = arith.select %94, %92, %95 : vector<8x8xi1>, vector<8x8xf32>
    %cst_40 = arith.constant dense<0xFF800000> : vector<8xf32>
    %97 = vector.multi_reduction <maximumf>, %96, %cst_40 [1] : vector<8x8xf32> to vector<8xf32>
    %98 = vector.shape_cast %97 : vector<8xf32> to vector<8x1xf32>
    %99 = vector.broadcast %98 : vector<8x1xf32> to vector<8x8xf32>
    %100 = arith.subf %96, %99 : vector<8x8xf32>
    %101 = math.exp %100 : vector<8x8xf32>
    %cst_41 = arith.constant dense<0.000000e+00> : vector<8xf32>
    %102 = vector.multi_reduction <add>, %101, %cst_41 [1] : vector<8x8xf32> to vector<8xf32>
    %103 = vector.shape_cast %102 : vector<8xf32> to vector<8x1xf32>
    %104 = tpu.reciprocal %103 {approx = true} : vector<8x1xf32> -> vector<8x1xf32>
    %105 = vector.broadcast %104 : vector<8x1xf32> to vector<8x8xf32>
    %106 = arith.mulf %101, %105 : vector<8x8xf32>
    %107 = vector.extract_strided_slice %40 {offsets = [0, 16], sizes = [8, 8], strides = [1, 1]} : vector<8x32xf32> to vector<8x8xf32>
    %cst_42 = arith.constant dense<0.000000e+00> : vector<8x8xf32>
    %108 = tpu.matmul %106, %107, %cst_42 {dimension_numbers = #tpu.dot_dimension_numbers<[1], [0], [0], [1], [0, 0, 1, 1], [], []>} : vector<8x8xf32>, vector<8x8xf32>, vector<8x8xf32> -> vector<8x8xf32>
    %109 = vector.extract_strided_slice %38 {offsets = [0, 24], sizes = [8, 8], strides = [1, 1]} : vector<8x32xf32> to vector<8x8xf32>
    %110 = vector.extract_strided_slice %39 {offsets = [0, 24], sizes = [8, 8], strides = [1, 1]} : vector<8x32xf32> to vector<8x8xf32>
    %111 = tpu.transpose %110, [1, 0] : vector<8x8xf32> -> vector<8x8xf32>
    %cst_43 = arith.constant dense<0.000000e+00> : vector<8x8xf32>
    %112 = tpu.matmul %109, %111, %cst_43 {dimension_numbers = #tpu.dot_dimension_numbers<[1], [0], [0], [1], [0, 0, 1, 1], [], []>} : vector<8x8xf32>, vector<8x8xf32>, vector<8x8xf32> -> vector<8x8xf32>
    %cst_44 = arith.constant 0.353553385 : f32
    %113 = vector.broadcast %cst_44 : f32 to vector<8x8xf32>
    %114 = arith.mulf %112, %113 : vector<8x8xf32>
    %cst_45 = arith.constant -1.000000e+09 : f32
    %115 = vector.shape_cast %42 : vector<1x8xi1> to vector<1x8xi1>
    %116 = vector.broadcast %115 : vector<1x8xi1> to vector<8x8xi1>
    %117 = vector.broadcast %cst_45 : f32 to vector<8x8xf32>
    %118 = arith.select %116, %114, %117 : vector<8x8xi1>, vector<8x8xf32>
    %cst_46 = arith.constant dense<0xFF800000> : vector<8xf32>
    %119 = vector.multi_reduction <maximumf>, %118, %cst_46 [1] : vector<8x8xf32> to vector<8xf32>
    %120 = vector.shape_cast %119 : vector<8xf32> to vector<8x1xf32>
    %121 = vector.broadcast %120 : vector<8x1xf32> to vector<8x8xf32>
    %122 = arith.subf %118, %121 : vector<8x8xf32>
    %123 = math.exp %122 : vector<8x8xf32>
    %cst_47 = arith.constant dense<0.000000e+00> : vector<8xf32>
    %124 = vector.multi_reduction <add>, %123, %cst_47 [1] : vector<8x8xf32> to vector<8xf32>
    %125 = vector.shape_cast %124 : vector<8xf32> to vector<8x1xf32>
    %126 = tpu.reciprocal %125 {approx = true} : vector<8x1xf32> -> vector<8x1xf32>
    %127 = vector.broadcast %126 : vector<8x1xf32> to vector<8x8xf32>
    %128 = arith.mulf %123, %127 : vector<8x8xf32>
    %129 = vector.extract_strided_slice %40 {offsets = [0, 24], sizes = [8, 8], strides = [1, 1]} : vector<8x32xf32> to vector<8x8xf32>
    %cst_48 = arith.constant dense<0.000000e+00> : vector<8x8xf32>
    %130 = tpu.matmul %128, %129, %cst_48 {dimension_numbers = #tpu.dot_dimension_numbers<[1], [0], [0], [1], [0, 0, 1, 1], [], []>} : vector<8x8xf32>, vector<8x8xf32>, vector<8x8xf32> -> vector<8x8xf32>
    %131 = tpu.concatenate %64, %86, %108, %130 in 1 : vector<8x8xf32>, vector<8x8xf32>, vector<8x8xf32>, vector<8x8xf32> -> vector<8x32xf32>
    %c0_49 = arith.constant 0 : index
    %c0_50 = arith.constant 0 : index
    %132 = vector.load %arg52[%c0_49, %c0_50] : memref<32x32xf32, #tpu.memory_space<vmem>>, vector<32x32xf32>
    %cst_51 = arith.constant dense<0.000000e+00> : vector<8x32xf32>
    %133 = tpu.matmul %131, %132, %cst_51 {dimension_numbers = #tpu.dot_dimension_numbers<[1], [0], [0], [1], [0, 0, 1, 1], [], []>} : vector<8x32xf32>, vector<32x32xf32>, vector<8x32xf32> -> vector<8x32xf32>
    %c0_52 = arith.constant 0 : index
    %c0_53 = arith.constant 0 : index
    %134 = vector.load %arg51[%c0_52, %c0_53] : memref<1x32xf32, #tpu.memory_space<vmem>>, vector<1x32xf32>
    %135 = vector.broadcast %134 : vector<1x32xf32> to vector<8x32xf32>
    %136 = arith.addf %133, %135 : vector<8x32xf32>
    %137 = arith.addf %1, %136 : vector<8x32xf32>
    %c0_54 = arith.constant 0 : index
    %c0_55 = arith.constant 0 : index
    %138 = vector.load %arg49[%c0_54, %c0_55] : memref<1x32xf32, #tpu.memory_space<vmem>>, vector<1x32xf32>
    %c0_56 = arith.constant 0 : index
    %c0_57 = arith.constant 0 : index
    %139 = vector.load %arg50[%c0_56, %c0_57] : memref<1x32xf32, #tpu.memory_space<vmem>>, vector<1x32xf32>
    %cst_58 = arith.constant dense<0.000000e+00> : vector<8xf32>
    %140 = vector.multi_reduction <add>, %137, %cst_58 [1] : vector<8x32xf32> to vector<8xf32>
    %141 = vector.shape_cast %140 : vector<8xf32> to vector<8x1xf32>
    %cst_59 = arith.constant 3.200000e+01 : f32
    %142 = vector.broadcast %cst_59 : f32 to vector<8x1xf32>
    %143 = arith.divf %141, %142 : vector<8x1xf32>
    %144 = vector.broadcast %143 : vector<8x1xf32> to vector<8x32xf32>
    %145 = arith.subf %137, %144 : vector<8x32xf32>
    %146 = arith.mulf %145, %145 : vector<8x32xf32>
    %cst_60 = arith.constant dense<0.000000e+00> : vector<8xf32>
    %147 = vector.multi_reduction <add>, %146, %cst_60 [1] : vector<8x32xf32> to vector<8xf32>
    %148 = vector.shape_cast %147 : vector<8xf32> to vector<8x1xf32>
    %cst_61 = arith.constant 3.100000e+01 : f32
    %149 = vector.broadcast %cst_61 : f32 to vector<8x1xf32>
    %150 = arith.divf %148, %149 : vector<8x1xf32>
    %151 = math.sqrt %150 : vector<8x1xf32>
    %cst_62 = arith.constant 9.99999997E-7 : f32
    %152 = vector.broadcast %cst_62 : f32 to vector<8x1xf32>
    %153 = arith.addf %151, %152 : vector<8x1xf32>
    %154 = tpu.reciprocal %153 {approx = true} : vector<8x1xf32> -> vector<8x1xf32>
    %155 = vector.broadcast %143 : vector<8x1xf32> to vector<8x32xf32>
    %156 = arith.subf %137, %155 : vector<8x32xf32>
    %157 = vector.broadcast %138 : vector<1x32xf32> to vector<8x32xf32>
    %158 = arith.mulf %157, %156 : vector<8x32xf32>
    %159 = vector.broadcast %154 : vector<8x1xf32> to vector<8x32xf32>
    %160 = arith.mulf %158, %159 : vector<8x32xf32>
    %161 = vector.broadcast %139 : vector<1x32xf32> to vector<8x32xf32>
    %162 = arith.addf %160, %161 : vector<8x32xf32>
    %c0_63 = arith.constant 0 : index
    %c0_64 = arith.constant 0 : index
    %163 = vector.load %arg45[%c0_63, %c0_64] : memref<32x64xf32, #tpu.memory_space<vmem>>, vector<32x64xf32>
    %cst_65 = arith.constant dense<0.000000e+00> : vector<8x64xf32>
    %164 = tpu.matmul %162, %163, %cst_65 {dimension_numbers = #tpu.dot_dimension_numbers<[1], [0], [0], [1], [0, 0, 1, 1], [], []>} : vector<8x32xf32>, vector<32x64xf32>, vector<8x64xf32> -> vector<8x64xf32>
    %c0_66 = arith.constant 0 : index
    %c0_67 = arith.constant 0 : index
    %165 = vector.load %arg43[%c0_66, %c0_67] : memref<1x64xf32, #tpu.memory_space<vmem>>, vector<1x64xf32>
    %166 = vector.broadcast %165 : vector<1x64xf32> to vector<8x64xf32>
    %167 = arith.addf %164, %166 : vector<8x64xf32>
    %cst_68 = arith.constant 0.000000e+00 : f32
    %168 = vector.broadcast %cst_68 : f32 to vector<8x64xf32>
    %169 = arith.maximumf %167, %168 : vector<8x64xf32>
    %c0_69 = arith.constant 0 : index
    %c0_70 = arith.constant 0 : index
    %170 = vector.load %arg46[%c0_69, %c0_70] : memref<64x32xf32, #tpu.memory_space<vmem>>, vector<64x32xf32>
    %cst_71 = arith.constant dense<0.000000e+00> : vector<8x32xf32>
    %171 = tpu.matmul %169, %170, %cst_71 {dimension_numbers = #tpu.dot_dimension_numbers<[1], [0], [0], [1], [0, 0, 1, 1], [], []>} : vector<8x64xf32>, vector<64x32xf32>, vector<8x32xf32> -> vector<8x32xf32>
    %c0_72 = arith.constant 0 : index
    %c0_73 = arith.constant 0 : index
    %172 = vector.load %arg44[%c0_72, %c0_73] : memref<1x32xf32, #tpu.memory_space<vmem>>, vector<1x32xf32>
    %173 = vector.broadcast %172 : vector<1x32xf32> to vector<8x32xf32>
    %174 = arith.addf %171, %173 : vector<8x32xf32>
    %175 = arith.addf %137, %174 : vector<8x32xf32>
    %c0_74 = arith.constant 0 : index
    %c0_75 = arith.constant 0 : index
    %176 = vector.load %arg59[%c0_74, %c0_75] : memref<1x32xf32, #tpu.memory_space<vmem>>, vector<1x32xf32>
    %c0_76 = arith.constant 0 : index
    %c0_77 = arith.constant 0 : index
    %177 = vector.load %arg60[%c0_76, %c0_77] : memref<1x32xf32, #tpu.memory_space<vmem>>, vector<1x32xf32>
    %cst_78 = arith.constant dense<0.000000e+00> : vector<8xf32>
    %178 = vector.multi_reduction <add>, %175, %cst_78 [1] : vector<8x32xf32> to vector<8xf32>
    %179 = vector.shape_cast %178 : vector<8xf32> to vector<8x1xf32>
    %cst_79 = arith.constant 3.200000e+01 : f32
    %180 = vector.broadcast %cst_79 : f32 to vector<8x1xf32>
    %181 = arith.divf %179, %180 : vector<8x1xf32>
    %182 = vector.broadcast %181 : vector<8x1xf32> to vector<8x32xf32>
    %183 = arith.subf %175, %182 : vector<8x32xf32>
    %184 = arith.mulf %183, %183 : vector<8x32xf32>
    %cst_80 = arith.constant dense<0.000000e+00> : vector<8xf32>
    %185 = vector.multi_reduction <add>, %184, %cst_80 [1] : vector<8x32xf32> to vector<8xf32>
    %186 = vector.shape_cast %185 : vector<8xf32> to vector<8x1xf32>
    %cst_81 = arith.constant 3.100000e+01 : f32
    %187 = vector.broadcast %cst_81 : f32 to vector<8x1xf32>
    %188 = arith.divf %186, %187 : vector<8x1xf32>
    %189 = math.sqrt %188 : vector<8x1xf32>
    %cst_82 = arith.constant 9.99999997E-7 : f32
    %190 = vector.broadcast %cst_82 : f32 to vector<8x1xf32>
    %191 = arith.addf %189, %190 : vector<8x1xf32>
    %192 = tpu.reciprocal %191 {approx = true} : vector<8x1xf32> -> vector<8x1xf32>
    %193 = vector.broadcast %181 : vector<8x1xf32> to vector<8x32xf32>
    %194 = arith.subf %175, %193 : vector<8x32xf32>
    %195 = vector.broadcast %176 : vector<1x32xf32> to vector<8x32xf32>
    %196 = arith.mulf %195, %194 : vector<8x32xf32>
    %197 = vector.broadcast %192 : vector<8x1xf32> to vector<8x32xf32>
    %198 = arith.mulf %196, %197 : vector<8x32xf32>
    %199 = vector.broadcast %177 : vector<1x32xf32> to vector<8x32xf32>
    %200 = arith.addf %198, %199 : vector<8x32xf32>
    %c0_83 = arith.constant 0 : index
    %c0_84 = arith.constant 0 : index
    %201 = vector.load %arg66[%c0_83, %c0_84] : memref<32x96xf32, #tpu.memory_space<vmem>>, vector<32x96xf32>
    %c0_85 = arith.constant 0 : index
    %c0_86 = arith.constant 0 : index
    %202 = vector.load %arg65[%c0_85, %c0_86] : memref<1x96xf32, #tpu.memory_space<vmem>>, vector<1x96xf32>
    %cst_87 = arith.constant dense<0.000000e+00> : vector<8x96xf32>
    %203 = tpu.matmul %200, %201, %cst_87 {dimension_numbers = #tpu.dot_dimension_numbers<[1], [0], [0], [1], [0, 0, 1, 1], [], []>} : vector<8x32xf32>, vector<32x96xf32>, vector<8x96xf32> -> vector<8x96xf32>
    %204 = vector.broadcast %202 : vector<1x96xf32> to vector<8x96xf32>
    %205 = arith.addf %203, %204 : vector<8x96xf32>
    %206 = vector.extract_strided_slice %205 {offsets = [0, 0], sizes = [8, 32], strides = [1, 1]} : vector<8x96xf32> to vector<8x32xf32>
    %207 = vector.extract_strided_slice %205 {offsets = [0, 32], sizes = [8, 32], strides = [1, 1]} : vector<8x96xf32> to vector<8x32xf32>
    %208 = vector.extract_strided_slice %205 {offsets = [0, 64], sizes = [8, 32], strides = [1, 1]} : vector<8x96xf32> to vector<8x32xf32>
    %cst_88 = arith.constant 5.000000e-01 : f32
    %209 = vector.broadcast %cst_88 : f32 to vector<1x8xf32>
    %210 = arith.cmpf ogt, %5, %209 : vector<1x8xf32>
    %211 = vector.extract_strided_slice %206 {offsets = [0, 0], sizes = [8, 8], strides = [1, 1]} : vector<8x32xf32> to vector<8x8xf32>
    %212 = vector.extract_strided_slice %207 {offsets = [0, 0], sizes = [8, 8], strides = [1, 1]} : vector<8x32xf32> to vector<8x8xf32>
    %213 = tpu.transpose %212, [1, 0] : vector<8x8xf32> -> vector<8x8xf32>
    %cst_89 = arith.constant dense<0.000000e+00> : vector<8x8xf32>
    %214 = tpu.matmul %211, %213, %cst_89 {dimension_numbers = #tpu.dot_dimension_numbers<[1], [0], [0], [1], [0, 0, 1, 1], [], []>} : vector<8x8xf32>, vector<8x8xf32>, vector<8x8xf32> -> vector<8x8xf32>
    %cst_90 = arith.constant 0.353553385 : f32
    %215 = vector.broadcast %cst_90 : f32 to vector<8x8xf32>
    %216 = arith.mulf %214, %215 : vector<8x8xf32>
    %cst_91 = arith.constant -1.000000e+09 : f32
    %217 = vector.shape_cast %210 : vector<1x8xi1> to vector<1x8xi1>
    %218 = vector.broadcast %217 : vector<1x8xi1> to vector<8x8xi1>
    %219 = vector.broadcast %cst_91 : f32 to vector<8x8xf32>
    %220 = arith.select %218, %216, %219 : vector<8x8xi1>, vector<8x8xf32>
    %cst_92 = arith.constant dense<0xFF800000> : vector<8xf32>
    %221 = vector.multi_reduction <maximumf>, %220, %cst_92 [1] : vector<8x8xf32> to vector<8xf32>
    %222 = vector.shape_cast %221 : vector<8xf32> to vector<8x1xf32>
    %223 = vector.broadcast %222 : vector<8x1xf32> to vector<8x8xf32>
    %224 = arith.subf %220, %223 : vector<8x8xf32>
    %225 = math.exp %224 : vector<8x8xf32>
    %cst_93 = arith.constant dense<0.000000e+00> : vector<8xf32>
    %226 = vector.multi_reduction <add>, %225, %cst_93 [1] : vector<8x8xf32> to vector<8xf32>
    %227 = vector.shape_cast %226 : vector<8xf32> to vector<8x1xf32>
    %228 = tpu.reciprocal %227 {approx = true} : vector<8x1xf32> -> vector<8x1xf32>
    %229 = vector.broadcast %228 : vector<8x1xf32> to vector<8x8xf32>
    %230 = arith.mulf %225, %229 : vector<8x8xf32>
    %231 = vector.extract_strided_slice %208 {offsets = [0, 0], sizes = [8, 8], strides = [1, 1]} : vector<8x32xf32> to vector<8x8xf32>
    %cst_94 = arith.constant dense<0.000000e+00> : vector<8x8xf32>
    %232 = tpu.matmul %230, %231, %cst_94 {dimension_numbers = #tpu.dot_dimension_numbers<[1], [0], [0], [1], [0, 0, 1, 1], [], []>} : vector<8x8xf32>, vector<8x8xf32>, vector<8x8xf32> -> vector<8x8xf32>
    %233 = vector.extract_strided_slice %206 {offsets = [0, 8], sizes = [8, 8], strides = [1, 1]} : vector<8x32xf32> to vector<8x8xf32>
    %234 = vector.extract_strided_slice %207 {offsets = [0, 8], sizes = [8, 8], strides = [1, 1]} : vector<8x32xf32> to vector<8x8xf32>
    %235 = tpu.transpose %234, [1, 0] : vector<8x8xf32> -> vector<8x8xf32>
    %cst_95 = arith.constant dense<0.000000e+00> : vector<8x8xf32>
    %236 = tpu.matmul %233, %235, %cst_95 {dimension_numbers = #tpu.dot_dimension_numbers<[1], [0], [0], [1], [0, 0, 1, 1], [], []>} : vector<8x8xf32>, vector<8x8xf32>, vector<8x8xf32> -> vector<8x8xf32>
    %cst_96 = arith.constant 0.353553385 : f32
    %237 = vector.broadcast %cst_96 : f32 to vector<8x8xf32>
    %238 = arith.mulf %236, %237 : vector<8x8xf32>
    %cst_97 = arith.constant -1.000000e+09 : f32
    %239 = vector.shape_cast %210 : vector<1x8xi1> to vector<1x8xi1>
    %240 = vector.broadcast %239 : vector<1x8xi1> to vector<8x8xi1>
    %241 = vector.broadcast %cst_97 : f32 to vector<8x8xf32>
    %242 = arith.select %240, %238, %241 : vector<8x8xi1>, vector<8x8xf32>
    %cst_98 = arith.constant dense<0xFF800000> : vector<8xf32>
    %243 = vector.multi_reduction <maximumf>, %242, %cst_98 [1] : vector<8x8xf32> to vector<8xf32>
    %244 = vector.shape_cast %243 : vector<8xf32> to vector<8x1xf32>
    %245 = vector.broadcast %244 : vector<8x1xf32> to vector<8x8xf32>
    %246 = arith.subf %242, %245 : vector<8x8xf32>
    %247 = math.exp %246 : vector<8x8xf32>
    %cst_99 = arith.constant dense<0.000000e+00> : vector<8xf32>
    %248 = vector.multi_reduction <add>, %247, %cst_99 [1] : vector<8x8xf32> to vector<8xf32>
    %249 = vector.shape_cast %248 : vector<8xf32> to vector<8x1xf32>
    %250 = tpu.reciprocal %249 {approx = true} : vector<8x1xf32> -> vector<8x1xf32>
    %251 = vector.broadcast %250 : vector<8x1xf32> to vector<8x8xf32>
    %252 = arith.mulf %247, %251 : vector<8x8xf32>
    %253 = vector.extract_strided_slice %208 {offsets = [0, 8], sizes = [8, 8], strides = [1, 1]} : vector<8x32xf32> to vector<8x8xf32>
    %cst_100 = arith.constant dense<0.000000e+00> : vector<8x8xf32>
    %254 = tpu.matmul %252, %253, %cst_100 {dimension_numbers = #tpu.dot_dimension_numbers<[1], [0], [0], [1], [0, 0, 1, 1], [], []>} : vector<8x8xf32>, vector<8x8xf32>, vector<8x8xf32> -> vector<8x8xf32>
    %255 = vector.extract_strided_slice %206 {offsets = [0, 16], sizes = [8, 8], strides = [1, 1]} : vector<8x32xf32> to vector<8x8xf32>
    %256 = vector.extract_strided_slice %207 {offsets = [0, 16], sizes = [8, 8], strides = [1, 1]} : vector<8x32xf32> to vector<8x8xf32>
    %257 = tpu.transpose %256, [1, 0] : vector<8x8xf32> -> vector<8x8xf32>
    %cst_101 = arith.constant dense<0.000000e+00> : vector<8x8xf32>
    %258 = tpu.matmul %255, %257, %cst_101 {dimension_numbers = #tpu.dot_dimension_numbers<[1], [0], [0], [1], [0, 0, 1, 1], [], []>} : vector<8x8xf32>, vector<8x8xf32>, vector<8x8xf32> -> vector<8x8xf32>
    %cst_102 = arith.constant 0.353553385 : f32
    %259 = vector.broadcast %cst_102 : f32 to vector<8x8xf32>
    %260 = arith.mulf %258, %259 : vector<8x8xf32>
    %cst_103 = arith.constant -1.000000e+09 : f32
    %261 = vector.shape_cast %210 : vector<1x8xi1> to vector<1x8xi1>
    %262 = vector.broadcast %261 : vector<1x8xi1> to vector<8x8xi1>
    %263 = vector.broadcast %cst_103 : f32 to vector<8x8xf32>
    %264 = arith.select %262, %260, %263 : vector<8x8xi1>, vector<8x8xf32>
    %cst_104 = arith.constant dense<0xFF800000> : vector<8xf32>
    %265 = vector.multi_reduction <maximumf>, %264, %cst_104 [1] : vector<8x8xf32> to vector<8xf32>
    %266 = vector.shape_cast %265 : vector<8xf32> to vector<8x1xf32>
    %267 = vector.broadcast %266 : vector<8x1xf32> to vector<8x8xf32>
    %268 = arith.subf %264, %267 : vector<8x8xf32>
    %269 = math.exp %268 : vector<8x8xf32>
    %cst_105 = arith.constant dense<0.000000e+00> : vector<8xf32>
    %270 = vector.multi_reduction <add>, %269, %cst_105 [1] : vector<8x8xf32> to vector<8xf32>
    %271 = vector.shape_cast %270 : vector<8xf32> to vector<8x1xf32>
    %272 = tpu.reciprocal %271 {approx = true} : vector<8x1xf32> -> vector<8x1xf32>
    %273 = vector.broadcast %272 : vector<8x1xf32> to vector<8x8xf32>
    %274 = arith.mulf %269, %273 : vector<8x8xf32>
    %275 = vector.extract_strided_slice %208 {offsets = [0, 16], sizes = [8, 8], strides = [1, 1]} : vector<8x32xf32> to vector<8x8xf32>
    %cst_106 = arith.constant dense<0.000000e+00> : vector<8x8xf32>
    %276 = tpu.matmul %274, %275, %cst_106 {dimension_numbers = #tpu.dot_dimension_numbers<[1], [0], [0], [1], [0, 0, 1, 1], [], []>} : vector<8x8xf32>, vector<8x8xf32>, vector<8x8xf32> -> vector<8x8xf32>
    %277 = vector.extract_strided_slice %206 {offsets = [0, 24], sizes = [8, 8], strides = [1, 1]} : vector<8x32xf32> to vector<8x8xf32>
    %278 = vector.extract_strided_slice %207 {offsets = [0, 24], sizes = [8, 8], strides = [1, 1]} : vector<8x32xf32> to vector<8x8xf32>
    %279 = tpu.transpose %278, [1, 0] : vector<8x8xf32> -> vector<8x8xf32>
    %cst_107 = arith.constant dense<0.000000e+00> : vector<8x8xf32>
    %280 = tpu.matmul %277, %279, %cst_107 {dimension_numbers = #tpu.dot_dimension_numbers<[1], [0], [0], [1], [0, 0, 1, 1], [], []>} : vector<8x8xf32>, vector<8x8xf32>, vector<8x8xf32> -> vector<8x8xf32>
    %cst_108 = arith.constant 0.353553385 : f32
    %281 = vector.broadcast %cst_108 : f32 to vector<8x8xf32>
    %282 = arith.mulf %280, %281 : vector<8x8xf32>
    %cst_109 = arith.constant -1.000000e+09 : f32
    %283 = vector.shape_cast %210 : vector<1x8xi1> to vector<1x8xi1>
    %284 = vector.broadcast %283 : vector<1x8xi1> to vector<8x8xi1>
    %285 = vector.broadcast %cst_109 : f32 to vector<8x8xf32>
    %286 = arith.select %284, %282, %285 : vector<8x8xi1>, vector<8x8xf32>
    %cst_110 = arith.constant dense<0xFF800000> : vector<8xf32>
    %287 = vector.multi_reduction <maximumf>, %286, %cst_110 [1] : vector<8x8xf32> to vector<8xf32>
    %288 = vector.shape_cast %287 : vector<8xf32> to vector<8x1xf32>
    %289 = vector.broadcast %288 : vector<8x1xf32> to vector<8x8xf32>
    %290 = arith.subf %286, %289 : vector<8x8xf32>
    %291 = math.exp %290 : vector<8x8xf32>
    %cst_111 = arith.constant dense<0.000000e+00> : vector<8xf32>
    %292 = vector.multi_reduction <add>, %291, %cst_111 [1] : vector<8x8xf32> to vector<8xf32>
    %293 = vector.shape_cast %292 : vector<8xf32> to vector<8x1xf32>
    %294 = tpu.reciprocal %293 {approx = true} : vector<8x1xf32> -> vector<8x1xf32>
    %295 = vector.broadcast %294 : vector<8x1xf32> to vector<8x8xf32>
    %296 = arith.mulf %291, %295 : vector<8x8xf32>
    %297 = vector.extract_strided_slice %208 {offsets = [0, 24], sizes = [8, 8], strides = [1, 1]} : vector<8x32xf32> to vector<8x8xf32>
    %cst_112 = arith.constant dense<0.000000e+00> : vector<8x8xf32>
    %298 = tpu.matmul %296, %297, %cst_112 {dimension_numbers = #tpu.dot_dimension_numbers<[1], [0], [0], [1], [0, 0, 1, 1], [], []>} : vector<8x8xf32>, vector<8x8xf32>, vector<8x8xf32> -> vector<8x8xf32>
    %299 = tpu.concatenate %232, %254, %276, %298 in 1 : vector<8x8xf32>, vector<8x8xf32>, vector<8x8xf32>, vector<8x8xf32> -> vector<8x32xf32>
    %c0_113 = arith.constant 0 : index
    %c0_114 = arith.constant 0 : index
    %300 = vector.load %arg64[%c0_113, %c0_114] : memref<32x32xf32, #tpu.memory_space<vmem>>, vector<32x32xf32>
    %cst_115 = arith.constant dense<0.000000e+00> : vector<8x32xf32>
    %301 = tpu.matmul %299, %300, %cst_115 {dimension_numbers = #tpu.dot_dimension_numbers<[1], [0], [0], [1], [0, 0, 1, 1], [], []>} : vector<8x32xf32>, vector<32x32xf32>, vector<8x32xf32> -> vector<8x32xf32>
    %c0_116 = arith.constant 0 : index
    %c0_117 = arith.constant 0 : index
    %302 = vector.load %arg63[%c0_116, %c0_117] : memref<1x32xf32, #tpu.memory_space<vmem>>, vector<1x32xf32>
    %303 = vector.broadcast %302 : vector<1x32xf32> to vector<8x32xf32>
    %304 = arith.addf %301, %303 : vector<8x32xf32>
    %305 = arith.addf %175, %304 : vector<8x32xf32>
    %c0_118 = arith.constant 0 : index
    %c0_119 = arith.constant 0 : index
    %306 = vector.load %arg61[%c0_118, %c0_119] : memref<1x32xf32, #tpu.memory_space<vmem>>, vector<1x32xf32>
    %c0_120 = arith.constant 0 : index
    %c0_121 = arith.constant 0 : index
    %307 = vector.load %arg62[%c0_120, %c0_121] : memref<1x32xf32, #tpu.memory_space<vmem>>, vector<1x32xf32>
    %cst_122 = arith.constant dense<0.000000e+00> : vector<8xf32>
    %308 = vector.multi_reduction <add>, %305, %cst_122 [1] : vector<8x32xf32> to vector<8xf32>
    %309 = vector.shape_cast %308 : vector<8xf32> to vector<8x1xf32>
    %cst_123 = arith.constant 3.200000e+01 : f32
    %310 = vector.broadcast %cst_123 : f32 to vector<8x1xf32>
    %311 = arith.divf %309, %310 : vector<8x1xf32>
    %312 = vector.broadcast %311 : vector<8x1xf32> to vector<8x32xf32>
    %313 = arith.subf %305, %312 : vector<8x32xf32>
    %314 = arith.mulf %313, %313 : vector<8x32xf32>
    %cst_124 = arith.constant dense<0.000000e+00> : vector<8xf32>
    %315 = vector.multi_reduction <add>, %314, %cst_124 [1] : vector<8x32xf32> to vector<8xf32>
    %316 = vector.shape_cast %315 : vector<8xf32> to vector<8x1xf32>
    %cst_125 = arith.constant 3.100000e+01 : f32
    %317 = vector.broadcast %cst_125 : f32 to vector<8x1xf32>
    %318 = arith.divf %316, %317 : vector<8x1xf32>
    %319 = math.sqrt %318 : vector<8x1xf32>
    %cst_126 = arith.constant 9.99999997E-7 : f32
    %320 = vector.broadcast %cst_126 : f32 to vector<8x1xf32>
    %321 = arith.addf %319, %320 : vector<8x1xf32>
    %322 = tpu.reciprocal %321 {approx = true} : vector<8x1xf32> -> vector<8x1xf32>
    %323 = vector.broadcast %311 : vector<8x1xf32> to vector<8x32xf32>
    %324 = arith.subf %305, %323 : vector<8x32xf32>
    %325 = vector.broadcast %306 : vector<1x32xf32> to vector<8x32xf32>
    %326 = arith.mulf %325, %324 : vector<8x32xf32>
    %327 = vector.broadcast %322 : vector<8x1xf32> to vector<8x32xf32>
    %328 = arith.mulf %326, %327 : vector<8x32xf32>
    %329 = vector.broadcast %307 : vector<1x32xf32> to vector<8x32xf32>
    %330 = arith.addf %328, %329 : vector<8x32xf32>
    %c0_127 = arith.constant 0 : index
    %c0_128 = arith.constant 0 : index
    %331 = vector.load %arg57[%c0_127, %c0_128] : memref<32x64xf32, #tpu.memory_space<vmem>>, vector<32x64xf32>
    %cst_129 = arith.constant dense<0.000000e+00> : vector<8x64xf32>
    %332 = tpu.matmul %330, %331, %cst_129 {dimension_numbers = #tpu.dot_dimension_numbers<[1], [0], [0], [1], [0, 0, 1, 1], [], []>} : vector<8x32xf32>, vector<32x64xf32>, vector<8x64xf32> -> vector<8x64xf32>
    %c0_130 = arith.constant 0 : index
    %c0_131 = arith.constant 0 : index
    %333 = vector.load %arg55[%c0_130, %c0_131] : memref<1x64xf32, #tpu.memory_space<vmem>>, vector<1x64xf32>
    %334 = vector.broadcast %333 : vector<1x64xf32> to vector<8x64xf32>
    %335 = arith.addf %332, %334 : vector<8x64xf32>
    %cst_132 = arith.constant 0.000000e+00 : f32
    %336 = vector.broadcast %cst_132 : f32 to vector<8x64xf32>
    %337 = arith.maximumf %335, %336 : vector<8x64xf32>
    %c0_133 = arith.constant 0 : index
    %c0_134 = arith.constant 0 : index
    %338 = vector.load %arg58[%c0_133, %c0_134] : memref<64x32xf32, #tpu.memory_space<vmem>>, vector<64x32xf32>
    %cst_135 = arith.constant dense<0.000000e+00> : vector<8x32xf32>
    %339 = tpu.matmul %337, %338, %cst_135 {dimension_numbers = #tpu.dot_dimension_numbers<[1], [0], [0], [1], [0, 0, 1, 1], [], []>} : vector<8x64xf32>, vector<64x32xf32>, vector<8x32xf32> -> vector<8x32xf32>
    %c0_136 = arith.constant 0 : index
    %c0_137 = arith.constant 0 : index
    %340 = vector.load %arg56[%c0_136, %c0_137] : memref<1x32xf32, #tpu.memory_space<vmem>>, vector<1x32xf32>
    %341 = vector.broadcast %340 : vector<1x32xf32> to vector<8x32xf32>
    %342 = arith.addf %339, %341 : vector<8x32xf32>
    %343 = arith.addf %305, %342 : vector<8x32xf32>
    %c0_138 = arith.constant 0 : index
    %c0_139 = arith.constant 0 : index
    %344 = vector.load %arg67[%c0_138, %c0_139] : memref<1x32xf32, #tpu.memory_space<vmem>>, vector<1x32xf32>
    %c0_140 = arith.constant 0 : index
    %c0_141 = arith.constant 0 : index
    %345 = vector.load %arg68[%c0_140, %c0_141] : memref<1x32xf32, #tpu.memory_space<vmem>>, vector<1x32xf32>
    %cst_142 = arith.constant dense<0.000000e+00> : vector<8xf32>
    %346 = vector.multi_reduction <add>, %343, %cst_142 [1] : vector<8x32xf32> to vector<8xf32>
    %347 = vector.shape_cast %346 : vector<8xf32> to vector<8x1xf32>
    %cst_143 = arith.constant 3.200000e+01 : f32
    %348 = vector.broadcast %cst_143 : f32 to vector<8x1xf32>
    %349 = arith.divf %347, %348 : vector<8x1xf32>
    %350 = vector.broadcast %349 : vector<8x1xf32> to vector<8x32xf32>
    %351 = arith.subf %343, %350 : vector<8x32xf32>
    %352 = arith.mulf %351, %351 : vector<8x32xf32>
    %cst_144 = arith.constant dense<0.000000e+00> : vector<8xf32>
    %353 = vector.multi_reduction <add>, %352, %cst_144 [1] : vector<8x32xf32> to vector<8xf32>
    %354 = vector.shape_cast %353 : vector<8xf32> to vector<8x1xf32>
    %cst_145 = arith.constant 3.100000e+01 : f32
    %355 = vector.broadcast %cst_145 : f32 to vector<8x1xf32>
    %356 = arith.divf %354, %355 : vector<8x1xf32>
    %357 = math.sqrt %356 : vector<8x1xf32>
    %cst_146 = arith.constant 9.99999997E-7 : f32
    %358 = vector.broadcast %cst_146 : f32 to vector<8x1xf32>
    %359 = arith.addf %357, %358 : vector<8x1xf32>
    %360 = tpu.reciprocal %359 {approx = true} : vector<8x1xf32> -> vector<8x1xf32>
    %361 = vector.broadcast %349 : vector<8x1xf32> to vector<8x32xf32>
    %362 = arith.subf %343, %361 : vector<8x32xf32>
    %363 = vector.broadcast %344 : vector<1x32xf32> to vector<8x32xf32>
    %364 = arith.mulf %363, %362 : vector<8x32xf32>
    %365 = vector.broadcast %360 : vector<8x1xf32> to vector<8x32xf32>
    %366 = arith.mulf %364, %365 : vector<8x32xf32>
    %367 = vector.broadcast %345 : vector<1x32xf32> to vector<8x32xf32>
    %368 = arith.addf %366, %367 : vector<8x32xf32>
    %c0_147 = arith.constant 0 : index
    %c0_148 = arith.constant 0 : index
    %369 = vector.load %arg9[%c0_147, %c0_148] : memref<1x32xf32, #tpu.memory_space<vmem>>, vector<1x32xf32>
    %c0_149 = arith.constant 0 : index
    %c0_150 = arith.constant 0 : index
    %370 = vector.load %arg10[%c0_149, %c0_150] : memref<1x32xf32, #tpu.memory_space<vmem>>, vector<1x32xf32>
    %cst_151 = arith.constant dense<0.000000e+00> : vector<8xf32>
    %371 = vector.multi_reduction <add>, %3, %cst_151 [1] : vector<8x32xf32> to vector<8xf32>
    %372 = vector.shape_cast %371 : vector<8xf32> to vector<8x1xf32>
    %cst_152 = arith.constant 3.200000e+01 : f32
    %373 = vector.broadcast %cst_152 : f32 to vector<8x1xf32>
    %374 = arith.divf %372, %373 : vector<8x1xf32>
    %375 = vector.broadcast %374 : vector<8x1xf32> to vector<8x32xf32>
    %376 = arith.subf %3, %375 : vector<8x32xf32>
    %377 = arith.mulf %376, %376 : vector<8x32xf32>
    %cst_153 = arith.constant dense<0.000000e+00> : vector<8xf32>
    %378 = vector.multi_reduction <add>, %377, %cst_153 [1] : vector<8x32xf32> to vector<8xf32>
    %379 = vector.shape_cast %378 : vector<8xf32> to vector<8x1xf32>
    %cst_154 = arith.constant 3.100000e+01 : f32
    %380 = vector.broadcast %cst_154 : f32 to vector<8x1xf32>
    %381 = arith.divf %379, %380 : vector<8x1xf32>
    %382 = math.sqrt %381 : vector<8x1xf32>
    %cst_155 = arith.constant 9.99999997E-7 : f32
    %383 = vector.broadcast %cst_155 : f32 to vector<8x1xf32>
    %384 = arith.addf %382, %383 : vector<8x1xf32>
    %385 = tpu.reciprocal %384 {approx = true} : vector<8x1xf32> -> vector<8x1xf32>
    %386 = vector.broadcast %374 : vector<8x1xf32> to vector<8x32xf32>
    %387 = arith.subf %3, %386 : vector<8x32xf32>
    %388 = vector.broadcast %369 : vector<1x32xf32> to vector<8x32xf32>
    %389 = arith.mulf %388, %387 : vector<8x32xf32>
    %390 = vector.broadcast %385 : vector<8x1xf32> to vector<8x32xf32>
    %391 = arith.mulf %389, %390 : vector<8x32xf32>
    %392 = vector.broadcast %370 : vector<1x32xf32> to vector<8x32xf32>
    %393 = arith.addf %391, %392 : vector<8x32xf32>
    %c0_156 = arith.constant 0 : index
    %c0_157 = arith.constant 0 : index
    %394 = vector.load %arg18[%c0_156, %c0_157] : memref<32x96xf32, #tpu.memory_space<vmem>>, vector<32x96xf32>
    %c0_158 = arith.constant 0 : index
    %c0_159 = arith.constant 0 : index
    %395 = vector.load %arg17[%c0_158, %c0_159] : memref<1x96xf32, #tpu.memory_space<vmem>>, vector<1x96xf32>
    %cst_160 = arith.constant dense<0.000000e+00> : vector<8x96xf32>
    %396 = tpu.matmul %393, %394, %cst_160 {dimension_numbers = #tpu.dot_dimension_numbers<[1], [0], [0], [1], [0, 0, 1, 1], [], []>} : vector<8x32xf32>, vector<32x96xf32>, vector<8x96xf32> -> vector<8x96xf32>
    %397 = vector.broadcast %395 : vector<1x96xf32> to vector<8x96xf32>
    %398 = arith.addf %396, %397 : vector<8x96xf32>
    %399 = vector.extract_strided_slice %398 {offsets = [0, 0], sizes = [8, 32], strides = [1, 1]} : vector<8x96xf32> to vector<8x32xf32>
    %400 = vector.extract_strided_slice %398 {offsets = [0, 32], sizes = [8, 32], strides = [1, 1]} : vector<8x96xf32> to vector<8x32xf32>
    %401 = vector.extract_strided_slice %398 {offsets = [0, 64], sizes = [8, 32], strides = [1, 1]} : vector<8x96xf32> to vector<8x32xf32>
    %cst_161 = arith.constant 5.000000e-01 : f32
    %402 = vector.broadcast %cst_161 : f32 to vector<8x8xf32>
    %403 = arith.cmpf ogt, %7, %402 : vector<8x8xf32>
    %404 = vector.extract_strided_slice %399 {offsets = [0, 0], sizes = [8, 8], strides = [1, 1]} : vector<8x32xf32> to vector<8x8xf32>
    %405 = vector.extract_strided_slice %400 {offsets = [0, 0], sizes = [8, 8], strides = [1, 1]} : vector<8x32xf32> to vector<8x8xf32>
    %406 = tpu.transpose %405, [1, 0] : vector<8x8xf32> -> vector<8x8xf32>
    %cst_162 = arith.constant dense<0.000000e+00> : vector<8x8xf32>
    %407 = tpu.matmul %404, %406, %cst_162 {dimension_numbers = #tpu.dot_dimension_numbers<[1], [0], [0], [1], [0, 0, 1, 1], [], []>} : vector<8x8xf32>, vector<8x8xf32>, vector<8x8xf32> -> vector<8x8xf32>
    %cst_163 = arith.constant 0.353553385 : f32
    %408 = vector.broadcast %cst_163 : f32 to vector<8x8xf32>
    %409 = arith.mulf %407, %408 : vector<8x8xf32>
    %cst_164 = arith.constant -1.000000e+09 : f32
    %410 = vector.broadcast %cst_164 : f32 to vector<8x8xf32>
    %411 = arith.select %403, %409, %410 : vector<8x8xi1>, vector<8x8xf32>
    %cst_165 = arith.constant dense<0xFF800000> : vector<8xf32>
    %412 = vector.multi_reduction <maximumf>, %411, %cst_165 [1] : vector<8x8xf32> to vector<8xf32>
    %413 = vector.shape_cast %412 : vector<8xf32> to vector<8x1xf32>
    %414 = vector.broadcast %413 : vector<8x1xf32> to vector<8x8xf32>
    %415 = arith.subf %411, %414 : vector<8x8xf32>
    %416 = math.exp %415 : vector<8x8xf32>
    %cst_166 = arith.constant dense<0.000000e+00> : vector<8xf32>
    %417 = vector.multi_reduction <add>, %416, %cst_166 [1] : vector<8x8xf32> to vector<8xf32>
    %418 = vector.shape_cast %417 : vector<8xf32> to vector<8x1xf32>
    %419 = tpu.reciprocal %418 {approx = true} : vector<8x1xf32> -> vector<8x1xf32>
    %420 = vector.broadcast %419 : vector<8x1xf32> to vector<8x8xf32>
    %421 = arith.mulf %416, %420 : vector<8x8xf32>
    %422 = vector.extract_strided_slice %401 {offsets = [0, 0], sizes = [8, 8], strides = [1, 1]} : vector<8x32xf32> to vector<8x8xf32>
    %cst_167 = arith.constant dense<0.000000e+00> : vector<8x8xf32>
    %423 = tpu.matmul %421, %422, %cst_167 {dimension_numbers = #tpu.dot_dimension_numbers<[1], [0], [0], [1], [0, 0, 1, 1], [], []>} : vector<8x8xf32>, vector<8x8xf32>, vector<8x8xf32> -> vector<8x8xf32>
    %424 = vector.extract_strided_slice %399 {offsets = [0, 8], sizes = [8, 8], strides = [1, 1]} : vector<8x32xf32> to vector<8x8xf32>
    %425 = vector.extract_strided_slice %400 {offsets = [0, 8], sizes = [8, 8], strides = [1, 1]} : vector<8x32xf32> to vector<8x8xf32>
    %426 = tpu.transpose %425, [1, 0] : vector<8x8xf32> -> vector<8x8xf32>
    %cst_168 = arith.constant dense<0.000000e+00> : vector<8x8xf32>
    %427 = tpu.matmul %424, %426, %cst_168 {dimension_numbers = #tpu.dot_dimension_numbers<[1], [0], [0], [1], [0, 0, 1, 1], [], []>} : vector<8x8xf32>, vector<8x8xf32>, vector<8x8xf32> -> vector<8x8xf32>
    %cst_169 = arith.constant 0.353553385 : f32
    %428 = vector.broadcast %cst_169 : f32 to vector<8x8xf32>
    %429 = arith.mulf %427, %428 : vector<8x8xf32>
    %cst_170 = arith.constant -1.000000e+09 : f32
    %430 = vector.broadcast %cst_170 : f32 to vector<8x8xf32>
    %431 = arith.select %403, %429, %430 : vector<8x8xi1>, vector<8x8xf32>
    %cst_171 = arith.constant dense<0xFF800000> : vector<8xf32>
    %432 = vector.multi_reduction <maximumf>, %431, %cst_171 [1] : vector<8x8xf32> to vector<8xf32>
    %433 = vector.shape_cast %432 : vector<8xf32> to vector<8x1xf32>
    %434 = vector.broadcast %433 : vector<8x1xf32> to vector<8x8xf32>
    %435 = arith.subf %431, %434 : vector<8x8xf32>
    %436 = math.exp %435 : vector<8x8xf32>
    %cst_172 = arith.constant dense<0.000000e+00> : vector<8xf32>
    %437 = vector.multi_reduction <add>, %436, %cst_172 [1] : vector<8x8xf32> to vector<8xf32>
    %438 = vector.shape_cast %437 : vector<8xf32> to vector<8x1xf32>
    %439 = tpu.reciprocal %438 {approx = true} : vector<8x1xf32> -> vector<8x1xf32>
    %440 = vector.broadcast %439 : vector<8x1xf32> to vector<8x8xf32>
    %441 = arith.mulf %436, %440 : vector<8x8xf32>
    %442 = vector.extract_strided_slice %401 {offsets = [0, 8], sizes = [8, 8], strides = [1, 1]} : vector<8x32xf32> to vector<8x8xf32>
    %cst_173 = arith.constant dense<0.000000e+00> : vector<8x8xf32>
    %443 = tpu.matmul %441, %442, %cst_173 {dimension_numbers = #tpu.dot_dimension_numbers<[1], [0], [0], [1], [0, 0, 1, 1], [], []>} : vector<8x8xf32>, vector<8x8xf32>, vector<8x8xf32> -> vector<8x8xf32>
    %444 = vector.extract_strided_slice %399 {offsets = [0, 16], sizes = [8, 8], strides = [1, 1]} : vector<8x32xf32> to vector<8x8xf32>
    %445 = vector.extract_strided_slice %400 {offsets = [0, 16], sizes = [8, 8], strides = [1, 1]} : vector<8x32xf32> to vector<8x8xf32>
    %446 = tpu.transpose %445, [1, 0] : vector<8x8xf32> -> vector<8x8xf32>
    %cst_174 = arith.constant dense<0.000000e+00> : vector<8x8xf32>
    %447 = tpu.matmul %444, %446, %cst_174 {dimension_numbers = #tpu.dot_dimension_numbers<[1], [0], [0], [1], [0, 0, 1, 1], [], []>} : vector<8x8xf32>, vector<8x8xf32>, vector<8x8xf32> -> vector<8x8xf32>
    %cst_175 = arith.constant 0.353553385 : f32
    %448 = vector.broadcast %cst_175 : f32 to vector<8x8xf32>
    %449 = arith.mulf %447, %448 : vector<8x8xf32>
    %cst_176 = arith.constant -1.000000e+09 : f32
    %450 = vector.broadcast %cst_176 : f32 to vector<8x8xf32>
    %451 = arith.select %403, %449, %450 : vector<8x8xi1>, vector<8x8xf32>
    %cst_177 = arith.constant dense<0xFF800000> : vector<8xf32>
    %452 = vector.multi_reduction <maximumf>, %451, %cst_177 [1] : vector<8x8xf32> to vector<8xf32>
    %453 = vector.shape_cast %452 : vector<8xf32> to vector<8x1xf32>
    %454 = vector.broadcast %453 : vector<8x1xf32> to vector<8x8xf32>
    %455 = arith.subf %451, %454 : vector<8x8xf32>
    %456 = math.exp %455 : vector<8x8xf32>
    %cst_178 = arith.constant dense<0.000000e+00> : vector<8xf32>
    %457 = vector.multi_reduction <add>, %456, %cst_178 [1] : vector<8x8xf32> to vector<8xf32>
    %458 = vector.shape_cast %457 : vector<8xf32> to vector<8x1xf32>
    %459 = tpu.reciprocal %458 {approx = true} : vector<8x1xf32> -> vector<8x1xf32>
    %460 = vector.broadcast %459 : vector<8x1xf32> to vector<8x8xf32>
    %461 = arith.mulf %456, %460 : vector<8x8xf32>
    %462 = vector.extract_strided_slice %401 {offsets = [0, 16], sizes = [8, 8], strides = [1, 1]} : vector<8x32xf32> to vector<8x8xf32>
    %cst_179 = arith.constant dense<0.000000e+00> : vector<8x8xf32>
    %463 = tpu.matmul %461, %462, %cst_179 {dimension_numbers = #tpu.dot_dimension_numbers<[1], [0], [0], [1], [0, 0, 1, 1], [], []>} : vector<8x8xf32>, vector<8x8xf32>, vector<8x8xf32> -> vector<8x8xf32>
    %464 = vector.extract_strided_slice %399 {offsets = [0, 24], sizes = [8, 8], strides = [1, 1]} : vector<8x32xf32> to vector<8x8xf32>
    %465 = vector.extract_strided_slice %400 {offsets = [0, 24], sizes = [8, 8], strides = [1, 1]} : vector<8x32xf32> to vector<8x8xf32>
    %466 = tpu.transpose %465, [1, 0] : vector<8x8xf32> -> vector<8x8xf32>
    %cst_180 = arith.constant dense<0.000000e+00> : vector<8x8xf32>
    %467 = tpu.matmul %464, %466, %cst_180 {dimension_numbers = #tpu.dot_dimension_numbers<[1], [0], [0], [1], [0, 0, 1, 1], [], []>} : vector<8x8xf32>, vector<8x8xf32>, vector<8x8xf32> -> vector<8x8xf32>
    %cst_181 = arith.constant 0.353553385 : f32
    %468 = vector.broadcast %cst_181 : f32 to vector<8x8xf32>
    %469 = arith.mulf %467, %468 : vector<8x8xf32>
    %cst_182 = arith.constant -1.000000e+09 : f32
    %470 = vector.broadcast %cst_182 : f32 to vector<8x8xf32>
    %471 = arith.select %403, %469, %470 : vector<8x8xi1>, vector<8x8xf32>
    %cst_183 = arith.constant dense<0xFF800000> : vector<8xf32>
    %472 = vector.multi_reduction <maximumf>, %471, %cst_183 [1] : vector<8x8xf32> to vector<8xf32>
    %473 = vector.shape_cast %472 : vector<8xf32> to vector<8x1xf32>
    %474 = vector.broadcast %473 : vector<8x1xf32> to vector<8x8xf32>
    %475 = arith.subf %471, %474 : vector<8x8xf32>
    %476 = math.exp %475 : vector<8x8xf32>
    %cst_184 = arith.constant dense<0.000000e+00> : vector<8xf32>
    %477 = vector.multi_reduction <add>, %476, %cst_184 [1] : vector<8x8xf32> to vector<8xf32>
    %478 = vector.shape_cast %477 : vector<8xf32> to vector<8x1xf32>
    %479 = tpu.reciprocal %478 {approx = true} : vector<8x1xf32> -> vector<8x1xf32>
    %480 = vector.broadcast %479 : vector<8x1xf32> to vector<8x8xf32>
    %481 = arith.mulf %476, %480 : vector<8x8xf32>
    %482 = vector.extract_strided_slice %401 {offsets = [0, 24], sizes = [8, 8], strides = [1, 1]} : vector<8x32xf32> to vector<8x8xf32>
    %cst_185 = arith.constant dense<0.000000e+00> : vector<8x8xf32>
    %483 = tpu.matmul %481, %482, %cst_185 {dimension_numbers = #tpu.dot_dimension_numbers<[1], [0], [0], [1], [0, 0, 1, 1], [], []>} : vector<8x8xf32>, vector<8x8xf32>, vector<8x8xf32> -> vector<8x8xf32>
    %484 = tpu.concatenate %423, %443, %463, %483 in 1 : vector<8x8xf32>, vector<8x8xf32>, vector<8x8xf32>, vector<8x8xf32> -> vector<8x32xf32>
    %c0_186 = arith.constant 0 : index
    %c0_187 = arith.constant 0 : index
    %485 = vector.load %arg16[%c0_186, %c0_187] : memref<32x32xf32, #tpu.memory_space<vmem>>, vector<32x32xf32>
    %cst_188 = arith.constant dense<0.000000e+00> : vector<8x32xf32>
    %486 = tpu.matmul %484, %485, %cst_188 {dimension_numbers = #tpu.dot_dimension_numbers<[1], [0], [0], [1], [0, 0, 1, 1], [], []>} : vector<8x32xf32>, vector<32x32xf32>, vector<8x32xf32> -> vector<8x32xf32>
    %c0_189 = arith.constant 0 : index
    %c0_190 = arith.constant 0 : index
    %487 = vector.load %arg15[%c0_189, %c0_190] : memref<1x32xf32, #tpu.memory_space<vmem>>, vector<1x32xf32>
    %488 = vector.broadcast %487 : vector<1x32xf32> to vector<8x32xf32>
    %489 = arith.addf %486, %488 : vector<8x32xf32>
    %490 = arith.addf %3, %489 : vector<8x32xf32>
    %c0_191 = arith.constant 0 : index
    %c0_192 = arith.constant 0 : index
    %491 = vector.load %arg11[%c0_191, %c0_192] : memref<1x32xf32, #tpu.memory_space<vmem>>, vector<1x32xf32>
    %c0_193 = arith.constant 0 : index
    %c0_194 = arith.constant 0 : index
    %492 = vector.load %arg12[%c0_193, %c0_194] : memref<1x32xf32, #tpu.memory_space<vmem>>, vector<1x32xf32>
    %cst_195 = arith.constant dense<0.000000e+00> : vector<8xf32>
    %493 = vector.multi_reduction <add>, %490, %cst_195 [1] : vector<8x32xf32> to vector<8xf32>
    %494 = vector.shape_cast %493 : vector<8xf32> to vector<8x1xf32>
    %cst_196 = arith.constant 3.200000e+01 : f32
    %495 = vector.broadcast %cst_196 : f32 to vector<8x1xf32>
    %496 = arith.divf %494, %495 : vector<8x1xf32>
    %497 = vector.broadcast %496 : vector<8x1xf32> to vector<8x32xf32>
    %498 = arith.subf %490, %497 : vector<8x32xf32>
    %499 = arith.mulf %498, %498 : vector<8x32xf32>
    %cst_197 = arith.constant dense<0.000000e+00> : vector<8xf32>
    %500 = vector.multi_reduction <add>, %499, %cst_197 [1] : vector<8x32xf32> to vector<8xf32>
    %501 = vector.shape_cast %500 : vector<8xf32> to vector<8x1xf32>
    %cst_198 = arith.constant 3.100000e+01 : f32
    %502 = vector.broadcast %cst_198 : f32 to vector<8x1xf32>
    %503 = arith.divf %501, %502 : vector<8x1xf32>
    %504 = math.sqrt %503 : vector<8x1xf32>
    %cst_199 = arith.constant 9.99999997E-7 : f32
    %505 = vector.broadcast %cst_199 : f32 to vector<8x1xf32>
    %506 = arith.addf %504, %505 : vector<8x1xf32>
    %507 = tpu.reciprocal %506 {approx = true} : vector<8x1xf32> -> vector<8x1xf32>
    %508 = vector.broadcast %496 : vector<8x1xf32> to vector<8x32xf32>
    %509 = arith.subf %490, %508 : vector<8x32xf32>
    %510 = vector.broadcast %491 : vector<1x32xf32> to vector<8x32xf32>
    %511 = arith.mulf %510, %509 : vector<8x32xf32>
    %512 = vector.broadcast %507 : vector<8x1xf32> to vector<8x32xf32>
    %513 = arith.mulf %511, %512 : vector<8x32xf32>
    %514 = vector.broadcast %492 : vector<1x32xf32> to vector<8x32xf32>
    %515 = arith.addf %513, %514 : vector<8x32xf32>
    %c0_200 = arith.constant 0 : index
    %c0_201 = arith.constant 0 : index
    %516 = vector.load %arg22[%c0_200, %c0_201] : memref<32x96xf32, #tpu.memory_space<vmem>>, vector<32x96xf32>
    %c0_202 = arith.constant 0 : index
    %c0_203 = arith.constant 0 : index
    %517 = vector.load %arg21[%c0_202, %c0_203] : memref<1x96xf32, #tpu.memory_space<vmem>>, vector<1x96xf32>
    %518 = vector.extract_strided_slice %516 {offsets = [0, 0], sizes = [32, 32], strides = [1, 1]} : vector<32x96xf32> to vector<32x32xf32>
    %cst_204 = arith.constant dense<0.000000e+00> : vector<8x32xf32>
    %519 = tpu.matmul %515, %518, %cst_204 {dimension_numbers = #tpu.dot_dimension_numbers<[1], [0], [0], [1], [0, 0, 1, 1], [], []>} : vector<8x32xf32>, vector<32x32xf32>, vector<8x32xf32> -> vector<8x32xf32>
    %520 = vector.extract_strided_slice %517 {offsets = [0, 0], sizes = [1, 32], strides = [1, 1]} : vector<1x96xf32> to vector<1x32xf32>
    %521 = vector.broadcast %520 : vector<1x32xf32> to vector<8x32xf32>
    %522 = arith.addf %519, %521 : vector<8x32xf32>
    %523 = vector.extract_strided_slice %516 {offsets = [0, 32], sizes = [32, 64], strides = [1, 1]} : vector<32x96xf32> to vector<32x64xf32>
    %cst_205 = arith.constant dense<0.000000e+00> : vector<8x64xf32>
    %524 = tpu.matmul %368, %523, %cst_205 {dimension_numbers = #tpu.dot_dimension_numbers<[1], [0], [0], [1], [0, 0, 1, 1], [], []>} : vector<8x32xf32>, vector<32x64xf32>, vector<8x64xf32> -> vector<8x64xf32>
    %525 = vector.extract_strided_slice %517 {offsets = [0, 32], sizes = [1, 64], strides = [1, 1]} : vector<1x96xf32> to vector<1x64xf32>
    %526 = vector.broadcast %525 : vector<1x64xf32> to vector<8x64xf32>
    %527 = arith.addf %524, %526 : vector<8x64xf32>
    %528 = vector.extract_strided_slice %527 {offsets = [0, 0], sizes = [8, 32], strides = [1, 1]} : vector<8x64xf32> to vector<8x32xf32>
    %529 = vector.extract_strided_slice %527 {offsets = [0, 32], sizes = [8, 32], strides = [1, 1]} : vector<8x64xf32> to vector<8x32xf32>
    %cst_206 = arith.constant 5.000000e-01 : f32
    %530 = vector.broadcast %cst_206 : f32 to vector<1x8xf32>
    %531 = arith.cmpf ogt, %5, %530 : vector<1x8xf32>
    %532 = vector.extract_strided_slice %522 {offsets = [0, 0], sizes = [8, 8], strides = [1, 1]} : vector<8x32xf32> to vector<8x8xf32>
    %533 = vector.extract_strided_slice %528 {offsets = [0, 0], sizes = [8, 8], strides = [1, 1]} : vector<8x32xf32> to vector<8x8xf32>
    %534 = tpu.transpose %533, [1, 0] : vector<8x8xf32> -> vector<8x8xf32>
    %cst_207 = arith.constant dense<0.000000e+00> : vector<8x8xf32>
    %535 = tpu.matmul %532, %534, %cst_207 {dimension_numbers = #tpu.dot_dimension_numbers<[1], [0], [0], [1], [0, 0, 1, 1], [], []>} : vector<8x8xf32>, vector<8x8xf32>, vector<8x8xf32> -> vector<8x8xf32>
    %cst_208 = arith.constant 0.353553385 : f32
    %536 = vector.broadcast %cst_208 : f32 to vector<8x8xf32>
    %537 = arith.mulf %535, %536 : vector<8x8xf32>
    %cst_209 = arith.constant -1.000000e+09 : f32
    %538 = vector.shape_cast %531 : vector<1x8xi1> to vector<1x8xi1>
    %539 = vector.broadcast %538 : vector<1x8xi1> to vector<8x8xi1>
    %540 = vector.broadcast %cst_209 : f32 to vector<8x8xf32>
    %541 = arith.select %539, %537, %540 : vector<8x8xi1>, vector<8x8xf32>
    %cst_210 = arith.constant dense<0xFF800000> : vector<8xf32>
    %542 = vector.multi_reduction <maximumf>, %541, %cst_210 [1] : vector<8x8xf32> to vector<8xf32>
    %543 = vector.shape_cast %542 : vector<8xf32> to vector<8x1xf32>
    %544 = vector.broadcast %543 : vector<8x1xf32> to vector<8x8xf32>
    %545 = arith.subf %541, %544 : vector<8x8xf32>
    %546 = math.exp %545 : vector<8x8xf32>
    %cst_211 = arith.constant dense<0.000000e+00> : vector<8xf32>
    %547 = vector.multi_reduction <add>, %546, %cst_211 [1] : vector<8x8xf32> to vector<8xf32>
    %548 = vector.shape_cast %547 : vector<8xf32> to vector<8x1xf32>
    %549 = tpu.reciprocal %548 {approx = true} : vector<8x1xf32> -> vector<8x1xf32>
    %550 = vector.broadcast %549 : vector<8x1xf32> to vector<8x8xf32>
    %551 = arith.mulf %546, %550 : vector<8x8xf32>
    %552 = vector.extract_strided_slice %529 {offsets = [0, 0], sizes = [8, 8], strides = [1, 1]} : vector<8x32xf32> to vector<8x8xf32>
    %cst_212 = arith.constant dense<0.000000e+00> : vector<8x8xf32>
    %553 = tpu.matmul %551, %552, %cst_212 {dimension_numbers = #tpu.dot_dimension_numbers<[1], [0], [0], [1], [0, 0, 1, 1], [], []>} : vector<8x8xf32>, vector<8x8xf32>, vector<8x8xf32> -> vector<8x8xf32>
    %554 = vector.extract_strided_slice %522 {offsets = [0, 8], sizes = [8, 8], strides = [1, 1]} : vector<8x32xf32> to vector<8x8xf32>
    %555 = vector.extract_strided_slice %528 {offsets = [0, 8], sizes = [8, 8], strides = [1, 1]} : vector<8x32xf32> to vector<8x8xf32>
    %556 = tpu.transpose %555, [1, 0] : vector<8x8xf32> -> vector<8x8xf32>
    %cst_213 = arith.constant dense<0.000000e+00> : vector<8x8xf32>
    %557 = tpu.matmul %554, %556, %cst_213 {dimension_numbers = #tpu.dot_dimension_numbers<[1], [0], [0], [1], [0, 0, 1, 1], [], []>} : vector<8x8xf32>, vector<8x8xf32>, vector<8x8xf32> -> vector<8x8xf32>
    %cst_214 = arith.constant 0.353553385 : f32
    %558 = vector.broadcast %cst_214 : f32 to vector<8x8xf32>
    %559 = arith.mulf %557, %558 : vector<8x8xf32>
    %cst_215 = arith.constant -1.000000e+09 : f32
    %560 = vector.shape_cast %531 : vector<1x8xi1> to vector<1x8xi1>
    %561 = vector.broadcast %560 : vector<1x8xi1> to vector<8x8xi1>
    %562 = vector.broadcast %cst_215 : f32 to vector<8x8xf32>
    %563 = arith.select %561, %559, %562 : vector<8x8xi1>, vector<8x8xf32>
    %cst_216 = arith.constant dense<0xFF800000> : vector<8xf32>
    %564 = vector.multi_reduction <maximumf>, %563, %cst_216 [1] : vector<8x8xf32> to vector<8xf32>
    %565 = vector.shape_cast %564 : vector<8xf32> to vector<8x1xf32>
    %566 = vector.broadcast %565 : vector<8x1xf32> to vector<8x8xf32>
    %567 = arith.subf %563, %566 : vector<8x8xf32>
    %568 = math.exp %567 : vector<8x8xf32>
    %cst_217 = arith.constant dense<0.000000e+00> : vector<8xf32>
    %569 = vector.multi_reduction <add>, %568, %cst_217 [1] : vector<8x8xf32> to vector<8xf32>
    %570 = vector.shape_cast %569 : vector<8xf32> to vector<8x1xf32>
    %571 = tpu.reciprocal %570 {approx = true} : vector<8x1xf32> -> vector<8x1xf32>
    %572 = vector.broadcast %571 : vector<8x1xf32> to vector<8x8xf32>
    %573 = arith.mulf %568, %572 : vector<8x8xf32>
    %574 = vector.extract_strided_slice %529 {offsets = [0, 8], sizes = [8, 8], strides = [1, 1]} : vector<8x32xf32> to vector<8x8xf32>
    %cst_218 = arith.constant dense<0.000000e+00> : vector<8x8xf32>
    %575 = tpu.matmul %573, %574, %cst_218 {dimension_numbers = #tpu.dot_dimension_numbers<[1], [0], [0], [1], [0, 0, 1, 1], [], []>} : vector<8x8xf32>, vector<8x8xf32>, vector<8x8xf32> -> vector<8x8xf32>
    %576 = vector.extract_strided_slice %522 {offsets = [0, 16], sizes = [8, 8], strides = [1, 1]} : vector<8x32xf32> to vector<8x8xf32>
    %577 = vector.extract_strided_slice %528 {offsets = [0, 16], sizes = [8, 8], strides = [1, 1]} : vector<8x32xf32> to vector<8x8xf32>
    %578 = tpu.transpose %577, [1, 0] : vector<8x8xf32> -> vector<8x8xf32>
    %cst_219 = arith.constant dense<0.000000e+00> : vector<8x8xf32>
    %579 = tpu.matmul %576, %578, %cst_219 {dimension_numbers = #tpu.dot_dimension_numbers<[1], [0], [0], [1], [0, 0, 1, 1], [], []>} : vector<8x8xf32>, vector<8x8xf32>, vector<8x8xf32> -> vector<8x8xf32>
    %cst_220 = arith.constant 0.353553385 : f32
    %580 = vector.broadcast %cst_220 : f32 to vector<8x8xf32>
    %581 = arith.mulf %579, %580 : vector<8x8xf32>
    %cst_221 = arith.constant -1.000000e+09 : f32
    %582 = vector.shape_cast %531 : vector<1x8xi1> to vector<1x8xi1>
    %583 = vector.broadcast %582 : vector<1x8xi1> to vector<8x8xi1>
    %584 = vector.broadcast %cst_221 : f32 to vector<8x8xf32>
    %585 = arith.select %583, %581, %584 : vector<8x8xi1>, vector<8x8xf32>
    %cst_222 = arith.constant dense<0xFF800000> : vector<8xf32>
    %586 = vector.multi_reduction <maximumf>, %585, %cst_222 [1] : vector<8x8xf32> to vector<8xf32>
    %587 = vector.shape_cast %586 : vector<8xf32> to vector<8x1xf32>
    %588 = vector.broadcast %587 : vector<8x1xf32> to vector<8x8xf32>
    %589 = arith.subf %585, %588 : vector<8x8xf32>
    %590 = math.exp %589 : vector<8x8xf32>
    %cst_223 = arith.constant dense<0.000000e+00> : vector<8xf32>
    %591 = vector.multi_reduction <add>, %590, %cst_223 [1] : vector<8x8xf32> to vector<8xf32>
    %592 = vector.shape_cast %591 : vector<8xf32> to vector<8x1xf32>
    %593 = tpu.reciprocal %592 {approx = true} : vector<8x1xf32> -> vector<8x1xf32>
    %594 = vector.broadcast %593 : vector<8x1xf32> to vector<8x8xf32>
    %595 = arith.mulf %590, %594 : vector<8x8xf32>
    %596 = vector.extract_strided_slice %529 {offsets = [0, 16], sizes = [8, 8], strides = [1, 1]} : vector<8x32xf32> to vector<8x8xf32>
    %cst_224 = arith.constant dense<0.000000e+00> : vector<8x8xf32>
    %597 = tpu.matmul %595, %596, %cst_224 {dimension_numbers = #tpu.dot_dimension_numbers<[1], [0], [0], [1], [0, 0, 1, 1], [], []>} : vector<8x8xf32>, vector<8x8xf32>, vector<8x8xf32> -> vector<8x8xf32>
    %598 = vector.extract_strided_slice %522 {offsets = [0, 24], sizes = [8, 8], strides = [1, 1]} : vector<8x32xf32> to vector<8x8xf32>
    %599 = vector.extract_strided_slice %528 {offsets = [0, 24], sizes = [8, 8], strides = [1, 1]} : vector<8x32xf32> to vector<8x8xf32>
    %600 = tpu.transpose %599, [1, 0] : vector<8x8xf32> -> vector<8x8xf32>
    %cst_225 = arith.constant dense<0.000000e+00> : vector<8x8xf32>
    %601 = tpu.matmul %598, %600, %cst_225 {dimension_numbers = #tpu.dot_dimension_numbers<[1], [0], [0], [1], [0, 0, 1, 1], [], []>} : vector<8x8xf32>, vector<8x8xf32>, vector<8x8xf32> -> vector<8x8xf32>
    %cst_226 = arith.constant 0.353553385 : f32
    %602 = vector.broadcast %cst_226 : f32 to vector<8x8xf32>
    %603 = arith.mulf %601, %602 : vector<8x8xf32>
    %cst_227 = arith.constant -1.000000e+09 : f32
    %604 = vector.shape_cast %531 : vector<1x8xi1> to vector<1x8xi1>
    %605 = vector.broadcast %604 : vector<1x8xi1> to vector<8x8xi1>
    %606 = vector.broadcast %cst_227 : f32 to vector<8x8xf32>
    %607 = arith.select %605, %603, %606 : vector<8x8xi1>, vector<8x8xf32>
    %cst_228 = arith.constant dense<0xFF800000> : vector<8xf32>
    %608 = vector.multi_reduction <maximumf>, %607, %cst_228 [1] : vector<8x8xf32> to vector<8xf32>
    %609 = vector.shape_cast %608 : vector<8xf32> to vector<8x1xf32>
    %610 = vector.broadcast %609 : vector<8x1xf32> to vector<8x8xf32>
    %611 = arith.subf %607, %610 : vector<8x8xf32>
    %612 = math.exp %611 : vector<8x8xf32>
    %cst_229 = arith.constant dense<0.000000e+00> : vector<8xf32>
    %613 = vector.multi_reduction <add>, %612, %cst_229 [1] : vector<8x8xf32> to vector<8xf32>
    %614 = vector.shape_cast %613 : vector<8xf32> to vector<8x1xf32>
    %615 = tpu.reciprocal %614 {approx = true} : vector<8x1xf32> -> vector<8x1xf32>
    %616 = vector.broadcast %615 : vector<8x1xf32> to vector<8x8xf32>
    %617 = arith.mulf %612, %616 : vector<8x8xf32>
    %618 = vector.extract_strided_slice %529 {offsets = [0, 24], sizes = [8, 8], strides = [1, 1]} : vector<8x32xf32> to vector<8x8xf32>
    %cst_230 = arith.constant dense<0.000000e+00> : vector<8x8xf32>
    %619 = tpu.matmul %617, %618, %cst_230 {dimension_numbers = #tpu.dot_dimension_numbers<[1], [0], [0], [1], [0, 0, 1, 1], [], []>} : vector<8x8xf32>, vector<8x8xf32>, vector<8x8xf32> -> vector<8x8xf32>
    %620 = tpu.concatenate %553, %575, %597, %619 in 1 : vector<8x8xf32>, vector<8x8xf32>, vector<8x8xf32>, vector<8x8xf32> -> vector<8x32xf32>
    %c0_231 = arith.constant 0 : index
    %c0_232 = arith.constant 0 : index
    %621 = vector.load %arg20[%c0_231, %c0_232] : memref<32x32xf32, #tpu.memory_space<vmem>>, vector<32x32xf32>
    %cst_233 = arith.constant dense<0.000000e+00> : vector<8x32xf32>
    %622 = tpu.matmul %620, %621, %cst_233 {dimension_numbers = #tpu.dot_dimension_numbers<[1], [0], [0], [1], [0, 0, 1, 1], [], []>} : vector<8x32xf32>, vector<32x32xf32>, vector<8x32xf32> -> vector<8x32xf32>
    %c0_234 = arith.constant 0 : index
    %c0_235 = arith.constant 0 : index
    %623 = vector.load %arg19[%c0_234, %c0_235] : memref<1x32xf32, #tpu.memory_space<vmem>>, vector<1x32xf32>
    %624 = vector.broadcast %623 : vector<1x32xf32> to vector<8x32xf32>
    %625 = arith.addf %622, %624 : vector<8x32xf32>
    %626 = arith.addf %490, %625 : vector<8x32xf32>
    %c0_236 = arith.constant 0 : index
    %c0_237 = arith.constant 0 : index
    %627 = vector.load %arg13[%c0_236, %c0_237] : memref<1x32xf32, #tpu.memory_space<vmem>>, vector<1x32xf32>
    %c0_238 = arith.constant 0 : index
    %c0_239 = arith.constant 0 : index
    %628 = vector.load %arg14[%c0_238, %c0_239] : memref<1x32xf32, #tpu.memory_space<vmem>>, vector<1x32xf32>
    %cst_240 = arith.constant dense<0.000000e+00> : vector<8xf32>
    %629 = vector.multi_reduction <add>, %626, %cst_240 [1] : vector<8x32xf32> to vector<8xf32>
    %630 = vector.shape_cast %629 : vector<8xf32> to vector<8x1xf32>
    %cst_241 = arith.constant 3.200000e+01 : f32
    %631 = vector.broadcast %cst_241 : f32 to vector<8x1xf32>
    %632 = arith.divf %630, %631 : vector<8x1xf32>
    %633 = vector.broadcast %632 : vector<8x1xf32> to vector<8x32xf32>
    %634 = arith.subf %626, %633 : vector<8x32xf32>
    %635 = arith.mulf %634, %634 : vector<8x32xf32>
    %cst_242 = arith.constant dense<0.000000e+00> : vector<8xf32>
    %636 = vector.multi_reduction <add>, %635, %cst_242 [1] : vector<8x32xf32> to vector<8xf32>
    %637 = vector.shape_cast %636 : vector<8xf32> to vector<8x1xf32>
    %cst_243 = arith.constant 3.100000e+01 : f32
    %638 = vector.broadcast %cst_243 : f32 to vector<8x1xf32>
    %639 = arith.divf %637, %638 : vector<8x1xf32>
    %640 = math.sqrt %639 : vector<8x1xf32>
    %cst_244 = arith.constant 9.99999997E-7 : f32
    %641 = vector.broadcast %cst_244 : f32 to vector<8x1xf32>
    %642 = arith.addf %640, %641 : vector<8x1xf32>
    %643 = tpu.reciprocal %642 {approx = true} : vector<8x1xf32> -> vector<8x1xf32>
    %644 = vector.broadcast %632 : vector<8x1xf32> to vector<8x32xf32>
    %645 = arith.subf %626, %644 : vector<8x32xf32>
    %646 = vector.broadcast %627 : vector<1x32xf32> to vector<8x32xf32>
    %647 = arith.mulf %646, %645 : vector<8x32xf32>
    %648 = vector.broadcast %643 : vector<8x1xf32> to vector<8x32xf32>
    %649 = arith.mulf %647, %648 : vector<8x32xf32>
    %650 = vector.broadcast %628 : vector<1x32xf32> to vector<8x32xf32>
    %651 = arith.addf %649, %650 : vector<8x32xf32>
    %c0_245 = arith.constant 0 : index
    %c0_246 = arith.constant 0 : index
    %652 = vector.load %arg7[%c0_245, %c0_246] : memref<32x64xf32, #tpu.memory_space<vmem>>, vector<32x64xf32>
    %cst_247 = arith.constant dense<0.000000e+00> : vector<8x64xf32>
    %653 = tpu.matmul %651, %652, %cst_247 {dimension_numbers = #tpu.dot_dimension_numbers<[1], [0], [0], [1], [0, 0, 1, 1], [], []>} : vector<8x32xf32>, vector<32x64xf32>, vector<8x64xf32> -> vector<8x64xf32>
    %c0_248 = arith.constant 0 : index
    %c0_249 = arith.constant 0 : index
    %654 = vector.load %arg5[%c0_248, %c0_249] : memref<1x64xf32, #tpu.memory_space<vmem>>, vector<1x64xf32>
    %655 = vector.broadcast %654 : vector<1x64xf32> to vector<8x64xf32>
    %656 = arith.addf %653, %655 : vector<8x64xf32>
    %cst_250 = arith.constant 0.000000e+00 : f32
    %657 = vector.broadcast %cst_250 : f32 to vector<8x64xf32>
    %658 = arith.maximumf %656, %657 : vector<8x64xf32>
    %c0_251 = arith.constant 0 : index
    %c0_252 = arith.constant 0 : index
    %659 = vector.load %arg8[%c0_251, %c0_252] : memref<64x32xf32, #tpu.memory_space<vmem>>, vector<64x32xf32>
    %cst_253 = arith.constant dense<0.000000e+00> : vector<8x32xf32>
    %660 = tpu.matmul %658, %659, %cst_253 {dimension_numbers = #tpu.dot_dimension_numbers<[1], [0], [0], [1], [0, 0, 1, 1], [], []>} : vector<8x64xf32>, vector<64x32xf32>, vector<8x32xf32> -> vector<8x32xf32>
    %c0_254 = arith.constant 0 : index
    %c0_255 = arith.constant 0 : index
    %661 = vector.load %arg6[%c0_254, %c0_255] : memref<1x32xf32, #tpu.memory_space<vmem>>, vector<1x32xf32>
    %662 = vector.broadcast %661 : vector<1x32xf32> to vector<8x32xf32>
    %663 = arith.addf %660, %662 : vector<8x32xf32>
    %664 = arith.addf %626, %663 : vector<8x32xf32>
    %c0_256 = arith.constant 0 : index
    %c0_257 = arith.constant 0 : index
    %665 = vector.load %arg27[%c0_256, %c0_257] : memref<1x32xf32, #tpu.memory_space<vmem>>, vector<1x32xf32>
    %c0_258 = arith.constant 0 : index
    %c0_259 = arith.constant 0 : index
    %666 = vector.load %arg28[%c0_258, %c0_259] : memref<1x32xf32, #tpu.memory_space<vmem>>, vector<1x32xf32>
    %cst_260 = arith.constant dense<0.000000e+00> : vector<8xf32>
    %667 = vector.multi_reduction <add>, %664, %cst_260 [1] : vector<8x32xf32> to vector<8xf32>
    %668 = vector.shape_cast %667 : vector<8xf32> to vector<8x1xf32>
    %cst_261 = arith.constant 3.200000e+01 : f32
    %669 = vector.broadcast %cst_261 : f32 to vector<8x1xf32>
    %670 = arith.divf %668, %669 : vector<8x1xf32>
    %671 = vector.broadcast %670 : vector<8x1xf32> to vector<8x32xf32>
    %672 = arith.subf %664, %671 : vector<8x32xf32>
    %673 = arith.mulf %672, %672 : vector<8x32xf32>
    %cst_262 = arith.constant dense<0.000000e+00> : vector<8xf32>
    %674 = vector.multi_reduction <add>, %673, %cst_262 [1] : vector<8x32xf32> to vector<8xf32>
    %675 = vector.shape_cast %674 : vector<8xf32> to vector<8x1xf32>
    %cst_263 = arith.constant 3.100000e+01 : f32
    %676 = vector.broadcast %cst_263 : f32 to vector<8x1xf32>
    %677 = arith.divf %675, %676 : vector<8x1xf32>
    %678 = math.sqrt %677 : vector<8x1xf32>
    %cst_264 = arith.constant 9.99999997E-7 : f32
    %679 = vector.broadcast %cst_264 : f32 to vector<8x1xf32>
    %680 = arith.addf %678, %679 : vector<8x1xf32>
    %681 = tpu.reciprocal %680 {approx = true} : vector<8x1xf32> -> vector<8x1xf32>
    %682 = vector.broadcast %670 : vector<8x1xf32> to vector<8x32xf32>
    %683 = arith.subf %664, %682 : vector<8x32xf32>
    %684 = vector.broadcast %665 : vector<1x32xf32> to vector<8x32xf32>
    %685 = arith.mulf %684, %683 : vector<8x32xf32>
    %686 = vector.broadcast %681 : vector<8x1xf32> to vector<8x32xf32>
    %687 = arith.mulf %685, %686 : vector<8x32xf32>
    %688 = vector.broadcast %666 : vector<1x32xf32> to vector<8x32xf32>
    %689 = arith.addf %687, %688 : vector<8x32xf32>
    %c0_265 = arith.constant 0 : index
    %c0_266 = arith.constant 0 : index
    %690 = vector.load %arg36[%c0_265, %c0_266] : memref<32x96xf32, #tpu.memory_space<vmem>>, vector<32x96xf32>
    %c0_267 = arith.constant 0 : index
    %c0_268 = arith.constant 0 : index
    %691 = vector.load %arg35[%c0_267, %c0_268] : memref<1x96xf32, #tpu.memory_space<vmem>>, vector<1x96xf32>
    %cst_269 = arith.constant dense<0.000000e+00> : vector<8x96xf32>
    %692 = tpu.matmul %689, %690, %cst_269 {dimension_numbers = #tpu.dot_dimension_numbers<[1], [0], [0], [1], [0, 0, 1, 1], [], []>} : vector<8x32xf32>, vector<32x96xf32>, vector<8x96xf32> -> vector<8x96xf32>
    %693 = vector.broadcast %691 : vector<1x96xf32> to vector<8x96xf32>
    %694 = arith.addf %692, %693 : vector<8x96xf32>
    %695 = vector.extract_strided_slice %694 {offsets = [0, 0], sizes = [8, 32], strides = [1, 1]} : vector<8x96xf32> to vector<8x32xf32>
    %696 = vector.extract_strided_slice %694 {offsets = [0, 32], sizes = [8, 32], strides = [1, 1]} : vector<8x96xf32> to vector<8x32xf32>
    %697 = vector.extract_strided_slice %694 {offsets = [0, 64], sizes = [8, 32], strides = [1, 1]} : vector<8x96xf32> to vector<8x32xf32>
    %cst_270 = arith.constant 5.000000e-01 : f32
    %698 = vector.broadcast %cst_270 : f32 to vector<8x8xf32>
    %699 = arith.cmpf ogt, %7, %698 : vector<8x8xf32>
    %700 = vector.extract_strided_slice %695 {offsets = [0, 0], sizes = [8, 8], strides = [1, 1]} : vector<8x32xf32> to vector<8x8xf32>
    %701 = vector.extract_strided_slice %696 {offsets = [0, 0], sizes = [8, 8], strides = [1, 1]} : vector<8x32xf32> to vector<8x8xf32>
    %702 = tpu.transpose %701, [1, 0] : vector<8x8xf32> -> vector<8x8xf32>
    %cst_271 = arith.constant dense<0.000000e+00> : vector<8x8xf32>
    %703 = tpu.matmul %700, %702, %cst_271 {dimension_numbers = #tpu.dot_dimension_numbers<[1], [0], [0], [1], [0, 0, 1, 1], [], []>} : vector<8x8xf32>, vector<8x8xf32>, vector<8x8xf32> -> vector<8x8xf32>
    %cst_272 = arith.constant 0.353553385 : f32
    %704 = vector.broadcast %cst_272 : f32 to vector<8x8xf32>
    %705 = arith.mulf %703, %704 : vector<8x8xf32>
    %cst_273 = arith.constant -1.000000e+09 : f32
    %706 = vector.broadcast %cst_273 : f32 to vector<8x8xf32>
    %707 = arith.select %699, %705, %706 : vector<8x8xi1>, vector<8x8xf32>
    %cst_274 = arith.constant dense<0xFF800000> : vector<8xf32>
    %708 = vector.multi_reduction <maximumf>, %707, %cst_274 [1] : vector<8x8xf32> to vector<8xf32>
    %709 = vector.shape_cast %708 : vector<8xf32> to vector<8x1xf32>
    %710 = vector.broadcast %709 : vector<8x1xf32> to vector<8x8xf32>
    %711 = arith.subf %707, %710 : vector<8x8xf32>
    %712 = math.exp %711 : vector<8x8xf32>
    %cst_275 = arith.constant dense<0.000000e+00> : vector<8xf32>
    %713 = vector.multi_reduction <add>, %712, %cst_275 [1] : vector<8x8xf32> to vector<8xf32>
    %714 = vector.shape_cast %713 : vector<8xf32> to vector<8x1xf32>
    %715 = tpu.reciprocal %714 {approx = true} : vector<8x1xf32> -> vector<8x1xf32>
    %716 = vector.broadcast %715 : vector<8x1xf32> to vector<8x8xf32>
    %717 = arith.mulf %712, %716 : vector<8x8xf32>
    %718 = vector.extract_strided_slice %697 {offsets = [0, 0], sizes = [8, 8], strides = [1, 1]} : vector<8x32xf32> to vector<8x8xf32>
    %cst_276 = arith.constant dense<0.000000e+00> : vector<8x8xf32>
    %719 = tpu.matmul %717, %718, %cst_276 {dimension_numbers = #tpu.dot_dimension_numbers<[1], [0], [0], [1], [0, 0, 1, 1], [], []>} : vector<8x8xf32>, vector<8x8xf32>, vector<8x8xf32> -> vector<8x8xf32>
    %720 = vector.extract_strided_slice %695 {offsets = [0, 8], sizes = [8, 8], strides = [1, 1]} : vector<8x32xf32> to vector<8x8xf32>
    %721 = vector.extract_strided_slice %696 {offsets = [0, 8], sizes = [8, 8], strides = [1, 1]} : vector<8x32xf32> to vector<8x8xf32>
    %722 = tpu.transpose %721, [1, 0] : vector<8x8xf32> -> vector<8x8xf32>
    %cst_277 = arith.constant dense<0.000000e+00> : vector<8x8xf32>
    %723 = tpu.matmul %720, %722, %cst_277 {dimension_numbers = #tpu.dot_dimension_numbers<[1], [0], [0], [1], [0, 0, 1, 1], [], []>} : vector<8x8xf32>, vector<8x8xf32>, vector<8x8xf32> -> vector<8x8xf32>
    %cst_278 = arith.constant 0.353553385 : f32
    %724 = vector.broadcast %cst_278 : f32 to vector<8x8xf32>
    %725 = arith.mulf %723, %724 : vector<8x8xf32>
    %cst_279 = arith.constant -1.000000e+09 : f32
    %726 = vector.broadcast %cst_279 : f32 to vector<8x8xf32>
    %727 = arith.select %699, %725, %726 : vector<8x8xi1>, vector<8x8xf32>
    %cst_280 = arith.constant dense<0xFF800000> : vector<8xf32>
    %728 = vector.multi_reduction <maximumf>, %727, %cst_280 [1] : vector<8x8xf32> to vector<8xf32>
    %729 = vector.shape_cast %728 : vector<8xf32> to vector<8x1xf32>
    %730 = vector.broadcast %729 : vector<8x1xf32> to vector<8x8xf32>
    %731 = arith.subf %727, %730 : vector<8x8xf32>
    %732 = math.exp %731 : vector<8x8xf32>
    %cst_281 = arith.constant dense<0.000000e+00> : vector<8xf32>
    %733 = vector.multi_reduction <add>, %732, %cst_281 [1] : vector<8x8xf32> to vector<8xf32>
    %734 = vector.shape_cast %733 : vector<8xf32> to vector<8x1xf32>
    %735 = tpu.reciprocal %734 {approx = true} : vector<8x1xf32> -> vector<8x1xf32>
    %736 = vector.broadcast %735 : vector<8x1xf32> to vector<8x8xf32>
    %737 = arith.mulf %732, %736 : vector<8x8xf32>
    %738 = vector.extract_strided_slice %697 {offsets = [0, 8], sizes = [8, 8], strides = [1, 1]} : vector<8x32xf32> to vector<8x8xf32>
    %cst_282 = arith.constant dense<0.000000e+00> : vector<8x8xf32>
    %739 = tpu.matmul %737, %738, %cst_282 {dimension_numbers = #tpu.dot_dimension_numbers<[1], [0], [0], [1], [0, 0, 1, 1], [], []>} : vector<8x8xf32>, vector<8x8xf32>, vector<8x8xf32> -> vector<8x8xf32>
    %740 = vector.extract_strided_slice %695 {offsets = [0, 16], sizes = [8, 8], strides = [1, 1]} : vector<8x32xf32> to vector<8x8xf32>
    %741 = vector.extract_strided_slice %696 {offsets = [0, 16], sizes = [8, 8], strides = [1, 1]} : vector<8x32xf32> to vector<8x8xf32>
    %742 = tpu.transpose %741, [1, 0] : vector<8x8xf32> -> vector<8x8xf32>
    %cst_283 = arith.constant dense<0.000000e+00> : vector<8x8xf32>
    %743 = tpu.matmul %740, %742, %cst_283 {dimension_numbers = #tpu.dot_dimension_numbers<[1], [0], [0], [1], [0, 0, 1, 1], [], []>} : vector<8x8xf32>, vector<8x8xf32>, vector<8x8xf32> -> vector<8x8xf32>
    %cst_284 = arith.constant 0.353553385 : f32
    %744 = vector.broadcast %cst_284 : f32 to vector<8x8xf32>
    %745 = arith.mulf %743, %744 : vector<8x8xf32>
    %cst_285 = arith.constant -1.000000e+09 : f32
    %746 = vector.broadcast %cst_285 : f32 to vector<8x8xf32>
    %747 = arith.select %699, %745, %746 : vector<8x8xi1>, vector<8x8xf32>
    %cst_286 = arith.constant dense<0xFF800000> : vector<8xf32>
    %748 = vector.multi_reduction <maximumf>, %747, %cst_286 [1] : vector<8x8xf32> to vector<8xf32>
    %749 = vector.shape_cast %748 : vector<8xf32> to vector<8x1xf32>
    %750 = vector.broadcast %749 : vector<8x1xf32> to vector<8x8xf32>
    %751 = arith.subf %747, %750 : vector<8x8xf32>
    %752 = math.exp %751 : vector<8x8xf32>
    %cst_287 = arith.constant dense<0.000000e+00> : vector<8xf32>
    %753 = vector.multi_reduction <add>, %752, %cst_287 [1] : vector<8x8xf32> to vector<8xf32>
    %754 = vector.shape_cast %753 : vector<8xf32> to vector<8x1xf32>
    %755 = tpu.reciprocal %754 {approx = true} : vector<8x1xf32> -> vector<8x1xf32>
    %756 = vector.broadcast %755 : vector<8x1xf32> to vector<8x8xf32>
    %757 = arith.mulf %752, %756 : vector<8x8xf32>
    %758 = vector.extract_strided_slice %697 {offsets = [0, 16], sizes = [8, 8], strides = [1, 1]} : vector<8x32xf32> to vector<8x8xf32>
    %cst_288 = arith.constant dense<0.000000e+00> : vector<8x8xf32>
    %759 = tpu.matmul %757, %758, %cst_288 {dimension_numbers = #tpu.dot_dimension_numbers<[1], [0], [0], [1], [0, 0, 1, 1], [], []>} : vector<8x8xf32>, vector<8x8xf32>, vector<8x8xf32> -> vector<8x8xf32>
    %760 = vector.extract_strided_slice %695 {offsets = [0, 24], sizes = [8, 8], strides = [1, 1]} : vector<8x32xf32> to vector<8x8xf32>
    %761 = vector.extract_strided_slice %696 {offsets = [0, 24], sizes = [8, 8], strides = [1, 1]} : vector<8x32xf32> to vector<8x8xf32>
    %762 = tpu.transpose %761, [1, 0] : vector<8x8xf32> -> vector<8x8xf32>
    %cst_289 = arith.constant dense<0.000000e+00> : vector<8x8xf32>
    %763 = tpu.matmul %760, %762, %cst_289 {dimension_numbers = #tpu.dot_dimension_numbers<[1], [0], [0], [1], [0, 0, 1, 1], [], []>} : vector<8x8xf32>, vector<8x8xf32>, vector<8x8xf32> -> vector<8x8xf32>
    %cst_290 = arith.constant 0.353553385 : f32
    %764 = vector.broadcast %cst_290 : f32 to vector<8x8xf32>
    %765 = arith.mulf %763, %764 : vector<8x8xf32>
    %cst_291 = arith.constant -1.000000e+09 : f32
    %766 = vector.broadcast %cst_291 : f32 to vector<8x8xf32>
    %767 = arith.select %699, %765, %766 : vector<8x8xi1>, vector<8x8xf32>
    %cst_292 = arith.constant dense<0xFF800000> : vector<8xf32>
    %768 = vector.multi_reduction <maximumf>, %767, %cst_292 [1] : vector<8x8xf32> to vector<8xf32>
    %769 = vector.shape_cast %768 : vector<8xf32> to vector<8x1xf32>
    %770 = vector.broadcast %769 : vector<8x1xf32> to vector<8x8xf32>
    %771 = arith.subf %767, %770 : vector<8x8xf32>
    %772 = math.exp %771 : vector<8x8xf32>
    %cst_293 = arith.constant dense<0.000000e+00> : vector<8xf32>
    %773 = vector.multi_reduction <add>, %772, %cst_293 [1] : vector<8x8xf32> to vector<8xf32>
    %774 = vector.shape_cast %773 : vector<8xf32> to vector<8x1xf32>
    %775 = tpu.reciprocal %774 {approx = true} : vector<8x1xf32> -> vector<8x1xf32>
    %776 = vector.broadcast %775 : vector<8x1xf32> to vector<8x8xf32>
    %777 = arith.mulf %772, %776 : vector<8x8xf32>
    %778 = vector.extract_strided_slice %697 {offsets = [0, 24], sizes = [8, 8], strides = [1, 1]} : vector<8x32xf32> to vector<8x8xf32>
    %cst_294 = arith.constant dense<0.000000e+00> : vector<8x8xf32>
    %779 = tpu.matmul %777, %778, %cst_294 {dimension_numbers = #tpu.dot_dimension_numbers<[1], [0], [0], [1], [0, 0, 1, 1], [], []>} : vector<8x8xf32>, vector<8x8xf32>, vector<8x8xf32> -> vector<8x8xf32>
    %780 = tpu.concatenate %719, %739, %759, %779 in 1 : vector<8x8xf32>, vector<8x8xf32>, vector<8x8xf32>, vector<8x8xf32> -> vector<8x32xf32>
    %c0_295 = arith.constant 0 : index
    %c0_296 = arith.constant 0 : index
    %781 = vector.load %arg34[%c0_295, %c0_296] : memref<32x32xf32, #tpu.memory_space<vmem>>, vector<32x32xf32>
    %cst_297 = arith.constant dense<0.000000e+00> : vector<8x32xf32>
    %782 = tpu.matmul %780, %781, %cst_297 {dimension_numbers = #tpu.dot_dimension_numbers<[1], [0], [0], [1], [0, 0, 1, 1], [], []>} : vector<8x32xf32>, vector<32x32xf32>, vector<8x32xf32> -> vector<8x32xf32>
    %c0_298 = arith.constant 0 : index
    %c0_299 = arith.constant 0 : index
    %783 = vector.load %arg33[%c0_298, %c0_299] : memref<1x32xf32, #tpu.memory_space<vmem>>, vector<1x32xf32>
    %784 = vector.broadcast %783 : vector<1x32xf32> to vector<8x32xf32>
    %785 = arith.addf %782, %784 : vector<8x32xf32>
    %786 = arith.addf %664, %785 : vector<8x32xf32>
    %c0_300 = arith.constant 0 : index
    %c0_301 = arith.constant 0 : index
    %787 = vector.load %arg29[%c0_300, %c0_301] : memref<1x32xf32, #tpu.memory_space<vmem>>, vector<1x32xf32>
    %c0_302 = arith.constant 0 : index
    %c0_303 = arith.constant 0 : index
    %788 = vector.load %arg30[%c0_302, %c0_303] : memref<1x32xf32, #tpu.memory_space<vmem>>, vector<1x32xf32>
    %cst_304 = arith.constant dense<0.000000e+00> : vector<8xf32>
    %789 = vector.multi_reduction <add>, %786, %cst_304 [1] : vector<8x32xf32> to vector<8xf32>
    %790 = vector.shape_cast %789 : vector<8xf32> to vector<8x1xf32>
    %cst_305 = arith.constant 3.200000e+01 : f32
    %791 = vector.broadcast %cst_305 : f32 to vector<8x1xf32>
    %792 = arith.divf %790, %791 : vector<8x1xf32>
    %793 = vector.broadcast %792 : vector<8x1xf32> to vector<8x32xf32>
    %794 = arith.subf %786, %793 : vector<8x32xf32>
    %795 = arith.mulf %794, %794 : vector<8x32xf32>
    %cst_306 = arith.constant dense<0.000000e+00> : vector<8xf32>
    %796 = vector.multi_reduction <add>, %795, %cst_306 [1] : vector<8x32xf32> to vector<8xf32>
    %797 = vector.shape_cast %796 : vector<8xf32> to vector<8x1xf32>
    %cst_307 = arith.constant 3.100000e+01 : f32
    %798 = vector.broadcast %cst_307 : f32 to vector<8x1xf32>
    %799 = arith.divf %797, %798 : vector<8x1xf32>
    %800 = math.sqrt %799 : vector<8x1xf32>
    %cst_308 = arith.constant 9.99999997E-7 : f32
    %801 = vector.broadcast %cst_308 : f32 to vector<8x1xf32>
    %802 = arith.addf %800, %801 : vector<8x1xf32>
    %803 = tpu.reciprocal %802 {approx = true} : vector<8x1xf32> -> vector<8x1xf32>
    %804 = vector.broadcast %792 : vector<8x1xf32> to vector<8x32xf32>
    %805 = arith.subf %786, %804 : vector<8x32xf32>
    %806 = vector.broadcast %787 : vector<1x32xf32> to vector<8x32xf32>
    %807 = arith.mulf %806, %805 : vector<8x32xf32>
    %808 = vector.broadcast %803 : vector<8x1xf32> to vector<8x32xf32>
    %809 = arith.mulf %807, %808 : vector<8x32xf32>
    %810 = vector.broadcast %788 : vector<1x32xf32> to vector<8x32xf32>
    %811 = arith.addf %809, %810 : vector<8x32xf32>
    %c0_309 = arith.constant 0 : index
    %c0_310 = arith.constant 0 : index
    %812 = vector.load %arg40[%c0_309, %c0_310] : memref<32x96xf32, #tpu.memory_space<vmem>>, vector<32x96xf32>
    %c0_311 = arith.constant 0 : index
    %c0_312 = arith.constant 0 : index
    %813 = vector.load %arg39[%c0_311, %c0_312] : memref<1x96xf32, #tpu.memory_space<vmem>>, vector<1x96xf32>
    %814 = vector.extract_strided_slice %812 {offsets = [0, 0], sizes = [32, 32], strides = [1, 1]} : vector<32x96xf32> to vector<32x32xf32>
    %cst_313 = arith.constant dense<0.000000e+00> : vector<8x32xf32>
    %815 = tpu.matmul %811, %814, %cst_313 {dimension_numbers = #tpu.dot_dimension_numbers<[1], [0], [0], [1], [0, 0, 1, 1], [], []>} : vector<8x32xf32>, vector<32x32xf32>, vector<8x32xf32> -> vector<8x32xf32>
    %816 = vector.extract_strided_slice %813 {offsets = [0, 0], sizes = [1, 32], strides = [1, 1]} : vector<1x96xf32> to vector<1x32xf32>
    %817 = vector.broadcast %816 : vector<1x32xf32> to vector<8x32xf32>
    %818 = arith.addf %815, %817 : vector<8x32xf32>
    %819 = vector.extract_strided_slice %812 {offsets = [0, 32], sizes = [32, 64], strides = [1, 1]} : vector<32x96xf32> to vector<32x64xf32>
    %cst_314 = arith.constant dense<0.000000e+00> : vector<8x64xf32>
    %820 = tpu.matmul %368, %819, %cst_314 {dimension_numbers = #tpu.dot_dimension_numbers<[1], [0], [0], [1], [0, 0, 1, 1], [], []>} : vector<8x32xf32>, vector<32x64xf32>, vector<8x64xf32> -> vector<8x64xf32>
    %821 = vector.extract_strided_slice %813 {offsets = [0, 32], sizes = [1, 64], strides = [1, 1]} : vector<1x96xf32> to vector<1x64xf32>
    %822 = vector.broadcast %821 : vector<1x64xf32> to vector<8x64xf32>
    %823 = arith.addf %820, %822 : vector<8x64xf32>
    %824 = vector.extract_strided_slice %823 {offsets = [0, 0], sizes = [8, 32], strides = [1, 1]} : vector<8x64xf32> to vector<8x32xf32>
    %825 = vector.extract_strided_slice %823 {offsets = [0, 32], sizes = [8, 32], strides = [1, 1]} : vector<8x64xf32> to vector<8x32xf32>
    %cst_315 = arith.constant 5.000000e-01 : f32
    %826 = vector.broadcast %cst_315 : f32 to vector<1x8xf32>
    %827 = arith.cmpf ogt, %5, %826 : vector<1x8xf32>
    %828 = vector.extract_strided_slice %818 {offsets = [0, 0], sizes = [8, 8], strides = [1, 1]} : vector<8x32xf32> to vector<8x8xf32>
    %829 = vector.extract_strided_slice %824 {offsets = [0, 0], sizes = [8, 8], strides = [1, 1]} : vector<8x32xf32> to vector<8x8xf32>
    %830 = tpu.transpose %829, [1, 0] : vector<8x8xf32> -> vector<8x8xf32>
    %cst_316 = arith.constant dense<0.000000e+00> : vector<8x8xf32>
    %831 = tpu.matmul %828, %830, %cst_316 {dimension_numbers = #tpu.dot_dimension_numbers<[1], [0], [0], [1], [0, 0, 1, 1], [], []>} : vector<8x8xf32>, vector<8x8xf32>, vector<8x8xf32> -> vector<8x8xf32>
    %cst_317 = arith.constant 0.353553385 : f32
    %832 = vector.broadcast %cst_317 : f32 to vector<8x8xf32>
    %833 = arith.mulf %831, %832 : vector<8x8xf32>
    %cst_318 = arith.constant -1.000000e+09 : f32
    %834 = vector.shape_cast %827 : vector<1x8xi1> to vector<1x8xi1>
    %835 = vector.broadcast %834 : vector<1x8xi1> to vector<8x8xi1>
    %836 = vector.broadcast %cst_318 : f32 to vector<8x8xf32>
    %837 = arith.select %835, %833, %836 : vector<8x8xi1>, vector<8x8xf32>
    %cst_319 = arith.constant dense<0xFF800000> : vector<8xf32>
    %838 = vector.multi_reduction <maximumf>, %837, %cst_319 [1] : vector<8x8xf32> to vector<8xf32>
    %839 = vector.shape_cast %838 : vector<8xf32> to vector<8x1xf32>
    %840 = vector.broadcast %839 : vector<8x1xf32> to vector<8x8xf32>
    %841 = arith.subf %837, %840 : vector<8x8xf32>
    %842 = math.exp %841 : vector<8x8xf32>
    %cst_320 = arith.constant dense<0.000000e+00> : vector<8xf32>
    %843 = vector.multi_reduction <add>, %842, %cst_320 [1] : vector<8x8xf32> to vector<8xf32>
    %844 = vector.shape_cast %843 : vector<8xf32> to vector<8x1xf32>
    %845 = tpu.reciprocal %844 {approx = true} : vector<8x1xf32> -> vector<8x1xf32>
    %846 = vector.broadcast %845 : vector<8x1xf32> to vector<8x8xf32>
    %847 = arith.mulf %842, %846 : vector<8x8xf32>
    %848 = vector.extract_strided_slice %825 {offsets = [0, 0], sizes = [8, 8], strides = [1, 1]} : vector<8x32xf32> to vector<8x8xf32>
    %cst_321 = arith.constant dense<0.000000e+00> : vector<8x8xf32>
    %849 = tpu.matmul %847, %848, %cst_321 {dimension_numbers = #tpu.dot_dimension_numbers<[1], [0], [0], [1], [0, 0, 1, 1], [], []>} : vector<8x8xf32>, vector<8x8xf32>, vector<8x8xf32> -> vector<8x8xf32>
    %850 = vector.extract_strided_slice %818 {offsets = [0, 8], sizes = [8, 8], strides = [1, 1]} : vector<8x32xf32> to vector<8x8xf32>
    %851 = vector.extract_strided_slice %824 {offsets = [0, 8], sizes = [8, 8], strides = [1, 1]} : vector<8x32xf32> to vector<8x8xf32>
    %852 = tpu.transpose %851, [1, 0] : vector<8x8xf32> -> vector<8x8xf32>
    %cst_322 = arith.constant dense<0.000000e+00> : vector<8x8xf32>
    %853 = tpu.matmul %850, %852, %cst_322 {dimension_numbers = #tpu.dot_dimension_numbers<[1], [0], [0], [1], [0, 0, 1, 1], [], []>} : vector<8x8xf32>, vector<8x8xf32>, vector<8x8xf32> -> vector<8x8xf32>
    %cst_323 = arith.constant 0.353553385 : f32
    %854 = vector.broadcast %cst_323 : f32 to vector<8x8xf32>
    %855 = arith.mulf %853, %854 : vector<8x8xf32>
    %cst_324 = arith.constant -1.000000e+09 : f32
    %856 = vector.shape_cast %827 : vector<1x8xi1> to vector<1x8xi1>
    %857 = vector.broadcast %856 : vector<1x8xi1> to vector<8x8xi1>
    %858 = vector.broadcast %cst_324 : f32 to vector<8x8xf32>
    %859 = arith.select %857, %855, %858 : vector<8x8xi1>, vector<8x8xf32>
    %cst_325 = arith.constant dense<0xFF800000> : vector<8xf32>
    %860 = vector.multi_reduction <maximumf>, %859, %cst_325 [1] : vector<8x8xf32> to vector<8xf32>
    %861 = vector.shape_cast %860 : vector<8xf32> to vector<8x1xf32>
    %862 = vector.broadcast %861 : vector<8x1xf32> to vector<8x8xf32>
    %863 = arith.subf %859, %862 : vector<8x8xf32>
    %864 = math.exp %863 : vector<8x8xf32>
    %cst_326 = arith.constant dense<0.000000e+00> : vector<8xf32>
    %865 = vector.multi_reduction <add>, %864, %cst_326 [1] : vector<8x8xf32> to vector<8xf32>
    %866 = vector.shape_cast %865 : vector<8xf32> to vector<8x1xf32>
    %867 = tpu.reciprocal %866 {approx = true} : vector<8x1xf32> -> vector<8x1xf32>
    %868 = vector.broadcast %867 : vector<8x1xf32> to vector<8x8xf32>
    %869 = arith.mulf %864, %868 : vector<8x8xf32>
    %870 = vector.extract_strided_slice %825 {offsets = [0, 8], sizes = [8, 8], strides = [1, 1]} : vector<8x32xf32> to vector<8x8xf32>
    %cst_327 = arith.constant dense<0.000000e+00> : vector<8x8xf32>
    %871 = tpu.matmul %869, %870, %cst_327 {dimension_numbers = #tpu.dot_dimension_numbers<[1], [0], [0], [1], [0, 0, 1, 1], [], []>} : vector<8x8xf32>, vector<8x8xf32>, vector<8x8xf32> -> vector<8x8xf32>
    %872 = vector.extract_strided_slice %818 {offsets = [0, 16], sizes = [8, 8], strides = [1, 1]} : vector<8x32xf32> to vector<8x8xf32>
    %873 = vector.extract_strided_slice %824 {offsets = [0, 16], sizes = [8, 8], strides = [1, 1]} : vector<8x32xf32> to vector<8x8xf32>
    %874 = tpu.transpose %873, [1, 0] : vector<8x8xf32> -> vector<8x8xf32>
    %cst_328 = arith.constant dense<0.000000e+00> : vector<8x8xf32>
    %875 = tpu.matmul %872, %874, %cst_328 {dimension_numbers = #tpu.dot_dimension_numbers<[1], [0], [0], [1], [0, 0, 1, 1], [], []>} : vector<8x8xf32>, vector<8x8xf32>, vector<8x8xf32> -> vector<8x8xf32>
    %cst_329 = arith.constant 0.353553385 : f32
    %876 = vector.broadcast %cst_329 : f32 to vector<8x8xf32>
    %877 = arith.mulf %875, %876 : vector<8x8xf32>
    %cst_330 = arith.constant -1.000000e+09 : f32
    %878 = vector.shape_cast %827 : vector<1x8xi1> to vector<1x8xi1>
    %879 = vector.broadcast %878 : vector<1x8xi1> to vector<8x8xi1>
    %880 = vector.broadcast %cst_330 : f32 to vector<8x8xf32>
    %881 = arith.select %879, %877, %880 : vector<8x8xi1>, vector<8x8xf32>
    %cst_331 = arith.constant dense<0xFF800000> : vector<8xf32>
    %882 = vector.multi_reduction <maximumf>, %881, %cst_331 [1] : vector<8x8xf32> to vector<8xf32>
    %883 = vector.shape_cast %882 : vector<8xf32> to vector<8x1xf32>
    %884 = vector.broadcast %883 : vector<8x1xf32> to vector<8x8xf32>
    %885 = arith.subf %881, %884 : vector<8x8xf32>
    %886 = math.exp %885 : vector<8x8xf32>
    %cst_332 = arith.constant dense<0.000000e+00> : vector<8xf32>
    %887 = vector.multi_reduction <add>, %886, %cst_332 [1] : vector<8x8xf32> to vector<8xf32>
    %888 = vector.shape_cast %887 : vector<8xf32> to vector<8x1xf32>
    %889 = tpu.reciprocal %888 {approx = true} : vector<8x1xf32> -> vector<8x1xf32>
    %890 = vector.broadcast %889 : vector<8x1xf32> to vector<8x8xf32>
    %891 = arith.mulf %886, %890 : vector<8x8xf32>
    %892 = vector.extract_strided_slice %825 {offsets = [0, 16], sizes = [8, 8], strides = [1, 1]} : vector<8x32xf32> to vector<8x8xf32>
    %cst_333 = arith.constant dense<0.000000e+00> : vector<8x8xf32>
    %893 = tpu.matmul %891, %892, %cst_333 {dimension_numbers = #tpu.dot_dimension_numbers<[1], [0], [0], [1], [0, 0, 1, 1], [], []>} : vector<8x8xf32>, vector<8x8xf32>, vector<8x8xf32> -> vector<8x8xf32>
    %894 = vector.extract_strided_slice %818 {offsets = [0, 24], sizes = [8, 8], strides = [1, 1]} : vector<8x32xf32> to vector<8x8xf32>
    %895 = vector.extract_strided_slice %824 {offsets = [0, 24], sizes = [8, 8], strides = [1, 1]} : vector<8x32xf32> to vector<8x8xf32>
    %896 = tpu.transpose %895, [1, 0] : vector<8x8xf32> -> vector<8x8xf32>
    %cst_334 = arith.constant dense<0.000000e+00> : vector<8x8xf32>
    %897 = tpu.matmul %894, %896, %cst_334 {dimension_numbers = #tpu.dot_dimension_numbers<[1], [0], [0], [1], [0, 0, 1, 1], [], []>} : vector<8x8xf32>, vector<8x8xf32>, vector<8x8xf32> -> vector<8x8xf32>
    %cst_335 = arith.constant 0.353553385 : f32
    %898 = vector.broadcast %cst_335 : f32 to vector<8x8xf32>
    %899 = arith.mulf %897, %898 : vector<8x8xf32>
    %cst_336 = arith.constant -1.000000e+09 : f32
    %900 = vector.shape_cast %827 : vector<1x8xi1> to vector<1x8xi1>
    %901 = vector.broadcast %900 : vector<1x8xi1> to vector<8x8xi1>
    %902 = vector.broadcast %cst_336 : f32 to vector<8x8xf32>
    %903 = arith.select %901, %899, %902 : vector<8x8xi1>, vector<8x8xf32>
    %cst_337 = arith.constant dense<0xFF800000> : vector<8xf32>
    %904 = vector.multi_reduction <maximumf>, %903, %cst_337 [1] : vector<8x8xf32> to vector<8xf32>
    %905 = vector.shape_cast %904 : vector<8xf32> to vector<8x1xf32>
    %906 = vector.broadcast %905 : vector<8x1xf32> to vector<8x8xf32>
    %907 = arith.subf %903, %906 : vector<8x8xf32>
    %908 = math.exp %907 : vector<8x8xf32>
    %cst_338 = arith.constant dense<0.000000e+00> : vector<8xf32>
    %909 = vector.multi_reduction <add>, %908, %cst_338 [1] : vector<8x8xf32> to vector<8xf32>
    %910 = vector.shape_cast %909 : vector<8xf32> to vector<8x1xf32>
    %911 = tpu.reciprocal %910 {approx = true} : vector<8x1xf32> -> vector<8x1xf32>
    %912 = vector.broadcast %911 : vector<8x1xf32> to vector<8x8xf32>
    %913 = arith.mulf %908, %912 : vector<8x8xf32>
    %914 = vector.extract_strided_slice %825 {offsets = [0, 24], sizes = [8, 8], strides = [1, 1]} : vector<8x32xf32> to vector<8x8xf32>
    %cst_339 = arith.constant dense<0.000000e+00> : vector<8x8xf32>
    %915 = tpu.matmul %913, %914, %cst_339 {dimension_numbers = #tpu.dot_dimension_numbers<[1], [0], [0], [1], [0, 0, 1, 1], [], []>} : vector<8x8xf32>, vector<8x8xf32>, vector<8x8xf32> -> vector<8x8xf32>
    %916 = tpu.concatenate %849, %871, %893, %915 in 1 : vector<8x8xf32>, vector<8x8xf32>, vector<8x8xf32>, vector<8x8xf32> -> vector<8x32xf32>
    %c0_340 = arith.constant 0 : index
    %c0_341 = arith.constant 0 : index
    %917 = vector.load %arg38[%c0_340, %c0_341] : memref<32x32xf32, #tpu.memory_space<vmem>>, vector<32x32xf32>
    %cst_342 = arith.constant dense<0.000000e+00> : vector<8x32xf32>
    %918 = tpu.matmul %916, %917, %cst_342 {dimension_numbers = #tpu.dot_dimension_numbers<[1], [0], [0], [1], [0, 0, 1, 1], [], []>} : vector<8x32xf32>, vector<32x32xf32>, vector<8x32xf32> -> vector<8x32xf32>
    %c0_343 = arith.constant 0 : index
    %c0_344 = arith.constant 0 : index
    %919 = vector.load %arg37[%c0_343, %c0_344] : memref<1x32xf32, #tpu.memory_space<vmem>>, vector<1x32xf32>
    %920 = vector.broadcast %919 : vector<1x32xf32> to vector<8x32xf32>
    %921 = arith.addf %918, %920 : vector<8x32xf32>
    %922 = arith.addf %786, %921 : vector<8x32xf32>
    %c0_345 = arith.constant 0 : index
    %c0_346 = arith.constant 0 : index
    %923 = vector.load %arg31[%c0_345, %c0_346] : memref<1x32xf32, #tpu.memory_space<vmem>>, vector<1x32xf32>
    %c0_347 = arith.constant 0 : index
    %c0_348 = arith.constant 0 : index
    %924 = vector.load %arg32[%c0_347, %c0_348] : memref<1x32xf32, #tpu.memory_space<vmem>>, vector<1x32xf32>
    %cst_349 = arith.constant dense<0.000000e+00> : vector<8xf32>
    %925 = vector.multi_reduction <add>, %922, %cst_349 [1] : vector<8x32xf32> to vector<8xf32>
    %926 = vector.shape_cast %925 : vector<8xf32> to vector<8x1xf32>
    %cst_350 = arith.constant 3.200000e+01 : f32
    %927 = vector.broadcast %cst_350 : f32 to vector<8x1xf32>
    %928 = arith.divf %926, %927 : vector<8x1xf32>
    %929 = vector.broadcast %928 : vector<8x1xf32> to vector<8x32xf32>
    %930 = arith.subf %922, %929 : vector<8x32xf32>
    %931 = arith.mulf %930, %930 : vector<8x32xf32>
    %cst_351 = arith.constant dense<0.000000e+00> : vector<8xf32>
    %932 = vector.multi_reduction <add>, %931, %cst_351 [1] : vector<8x32xf32> to vector<8xf32>
    %933 = vector.shape_cast %932 : vector<8xf32> to vector<8x1xf32>
    %cst_352 = arith.constant 3.100000e+01 : f32
    %934 = vector.broadcast %cst_352 : f32 to vector<8x1xf32>
    %935 = arith.divf %933, %934 : vector<8x1xf32>
    %936 = math.sqrt %935 : vector<8x1xf32>
    %cst_353 = arith.constant 9.99999997E-7 : f32
    %937 = vector.broadcast %cst_353 : f32 to vector<8x1xf32>
    %938 = arith.addf %936, %937 : vector<8x1xf32>
    %939 = tpu.reciprocal %938 {approx = true} : vector<8x1xf32> -> vector<8x1xf32>
    %940 = vector.broadcast %928 : vector<8x1xf32> to vector<8x32xf32>
    %941 = arith.subf %922, %940 : vector<8x32xf32>
    %942 = vector.broadcast %923 : vector<1x32xf32> to vector<8x32xf32>
    %943 = arith.mulf %942, %941 : vector<8x32xf32>
    %944 = vector.broadcast %939 : vector<8x1xf32> to vector<8x32xf32>
    %945 = arith.mulf %943, %944 : vector<8x32xf32>
    %946 = vector.broadcast %924 : vector<1x32xf32> to vector<8x32xf32>
    %947 = arith.addf %945, %946 : vector<8x32xf32>
    %c0_354 = arith.constant 0 : index
    %c0_355 = arith.constant 0 : index
    %948 = vector.load %arg25[%c0_354, %c0_355] : memref<32x64xf32, #tpu.memory_space<vmem>>, vector<32x64xf32>
    %cst_356 = arith.constant dense<0.000000e+00> : vector<8x64xf32>
    %949 = tpu.matmul %947, %948, %cst_356 {dimension_numbers = #tpu.dot_dimension_numbers<[1], [0], [0], [1], [0, 0, 1, 1], [], []>} : vector<8x32xf32>, vector<32x64xf32>, vector<8x64xf32> -> vector<8x64xf32>
    %c0_357 = arith.constant 0 : index
    %c0_358 = arith.constant 0 : index
    %950 = vector.load %arg23[%c0_357, %c0_358] : memref<1x64xf32, #tpu.memory_space<vmem>>, vector<1x64xf32>
    %951 = vector.broadcast %950 : vector<1x64xf32> to vector<8x64xf32>
    %952 = arith.addf %949, %951 : vector<8x64xf32>
    %cst_359 = arith.constant 0.000000e+00 : f32
    %953 = vector.broadcast %cst_359 : f32 to vector<8x64xf32>
    %954 = arith.maximumf %952, %953 : vector<8x64xf32>
    %c0_360 = arith.constant 0 : index
    %c0_361 = arith.constant 0 : index
    %955 = vector.load %arg26[%c0_360, %c0_361] : memref<64x32xf32, #tpu.memory_space<vmem>>, vector<64x32xf32>
    %cst_362 = arith.constant dense<0.000000e+00> : vector<8x32xf32>
    %956 = tpu.matmul %954, %955, %cst_362 {dimension_numbers = #tpu.dot_dimension_numbers<[1], [0], [0], [1], [0, 0, 1, 1], [], []>} : vector<8x64xf32>, vector<64x32xf32>, vector<8x32xf32> -> vector<8x32xf32>
    %c0_363 = arith.constant 0 : index
    %c0_364 = arith.constant 0 : index
    %957 = vector.load %arg24[%c0_363, %c0_364] : memref<1x32xf32, #tpu.memory_space<vmem>>, vector<1x32xf32>
    %958 = vector.broadcast %957 : vector<1x32xf32> to vector<8x32xf32>
    %959 = arith.addf %956, %958 : vector<8x32xf32>
    %960 = arith.addf %922, %959 : vector<8x32xf32>
    %c0_365 = arith.constant 0 : index
    %c0_366 = arith.constant 0 : index
    %961 = vector.load %arg41[%c0_365, %c0_366] : memref<1x32xf32, #tpu.memory_space<vmem>>, vector<1x32xf32>
    %c0_367 = arith.constant 0 : index
    %c0_368 = arith.constant 0 : index
    %962 = vector.load %arg42[%c0_367, %c0_368] : memref<1x32xf32, #tpu.memory_space<vmem>>, vector<1x32xf32>
    %cst_369 = arith.constant dense<0.000000e+00> : vector<8xf32>
    %963 = vector.multi_reduction <add>, %960, %cst_369 [1] : vector<8x32xf32> to vector<8xf32>
    %964 = vector.shape_cast %963 : vector<8xf32> to vector<8x1xf32>
    %cst_370 = arith.constant 3.200000e+01 : f32
    %965 = vector.broadcast %cst_370 : f32 to vector<8x1xf32>
    %966 = arith.divf %964, %965 : vector<8x1xf32>
    %967 = vector.broadcast %966 : vector<8x1xf32> to vector<8x32xf32>
    %968 = arith.subf %960, %967 : vector<8x32xf32>
    %969 = arith.mulf %968, %968 : vector<8x32xf32>
    %cst_371 = arith.constant dense<0.000000e+00> : vector<8xf32>
    %970 = vector.multi_reduction <add>, %969, %cst_371 [1] : vector<8x32xf32> to vector<8xf32>
    %971 = vector.shape_cast %970 : vector<8xf32> to vector<8x1xf32>
    %cst_372 = arith.constant 3.100000e+01 : f32
    %972 = vector.broadcast %cst_372 : f32 to vector<8x1xf32>
    %973 = arith.divf %971, %972 : vector<8x1xf32>
    %974 = math.sqrt %973 : vector<8x1xf32>
    %cst_373 = arith.constant 9.99999997E-7 : f32
    %975 = vector.broadcast %cst_373 : f32 to vector<8x1xf32>
    %976 = arith.addf %974, %975 : vector<8x1xf32>
    %977 = tpu.reciprocal %976 {approx = true} : vector<8x1xf32> -> vector<8x1xf32>
    %978 = vector.broadcast %966 : vector<8x1xf32> to vector<8x32xf32>
    %979 = arith.subf %960, %978 : vector<8x32xf32>
    %980 = vector.broadcast %961 : vector<1x32xf32> to vector<8x32xf32>
    %981 = arith.mulf %980, %979 : vector<8x32xf32>
    %982 = vector.broadcast %977 : vector<8x1xf32> to vector<8x32xf32>
    %983 = arith.mulf %981, %982 : vector<8x32xf32>
    %984 = vector.broadcast %962 : vector<1x32xf32> to vector<8x32xf32>
    %985 = arith.addf %983, %984 : vector<8x32xf32>
    %c0_374 = arith.constant 0 : index
    %c0_375 = arith.constant 0 : index
    %c0_376 = arith.constant 0 : index
    %986 = vector.load %arg69[%c0_374, %c0_375, %c0_376] : memref<1x8x32xf32, #tpu.memory_space<vmem>>, vector<1x8x32xf32>
    %987 = vector.shape_cast %986 : vector<1x8x32xf32> to vector<8x32xf32>
    %988 = vector.shape_cast %985 : vector<8x32xf32> to vector<1x8x32xf32>
    tpu.vector_store %arg69[%c0_374, %c0_375, %c0_376], %988 {strides = array<i32>} : memref<1x8x32xf32, #tpu.memory_space<vmem>>, vector<1x8x32xf32>,
    return
  }
  func.func @transform_0(%arg0: i32) -> (i32, i32, i32) {
    %c0_i32 = arith.constant 0 : i32
    %c0_i32_0 = arith.constant 0 : i32
    %c0_i32_1 = arith.constant 0 : i32
    return %arg0, %c0_i32, %c0_i32_0 : i32, i32, i32
  }
  func.func @transform_1(%arg0: i32) -> (i32, i32, i32) {
    %c0_i32 = arith.constant 0 : i32
    %c0_i32_0 = arith.constant 0 : i32
    %c0_i32_1 = arith.constant 0 : i32
    return %arg0, %c0_i32, %c0_i32_0 : i32, i32, i32
  }
  func.func @transform_2(%arg0: i32) -> (i32, i32, i32) {
    %c0_i32 = arith.constant 0 : i32
    %c0_i32_0 = arith.constant 0 : i32
    %c0_i32_1 = arith.constant 0 : i32
    return %arg0, %c0_i32, %c0_i32_0 : i32, i32, i32
  }
  func.func @transform_3(%arg0: i32) -> (i32, i32, i32) {
    %c0_i32 = arith.constant 0 : i32
    %c0_i32_0 = arith.constant 0 : i32
    %c0_i32_1 = arith.constant 0 : i32
    return %arg0, %c0_i32, %c0_i32_0 : i32, i32, i32
  }
  func.func @transform_4(%arg0: i32) -> (i32, i32) {
    %c0_i32 = arith.constant 0 : i32
    %c0_i32_0 = arith.constant 0 : i32
    %c0_i32_1 = arith.constant 0 : i32
    return %c0_i32, %c0_i32_0 : i32, i32
  }
  func.func @transform_5(%arg0: i32) -> (i32, i32) {
    %c0_i32 = arith.constant 0 : i32
    %c0_i32_0 = arith.constant 0 : i32
    %c0_i32_1 = arith.constant 0 : i32
    return %c0_i32, %c0_i32_0 : i32, i32
  }
  func.func @transform_6(%arg0: i32) -> (i32, i32) {
    %c0_i32 = arith.constant 0 : i32
    %c0_i32_0 = arith.constant 0 : i32
    %c0_i32_1 = arith.constant 0 : i32
    return %c0_i32, %c0_i32_0 : i32, i32
  }
  func.func @transform_7(%arg0: i32) -> (i32, i32) {
    %c0_i32 = arith.constant 0 : i32
    %c0_i32_0 = arith.constant 0 : i32
    %c0_i32_1 = arith.constant 0 : i32
    return %c0_i32, %c0_i32_0 : i32, i32
  }
  func.func @transform_8(%arg0: i32) -> (i32, i32) {
    %c0_i32 = arith.constant 0 : i32
    %c0_i32_0 = arith.constant 0 : i32
    %c0_i32_1 = arith.constant 0 : i32
    return %c0_i32, %c0_i32_0 : i32, i32
  }
  func.func @transform_9(%arg0: i32) -> (i32, i32) {
    %c0_i32 = arith.constant 0 : i32
    %c0_i32_0 = arith.constant 0 : i32
    %c0_i32_1 = arith.constant 0 : i32
    return %c0_i32, %c0_i32_0 : i32, i32
  }
  func.func @transform_10(%arg0: i32) -> (i32, i32) {
    %c0_i32 = arith.constant 0 : i32
    %c0_i32_0 = arith.constant 0 : i32
    %c0_i32_1 = arith.constant 0 : i32
    return %c0_i32, %c0_i32_0 : i32, i32
  }
  func.func @transform_11(%arg0: i32) -> (i32, i32) {
    %c0_i32 = arith.constant 0 : i32
    %c0_i32_0 = arith.constant 0 : i32
    %c0_i32_1 = arith.constant 0 : i32
    return %c0_i32, %c0_i32_0 : i32, i32
  }
  func.func @transform_12(%arg0: i32) -> (i32, i32) {
    %c0_i32 = arith.constant 0 : i32
    %c0_i32_0 = arith.constant 0 : i32
    %c0_i32_1 = arith.constant 0 : i32
    return %c0_i32, %c0_i32_0 : i32, i32
  }
  func.func @transform_13(%arg0: i32) -> (i32, i32) {
    %c0_i32 = arith.constant 0 : i32
    %c0_i32_0 = arith.constant 0 : i32
    %c0_i32_1 = arith.constant 0 : i32
    return %c0_i32, %c0_i32_0 : i32, i32
  }
  func.func @transform_14(%arg0: i32) -> (i32, i32) {
    %c0_i32 = arith.constant 0 : i32
    %c0_i32_0 = arith.constant 0 : i32
    %c0_i32_1 = arith.constant 0 : i32
    return %c0_i32, %c0_i32_0 : i32, i32
  }
  func.func @transform_15(%arg0: i32) -> (i32, i32) {
    %c0_i32 = arith.constant 0 : i32
    %c0_i32_0 = arith.constant 0 : i32
    %c0_i32_1 = arith.constant 0 : i32
    return %c0_i32, %c0_i32_0 : i32, i32
  }
  func.func @transform_16(%arg0: i32) -> (i32, i32) {
    %c0_i32 = arith.constant 0 : i32
    %c0_i32_0 = arith.constant 0 : i32
    %c0_i32_1 = arith.constant 0 : i32
    return %c0_i32, %c0_i32_0 : i32, i32
  }
  func.func @transform_17(%arg0: i32) -> (i32, i32) {
    %c0_i32 = arith.constant 0 : i32
    %c0_i32_0 = arith.constant 0 : i32
    %c0_i32_1 = arith.constant 0 : i32
    return %c0_i32, %c0_i32_0 : i32, i32
  }
  func.func @transform_18(%arg0: i32) -> (i32, i32) {
    %c0_i32 = arith.constant 0 : i32
    %c0_i32_0 = arith.constant 0 : i32
    %c0_i32_1 = arith.constant 0 : i32
    return %c0_i32, %c0_i32_0 : i32, i32
  }
  func.func @transform_19(%arg0: i32) -> (i32, i32) {
    %c0_i32 = arith.constant 0 : i32
    %c0_i32_0 = arith.constant 0 : i32
    %c0_i32_1 = arith.constant 0 : i32
    return %c0_i32, %c0_i32_0 : i32, i32
  }
  func.func @transform_20(%arg0: i32) -> (i32, i32) {
    %c0_i32 = arith.constant 0 : i32
    %c0_i32_0 = arith.constant 0 : i32
    %c0_i32_1 = arith.constant 0 : i32
    return %c0_i32, %c0_i32_0 : i32, i32
  }
  func.func @transform_21(%arg0: i32) -> (i32, i32) {
    %c0_i32 = arith.constant 0 : i32
    %c0_i32_0 = arith.constant 0 : i32
    %c0_i32_1 = arith.constant 0 : i32
    return %c0_i32, %c0_i32_0 : i32, i32
  }
  func.func @transform_22(%arg0: i32) -> (i32, i32) {
    %c0_i32 = arith.constant 0 : i32
    %c0_i32_0 = arith.constant 0 : i32
    %c0_i32_1 = arith.constant 0 : i32
    return %c0_i32, %c0_i32_0 : i32, i32
  }
  func.func @transform_23(%arg0: i32) -> (i32, i32) {
    %c0_i32 = arith.constant 0 : i32
    %c0_i32_0 = arith.constant 0 : i32
    %c0_i32_1 = arith.constant 0 : i32
    return %c0_i32, %c0_i32_0 : i32, i32
  }
  func.func @transform_24(%arg0: i32) -> (i32, i32) {
    %c0_i32 = arith.constant 0 : i32
    %c0_i32_0 = arith.constant 0 : i32
    %c0_i32_1 = arith.constant 0 : i32
    return %c0_i32, %c0_i32_0 : i32, i32
  }
  func.func @transform_25(%arg0: i32) -> (i32, i32) {
    %c0_i32 = arith.constant 0 : i32
    %c0_i32_0 = arith.constant 0 : i32
    %c0_i32_1 = arith.constant 0 : i32
    return %c0_i32, %c0_i32_0 : i32, i32
  }
  func.func @transform_26(%arg0: i32) -> (i32, i32) {
    %c0_i32 = arith.constant 0 : i32
    %c0_i32_0 = arith.constant 0 : i32
    %c0_i32_1 = arith.constant 0 : i32
    return %c0_i32, %c0_i32_0 : i32, i32
  }
  func.func @transform_27(%arg0: i32) -> (i32, i32) {
    %c0_i32 = arith.constant 0 : i32
    %c0_i32_0 = arith.constant 0 : i32
    %c0_i32_1 = arith.constant 0 : i32
    return %c0_i32, %c0_i32_0 : i32, i32
  }
  func.func @transform_28(%arg0: i32) -> (i32, i32) {
    %c0_i32 = arith.constant 0 : i32
    %c0_i32_0 = arith.constant 0 : i32
    %c0_i32_1 = arith.constant 0 : i32
    return %c0_i32, %c0_i32_0 : i32, i32
  }
  func.func @transform_29(%arg0: i32) -> (i32, i32) {
    %c0_i32 = arith.constant 0 : i32
    %c0_i32_0 = arith.constant 0 : i32
    %c0_i32_1 = arith.constant 0 : i32
    return %c0_i32, %c0_i32_0 : i32, i32
  }
  func.func @transform_30(%arg0: i32) -> (i32, i32) {
    %c0_i32 = arith.constant 0 : i32
    %c0_i32_0 = arith.constant 0 : i32
    %c0_i32_1 = arith.constant 0 : i32
    return %c0_i32, %c0_i32_0 : i32, i32
  }
  func.func @transform_31(%arg0: i32) -> (i32, i32) {
    %c0_i32 = arith.constant 0 : i32
    %c0_i32_0 = arith.constant 0 : i32
    %c0_i32_1 = arith.constant 0 : i32
    return %c0_i32, %c0_i32_0 : i32, i32
  }
  func.func @transform_32(%arg0: i32) -> (i32, i32) {
    %c0_i32 = arith.constant 0 : i32
    %c0_i32_0 = arith.constant 0 : i32
    %c0_i32_1 = arith.constant 0 : i32
    return %c0_i32, %c0_i32_0 : i32, i32
  }
  func.func @transform_33(%arg0: i32) -> (i32, i32) {
    %c0_i32 = arith.constant 0 : i32
    %c0_i32_0 = arith.constant 0 : i32
    %c0_i32_1 = arith.constant 0 : i32
    return %c0_i32, %c0_i32_0 : i32, i32
  }
  func.func @transform_34(%arg0: i32) -> (i32, i32) {
    %c0_i32 = arith.constant 0 : i32
    %c0_i32_0 = arith.constant 0 : i32
    %c0_i32_1 = arith.constant 0 : i32
    return %c0_i32, %c0_i32_0 : i32, i32
  }
  func.func @transform_35(%arg0: i32) -> (i32, i32) {
    %c0_i32 = arith.constant 0 : i32
    %c0_i32_0 = arith.constant 0 : i32
    %c0_i32_1 = arith.constant 0 : i32
    return %c0_i32, %c0_i32_0 : i32, i32
  }
  func.func @transform_36(%arg0: i32) -> (i32, i32) {
    %c0_i32 = arith.constant 0 : i32
    %c0_i32_0 = arith.constant 0 : i32
    %c0_i32_1 = arith.constant 0 : i32
    return %c0_i32, %c0_i32_0 : i32, i32
  }
  func.func @transform_37(%arg0: i32) -> (i32, i32) {
    %c0_i32 = arith.constant 0 : i32
    %c0_i32_0 = arith.constant 0 : i32
    %c0_i32_1 = arith.constant 0 : i32
    return %c0_i32, %c0_i32_0 : i32, i32
  }
  func.func @transform_38(%arg0: i32) -> (i32, i32) {
    %c0_i32 = arith.constant 0 : i32
    %c0_i32_0 = arith.constant 0 : i32
    %c0_i32_1 = arith.constant 0 : i32
    return %c0_i32, %c0_i32_0 : i32, i32
  }
  func.func @transform_39(%arg0: i32) -> (i32, i32) {
    %c0_i32 = arith.constant 0 : i32
    %c0_i32_0 = arith.constant 0 : i32
    %c0_i32_1 = arith.constant 0 : i32
    return %c0_i32, %c0_i32_0 : i32, i32
  }
  func.func @transform_40(%arg0: i32) -> (i32, i32) {
    %c0_i32 = arith.constant 0 : i32
    %c0_i32_0 = arith.constant 0 : i32
    %c0_i32_1 = arith.constant 0 : i32
    return %c0_i32, %c0_i32_0 : i32, i32
  }
  func.func @transform_41(%arg0: i32) -> (i32, i32) {
    %c0_i32 = arith.constant 0 : i32
    %c0_i32_0 = arith.constant 0 : i32
    %c0_i32_1 = arith.constant 0 : i32
    return %c0_i32, %c0_i32_0 : i32, i32
  }
  func.func @transform_42(%arg0: i32) -> (i32, i32) {
    %c0_i32 = arith.constant 0 : i32
    %c0_i32_0 = arith.constant 0 : i32
    %c0_i32_1 = arith.constant 0 : i32
    return %c0_i32, %c0_i32_0 : i32, i32
  }
  func.func @transform_43(%arg0: i32) -> (i32, i32) {
    %c0_i32 = arith.constant 0 : i32
    %c0_i32_0 = arith.constant 0 : i32
    %c0_i32_1 = arith.constant 0 : i32
    return %c0_i32, %c0_i32_0 : i32, i32
  }
  func.func @transform_44(%arg0: i32) -> (i32, i32) {
    %c0_i32 = arith.constant 0 : i32
    %c0_i32_0 = arith.constant 0 : i32
    %c0_i32_1 = arith.constant 0 : i32
    return %c0_i32, %c0_i32_0 : i32, i32
  }
  func.func @transform_45(%arg0: i32) -> (i32, i32) {
    %c0_i32 = arith.constant 0 : i32
    %c0_i32_0 = arith.constant 0 : i32
    %c0_i32_1 = arith.constant 0 : i32
    return %c0_i32, %c0_i32_0 : i32, i32
  }
  func.func @transform_46(%arg0: i32) -> (i32, i32) {
    %c0_i32 = arith.constant 0 : i32
    %c0_i32_0 = arith.constant 0 : i32
    %c0_i32_1 = arith.constant 0 : i32
    return %c0_i32, %c0_i32_0 : i32, i32
  }
  func.func @transform_47(%arg0: i32) -> (i32, i32) {
    %c0_i32 = arith.constant 0 : i32
    %c0_i32_0 = arith.constant 0 : i32
    %c0_i32_1 = arith.constant 0 : i32
    return %c0_i32, %c0_i32_0 : i32, i32
  }
  func.func @transform_48(%arg0: i32) -> (i32, i32) {
    %c0_i32 = arith.constant 0 : i32
    %c0_i32_0 = arith.constant 0 : i32
    %c0_i32_1 = arith.constant 0 : i32
    return %c0_i32, %c0_i32_0 : i32, i32
  }
  func.func @transform_49(%arg0: i32) -> (i32, i32) {
    %c0_i32 = arith.constant 0 : i32
    %c0_i32_0 = arith.constant 0 : i32
    %c0_i32_1 = arith.constant 0 : i32
    return %c0_i32, %c0_i32_0 : i32, i32
  }
  func.func @transform_50(%arg0: i32) -> (i32, i32) {
    %c0_i32 = arith.constant 0 : i32
    %c0_i32_0 = arith.constant 0 : i32
    %c0_i32_1 = arith.constant 0 : i32
    return %c0_i32, %c0_i32_0 : i32, i32
  }
  func.func @transform_51(%arg0: i32) -> (i32, i32) {
    %c0_i32 = arith.constant 0 : i32
    %c0_i32_0 = arith.constant 0 : i32
    %c0_i32_1 = arith.constant 0 : i32
    return %c0_i32, %c0_i32_0 : i32, i32
  }
  func.func @transform_52(%arg0: i32) -> (i32, i32) {
    %c0_i32 = arith.constant 0 : i32
    %c0_i32_0 = arith.constant 0 : i32
    %c0_i32_1 = arith.constant 0 : i32
    return %c0_i32, %c0_i32_0 : i32, i32
  }
  func.func @transform_53(%arg0: i32) -> (i32, i32) {
    %c0_i32 = arith.constant 0 : i32
    %c0_i32_0 = arith.constant 0 : i32
    %c0_i32_1 = arith.constant 0 : i32
    return %c0_i32, %c0_i32_0 : i32, i32
  }
  func.func @transform_54(%arg0: i32) -> (i32, i32) {
    %c0_i32 = arith.constant 0 : i32
    %c0_i32_0 = arith.constant 0 : i32
    %c0_i32_1 = arith.constant 0 : i32
    return %c0_i32, %c0_i32_0 : i32, i32
  }
  func.func @transform_55(%arg0: i32) -> (i32, i32) {
    %c0_i32 = arith.constant 0 : i32
    %c0_i32_0 = arith.constant 0 : i32
    %c0_i32_1 = arith.constant 0 : i32
    return %c0_i32, %c0_i32_0 : i32, i32
  }
  func.func @transform_56(%arg0: i32) -> (i32, i32) {
    %c0_i32 = arith.constant 0 : i32
    %c0_i32_0 = arith.constant 0 : i32
    %c0_i32_1 = arith.constant 0 : i32
    return %c0_i32, %c0_i32_0 : i32, i32
  }
  func.func @transform_57(%arg0: i32) -> (i32, i32) {
    %c0_i32 = arith.constant 0 : i32
    %c0_i32_0 = arith.constant 0 : i32
    %c0_i32_1 = arith.constant 0 : i32
    return %c0_i32, %c0_i32_0 : i32, i32
  }
  func.func @transform_58(%arg0: i32) -> (i32, i32) {
    %c0_i32 = arith.constant 0 : i32
    %c0_i32_0 = arith.constant 0 : i32
    %c0_i32_1 = arith.constant 0 : i32
    return %c0_i32, %c0_i32_0 : i32, i32
  }
  func.func @transform_59(%arg0: i32) -> (i32, i32) {
    %c0_i32 = arith.constant 0 : i32
    %c0_i32_0 = arith.constant 0 : i32
    %c0_i32_1 = arith.constant 0 : i32
    return %c0_i32, %c0_i32_0 : i32, i32
  }
  func.func @transform_60(%arg0: i32) -> (i32, i32) {
    %c0_i32 = arith.constant 0 : i32
    %c0_i32_0 = arith.constant 0 : i32
    %c0_i32_1 = arith.constant 0 : i32
    return %c0_i32, %c0_i32_0 : i32, i32
  }
  func.func @transform_61(%arg0: i32) -> (i32, i32) {
    %c0_i32 = arith.constant 0 : i32
    %c0_i32_0 = arith.constant 0 : i32
    %c0_i32_1 = arith.constant 0 : i32
    return %c0_i32, %c0_i32_0 : i32, i32
  }
  func.func @transform_62(%arg0: i32) -> (i32, i32) {
    %c0_i32 = arith.constant 0 : i32
    %c0_i32_0 = arith.constant 0 : i32
    %c0_i32_1 = arith.constant 0 : i32
    return %c0_i32, %c0_i32_0 : i32, i32
  }
  func.func @transform_63(%arg0: i32) -> (i32, i32) {
    %c0_i32 = arith.constant 0 : i32
    %c0_i32_0 = arith.constant 0 : i32
    %c0_i32_1 = arith.constant 0 : i32
    return %c0_i32, %c0_i32_0 : i32, i32
  }
  func.func @transform_64(%arg0: i32) -> (i32, i32) {
    %c0_i32 = arith.constant 0 : i32
    %c0_i32_0 = arith.constant 0 : i32
    %c0_i32_1 = arith.constant 0 : i32
    return %c0_i32, %c0_i32_0 : i32, i32
  }
  func.func @transform_65(%arg0: i32) -> (i32, i32) {
    %c0_i32 = arith.constant 0 : i32
    %c0_i32_0 = arith.constant 0 : i32
    %c0_i32_1 = arith.constant 0 : i32
    return %c0_i32, %c0_i32_0 : i32, i32
  }
  func.func @transform_66(%arg0: i32) -> (i32, i32) {
    %c0_i32 = arith.constant 0 : i32
    %c0_i32_0 = arith.constant 0 : i32
    %c0_i32_1 = arith.constant 0 : i32
    return %c0_i32, %c0_i32_0 : i32, i32
  }
  func.func @transform_67(%arg0: i32) -> (i32, i32) {
    %c0_i32 = arith.constant 0 : i32
    %c0_i32_0 = arith.constant 0 : i32
    %c0_i32_1 = arith.constant 0 : i32
    return %c0_i32, %c0_i32_0 : i32, i32
  }
  func.func @transform_68(%arg0: i32) -> (i32, i32, i32) {
    %c0_i32 = arith.constant 0 : i32
    %c0_i32_0 = arith.constant 0 : i32
    %c0_i32_1 = arith.constant 0 : i32
    return %arg0, %c0_i32, %c0_i32_0 : i32, i32, i32
  }
}

</mosaic_0001>

<bundles_post_ra>
// kernel: encoder_decoder_forward.1
= control target key start
LH: loop header
LB: loop body
LE: loop exit
PB: predicated region body
PF: predicated region fallthrough
CT: control target
= control target key end

     0   :  { %s11665_s6 = smov 1   ;;  %s11666_s10 = smov 2   ;;  %s13327_s0 = inlined_call_operand.smem [shape: u32[69], index: -1, kind: input, shape index: {}] }
   0x1   :  { %s11788_s5 = sld [smem:[%s13327_s0]]   ;;  %s11667_s14 = smov 3  }
   0x2   :  { %s11793_s9 = sld [smem:[%s13327_s0 + %s11665_s6]]   ;;  %s11668_s18 = smov 4  }
   0x3   :  { %s11798_s13 = sld [smem:[%s13327_s0 + %s11666_s10]]   ;;  %s11669_s22 = smov 5  }
   0x4   :  { %s11803_s17 = sld [smem:[%s13327_s0 + %s11667_s14]]   ;;  %s11670_s26 = smov 6  }
   0x5   :  { %s11808_s21 = sld [smem:[%s13327_s0 + %s11668_s18]]   ;;  %s11671_s30 = smov 7  }
   0x6   :  { %s11813_s25 = sld [smem:[%s13327_s0 + %s11669_s22]]   ;;  %s11672_s4 = smov 8  }
   0x7   :  { %13396 = sst [smem:[#allocation64_spill]] %s11788_s5  ;;  %s11673_s10 = smov 9  }
   0x8   :  { %13397 = sst [smem:[#allocation65_spill]] %s11793_s9  ;;  %s11674_s15 = smov 10  }
   0x9   :  { %13398 = sst [smem:[#allocation66_spill]] %s11798_s13  ;;  %s11675_s20 = smov 11  }
   0xa   :  { %13399 = sst [smem:[#allocation67_spill]] %s11803_s17  ;;  %s11677_s1 = smov 13  }
   0xb   :  { %13400 = sst [smem:[#allocation68_spill]] %s11808_s21  ;;  %s11678_s7 = smov 14  }
   0xc   :  { %13401 = sst [smem:[#allocation69_spill]] %s11813_s25  ;;  %s11680_s22 = smov 16  }
   0xd   :  { %s11818_s29 = sld [smem:[%s13327_s0 + %s11670_s26]]   ;;  %s11676_s26 = smov 12  }
   0xe   :  { %s11823_s3 = sld [smem:[%s13327_s0 + %s11671_s30]]   ;;  %s11681_s28 = smov 17  }
   0xf   :  { %s11828_s8 = sld [smem:[%s13327_s0 + %s11672_s4]]  }
  0x10   :  { %s11833_s14 = sld [smem:[%s13327_s0 + %s11673_s10]]  }
  0x11   :  { %s11838_s19 = sld [smem:[%s13327_s0 + %s11674_s15]]   ;;  %s11679_s15 = smov 15  }
  0x12   :  { %s11843_s24 = sld [smem:[%s13327_s0 + %s11675_s20]]  }
  0x13   :  { %13402 = sst [smem:[#allocation70_spill]] %s11818_s29 }
  0x14   :  { %13403 = sst [smem:[#allocation71_spill]] %s11823_s3 }
  0x15   :  { %13404 = sst [smem:[#allocation72_spill]] %s11828_s8 }
  0x16   :  { %13405 = sst [smem:[#allocation73_spill]] %s11833_s14 }
  0x17   :  { %13406 = sst [smem:[#allocation74_spill]] %s11838_s19 }
  0x18   :  { %13407 = sst [smem:[#allocation75_spill]] %s11843_s24 }
  0x19   :  { %s11848_s30 = sld [smem:[%s13327_s0 + %s11676_s26]]  }
  0x1a   :  { %s11853_s6 = sld [smem:[%s13327_s0 + %s11677_s1]]  }
  0x1b   :  { %s11858_s12 = sld [smem:[%s13327_s0 + %s11678_s7]]   ;;  %s11682_s7 = smov 18  }
  0x1c   :  { %s11863_s20 = sld [smem:[%s13327_s0 + %s11679_s15]]   ;;  %s11683_s15 = smov 19  }
  0x1d   :  { %s11868_s27 = sld [smem:[%s13327_s0 + %s11680_s22]]   ;;  %s11684_s22 = smov 20  }
  0x1e   :  { %s11873_s4 = sld [smem:[%s13327_s0 + %s11681_s28]]   ;;  %s11685_s28 = smov 21  }
  0x1f   :  { %13408 = sst [smem:[#allocation76_spill]] %s11848_s30 }
  0x20   :  { %13409 = sst [smem:[#allocation77_spill]] %s11853_s6 }
  0x21   :  { %13410 = sst [smem:[#allocation78_spill]] %s11858_s12 }
  0x22   :  { %13411 = sst [smem:[#allocation79_spill]] %s11863_s20 }
  0x23   :  { %13412 = sst [smem:[#allocation80_spill]] %s11868_s27 }
  0x24   :  { %13413 = sst [smem:[#allocation81_spill]] %s11873_s4 }
  0x25   :  { %s11878_s25 = sld [smem:[%s13327_s0 + %s11682_s7]]   ;;  %s11686_s7 = smov 22  }
  0x26   :  { %s11883_s21 = sld [smem:[%s13327_s0 + %s11683_s15]]   ;;  %s11687_s15 = smov 23  }
  0x27   :  { %s11888_s6 = sld [smem:[%s13327_s0 + %s11684_s22]]   ;;  %s11688_s22 = smov 24  }
  0x28   :  { %s11893_s30 = sld [smem:[%s13327_s0 + %s11685_s28]]   ;;  %s11689_s28 = smov 25  }
  0x29   :  { %s11898_s3 = sld [smem:[%s13327_s0 + %s11686_s7]]   ;;  %s11690_s7 = smov 26  }
  0x2a   :  { %s11903_s29 = sld [smem:[%s13327_s0 + %s11687_s15]]   ;;  %s11691_s15 = smov 27  }
  0x2b   :  { %13414 = sst [smem:[#allocation82_spill]] %s11878_s25 }
  0x2c   :  { %13415 = sst [smem:[#allocation83_spill]] %s11883_s21 }
  0x2d   :  { %13416 = sst [smem:[#allocation84_spill]] %s11888_s6 }
  0x2e   :  { %13417 = sst [smem:[#allocation85_spill]] %s11893_s30 }
  0x2f   :  { %13418 = sst [smem:[#allocation86_spill]] %s11898_s3 }
  0x30   :  { %13419 = sst [smem:[#allocation87_spill]] %s11903_s29 }
  0x31   :  { %s11908_s25 = sld [smem:[%s13327_s0 + %s11688_s22]]   ;;  %s11692_s22 = smov 28  }
  0x32   :  { %s11913_s21 = sld [smem:[%s13327_s0 + %s11689_s28]]   ;;  %s11693_s28 = smov 29  }
  0x33   :  { %s11918_s3 = sld [smem:[%s13327_s0 + %s11690_s7]]   ;;  %s11694_s7 = smov 30  }
  0x34   :  { %s11923_s29 = sld [smem:[%s13327_s0 + %s11691_s15]]   ;;  %s11695_s15 = smov 31  }
  0x35   :  { %s11943_s24 = sld [smem:[%s13327_s0 + %s11695_s15]]   ;;  %s11699_s15 = smov 35  }
  0x36   :  { %s11963_s12 = sld [smem:[%s13327_s0 + %s11699_s15]]   ;;  %s11703_s15 = smov 39  }
  0x37   :  { %13420 = sst [smem:[#allocation88_spill]] %s11908_s25 }
  0x38   :  { %13421 = sst [smem:[#allocation89_spill]] %s11913_s21 }
  0x39   :  { %13422 = sst [smem:[#allocation90_spill]] %s11918_s3 }
  0x3a   :  { %s11928_s25 = sld [smem:[%s13327_s0 + %s11692_s22]]   ;;  %s11696_s22 = smov 32  }
  0x3b   :  { %s11933_s21 = sld [smem:[%s13327_s0 + %s11693_s28]]   ;;  %s11697_s28 = smov 33  }
  0x3c   :  { %s11938_s3 = sld [smem:[%s13327_s0 + %s11694_s7]]   ;;  %s11698_s7 = smov 34  }
  0x3d   :  { %13425 = sst [smem:[#allocation93_spill]] %s11943_s24 }
  0x3e   :  { %s11948_s19 = sld [smem:[%s13327_s0 + %s11696_s22]]   ;;  %s11700_s22 = smov 36  }
  0x3f   :  { %s11953_s6 = sld [smem:[%s13327_s0 + %s11697_s28]]   ;;  %s11701_s28 = smov 37  }
  0x40   :  { %s11958_s30 = sld [smem:[%s13327_s0 + %s11698_s7]]   ;;  %s11702_s7 = smov 38  }
  0x41   :  { %13423 = sst [smem:[#allocation91_spill]] %s11933_s21 }
  0x42   :  { %13424 = sst [smem:[#allocation92_spill]] %s11938_s3 }
  0x43   :  { %13429 = sst [smem:[#allocation97_spill]] %s11963_s12 }
  0x44   :  { %13426 = sst [smem:[#allocation94_spill]] %s11948_s19 }
  0x45   :  { %13427 = sst [smem:[#allocation95_spill]] %s11953_s6 }
  0x46   :  { %13428 = sst [smem:[#allocation96_spill]] %s11958_s30 }
  0x47   :  { %s11968_s20 = sld [smem:[%s13327_s0 + %s11700_s22]]   ;;  %s11704_s22 = smov 40  }
  0x48   :  { %s11973_s6 = sld [smem:[%s13327_s0 + %s11701_s28]]   ;;  %s11705_s28 = smov 41  }
  0x49   :  { %s11978_s17 = sld [smem:[%s13327_s0 + %s11702_s7]]   ;;  %s11706_s7 = smov 42  }
  0x4a   :  { %s11983_s12 = sld [smem:[%s13327_s0 + %s11703_s15]]   ;;  %s11707_s15 = smov 43  }
  0x4b   :  { %s11988_s27 = sld [smem:[%s13327_s0 + %s11704_s22]]   ;;  %s11708_s22 = smov 44  }
  0x4c   :  { %s11998_s14 = sld [smem:[%s13327_s0 + %s11706_s7]]   ;;  %s11710_s7 = smov 46  }
  0x4d   :  { %s12008_s4 = sld [smem:[%s13327_s0 + %s11708_s22]]   ;;  %s11712_s22 = smov 48  }
  0x4e   :  { %13430 = sst [smem:[#allocation98_spill]] %s11973_s6 }
  0x4f   :  { %13431 = sst [smem:[#allocation99_spill]] %s11978_s17 }
  0x50   :  { %13432 = sst [smem:[#allocation100_spill]] %s11983_s12 }
  0x51   :  { %s11993_s6 = sld [smem:[%s13327_s0 + %s11705_s28]]   ;;  %s11709_s28 = smov 45  }
  0x52   :  { %13434 = sst [smem:[#allocation102_spill]] %s11998_s14 }
  0x53   :  { %s12003_s12 = sld [smem:[%s13327_s0 + %s11707_s15]]   ;;  %s11711_s15 = smov 47  }
  0x54   :  { %13436 = sst [smem:[#allocation104_spill]] %s12008_s4 }
  0x55   :  { %s12013_s8 = sld [smem:[%s13327_s0 + %s11709_s28]]   ;;  %s11713_s28 = smov 49  }
  0x56   :  { %s12018_s9 = sld [smem:[%s13327_s0 + %s11710_s7]]   ;;  %s11714_s7 = smov 50  }
  0x57   :  { %13433 = sst [smem:[#allocation101_spill]] %s11993_s6 }
  0x58   :  { %s12023_s13 = sld [smem:[%s13327_s0 + %s11711_s15]]   ;;  %s11715_s15 = smov 51  }
  0x59   :  { %13435 = sst [smem:[#allocation103_spill]] %s12003_s12 }
  0x5a   :  { %s12028_s4 = sld [smem:[%s13327_s0 + %s11712_s22]]   ;;  %s11716_s22 = smov 52  }
  0x5b   :  { %13437 = sst [smem:[#allocation105_spill]] %s12013_s8 }
  0x5c   :  { %13438 = sst [smem:[#allocation106_spill]] %s12018_s9 }
  0x5d   :  { %s12033_s8 = sld [smem:[%s13327_s0 + %s11713_s28]]   ;;  %s11717_s28 = smov 53  }
  0x5e   :  { %13439 = sst [smem:[#allocation107_spill]] %s12023_s13 }
  0x5f   :  { %s12038_s5 = sld [smem:[%s13327_s0 + %s11714_s7]]   ;;  %s11718_s7 = smov 54  }
  0x60   :  { %13440 = sst [smem:[#allocation108_spill]] %s12028_s4 }
  0x61   :  { %s12043_s13 = sld [smem:[%s13327_s0 + %s11715_s15]]   ;;  %s11719_s15 = smov 55  }
  0x62   :  { %s12048_s12 = sld [smem:[%s13327_s0 + %s11716_s22]]   ;;  %s11720_s22 = smov 56  }
  0x63   :  { %13441 = sst [smem:[#allocation109_spill]] %s12033_s8 }
  0x64   :  { %s12053_s8 = sld [smem:[%s13327_s0 + %s11717_s28]]   ;;  %s11721_s28 = smov 57  }
  0x65   :  { %13442 = sst [smem:[#allocation110_spill]] %s12038_s5 }
  0x66   :  { %s12058_s6 = sld [smem:[%s13327_s0 + %s11718_s7]]   ;;  %s11722_s7 = smov 58  }
  0x67   :  { %13443 = sst [smem:[#allocation111_spill]] %s12043_s13 }
  0x68   :  { %13444 = sst [smem:[#allocation112_spill]] %s12048_s12 }
  0x69   :  { %s12063_s13 = sld [smem:[%s13327_s0 + %s11719_s15]]   ;;  %s11723_s15 = smov 59  }
  0x6a   :  { %13445 = sst [smem:[#allocation113_spill]] %s12053_s8 }
  0x6b   :  { %s12068_s12 = sld [smem:[%s13327_s0 + %s11720_s22]]   ;;  %s11724_s22 = smov 60  }
  0x6c   :  { %13446 = sst [smem:[#allocation114_spill]] %s12058_s6 }
  0x6d   :  { %s12073_s8 = sld [smem:[%s13327_s0 + %s11721_s28]]   ;;  %s11725_s28 = smov 61  }
  0x6e   :  { %s12078_s17 = sld [smem:[%s13327_s0 + %s11722_s7]]   ;;  %s11726_s7 = smov 62  }
  0x6f   :  { %13447 = sst [smem:[#allocation115_spill]] %s12063_s13 }
  0x70   :  { %s12083_s13 = sld [smem:[%s13327_s0 + %s11723_s15]]   ;;  %s11727_s15 = smov 63  }
  0x71   :  { %13448 = sst [smem:[#allocation116_spill]] %s12068_s12 }
  0x72   :  { %s12088_s12 = sld [smem:[%s13327_s0 + %s11724_s22]]   ;;  %s11728_s22 = smov 64  }
  0x73   :  { %13449 = sst [smem:[#allocation117_spill]] %s12073_s8 }
  0x74   :  { %s12093_s8 = sld [smem:[%s13327_s0 + %s11725_s28]]   ;;  %s11729_s28 = smov 65  }
  0x75   :  { %s12098_s30 = sld [smem:[%s13327_s0 + %s11726_s7]]   ;;  %s11730_s7 = smov 66  }
  0x76   :  { %13450 = sst [smem:[#allocation118_spill]] %s12083_s13 }
  0x77   :  { %s12103_s13 = sld [smem:[%s13327_s0 + %s11727_s15]]   ;;  %s11731_s15 = smov 67  }
  0x78   :  { %13451 = sst [smem:[#allocation119_spill]] %s12088_s12 }
  0x79   :  { %s12108_s24 = sld [smem:[%s13327_s0 + %s11728_s22]]   ;;  %s11732_s22 = smov 68  }
  0x7a   :  { %13452 = sst [smem:[#allocation120_spill]] %s12093_s8 }
  0x7b   :  { %s12113_s8 = sld [smem:[%s13327_s0 + %s11729_s28]]  }
  0x7c   :  { %s12118_s21 = sld [smem:[%s13327_s0 + %s11730_s7]]  }
  0x7d   :  { %13453 = sst [smem:[#allocation121_spill]] %s12103_s13 }
  0x7e   :  { %s12123_s13 = sld [smem:[%s13327_s0 + %s11731_s15]]  }
  0x7f   :  { %13454 = sst [smem:[#allocation122_spill]] %s12108_s24 }
  0x80   :  { %s12128_s24 = sld [smem:[%s13327_s0 + %s11732_s22]]  }
  0x81   :  { %13455 = sst [smem:[#allocation123_spill]] %s12113_s8 }
  0x84   :  { %13456 = sst [smem:[#allocation124_spill]] %s12123_s13 }
  0x85   :  { %142 = vsyncpa [#allocation3], 0 }
  0x86   :  { %143 = vsyncpa [#allocation6], 0 }
  0x87   :  { %144 = vsyncpa [#allocation9], 0 }
  0x88   :  { %145 = vsyncpa [#allocation12], 0 }
  0x89   :  { %146 = vsyncpa [#allocation15], 0 }
  0x8a   :  { %147 = vsyncpa [#allocation18], 0 }
  0x8b   :  { %148 = vsyncpa [#allocation21], 0 }
  0x8c   :  { %149 = vsyncpa [#allocation24], 0 }
  0x8d   :  { %150 = vsyncpa [#allocation27], 0 }
  0x8e   :  { %151 = vsyncpa [#allocation30], 0 }
  0x8f   :  { %152 = vsyncpa [#allocation33], 0 }
  0x90   :  { %153 = vsyncpa [#allocation36], 0 }
  0x91   :  { %154 = vsyncpa [#allocation39], 0 }
  0x92   :  { %155 = vsyncpa [#allocation42], 0 }
  0x93   :  { %156 = vsyncpa [#allocation45], 0 }
  0x94   :  { %157 = vsyncpa [#allocation4], 0 }
  0x95   :  { %159 = vsyncpa [#allocation4 + $0x1], 0  ;;  %s12130_s28 = smov 0   ;;  %s12132_s0 = smov 0  }
  0x96   :  { %s12134_s1 = smov 0   ;;  %s12136_s2 = smov 0  }
  0x97 LB: > { %s13457_s8 = sld [smem:[#allocation123_spill]]  ;;  %s12151_s7 = sadd.s32 4294967295, %s11663_s2   ;;  %s11651_s28 = sphi %s12130_s28, %s13586_s28   ;;  %s11663_s2 = sphi %s12136_s2, %s13583_s2   ;;  %s11659_s1 = sphi %s12134_s1, %s13585_s1   ;;  %s11655_s0 = sphi %s12132_s0, %s13587_s0  }
  0x98   : > { %13458 = sst [smem:[#allocation125_spill]] %s11651_s28  ;;  %s9286_s10 = sadd.s32 4294967294, %s11663_s2  }
  0x99   : > { %13459 = sst [smem:[#allocation126_spill]] %s11659_s1  ;;  %s12155_s11 = sadd.s32 1, %s11663_s2  }
  0x9a   : > { %13460 = sst [smem:[#allocation127_spill]] %s11663_s2  ;;  %s1620_s15 = sadd.s32 1, %s11659_s1 }
  0x9b   : > { %13461 = sst [smem:[#allocation128_spill]] %s12155_s11  ;;  %s1617_s16 = ssub.s32 %s11663_s2, %s12155_s11 }
  0x9c   : > { %p1630_p0 = scmp.ne.s32.totalorder %s11659_s1, %s11655_s0  ;;  %p1618_p1 = scmp.eq.s32.totalorder %s1617_s16, 0 }
  0x9d   : > { %p1631_p2 = scmp.eq.s32.totalorder %s12151_s7, 1  ;;  %p1636_p3 = scmp.ne.s32.totalorder %s11655_s0, %s11651_s28 }
  0x9e   : > { %p1637_p4 = scmp.eq.s32.totalorder %s9286_s10, 1  ;;  %p9287_p7 = scmp.ge.s32.totalorder %s11663_s2, 1 }
  0x9f   : > { %s12166_s18 = scalar_select %p1618_p1, %s11659_s1, %s1620_s15  }
  0xa0   : > { %p12168_p5 = por %p1631_p2, %p1630_p0  ;;  %p12172_p6 = por %p1637_p4, %p1636_p3 }
  0xa1   : > { %13462 = sst [smem:[#allocation129_spill]] %s12166_s18  ;;  %p1644_p8 = scmp.lt.s32.totalorder %s11663_s2, 3 }
  0xa2   : > { %s13463_s22 = scalar_select %p12168_p5, 1, 0 }
  0xa3   : > { %s13464_s23 = scalar_select %p12172_p6, 1, 0 }
  0xa4   : > { %p13352_p9 = scmp.eq.s32.totalorder %s12151_s7, 0  ;;  %p12179_p10 = pnand %p9287_p7, %p1644_p8 }
  0xa5   : > { %13465 = sst [smem:[#allocation130_spill]] %s13464_s23  ;;  %s11733_s16 = smov [#allocation5]  }
  0xa6   : > { %s13466_s26 = scalar_select %p12179_p10, 1, 0 }
  0xa7   : > { %s1737_s10 = sshll.u32 %s11733_s16, 4  ;;  %p10348_p11 = pneg %p12179_p10  ;;  %s1738_s10 = int_to_ptr.vmem [resolvable:$true] %s1737_s10 }
  0xa8   : > { %s11734_s15 = smov [#allocation8]   ;;  %s11735_s11 = smov [#allocation11]  }
  0xa9   : > { %s1759_s18 = sshll.u32 %s11734_s15, 4  ;;  %p12187_p12 = pnand %p13352_p9, %p10348_p11  ;;  %s1760_s18 = int_to_ptr.vmem [resolvable:$true] %s1759_s18 }
  0xaa   : > { %s1781_s23 = sshll.u32 %s11735_s11, 4  ;;  %s10800_s16 = scalar_lea.vmem %s1738_s10, 16  ;;  %s12191_s23 = int_to_ptr.vmem [resolvable:$true] %s1781_s23 }
  0xab   : > { %p12195_p13 = pneg %p12187_p12  ;;  %p10801_p0 = scmp.ne.s32.totalorder %s1738_s10, %s10800_s16 }
  0xac   : > { %s10807_s15 = scalar_lea.vmem %s1738_s10, 32  ;;  %p10808_p3 = scmp.lt.s32.totalorder %s1738_s10, %s1738_s10 }
  0xad   : > { %p10803_p1 = pnand %p10801_p0, %p12195_p13  ;;  %p10809_p4 = scmp.lt.s32.totalorder %s10807_s15, %s10800_s16 }
  0xaf   : > { %p10804_p2 = pneg %p10803_p1  ;;  %p10810_p7 = por %p10809_p4, %p10808_p3 }
  0xb1   : > { %p10811_p8 = pnand %p10810_p7, %p10804_p2 }
  0xb3   : > { %10814 = shalt.err (!%p10811_p8)
}
  0xb4   : > { %10354 = dma.hbm_to_vmem [thread:$0]  (!%p12187_p12), %s11928_s25, 16, %s1738_s10, [#allocation6]  }
  0xb5   : > { %s10826_s11 = scalar_lea.vmem %s1760_s18, 16  ;;  %s10833_s2 = scalar_lea.vmem %s1760_s18, 32 }
  0xb6   : > { %p10827_p11 = scmp.ne.s32.totalorder %s1760_s18, %s10826_s11  ;;  %p10834_p5 = scmp.lt.s32.totalorder %s1760_s18, %s1760_s18 }
  0xb7   : > { %p10835_p0 = scmp.lt.s32.totalorder %s10833_s2, %s10826_s11 }
  0xb8   : > { %p10829_p9 = pnand %p10827_p11, %p12195_p13 }
  0xb9   : > { %p10836_p1 = por %p10835_p0, %p10834_p5 }
  0xba   : > { %p10830_p6 = pneg %p10829_p9 }
  0xbc   : > { %p10837_p10 = pnand %p10836_p1, %p10830_p6 }
  0xbe   : > { %10840 = shalt.err (!%p10837_p10)
}
  0xbf   : > { %s13469_s3 = sld [smem:[#allocation92_spill]]  ;;  %s10852_s10 = scalar_lea.vmem %s12191_s23, 16 }
  0xc0   : > { %p10853_p2 = scmp.ne.s32.totalorder %s12191_s23, %s10852_s10  ;;  %s10859_s16 = scalar_lea.vmem %s12191_s23, 32 }
  0xc1   : > { %p10860_p4 = scmp.lt.s32.totalorder %s12191_s23, %s12191_s23  ;;  %p10861_p5 = scmp.lt.s32.totalorder %s10859_s16, %s10852_s10 }
  0xc2   : > { %p10855_p3 = pnand %p10853_p2, %p12195_p13 }
  0xc3   : > { %p10862_p6 = por %p10861_p5, %p10860_p4 }
  0xc4   : > { %p10856_p9 = pneg %p10855_p3 }
  0xc5   : > { %10360 = dma.hbm_to_vmem [thread:$0]  (!%p12187_p12), %s13469_s3, 16, %s1760_s18, [#allocation9]  }
  0xc6   : > { %p10863_p10 = pnand %p10862_p6, %p10856_p9 }
  0xc8   : > { %10866 = shalt.err (!%p10863_p10)
}
  0xc9   : > { %s13470_s19 = sld [smem:[#allocation94_spill]]  ;;  %s11736_s2 = smov [#allocation14]  }
  0xca   : > { %s1809_s18 = sshll.u32 %s11736_s2, 4  ;;  %s11737_s15 = smov [#allocation17]   ;;  %s1810_s18 = int_to_ptr.vmem [resolvable:$true] %s1809_s18 }
  0xcb   : > { %s1837_s11 = sshll.u32 %s11737_s15, 4  ;;  %s10878_s3 = scalar_lea.vmem %s1810_s18, 16  ;;  %s1838_s11 = int_to_ptr.vmem [resolvable:$true] %s1837_s11 }
  0xcc   : > { %p10879_p7 = scmp.ne.s32.totalorder %s1810_s18, %s10878_s3  ;;  %s10885_s10 = scalar_lea.vmem %s1810_s18, 32 }
  0xcd   : > { %p10886_p0 = scmp.lt.s32.totalorder %s1810_s18, %s1810_s18  ;;  %p10887_p1 = scmp.lt.s32.totalorder %s10885_s10, %s10878_s3 }
  0xce   : > { %p10881_p8 = pnand %p10879_p7, %p12195_p13 }
  0xcf   : > { %10366 = dma.hbm_to_vmem [thread:$0]  (!%p12187_p12), %s13470_s19, 16, %s12191_s23, [#allocation12]  }
  0xd0   : > { %p10882_p11 = pneg %p10881_p8  ;;  %p10888_p2 = por %p10887_p1, %p10886_p0 }
  0xd2   : > { %p10889_p3 = pnand %p10888_p2, %p10882_p11 }
  0xd4   : > { %10892 = shalt.err (!%p10889_p3)
}
  0xd5   : > { %10372 = dma.hbm_to_vmem [thread:$0]  (!%p12187_p12), %s11968_s20, 16, %s1810_s18, [#allocation15]  }
  0xd6   : > { %s10904_s23 = scalar_lea.vmem %s1838_s11, 16  ;;  %s10911_s16 = scalar_lea.vmem %s1838_s11, 32 }
  0xd7   : > { %p10905_p9 = scmp.ne.s32.totalorder %s1838_s11, %s10904_s23  ;;  %p10912_p6 = scmp.lt.s32.totalorder %s1838_s11, %s1838_s11 }
  0xd8   : > { %p10913_p10 = scmp.lt.s32.totalorder %s10911_s16, %s10904_s23 }
  0xd9   : > { %p10907_p4 = pnand %p10905_p9, %p12195_p13 }
  0xda   : > { %p10914_p7 = por %p10913_p10, %p10912_p6 }
  0xdb   : > { %p10908_p5 = pneg %p10907_p4 }
  0xdd   : > { %p10915_p8 = pnand %p10914_p7, %p10908_p5 }
  0xdf   : > { %10918 = shalt.err (!%p10915_p8)
}
  0xe0   : > { %10378 = dma.hbm_to_vmem [thread:$0]  (!%p12187_p12), %s11988_s27, 16, %s1838_s11, [#allocation18]  }
  0xe1   : > { %s11738_s3 = smov [#allocation20]   ;;  %s11739_s18 = smov [#allocation23]  }
  0xe2   : > { %s1859_s2 = sshll.u32 %s11738_s3, 4  ;;  %s1887_s15 = sshll.u32 %s11739_s18, 4  ;;  %s1860_s2 = int_to_ptr.vmem [resolvable:$true] %s1859_s2  ;;  %s1888_s15 = int_to_ptr.vmem [resolvable:$true] %s1887_s15 }
  0xe3   : > { %s10930_s10 = scalar_lea.vmem %s1860_s2, 16  ;;  %s10937_s19 = scalar_lea.vmem %s1860_s2, 32 }
  0xe4   : > { %p10931_p11 = scmp.ne.s32.totalorder %s1860_s2, %s10930_s10  ;;  %p10938_p2 = scmp.lt.s32.totalorder %s1860_s2, %s1860_s2 }
  0xe5   : > { %p10939_p3 = scmp.lt.s32.totalorder %s10937_s19, %s10930_s10 }
  0xe6   : > { %p10933_p0 = pnand %p10931_p11, %p12195_p13 }
  0xe7   : > { %p10940_p9 = por %p10939_p3, %p10938_p2 }
  0xe8   : > { %p10934_p1 = pneg %p10933_p0 }
  0xea   : > { %p10941_p4 = pnand %p10940_p9, %p10934_p1 }
  0xec   : > { %10944 = shalt.err (!%p10941_p4)
}
  0xed   : > { %s13471_s14 = sld [smem:[#allocation102_spill]]  ;;  %s10956_s11 = scalar_lea.vmem %s1888_s15, 16 }
  0xee   : > { %p10957_p5 = scmp.ne.s32.totalorder %s1888_s15, %s10956_s11  ;;  %s10963_s23 = scalar_lea.vmem %s1888_s15, 32 }
  0xef   : > { %p10964_p7 = scmp.lt.s32.totalorder %s1888_s15, %s1888_s15  ;;  %p10965_p8 = scmp.lt.s32.totalorder %s10963_s23, %s10956_s11 }
  0xf0   : > { %p10959_p6 = pnand %p10957_p5, %p12195_p13 }
  0xf1   : > { %p10966_p11 = por %p10965_p8, %p10964_p7 }
  0xf2   : > { %p10960_p10 = pneg %p10959_p6 }
  0xf3   : > { %10384 = dma.hbm_to_vmem [thread:$0]  (!%p12187_p12), %s13471_s14, 16, %s1860_s2, [#allocation21]  }
  0xf4   : > { %p10967_p0 = pnand %p10966_p11, %p10960_p10 }
  0xf6   : > { %10970 = shalt.err (!%p10967_p0)
}
  0xf7   : > { %s13472_s9 = sld [smem:[#allocation106_spill]]  ;;  %s11740_s19 = smov [#allocation26]  }
  0xf8   : > { %s1909_s16 = sshll.u32 %s11740_s19, 4  ;;  %s11741_s3 = smov [#allocation29]   ;;  %s1910_s16 = int_to_ptr.vmem [resolvable:$true] %s1909_s16 }
  0xf9   : > { %s1931_s2 = sshll.u32 %s11741_s3, 4  ;;  %s10982_s18 = scalar_lea.vmem %s1910_s16, 16  ;;  %s1932_s2 = int_to_ptr.vmem [resolvable:$true] %s1931_s2 }
  0xfa   : > { %p10983_p1 = scmp.ne.s32.totalorder %s1910_s16, %s10982_s18  ;;  %s10989_s10 = scalar_lea.vmem %s1910_s16, 32 }
  0xfb   : > { %p10990_p9 = scmp.lt.s32.totalorder %s1910_s16, %s1910_s16  ;;  %p10991_p4 = scmp.lt.s32.totalorder %s10989_s10, %s10982_s18 }
  0xfc   : > { %p10985_p2 = pnand %p10983_p1, %p12195_p13 }
  0xfd   : > { %10390 = dma.hbm_to_vmem [thread:$0]  (!%p12187_p12), %s13472_s9, 16, %s1888_s15, [#allocation24]  }
  0xfe   : > { %p10986_p3 = pneg %p10985_p2  ;;  %p10992_p5 = por %p10991_p4, %p10990_p9 }
 0x100   : > { %p10993_p6 = pnand %p10992_p5, %p10986_p3 }
 0x102   : > { %10996 = shalt.err (!%p10993_p6)
}
 0x103   : > { %s13473_s4 = sld [smem:[#allocation108_spill]]  ;;  %s11008_s15 = scalar_lea.vmem %s1932_s2, 16 }
 0x104   : > { %p11009_p10 = scmp.ne.s32.totalorder %s1932_s2, %s11008_s15  ;;  %s11015_s11 = scalar_lea.vmem %s1932_s2, 32 }
 0x105   : > { %p11016_p11 = scmp.lt.s32.totalorder %s1932_s2, %s1932_s2  ;;  %p11017_p0 = scmp.lt.s32.totalorder %s11015_s11, %s11008_s15 }
 0x106   : > { %p11011_p7 = pnand %p11009_p10, %p12195_p13 }
 0x107   : > { %p11018_p1 = por %p11017_p0, %p11016_p11 }
 0x108   : > { %p11012_p8 = pneg %p11011_p7 }
 0x109   : > { %10396 = dma.hbm_to_vmem [thread:$0]  (!%p12187_p12), %s13473_s4, 16, %s1910_s16, [#allocation27]  }
 0x10a   : > { %p11019_p2 = pnand %p11018_p1, %p11012_p8 }
 0x10c   : > { %11022 = shalt.err (!%p11019_p2)
}
 0x10d   : > { %s13474_s5 = sld [smem:[#allocation110_spill]]  ;;  %s11742_s23 = smov [#allocation32]  }
 0x10e   : > { %s1959_s19 = sshll.u32 %s11742_s23, 4  ;;  %s11743_s16 = smov [#allocation35]   ;;  %s1960_s19 = int_to_ptr.vmem [resolvable:$true] %s1959_s19 }
 0x10f   : > { %s1987_s3 = sshll.u32 %s11743_s16, 4  ;;  %s11034_s18 = scalar_lea.vmem %s1960_s19, 16  ;;  %s1988_s3 = int_to_ptr.vmem [resolvable:$true] %s1987_s3 }
 0x110   : > { %p11035_p3 = scmp.ne.s32.totalorder %s1960_s19, %s11034_s18  ;;  %s11041_s10 = scalar_lea.vmem %s1960_s19, 32 }
 0x111   : > { %p11042_p5 = scmp.lt.s32.totalorder %s1960_s19, %s1960_s19  ;;  %p11043_p6 = scmp.lt.s32.totalorder %s11041_s10, %s11034_s18 }
 0x112   : > { %p11037_p9 = pnand %p11035_p3, %p12195_p13 }
 0x113   : > { %10402 = dma.hbm_to_vmem [thread:$0]  (!%p12187_p12), %s13474_s5, 16, %s1932_s2, [#allocation30]  }
 0x114   : > { %p11038_p4 = pneg %p11037_p9  ;;  %p11044_p10 = por %p11043_p6, %p11042_p5 }
 0x116   : > { %p11045_p7 = pnand %p11044_p10, %p11038_p4 }
 0x118   : > { %11048 = shalt.err (!%p11045_p7)
}
 0x119   : > { %s13475_s6 = sld [smem:[#allocation114_spill]]  ;;  %s11060_s2 = scalar_lea.vmem %s1988_s3, 16 }
 0x11a   : > { %p11061_p8 = scmp.ne.s32.totalorder %s1988_s3, %s11060_s2  ;;  %s11067_s15 = scalar_lea.vmem %s1988_s3, 32 }
 0x11b   : > { %p11068_p1 = scmp.lt.s32.totalorder %s1988_s3, %s1988_s3  ;;  %p11069_p2 = scmp.lt.s32.totalorder %s11067_s15, %s11060_s2 }
 0x11c   : > { %p11063_p11 = pnand %p11061_p8, %p12195_p13 }
 0x11d   : > { %p11070_p3 = por %p11069_p2, %p11068_p1 }
 0x11e   : > { %p11064_p0 = pneg %p11063_p11 }
 0x11f   : > { %10408 = dma.hbm_to_vmem [thread:$0]  (!%p12187_p12), %s13475_s6, 16, %s1960_s19, [#allocation33]  }
 0x120   : > { %p11071_p9 = pnand %p11070_p3, %p11064_p0 }
 0x122   : > { %11074 = shalt.err (!%p11071_p9)
}
 0x123   : > { %10414 = dma.hbm_to_vmem [thread:$0]  (!%p12187_p12), %s12078_s17, 16, %s1988_s3, [#allocation36]  }
 0x124   : > { %s11744_s11 = smov [#allocation38]   ;;  %s11745_s19 = smov [#allocation41]  }
 0x125   : > { %s2009_s23 = sshll.u32 %s11744_s11, 4  ;;  %s2031_s16 = sshll.u32 %s11745_s19, 4  ;;  %s2010_s23 = int_to_ptr.vmem [resolvable:$true] %s2009_s23  ;;  %s2032_s16 = int_to_ptr.vmem [resolvable:$true] %s2031_s16 }
 0x126   : > { %s11086_s18 = scalar_lea.vmem %s2010_s23, 16  ;;  %s11093_s10 = scalar_lea.vmem %s2010_s23, 32 }
 0x127   : > { %p11087_p4 = scmp.ne.s32.totalorder %s2010_s23, %s11086_s18  ;;  %p11094_p10 = scmp.lt.s32.totalorder %s2010_s23, %s2010_s23 }
 0x128   : > { %p11095_p7 = scmp.lt.s32.totalorder %s11093_s10, %s11086_s18 }
 0x129   : > { %p11089_p5 = pnand %p11087_p4, %p12195_p13 }
 0x12a   : > { %p11096_p8 = por %p11095_p7, %p11094_p10 }
 0x12b   : > { %p11090_p6 = pneg %p11089_p5 }
 0x12d   : > { %p11097_p11 = pnand %p11096_p8, %p11090_p6 }
 0x12f   : > { %11100 = shalt.err (!%p11097_p11)
}
 0x130   : > { %s13476_s12 = sld [smem:[#allocation119_spill]]  ;;  %s11112_s3 = scalar_lea.vmem %s2032_s16, 16 }
 0x131   : > { %p11113_p0 = scmp.ne.s32.totalorder %s2032_s16, %s11112_s3  ;;  %s11119_s2 = scalar_lea.vmem %s2032_s16, 32 }
 0x132   : > { %p11120_p3 = scmp.lt.s32.totalorder %s2032_s16, %s2032_s16  ;;  %p11121_p9 = scmp.lt.s32.totalorder %s11119_s2, %s11112_s3 }
 0x133   : > { %p11115_p1 = pnand %p11113_p0, %p12195_p13 }
 0x134   : > { %p11122_p4 = por %p11121_p9, %p11120_p3 }
 0x135   : > { %p11116_p2 = pneg %p11115_p1 }
 0x136   : > { %10420 = dma.hbm_to_vmem [thread:$0]  (!%p12187_p12), %s13476_s12, 16, %s2010_s23, [#allocation39]  }
 0x137   : > { %p11123_p5 = pnand %p11122_p4, %p11116_p2 }
 0x139   : > { %11126 = shalt.err (!%p11123_p5)
}
 0x13a   : > { %10426 = dma.hbm_to_vmem [thread:$0]  (!%p12187_p12), %s12098_s30, 16, %s2032_s16, [#allocation42]  }
 0x13b   : > { %s11746_s15 = smov [#allocation44]   ;;  %s11747_s23 = smov [#allocation2]  }
 0x13c   : > { %s2059_s11 = sshll.u32 %s11746_s15, 4  ;;  %s1726_s19 = sshll.u32 %s11747_s23, 4  ;;  %s2060_s11 = int_to_ptr.vmem [resolvable:$true] %s2059_s11  ;;  %s1727_s19 = int_to_ptr.vmem [resolvable:$true] %s1726_s19 }
 0x13d   : > { %s11138_s18 = scalar_lea.vmem %s2060_s11, 16  ;;  %s11145_s10 = scalar_lea.vmem %s2060_s11, 32 }
 0x13e   : > { %p11139_p6 = scmp.ne.s32.totalorder %s2060_s11, %s11138_s18  ;;  %p11146_p8 = scmp.lt.s32.totalorder %s2060_s11, %s2060_s11 }
 0x13f   : > { %p11147_p11 = scmp.lt.s32.totalorder %s11145_s10, %s11138_s18 }
 0x140   : > { %p11141_p10 = pnand %p11139_p6, %p12195_p13 }
 0x141   : > { %p11148_p0 = por %p11147_p11, %p11146_p8 }
 0x142   : > { %p11142_p7 = pneg %p11141_p10 }
 0x144   : > { %p11149_p1 = pnand %p11148_p0, %p11142_p7 }
 0x146   : > { %11152 = shalt.err (!%p11149_p1)
}
 0x147   : > { %10432 = dma.hbm_to_vmem [thread:$0]  (!%p12187_p12), %s12118_s21, 16, %s2060_s11, [#allocation45]  }
 0x148   : > { %s11164_s16 = scalar_lea.vmem %s1727_s19, 16  ;;  %s11171_s3 = scalar_lea.vmem %s1727_s19, 32 }
 0x149   : > { %p11165_p2 = scmp.ne.s32.totalorder %s1727_s19, %s11164_s16  ;;  %p11172_p4 = scmp.lt.s32.totalorder %s1727_s19, %s1727_s19 }
 0x14a   : > { %p11173_p5 = scmp.lt.s32.totalorder %s11171_s3, %s11164_s16 }
 0x14b   : > { %p11167_p3 = pnand %p11165_p2, %p12195_p13 }
 0x14c   : > { %p11174_p6 = por %p11173_p5, %p11172_p4 }
 0x14d   : > { %p11168_p9 = pneg %p11167_p3 }
 0x14f   : > { %p11175_p10 = pnand %p11174_p6, %p11168_p9 }
 0x151   : > { %11178 = shalt.err (!%p11175_p10)
}
 0x152   : > { %10351 = dma.hbm_to_vmem [thread:$0]  (!%p12187_p12), %s11923_s29, 16, %s1727_s19, [#allocation3]  }
 0x153   : > { %s11748_s2 = smov [#allocation7]   ;;  %s11749_s11 = smov [#allocation10]  }
 0x154   : > { %s1748_s15 = sshll.u32 %s11748_s2, 4  ;;  %s1770_s23 = sshll.u32 %s11749_s11, 4  ;;  %s1749_s15 = int_to_ptr.vmem [resolvable:$true] %s1748_s15  ;;  %s1771_s23 = int_to_ptr.vmem [resolvable:$true] %s1770_s23 }
 0x155   : > { %s11190_s18 = scalar_lea.vmem %s1749_s15, 16  ;;  %s11197_s10 = scalar_lea.vmem %s1749_s15, 32 }
 0x156   : > { %p11191_p7 = scmp.ne.s32.totalorder %s1749_s15, %s11190_s18  ;;  %p11198_p0 = scmp.lt.s32.totalorder %s1749_s15, %s1749_s15 }
 0x157   : > { %p11199_p1 = scmp.lt.s32.totalorder %s11197_s10, %s11190_s18 }
 0x158   : > { %p11193_p8 = pnand %p11191_p7, %p12195_p13 }
 0x159   : > { %p11200_p2 = por %p11199_p1, %p11198_p0 }
 0x15a   : > { %p11194_p11 = pneg %p11193_p8 }
 0x15c   : > { %p11201_p3 = pnand %p11200_p2, %p11194_p11 }
 0x15e   : > { %11204 = shalt.err (!%p11201_p3)
}
 0x15f   : > { %s13477_s16 = sld [smem:[#allocation91_spill]]  ;;  %s11216_s19 = scalar_lea.vmem %s1771_s23, 16 }
 0x160   : > { %p11217_p9 = scmp.ne.s32.totalorder %s1771_s23, %s11216_s19  ;;  %s11223_s3 = scalar_lea.vmem %s1771_s23, 32 }
 0x161   : > { %p11224_p6 = scmp.lt.s32.totalorder %s1771_s23, %s1771_s23  ;;  %p11225_p10 = scmp.lt.s32.totalorder %s11223_s3, %s11216_s19 }
 0x162   : > { %p11219_p4 = pnand %p11217_p9, %p12195_p13 }
 0x163   : > { %p11226_p7 = por %p11225_p10, %p11224_p6 }
 0x164   : > { %p11220_p5 = pneg %p11219_p4 }
 0x165   : > { %10357 = dma.hbm_to_vmem [thread:$0]  (!%p12187_p12), %s13477_s16, 16, %s1749_s15, [#allocation6]  }
 0x166   : > { %p11227_p8 = pnand %p11226_p7, %p11220_p5 }
 0x168   : > { %11230 = shalt.err (!%p11227_p8)
}
 0x169   : > { %s13478_s2 = sld [smem:[#allocation93_spill]]  ;;  %s11750_s11 = smov [#allocation13]  }
 0x16a   : > { %s1795_s18 = sshll.u32 %s11750_s11, 4  ;;  %s11751_s15 = smov [#allocation16]   ;;  %s1796_s18 = int_to_ptr.vmem [resolvable:$true] %s1795_s18 }
 0x16b   : > { %s1823_s10 = sshll.u32 %s11751_s15, 4  ;;  %s11242_s16 = scalar_lea.vmem %s1796_s18, 16  ;;  %s1824_s10 = int_to_ptr.vmem [resolvable:$true] %s1823_s10 }
 0x16c   : > { %p11243_p11 = scmp.ne.s32.totalorder %s1796_s18, %s11242_s16  ;;  %s11249_s4 = scalar_lea.vmem %s1796_s18, 32 }
 0x16d   : > { %p11250_p2 = scmp.lt.s32.totalorder %s1796_s18, %s1796_s18  ;;  %p11251_p3 = scmp.lt.s32.totalorder %s11249_s4, %s11242_s16 }
 0x16e   : > { %p11245_p0 = pnand %p11243_p11, %p12195_p13 }
 0x16f   : > { %10363 = dma.hbm_to_vmem [thread:$0]  (!%p12187_p12), %s13478_s2, 16, %s1771_s23, [#allocation9]  }
 0x170   : > { %p11246_p1 = pneg %p11245_p0  ;;  %p11252_p9 = por %p11251_p3, %p11250_p2 }
 0x172   : > { %p11253_p4 = pnand %p11252_p9, %p11246_p1 }
 0x174   : > { %11256 = shalt.err (!%p11253_p4)
}
 0x175   : > { %s13479_s19 = sld [smem:[#allocation96_spill]]  ;;  %s11268_s23 = scalar_lea.vmem %s1824_s10, 16 }
 0x176   : > { %p11269_p5 = scmp.ne.s32.totalorder %s1824_s10, %s11268_s23  ;;  %s11275_s3 = scalar_lea.vmem %s1824_s10, 32 }
 0x177   : > { %p11276_p7 = scmp.lt.s32.totalorder %s1824_s10, %s1824_s10  ;;  %p11277_p8 = scmp.lt.s32.totalorder %s11275_s3, %s11268_s23 }
 0x178   : > { %p11271_p6 = pnand %p11269_p5, %p12195_p13 }
 0x179   : > { %p11278_p11 = por %p11277_p8, %p11276_p7 }
 0x17a   : > { %p11272_p10 = pneg %p11271_p6 }
 0x17b   : > { %10369 = dma.hbm_to_vmem [thread:$0]  (!%p12187_p12), %s13479_s19, 16, %s1796_s18, [#allocation12]  }
 0x17c   : > { %p11279_p0 = pnand %p11278_p11, %p11272_p10 }
 0x17e   : > { %11282 = shalt.err (!%p11279_p0)
}
 0x17f   : > { %s13480_s4 = sld [smem:[#allocation99_spill]]  ;;  %s11752_s2 = smov [#allocation19]  }
 0x180   : > { %s1848_s11 = sshll.u32 %s11752_s2, 4  ;;  %s11753_s18 = smov [#allocation22]   ;;  %s1849_s11 = int_to_ptr.vmem [resolvable:$true] %s1848_s11 }
 0x181   : > { %s1870_s15 = sshll.u32 %s11753_s18, 4  ;;  %s11294_s16 = scalar_lea.vmem %s1849_s11, 16  ;;  %s1871_s15 = int_to_ptr.vmem [resolvable:$true] %s1870_s15 }
 0x182   : > { %p11295_p1 = scmp.ne.s32.totalorder %s1849_s11, %s11294_s16  ;;  %s11301_s19 = scalar_lea.vmem %s1849_s11, 32 }
 0x183   : > { %p11302_p9 = scmp.lt.s32.totalorder %s1849_s11, %s1849_s11  ;;  %p11303_p4 = scmp.lt.s32.totalorder %s11301_s19, %s11294_s16 }
 0x184   : > { %p11297_p2 = pnand %p11295_p1, %p12195_p13 }
 0x185   : > { %10375 = dma.hbm_to_vmem [thread:$0]  (!%p12187_p12), %s13480_s4, 16, %s1824_s10, [#allocation15]  }
 0x186   : > { %p11298_p3 = pneg %p11297_p2  ;;  %p11304_p5 = por %p11303_p4, %p11302_p9 }
 0x188   : > { %p11305_p6 = pnand %p11304_p5, %p11298_p3 }
 0x18a   : > { %11308 = shalt.err (!%p11305_p6)
}
 0x18b   : > { %s13481_s23 = sld [smem:[#allocation101_spill]]  ;;  %s11320_s10 = scalar_lea.vmem %s1871_s15, 16 }
 0x18c   : > { %p11321_p10 = scmp.ne.s32.totalorder %s1871_s15, %s11320_s10  ;;  %s11327_s3 = scalar_lea.vmem %s1871_s15, 32 }
 0x18d   : > { %p11328_p11 = scmp.lt.s32.totalorder %s1871_s15, %s1871_s15  ;;  %p11329_p0 = scmp.lt.s32.totalorder %s11327_s3, %s11320_s10 }
 0x18e   : > { %p11323_p7 = pnand %p11321_p10, %p12195_p13 }
 0x18f   : > { %p11330_p1 = por %p11329_p0, %p11328_p11 }
 0x190   : > { %p11324_p8 = pneg %p11323_p7 }
 0x191   : > { %10381 = dma.hbm_to_vmem [thread:$0]  (!%p12187_p12), %s13481_s23, 16, %s1849_s11, [#allocation18]  }
 0x192   : > { %p11331_p2 = pnand %p11330_p1, %p11324_p8 }
 0x194   : > { %11334 = shalt.err (!%p11331_p2)
}
 0x195   : > { %s13482_s4 = sld [smem:[#allocation103_spill]]  ;;  %s11754_s2 = smov [#allocation25]  }
 0x196   : > { %s1898_s18 = sshll.u32 %s11754_s2, 4  ;;  %s11755_s11 = smov [#allocation28]   ;;  %s1899_s18 = int_to_ptr.vmem [resolvable:$true] %s1898_s18 }
 0x197   : > { %s1920_s16 = sshll.u32 %s11755_s11, 4  ;;  %s11346_s19 = scalar_lea.vmem %s1899_s18, 16  ;;  %s1921_s16 = int_to_ptr.vmem [resolvable:$true] %s1920_s16 }
 0x198   : > { %p11347_p3 = scmp.ne.s32.totalorder %s1899_s18, %s11346_s19  ;;  %s11353_s23 = scalar_lea.vmem %s1899_s18, 32 }
 0x199   : > { %p11354_p5 = scmp.lt.s32.totalorder %s1899_s18, %s1899_s18  ;;  %p11355_p6 = scmp.lt.s32.totalorder %s11353_s23, %s11346_s19 }
 0x19a   : > { %p11349_p9 = pnand %p11347_p3, %p12195_p13 }
 0x19b   : > { %10387 = dma.hbm_to_vmem [thread:$0]  (!%p12187_p12), %s13482_s4, 16, %s1871_s15, [#allocation21]  }
 0x19c   : > { %p11350_p4 = pneg %p11349_p9  ;;  %p11356_p10 = por %p11355_p6, %p11354_p5 }
 0x19e   : > { %p11357_p7 = pnand %p11356_p10, %p11350_p4 }
 0x1a0   : > { %11360 = shalt.err (!%p11357_p7)
}
 0x1a1   : > { %s13483_s10 = sld [smem:[#allocation107_spill]]  ;;  %s11372_s15 = scalar_lea.vmem %s1921_s16, 16 }
 0x1a2   : > { %p11373_p8 = scmp.ne.s32.totalorder %s1921_s16, %s11372_s15  ;;  %s11379_s3 = scalar_lea.vmem %s1921_s16, 32 }
 0x1a3   : > { %p11380_p1 = scmp.lt.s32.totalorder %s1921_s16, %s1921_s16  ;;  %p11381_p2 = scmp.lt.s32.totalorder %s11379_s3, %s11372_s15 }
 0x1a4   : > { %p11375_p11 = pnand %p11373_p8, %p12195_p13 }
 0x1a5   : > { %p11382_p3 = por %p11381_p2, %p11380_p1 }
 0x1a6   : > { %p11376_p0 = pneg %p11375_p11 }
 0x1a7   : > { %10393 = dma.hbm_to_vmem [thread:$0]  (!%p12187_p12), %s13483_s10, 16, %s1899_s18, [#allocation24]  }
 0x1a8   : > { %p11383_p9 = pnand %p11382_p3, %p11376_p0 }
 0x1aa   : > { %11386 = shalt.err (!%p11383_p9)
}
 0x1ab   : > { %s13484_s4 = sld [smem:[#allocation109_spill]]  ;;  %s11756_s2 = smov [#allocation31]  }
 0x1ac   : > { %s1945_s11 = sshll.u32 %s11756_s2, 4  ;;  %s11757_s18 = smov [#allocation34]   ;;  %s1946_s11 = int_to_ptr.vmem [resolvable:$true] %s1945_s11 }
 0x1ad   : > { %s1970_s19 = sshll.u32 %s11757_s18, 4  ;;  %s11398_s23 = scalar_lea.vmem %s1946_s11, 16  ;;  %s1971_s19 = int_to_ptr.vmem [resolvable:$true] %s1970_s19 }
 0x1ae   : > { %p11399_p4 = scmp.ne.s32.totalorder %s1946_s11, %s11398_s23  ;;  %s11405_s10 = scalar_lea.vmem %s1946_s11, 32 }
 0x1af   : > { %p11406_p10 = scmp.lt.s32.totalorder %s1946_s11, %s1946_s11  ;;  %p11407_p7 = scmp.lt.s32.totalorder %s11405_s10, %s11398_s23 }
 0x1b0   : > { %p11401_p5 = pnand %p11399_p4, %p12195_p13 }
 0x1b1   : > { %10399 = dma.hbm_to_vmem [thread:$0]  (!%p12187_p12), %s13484_s4, 16, %s1921_s16, [#allocation27]  }
 0x1b2   : > { %p11402_p6 = pneg %p11401_p5  ;;  %p11408_p8 = por %p11407_p7, %p11406_p10 }
 0x1b4   : > { %p11409_p11 = pnand %p11408_p8, %p11402_p6 }
 0x1b6   : > { %11412 = shalt.err (!%p11409_p11)
}
 0x1b7   : > { %s13485_s15 = sld [smem:[#allocation112_spill]]  ;;  %s11424_s16 = scalar_lea.vmem %s1971_s19, 16 }
 0x1b8   : > { %p11425_p0 = scmp.ne.s32.totalorder %s1971_s19, %s11424_s16  ;;  %s11431_s3 = scalar_lea.vmem %s1971_s19, 32 }
 0x1b9   : > { %p11432_p3 = scmp.lt.s32.totalorder %s1971_s19, %s1971_s19  ;;  %p11433_p9 = scmp.lt.s32.totalorder %s11431_s3, %s11424_s16 }
 0x1ba   : > { %p11427_p1 = pnand %p11425_p0, %p12195_p13 }
 0x1bb   : > { %p11434_p4 = por %p11433_p9, %p11432_p3 }
 0x1bc   : > { %p11428_p2 = pneg %p11427_p1 }
 0x1bd   : > { %10405 = dma.hbm_to_vmem [thread:$0]  (!%p12187_p12), %s13485_s15, 16, %s1946_s11, [#allocation30]  }
 0x1be   : > { %p11435_p5 = pnand %p11434_p4, %p11428_p2 }
 0x1c0   : > { %11438 = shalt.err (!%p11435_p5)
}
 0x1c1   : > { %s13486_s4 = sld [smem:[#allocation115_spill]]  ;;  %s11758_s2 = smov [#allocation37]  }
 0x1c2   : > { %s1998_s18 = sshll.u32 %s11758_s2, 4  ;;  %s11759_s11 = smov [#allocation40]   ;;  %s1999_s18 = int_to_ptr.vmem [resolvable:$true] %s1998_s18 }
 0x1c3   : > { %s2020_s23 = sshll.u32 %s11759_s11, 4  ;;  %s11450_s10 = scalar_lea.vmem %s1999_s18, 16  ;;  %s2021_s23 = int_to_ptr.vmem [resolvable:$true] %s2020_s23 }
 0x1c4   : > { %p11451_p6 = scmp.ne.s32.totalorder %s1999_s18, %s11450_s10  ;;  %s11457_s15 = scalar_lea.vmem %s1999_s18, 32 }
 0x1c5   : > { %p11458_p8 = scmp.lt.s32.totalorder %s1999_s18, %s1999_s18  ;;  %p11459_p11 = scmp.lt.s32.totalorder %s11457_s15, %s11450_s10 }
 0x1c6   : > { %p11453_p10 = pnand %p11451_p6, %p12195_p13 }
 0x1c7   : > { %10411 = dma.hbm_to_vmem [thread:$0]  (!%p12187_p12), %s13486_s4, 16, %s1971_s19, [#allocation33]  }
 0x1c8   : > { %p11454_p7 = pneg %p11453_p10  ;;  %p11460_p0 = por %p11459_p11, %p11458_p8 }
 0x1ca   : > { %p11461_p1 = pnand %p11460_p0, %p11454_p7 }
 0x1cc   : > { %11464 = shalt.err (!%p11461_p1)
}
 0x1cd   : > { %s13487_s16 = sld [smem:[#allocation118_spill]]  ;;  %s11476_s19 = scalar_lea.vmem %s2021_s23, 16 }
 0x1ce   : > { %p11477_p2 = scmp.ne.s32.totalorder %s2021_s23, %s11476_s19  ;;  %s11483_s3 = scalar_lea.vmem %s2021_s23, 32 }
 0x1cf   : > { %p11484_p4 = scmp.lt.s32.totalorder %s2021_s23, %s2021_s23  ;;  %p11485_p5 = scmp.lt.s32.totalorder %s11483_s3, %s11476_s19 }
 0x1d0   : > { %p11479_p3 = pnand %p11477_p2, %p12195_p13 }
 0x1d1   : > { %p11486_p6 = por %p11485_p5, %p11484_p4 }
 0x1d2   : > { %p11480_p9 = pneg %p11479_p3 }
 0x1d3   : > { %10417 = dma.hbm_to_vmem [thread:$0]  (!%p12187_p12), %s13487_s16, 16, %s1999_s18, [#allocation36]  }
 0x1d4   : > { %p11487_p10 = pnand %p11486_p6, %p11480_p9 }
 0x1d6   : > { %11490 = shalt.err (!%p11487_p10)
}
 0x1d7   : > { %s13488_s4 = sld [smem:[#allocation120_spill]]  ;;  %s11760_s2 = smov [#allocation43]  }
 0x1d8   : > { %s2045_s11 = sshll.u32 %s11760_s2, 4  ;;  %s11761_s18 = smov [#allocation46]   ;;  %s2046_s11 = int_to_ptr.vmem [resolvable:$true] %s2045_s11 }
 0x1d9   : > { %s2070_s10 = sshll.u32 %s11761_s18, 4  ;;  %s11502_s15 = scalar_lea.vmem %s2046_s11, 16  ;;  %s2071_s10 = int_to_ptr.vmem [resolvable:$true] %s2070_s10 }
 0x1da   : > { %p11503_p7 = scmp.ne.s32.totalorder %s2046_s11, %s11502_s15  ;;  %s11509_s16 = scalar_lea.vmem %s2046_s11, 32 }
 0x1db   : > { %p11510_p0 = scmp.lt.s32.totalorder %s2046_s11, %s2046_s11  ;;  %p11511_p1 = scmp.lt.s32.totalorder %s11509_s16, %s11502_s15 }
 0x1dc   : > { %p11505_p8 = pnand %p11503_p7, %p12195_p13 }
 0x1dd   : > { %10423 = dma.hbm_to_vmem [thread:$0]  (!%p12187_p12), %s13488_s4, 16, %s2021_s23, [#allocation39]  }
 0x1de   : > { %p11506_p11 = pneg %p11505_p8  ;;  %p11512_p2 = por %p11511_p1, %p11510_p0 }
 0x1e0   : > { %p11513_p3 = pnand %p11512_p2, %p11506_p11 }
 0x1e2   : > { %11516 = shalt.err (!%p11513_p3)
}
 0x1e3   : > { %s13489_s19 = sld [smem:[#allocation122_spill]]  ;;  %s11528_s23 = scalar_lea.vmem %s2071_s10, 16 }
 0x1e4   : > { %p11529_p9 = scmp.ne.s32.totalorder %s2071_s10, %s11528_s23  ;;  %s11535_s3 = scalar_lea.vmem %s2071_s10, 32 }
 0x1e5   : > { %p11536_p6 = scmp.lt.s32.totalorder %s2071_s10, %s2071_s10  ;;  %p11537_p10 = scmp.lt.s32.totalorder %s11535_s3, %s11528_s23 }
 0x1e6   : > { %p11531_p4 = pnand %p11529_p9, %p12195_p13 }
 0x1e7   : > { %p11538_p7 = por %p11537_p10, %p11536_p6 }
 0x1e8   : > { %p11532_p5 = pneg %p11531_p4 }
 0x1e9   : > { %10429 = dma.hbm_to_vmem [thread:$0]  (!%p12187_p12), %s13489_s19, 16, %s2046_s11, [#allocation42]  }
 0x1ea   : > { %p11539_p8 = pnand %p11538_p7, %p11532_p5 }
 0x1ec   : > { %11542 = shalt.err (!%p11539_p8)
}
 0x1ed   : > { %s13490_s13 = sld [smem:[#allocation124_spill]]  ;;  %p13491_p11 = scmp.ne.s32.totalorder %s13466_s26, 0 }
 0x1ee   : > { %p13492_p0 = scmp.eq.s32.totalorder (!%p13491_p11), %s12151_s7, 0 }
 0x1ef   : > { %2110 = sbr.rel (%p13491_p11) target bundleno = 13019 (0x32db), region = 292 }
 0x1f3   : > { %10435 = dma.hbm_to_vmem [thread:$0]  (!%p12187_p12), %s13490_s13, 16, %s2071_s10, [#allocation45]  }
 0x1f4   : > { %11586 = dma.done.wait (%p13492_p0), [#allocation3], 16   ;;  %p13493_p1 = pmov %p13492_p0 }
 0x1f5   : > { %p13494_p13 = pmov %p13492_p0 }
 0x1f6   : > { %11588 = vsyncadd (%p13493_p1), [#allocation3], 4294967280 }
 0x1f7   : > { %11590 = dma.done.wait (%p13494_p13), [#allocation6], 32   ;;  %p13495_p2 = pmov %p13492_p0 }
 0x1f8   : > { %p13496_p3 = pmov %p13492_p0 }
 0x1f9   : > { %11592 = vsyncadd (%p13495_p2), [#allocation6], 4294967264 }
 0x1fa   : > { %11594 = dma.done.wait (%p13496_p3), [#allocation9], 32   ;;  %p13497_p12 = pmov %p13492_p0 }
 0x1fb   : > { %p13498_p9 = pmov %p13492_p0 }
 0x1fc   : > { %11596 = vsyncadd (%p13497_p12), [#allocation9], 4294967264 }
 0x1fd   : > { %11598 = dma.done.wait (%p13498_p9), [#allocation12], 32   ;;  %p13499_p4 = pmov %p13492_p0 }
 0x1fe   : > { %p13500_p5 = pmov %p13492_p0 }
 0x1ff   : > { %11600 = vsyncadd (%p13499_p4), [#allocation12], 4294967264 }
 0x200   : > { %11602 = dma.done.wait (%p13500_p5), [#allocation15], 32   ;;  %p13501_p6 = pmov %p13492_p0 }
 0x201   : > { %p13502_p10 = pmov %p13492_p0 }
 0x202   : > { %11604 = vsyncadd (%p13501_p6), [#allocation15], 4294967264 }
 0x203   : > { %11606 = dma.done.wait (%p13502_p10), [#allocation18], 32   ;;  %p13503_p7 = pmov %p13492_p0 }
 0x204   : > { %p13504_p8 = pmov %p13492_p0 }
 0x205   : > { %11608 = vsyncadd (%p13503_p7), [#allocation18], 4294967264 }
 0x206   : > { %11610 = dma.done.wait (%p13504_p8), [#allocation21], 32   ;;  %p13505_p11 = pmov %p13492_p0 }
 0x208   : > { %11612 = vsyncadd (%p13505_p11), [#allocation21], 4294967264 }
 0x209   : > { %11614 = dma.done.wait (%p13492_p0), [#allocation24], 32   ;;  %p13506_p1 = pmov %p13492_p0 }
 0x20a   : > { %p13507_p13 = pmov %p13492_p0 }
 0x20b   : > { %11616 = vsyncadd (%p13506_p1), [#allocation24], 4294967264 }
 0x20c   : > { %11618 = dma.done.wait (%p13507_p13), [#allocation27], 32   ;;  %p13508_p2 = pmov %p13492_p0 }
 0x20d   : > { %p13509_p3 = pmov %p13492_p0 }
 0x20e   : > { %11620 = vsyncadd (%p13508_p2), [#allocation27], 4294967264 }
 0x20f   : > { %11622 = dma.done.wait (%p13509_p3), [#allocation30], 32   ;;  %p13510_p12 = pmov %p13492_p0 }
 0x210   : > { %p13511_p9 = pmov %p13492_p0 }
 0x211   : > { %11624 = vsyncadd (%p13510_p12), [#allocation30], 4294967264 }
 0x212   : > { %11626 = dma.done.wait (%p13511_p9), [#allocation33], 32   ;;  %p13512_p4 = pmov %p13492_p0 }
 0x213   : > { %p13513_p5 = pmov %p13492_p0 }
 0x214   : > { %11628 = vsyncadd (%p13512_p4), [#allocation33], 4294967264 }
 0x215   : > { %11630 = dma.done.wait (%p13513_p5), [#allocation36], 32   ;;  %p13514_p6 = pmov %p13492_p0 }
 0x216   : > { %p13515_p10 = pmov %p13492_p0 }
 0x217   : > { %11632 = vsyncadd (%p13514_p6), [#allocation36], 4294967264 }
 0x218   : > { %11634 = dma.done.wait (%p13515_p10), [#allocation39], 32   ;;  %p13516_p7 = pmov %p13492_p0 }
 0x219   : > { %p13517_p8 = pmov %p13492_p0 }
 0x21a   : > { %11636 = vsyncadd (%p13516_p7), [#allocation39], 4294967264 }
 0x21b   : > { %11638 = dma.done.wait (%p13517_p8), [#allocation42], 32   ;;  %p13518_p11 = pmov %p13492_p0 }
 0x21d   : > { %11640 = vsyncadd (%p13518_p11), [#allocation42], 4294967264 }
 0x21e   : > { %11642 = dma.done.wait (%p13492_p0), [#allocation45], 32   ;;  %p13519_p1 = pmov %p13492_p0 }
 0x21f   : > { %s13520_s28 = sld [smem:[#allocation64_spill]]  ;;  %p2386_p13 = scmp.lt.s32.totalorder %s12151_s7, 1  ;;  %vm2407_vm0 = vcmask 261120   ;;  %v11762_v8 = vmov 0.0   ;;  %vm11763_vm1 = vmmov 0   ;;  %vm2532_vm4 = vcmask 64512  }
 0x220   : > { %11644 = vsyncadd (%p13519_p1), [#allocation45], 4294967264  ;;  %s13521_s1 = sld [smem:[#allocation113_spill]]  ;;  %9716 = vmatprep.subr.mxu1 %v11762_v8  ;;  %9724 = vmatprep.mubr.msk.f32.mxu1 %vm11763_vm1, %v11762_v8  ;;  %v9352_v20 = vld [vmem:[#allocation23] ss:$0 sm:$0xff]  ;;  %s13376_s18 = smov 120   ;;  %v2609_v37 = vlaneseq }
 0x221   : > { %s12414_s4 = scalar_select %p2386_p13, %s12151_s7, 1  ;;  %9737 = vmatprep.subr.mxu0 %v11762_v8  ;;  %9739 = vmatprep.mubr.msk.f32.mxu0 %vm11763_vm1, %v11762_v8  ;;  %v9353_v23 = vld [vmem:[#allocation25] ss:$0 sm:$0xff]  ;;  %v9354_v26 = vld [vmem:[#allocation31] ss:$0 sm:$0xff]  ;;  %v11771_v41 = vmov 0  }
 0x222   : > { %s13378_s10 = smov 96   ;;  %s13380_s15 = smov 88   ;;  %v2610_v39 = vshrl.u32 %v2609_v37, 7  ;;  %vm3216_vm7 = vcmask 130048   ;;  %vm3218_vm8 = vcmask 195584   ;;  %vm3441_vm11 = vcmask 523264  }
 0x223   : > { %s12417_s2 = sshll.u32 %s12414_s4, 3  ;;  %s13374_s16 = smov 80  }
 0x224   : > { %s13372_s19 = smov 112   ;;  %s13370_s23 = smov 72   ;;  %v2611_v40 = vsub.s32 0, %v2610_v39 }
 0x225   : > { %s2389_s11 = scalar_lea.vmem %s13520_s28, %s12417_s2  ;;  %s13366_s3 = smov 104  }
 0x226   : > { %s13522_s26 = smov %s13521_s1  ;;  %v12421_v0 = vld [vmem:[%s2389_s11] sm:$0xff]  ;;  %v2447_v7 = vld [vmem:[%s13521_s1 + $0x18] sm:$0xff]  ;;  %s13523_s28 = sld [smem:[#allocation66_spill]] }
 0x227   : > { %v2408_v1 = vsel %vm2407_vm0, %v12421_v0, 0.0  ;;  %v2446_v9 = vld [vmem:[%s13522_s26 + $0x10] sm:$0xff]  ;;  %9717 = vmatpush3.msra.mxu1 %v2447_v7  ;;  %v2445_v10 = vld [vmem:[%s13522_s26 + $0x8] sm:$0xff]  ;;  %v2444_v11 = vld [vmem:[%s13522_s26] sm:$0xff]  ;;  %s13358_s11 = smov 48   ;;  %s13542_s6 = sld [smem:[#allocation81_spill]] }
 0x228   : > { %2409 = vadd.xlane.f32.xlu0 %v2408_v1  ;;  %9718 = vmatprep.subr.mxu1 %v11762_v8  ;;  %s13547_s9 = smov 120   ;;  %s13551_s12 = sld [smem:[#allocation67_spill]] }
 0x229   : > { %9719 = vmatpush3.msra.mxu1 %v2446_v9  ;;  %s13564_s14 = sld [smem:[#allocation71_spill]]  ;;  %p13578_p3 = scmp.ne.s32.totalorder %s13463_s22, 0 }
 0x22a   : > { %9720 = vmatprep.subr.mxu1 %v11762_v8 }
 0x22b   : > { %9721 = vmatpush3.msra.mxu1 %v2445_v10 }
 0x22c   : > { %9722 = vmatprep.subr.mxu1 %v11762_v8  ;;  %s2396_s1 = scalar_lea.vmem %s13523_s28, %s12414_s4  ;;  %s13362_s4 = smov 64  }
 0x22d   : > { %9723 = vmatpush3.msra.mxu1 %v2444_v11  ;;  %v2403_v38 = vld [vmem:[%s2396_s1] sm:$0x1]  ;;  %s13360_s28 = smov 40   ;;  %s13356_s1 = smov 56  }
 0x22e   : > { %9727 = vmatprep.subr.mxu1 %v11762_v8  ;;  %vm2528_vm5 = vcmp.gt.f32.partialorder %v2403_v38, 0.5  ;;  %s2400_s13 = scalar_lea.vmem %s13551_s12, %s12417_s2  ;;  %s13553_s12 = sld [smem:[#allocation78_spill]] }
 0x22f   : > { %v2608_v42 = vsel %vm2528_vm5, 1, %v11771_v41 }
 0x230   : > { %v12483_v43 = vrot.slane %v2608_v42, %v2611_v40 }
 0x232   : > { %vm2613_vm6 = vcmp.eq.s32.totalorder %v12483_v43, 1 }
 0x2b1   : > { %v2410_v2 = vpop.xlane.xlu0 %2409 }
 0x2b2   : > { %v2412_v3 = vmul.f32 0.03125, %v2410_v2 }
 0x2b4   : > { %v2413_v4 = vsub.f32 %v12421_v0, %v2412_v3 }
 0x2b6   : > { %v2414_v5 = vmul.f32 %v2413_v4, %v2413_v4  ;;  %v2435_v21 = vmul.f32 %v9352_v20, %v2413_v4 }
 0x2b8   : > { %v2415_v6 = vsel %vm2407_vm0, %v2414_v5, 0.0 }
 0x2b9   : > { %2416 = vadd.xlane.f32.xlu0 %v2415_v6 }
 0x342   : > { %v2417_v12 = vpop.xlane.xlu0 %2416 }
 0x343   : > { %v2419_v13 = vmul.f32 0.032258064, %v2417_v12 }
 0x345   : > { %10645 = vrsqrt.f32 %v2419_v13  ;;  %vm2422_vm2 = vcmp.eq.f32.partialorder %v2419_v13, inf  ;;  %v2425_v16 = vand.u32 2147483648, %v2419_v13  ;;  %vm2424_vm3 = vcmp.eq.f32.partialorder %v2419_v13, 0.0 }
 0x352   : > { %v10646_v14 = vpop.eup %10645 }
 0x353   : > { %v2421_v15 = vmul.f32 %v10646_v14, %v2419_v13 }
 0x355   : > { %v2423_v17 = vsel %vm2422_vm2, %v2419_v13, %v2421_v15 }
 0x356   : > { %v2426_v18 = vsel %vm2424_vm3, %v2425_v16, %v2423_v17 }
 0x357   : > { %v2427_v19 = vadd.f32 1e-06, %v2426_v18 }
 0x359   : > { %10647 = vrcp.f32 %v2427_v19 }
 0x366   : > { %v10648_v22 = vpop.eup %10647 }
 0x367   : > { %v2436_v24 = vmul.f32 %v10648_v22, %v2435_v21 }
 0x369   : > { %v2443_v25 = vadd.f32 %v9353_v23, %v2436_v24 }
 0x36b   : > { %9725 = vmatmul.mubr.msk.f32.vlgmr.msra.gmra.mxu1 %vm2407_vm0, %v2443_v25 }
 0x36c   : > { %9729 = vmatprep.mubr.msk.f32.mxu1 %vm11763_vm1, %v11762_v8 }
 0x42b   : > { %v2524_v27 = vpop.f32.mrf.mxu1 }
 0x42c   : > { %v12444_v28 = vadd.f32 %v9354_v26, %v2524_v27 }
 0x42d   : > { %v9726_v29 = vpop.f32.mrf.mxu1 }
 0x42e   : > { %2702 = vrot.lane.b32.xlu0 %v12444_v28, %s13376_s18  ;;  %2530 = vrot.lane.b32.xlu1 %v12444_v28, %s13378_s10 }
 0x432   : > { %2704 = vrot.lane.b32.xlu1 %v12444_v28, %s13380_s15 }
 0x436   : > { %2871 = vrot.lane.b32.xlu1 %v12444_v28, %s13374_s16 }
 0x43a   : > { %2869 = vrot.lane.b32.xlu1 %v12444_v28, %s13372_s19 }
 0x43e   : > { %3038 = vrot.lane.b32.xlu1 %v12444_v28, %s13370_s23 }
 0x442   : > { %3036 = vrot.lane.b32.xlu1 %v12444_v28, %s13366_s3 }
 0x4a0   : > { %v2531_v30 = vpop.permute.xlu1 %2530  ;;  %v2703_v32 = vpop.permute.xlu0 %2702 }
 0x4a1   : > { %9728 = vmatpush3.xpose.msk.msra.mxu1 %vm2532_vm4, %v2531_v30 }
 0x4a2   : > { %9732 = vmatprep.subr.mxu1 %v11762_v8 }
 0x4a4   : > { %9730 = vmatmul.mubr.msk.f32.vlgmr.msra.gmra.mxu1 %vm2532_vm4, %v12444_v28  ;;  %v2705_v31 = vpop.permute.xlu1 %2704 }
 0x4a5   : > { %9738 = vmatpush3.xpose.msk.msra.mxu0 %vm2532_vm4, %v2705_v31  ;;  %9734 = vmatprep.mubr.msk.f32.mxu1 %vm11763_vm1, %v11762_v8 }
 0x4a6   : > { %9747 = vmatprep.subr.mxu0 %v11762_v8 }
 0x4a8   : > { %9740 = vmatmul.mubr.msk.f32.vlgmr.msra.gmra.mxu0 %vm2532_vm4, %v2703_v32  ;;  %v2872_v33 = vpop.permute.xlu1 %2871 }
 0x4a9   : > { %9748 = vmatpush3.xpose.msk.msra.mxu0 %vm2532_vm4, %v2872_v33  ;;  %9749 = vmatprep.mubr.msk.f32.mxu0 %vm11763_vm1, %v11762_v8 }
 0x4aa   : > { %9757 = vmatprep.subr.mxu0 %v11762_v8 }
 0x4ac   : > { %v2870_v34 = vpop.permute.xlu1 %2869 }
 0x4ad   : > { %9750 = vmatmul.mubr.msk.f32.vlgmr.msra.gmra.mxu0 %vm2532_vm4, %v2870_v34 }
 0x4ae   : > { %9759 = vmatprep.mubr.msk.f32.mxu0 %vm11763_vm1, %v11762_v8 }
 0x4b0   : > { %v3039_v35 = vpop.permute.xlu1 %3038 }
 0x4b1   : > { %9758 = vmatpush3.xpose.msk.msra.mxu0 %vm2532_vm4, %v3039_v35 }
 0x4b2   : > { %9767 = vmatprep.subr.mxu0 %v11762_v8 }
 0x4b4   : > { %v3037_v36 = vpop.permute.xlu1 %3036 }
 0x4b5   : > { %9760 = vmatmul.mubr.msk.f32.vlgmr.msra.gmra.mxu0 %vm2532_vm4, %v3037_v36 }
 0x4b6   : > { %9775 = vmatprep.mubr.msk.f32.mxu0 %vm11763_vm1, %v11762_v8 }
 0x564   : > { %v2603_v44 = vpop.f32.mrf.mxu1 }
 0x565   : > { %v2607_v45 = vmul.f32 0.35355338, %v2603_v44 }
 0x566   : > { %v9731_v46 = vpop.f32.mrf.mxu1 }
 0x567   : > { %v2614_v47 = vsel %vm2613_vm6, %v2607_v45, -1e+09 }
 0x568   : > { %v2776_v48 = vpop.f32.mrf.mxu0  ;;  %v2615_v49 = vsel %vm2532_vm4, %v2614_v47, -inf }
 0x569   : > { %v2780_v50 = vmul.f32 0.35355338, %v2776_v48  ;;  %2616 = vmax.xlane.f32.xlu1 %v2615_v49 }
 0x56a   : > { %v9741_v51 = vpop.f32.mrf.mxu0 }
 0x56b   : > { %v2781_v52 = vsel %vm2613_vm6, %v2780_v50, -1e+09 }
 0x56c   : > { %v2782_v53 = vsel %vm2532_vm4, %v2781_v52, -inf }
 0x56d   : > { %2783 = vmax.xlane.f32.xlu0 %v2782_v53  ;;  %v2943_v54 = vpop.f32.mrf.mxu0 }
 0x56e   : > { %v2947_v55 = vmul.f32 0.35355338, %v2943_v54 }
 0x56f   : > { %v9751_v56 = vpop.f32.mrf.mxu0 }
 0x570   : > { %v2948_v57 = vsel %vm2613_vm6, %v2947_v55, -1e+09 }
 0x571   : > { %v2949_v58 = vsel %vm2532_vm4, %v2948_v57, -inf }
 0x572   : > { %2950 = vmax.xlane.f32.xlu1 %v2949_v58 }
 0x575   : > { %v3110_v59 = vpop.f32.mrf.mxu0 }
 0x576   : > { %v3114_v60 = vmul.f32 0.35355338, %v3110_v59 }
 0x577   : > { %v9761_v61 = vpop.f32.mrf.mxu0 }
 0x578   : > { %v3115_v62 = vsel %vm2613_vm6, %v3114_v60, -1e+09 }
 0x579   : > { %v3116_v63 = vsel %vm2532_vm4, %v3115_v62, -inf }
 0x57a   : > { %3117 = vmax.xlane.f32.xlu0 %v3116_v63 }
 0x583   : > { %2626 = vrot.lane.b32.xlu1 %v12444_v28, %s13362_s4  ;;  %s13368_s4 = smov 24  }
 0x5f2   : > { %v2617_v1 = vpop.xlane.xlu1 %2616 }
 0x5f3   : > { %v2618_v2 = vsub.f32 %v2614_v47, %v2617_v1 }
 0x5f5   : > { %v2619_v3 = vmul.f32 1.442695, %v2618_v2 }
 0x5f6   : > { %v2784_v4 = vpop.xlane.xlu0 %2783 }
 0x5f7   : > { %10649 = vpow2.f32 %v2619_v3  ;;  %v2785_v5 = vsub.f32 %v2781_v52, %v2784_v4 }
 0x5f9   : > { %v2786_v6 = vmul.f32 1.442695, %v2785_v5 }
 0x5fb   : > { %10651 = vpow2.f32 %v2786_v6  ;;  %v2951_v7 = vpop.xlane.xlu1 %2950 }
 0x5fc   : > { %v2952_v9 = vsub.f32 %v2948_v57, %v2951_v7  ;;  %v9368_v57 = vld [vmem:[#allocation29] ss:$0 sm:$0xff] }
 0x5fe   : > { %v2953_v10 = vmul.f32 1.442695, %v2952_v9 }
 0x5ff   : > { %v2627_v11 = vpop.permute.xlu1 %2626 }
 0x600   : > { %10653 = vpow2.f32 %v2953_v10  ;;  %9733 = vmatpush3.msra.mxu1 %v2627_v11 }
 0x601   : > { %9742 = vmatprep.subr.mxu1 %v11762_v8 }
 0x603   : > { %v3118_v12 = vpop.xlane.xlu0 %3117 }
 0x604   : > { %v10650_v13 = vpop.eup %10649  ;;  %v3119_v14 = vsub.f32 %v3115_v62, %v3118_v12 }
 0x605   : > { %v2621_v15 = vsel %vm2532_vm4, %v10650_v13, 0.0 }
 0x606   : > { %v3120_v16 = vmul.f32 1.442695, %v3119_v14  ;;  %2622 = vadd.xlane.f32.xlu1 %v2621_v15 }
 0x608   : > { %v10652_v17 = vpop.eup %10651  ;;  %10655 = vpow2.f32 %v3120_v16 }
 0x609   : > { %v2788_v18 = vsel %vm2532_vm4, %v10652_v17, 0.0 }
 0x60a   : > { %2789 = vadd.xlane.f32.xlu0 %v2788_v18 }
 0x60d   : > { %v10654_v19 = vpop.eup %10653 }
 0x60e   : > { %v2955_v20 = vsel %vm2532_vm4, %v10654_v19, 0.0 }
 0x60f   : > { %2956 = vadd.xlane.f32.xlu1 %v2955_v20 }
 0x615   : > { %v10656_v21 = vpop.eup %10655 }
 0x616   : > { %v3122_v22 = vsel %vm2532_vm4, %v10656_v21, 0.0 }
 0x617   : > { %3123 = vadd.xlane.f32.xlu0 %v3122_v22  ;;  %v9370_v22 = vld [vmem:[#allocation26] ss:$0 sm:$0xff] }
 0x620   : > { %2960 = vrot.lane.b32.xlu1 %v12444_v28, %s13358_s11 }
 0x624   : > { %3127 = vrot.lane.b32.xlu1 %v12444_v28, %s13360_s28  ;;  %s13364_s28 = smov 8  }
 0x62d   : > { %2793 = vrot.lane.b32.xlu0 %v12444_v28, %s13356_s1  ;;  %s13524_s1 = sld [smem:[#allocation111_spill]] }
 0x633   : > { %s13525_s11 = smov %s13524_s1  ;;  %v3223_v38 = vld [vmem:[%s13524_s1 + $0x18] sm:$0xff]  ;;  %s13382_s1 = smov 16  }
 0x634   : > { %v3222_v39 = vld [vmem:[%s13525_s11 + $0x10] sm:$0xff]  ;;  %9768 = vmatpush3.msra.mxu0 %v3223_v38  ;;  %v3221_v41 = vld [vmem:[%s13525_s11 + $0x8] sm:$0xff]  ;;  %v3220_v44 = vld [vmem:[%s13525_s11] sm:$0xff]  ;;  %s13550_s11 = smov 72  }
 0x635   : > { %9769 = vmatprep.subr.mxu0 %v11762_v8 }
 0x636   : > { %9770 = vmatpush3.msra.mxu0 %v3222_v39 }
 0x637   : > { %9771 = vmatprep.subr.mxu0 %v11762_v8 }
 0x638   : > { %9772 = vmatpush3.msra.mxu0 %v3221_v41 }
 0x639   : > { %9773 = vmatprep.subr.mxu0 %v11762_v8 }
 0x63a   : > { %9774 = vmatpush3.msra.mxu0 %v3220_v44 }
 0x63b   : > { %9789 = vmatprep.subr.mxu0 %v11762_v8 }
 0x68f   : > { %v2623_v23 = vpop.xlane.xlu1 %2622 }
 0x690   : > { %10657 = vrcp.f32 %v2623_v23 }
 0x693   : > { %v2790_v24 = vpop.xlane.xlu0 %2789 }
 0x694   : > { %10659 = vrcp.f32 %v2790_v24 }
 0x698   : > { %v2957_v25 = vpop.xlane.xlu1 %2956 }
 0x699   : > { %10661 = vrcp.f32 %v2957_v25  ;;  %v9371_v25 = vld [vmem:[#allocation28] ss:$0 sm:$0xff] }
 0x69c   : > { %v2961_v31 = vpop.permute.xlu1 %2960 }
 0x69d   : > { %v10658_v26 = vpop.eup %10657 }
 0x69e   : > { %v2625_v27 = vmul.f32 %v10658_v26, %v10650_v13 }
 0x6a0   : > { %v3124_v29 = vpop.xlane.xlu0 %3123  ;;  %9735 = vmatmul.mubr.msk.f32.vlgmr.msra.gmra.mxu1 %vm2532_vm4, %v2625_v27  ;;  %v3128_v35 = vpop.permute.xlu1 %3127 }
 0x6a1   : > { %v10660_v30 = vpop.eup %10659  ;;  %10663 = vrcp.f32 %v3124_v29  ;;  %9744 = vmatprep.mubr.msk.f32.mxu1 %vm11763_vm1, %v11762_v8 }
 0x6a2   : > { %v2792_v33 = vmul.f32 %v10660_v30, %v10652_v17 }
 0x6a4   : > { %v2794_v32 = vpop.permute.xlu0 %2793 }
 0x6a5   : > { %9743 = vmatpush3.msra.mxu1 %v2794_v32  ;;  %v9372_v32 = vld [vmem:[#allocation20] ss:$0 sm:$0xff] }
 0x6a6   : > { %v10662_v28 = vpop.eup %10661  ;;  %9745 = vmatmul.mubr.msk.f32.vlgmr.msra.gmra.mxu1 %vm2532_vm4, %v2792_v33  ;;  %9752 = vmatprep.subr.mxu1 %v11762_v8 }
 0x6a7   : > { %9753 = vmatpush3.msra.mxu1 %v2961_v31  ;;  %9754 = vmatprep.mubr.msk.f32.mxu1 %vm11763_vm1, %v11762_v8  ;;  %v2959_v34 = vmul.f32 %v10662_v28, %v10654_v19 }
 0x6a8   : > { %9762 = vmatprep.subr.mxu1 %v11762_v8 }
 0x6aa   : > { %9755 = vmatmul.mubr.msk.f32.vlgmr.msra.gmra.mxu1 %vm2532_vm4, %v2959_v34 }
 0x6ab   : > { %9763 = vmatpush3.msra.mxu1 %v3128_v35  ;;  %9764 = vmatprep.mubr.msk.f32.mxu1 %vm11763_vm1, %v11762_v8 }
 0x6ac   : > { %9778 = vmatprep.subr.mxu1 %v11762_v8 }
 0x6ae   : > { %v10664_v36 = vpop.eup %10663 }
 0x6af   : > { %v3126_v37 = vmul.f32 %v10664_v36, %v10656_v21  ;;  %v9374_v36 = vld [vmem:[#allocation22] ss:$0 sm:$0xff] }
 0x6b1   : > { %9765 = vmatmul.mubr.msk.f32.vlgmr.msra.gmra.mxu1 %vm2532_vm4, %v3126_v37 }
 0x6b2   : > { %9786 = vmatprep.mubr.msk.f32.mxu1 %vm11763_vm1, %v11762_v8 }
 0x760   : > { %v2698_v40 = vpop.f32.mrf.mxu1 }
 0x762   : > { %v9736_v42 = vpop.f32.mrf.mxu1 }
 0x766   : > { %v2865_v45 = vpop.f32.mrf.mxu1 }
 0x767   : > { %3204 = vrot.lane.b32.xlu0 %v2865_v45, %s13364_s28  ;;  %s13526_s28 = sld [smem:[#allocation104_spill]] }
 0x768   : > { %v9746_v46 = vpop.f32.mrf.mxu1 }
 0x76a   : > { %v3032_v47 = vpop.f32.mrf.mxu1 }
 0x76b   : > { %3208 = vrot.lane.b32.xlu1 %v3032_v47, %s13382_s1  ;;  %s13536_s1 = smov 8  }
 0x76c   : > { %v9756_v48 = vpop.f32.mrf.mxu1 }
 0x76d   : > { %s13527_s3 = smov %s13526_s28  ;;  %v3344_v5 = vld [vmem:[%s13526_s28 + $0x18] sm:$0xff]  ;;  %s13529_s28 = smov 104  }
 0x76e   : > { %v3343_v6 = vld [vmem:[%s13527_s3 + $0x10] sm:$0xff]  ;;  %9779 = vmatpush3.msra.mxu1 %v3344_v5  ;;  %v3341_v7 = vld [vmem:[%s13527_s3] sm:$0xff]  ;;  %v3555_v48 = vld [vmem:[%s13457_s8 + $0x18] sm:$0xff] }
 0x76f   : > { %9780 = vmatprep.subr.mxu1 %v11762_v8 }
 0x770   : > { %9781 = vmatpush3.msra.mxu1 %v3343_v6 }
 0x771   : > { %v3199_v49 = vpop.f32.mrf.mxu1  ;;  %9782 = vmatprep.subr.mxu1 %v11762_v8 }
 0x772   : > { %3212 = vrot.lane.b32.xlu0 %v3199_v49, %s13368_s4  ;;  %s13528_s4 = sld [smem:[#allocation105_spill]]  ;;  %v3554_v49 = vld [vmem:[%s13457_s8 + $0x10] sm:$0xff] }
 0x773   : > { %v9766_v50 = vpop.f32.mrf.mxu1 }
 0x774   : > { %v3553_v50 = vld [vmem:[%s13457_s8 + $0x8] sm:$0xff] }
 0x778   : > { %v3433_v9 = vld [vmem:[%s13528_s4 + $0x38] sm:$0xff]  ;;  %v3432_v10 = vld [vmem:[%s13528_s4 + $0x30] sm:$0xff]  ;;  %v3431_v11 = vld [vmem:[%s13528_s4 + $0x28] sm:$0xff] }
 0x779   : > { %v3430_v12 = vld [vmem:[%s13528_s4 + $0x20] sm:$0xff]  ;;  %v3429_v13 = vld [vmem:[%s13528_s4 + $0x18] sm:$0xff]  ;;  %v3428_v29 = vld [vmem:[%s13528_s4 + $0x10] sm:$0xff] }
 0x77a   : > { %v3427_v30 = vld [vmem:[%s13528_s4 + $0x8] sm:$0xff]  ;;  %v3426_v31 = vld [vmem:[%s13528_s4] sm:$0xff]  ;;  %s13538_s4 = smov 24  }
 0x7d9   : > { %v3205_v51 = vpop.permute.xlu0 %3204 }
 0x7da   : > { %v3215_v53 = vsel %vm2532_vm4, %v2698_v40, %v3205_v51  ;;  %v3552_v51 = vld [vmem:[%s13457_s8] sm:$0xff]  ;;  %s13543_s8 = sld [smem:[#allocation73_spill]] }
 0x7dd   : > { %v3209_v52 = vpop.permute.xlu1 %3208 }
 0x7de   : > { %v3217_v54 = vsel %vm3216_vm7, %v3215_v53, %v3209_v52 }
 0x7e4   : > { %v3213_v55 = vpop.permute.xlu0 %3212 }
 0x7e5   : > { %v3219_v56 = vsel %vm3218_vm8, %v3217_v54, %v3213_v55 }
 0x7e6   : > { %9776 = vmatmul.mubr.msk.f32.vlgmr.msra.gmra.mxu0 %vm2407_vm0, %v3219_v56 }
 0x7e7   : > { %9805 = vmatprep.mubr.msk.f32.mxu0 %vm11763_vm1, %v11762_v8  ;;  %9790 = vmatpush3.msra.mxu0 %v3433_v9 }
 0x7e8   : > { %9791 = vmatprep.subr.mxu0 %v11762_v8 }
 0x7e9   : > { %9792 = vmatpush3.msra.mxu0 %v3432_v10 }
 0x7ea   : > { %9793 = vmatprep.subr.mxu0 %v11762_v8 }
 0x7eb   : > { %9794 = vmatpush3.msra.mxu0 %v3431_v11 }
 0x7ec   : > { %9795 = vmatprep.subr.mxu0 %v11762_v8 }
 0x7ed   : > { %9796 = vmatpush3.msra.mxu0 %v3430_v12 }
 0x7ee   : > { %9797 = vmatprep.subr.mxu0 %v11762_v8 }
 0x7ef   : > { %9798 = vmatpush3.msra.mxu0 %v3429_v13 }
 0x7f0   : > { %9799 = vmatprep.subr.mxu0 %v11762_v8 }
 0x7f1   : > { %9800 = vmatpush3.msra.mxu0 %v3428_v29 }
 0x7f2   : > { %9801 = vmatprep.subr.mxu0 %v11762_v8 }
 0x7f3   : > { %9802 = vmatpush3.msra.mxu0 %v3427_v30 }
 0x7f4   : > { %9803 = vmatprep.subr.mxu0 %v11762_v8 }
 0x7f5   : > { %9804 = vmatpush3.msra.mxu0 %v3426_v31 }
 0x7f6   : > { %9829 = vmatprep.subr.mxu0 %v11762_v8 }
 0x8a6   : > { %v3300_v58 = vpop.f32.mrf.mxu0 }
 0x8a7   : > { %v3301_v59 = vadd.f32 %v9368_v57, %v3300_v58 }
 0x8a8   : > { %v9777_v60 = vpop.f32.mrf.mxu0 }
 0x8a9   : > { %v12544_v61 = vadd.f32 %v3301_v59, %v12421_v0  ;;  %v3342_v0 = vld [vmem:[%s13527_s3 + $0x8] sm:$0xff]  ;;  %s13537_s3 = smov 16  }
 0x8aa   : > { %9783 = vmatpush3.msra.mxu1 %v3342_v0  ;;  %v9376_v60 = vld [vmem:[#allocation35] ss:$0 sm:$0xff] }
 0x8ab   : > { %v3307_v62 = vsel %vm2407_vm0, %v12544_v61, 0.0  ;;  %9784 = vmatprep.subr.mxu1 %v11762_v8 }
 0x8ac   : > { %3308 = vadd.xlane.f32.xlu1 %v3307_v62  ;;  %9785 = vmatpush3.msra.mxu1 %v3341_v7 }
 0x8ad   : > { %9808 = vmatprep.subr.mxu1 %v11762_v8 }
 0x935   : > { %v3309_v63 = vpop.xlane.xlu1 %3308 }
 0x936   : > { %v3310_v1 = vmul.f32 0.03125, %v3309_v63  ;;  %v9377_v63 = vld [vmem:[#allocation37] ss:$0 sm:$0xff] }
 0x938   : > { %v3311_v2 = vsub.f32 %v12544_v61, %v3310_v1 }
 0x93a   : > { %v3312_v3 = vmul.f32 %v3311_v2, %v3311_v2  ;;  %v3332_v23 = vmul.f32 %v9370_v22, %v3311_v2 }
 0x93c   : > { %v3313_v4 = vsel %vm2407_vm0, %v3312_v3, 0.0  ;;  %v9378_v3 = vld [vmem:[#allocation43] ss:$0 sm:$0xff] }
 0x93d   : > { %3314 = vadd.xlane.f32.xlu0 %v3313_v4 }
 0x9c6   : > { %v3315_v14 = vpop.xlane.xlu0 %3314 }
 0x9c7   : > { %v3316_v15 = vmul.f32 0.032258064, %v3315_v14 }
 0x9c9   : > { %10665 = vrsqrt.f32 %v3316_v15  ;;  %vm3319_vm9 = vcmp.eq.f32.partialorder %v3316_v15, inf  ;;  %v3322_v18 = vand.u32 2147483648, %v3316_v15  ;;  %vm3321_vm10 = vcmp.eq.f32.partialorder %v3316_v15, 0.0 }
 0x9d6   : > { %v10666_v16 = vpop.eup %10665 }
 0x9d7   : > { %v3318_v17 = vmul.f32 %v10666_v16, %v3316_v15 }
 0x9d9   : > { %v3320_v19 = vsel %vm3319_vm9, %v3316_v15, %v3318_v17 }
 0x9da   : > { %v3323_v20 = vsel %vm3321_vm10, %v3322_v18, %v3320_v19 }
 0x9db   : > { %v3324_v21 = vadd.f32 1e-06, %v3323_v20 }
 0x9dd   : > { %10667 = vrcp.f32 %v3324_v21 }
 0x9ea   : > { %v10668_v24 = vpop.eup %10667 }
 0x9eb   : > { %v3333_v26 = vmul.f32 %v10668_v24, %v3332_v23 }
 0x9ed   : > { %v3340_v27 = vadd.f32 %v9371_v25, %v3333_v26 }
 0x9ef   : > { %9787 = vmatmul.mubr.msk.f32.vlgmr.msra.gmra.mxu1 %vm2407_vm0, %v3340_v27 }
 0x9f0   : > { %9816 = vmatprep.mubr.msk.f32.mxu1 %vm11763_vm1, %v11762_v8  ;;  %9809 = vmatpush3.msra.mxu1 %v3555_v48 }
 0x9f1   : > { %9810 = vmatprep.subr.mxu1 %v11762_v8 }
 0x9f2   : > { %9811 = vmatpush3.msra.mxu1 %v3554_v49 }
 0x9f3   : > { %9812 = vmatprep.subr.mxu1 %v11762_v8 }
 0x9f4   : > { %9813 = vmatpush3.msra.mxu1 %v3553_v50 }
 0x9f5   : > { %9814 = vmatprep.subr.mxu1 %v11762_v8 }
 0x9f6   : > { %9815 = vmatpush3.msra.mxu1 %v3552_v51 }
 0x9f7   : > { %9819 = vmatprep.subr.mxu1 %v11762_v8 }
 0xaaf   : > { %v3421_v33 = vpop.f32.mrf.mxu1 }
 0xab0   : > { %v3422_v28 = vadd.f32 %v9372_v32, %v3421_v33 }
 0xab1   : > { %v9788_v34 = vpop.f32.mrf.mxu1 }
 0xab2   : > { %v3425_v35 = vmax.f32 %v3422_v28, 0.0 }
 0xab4   : > { %9806 = vmatmul.mubr.msk.f32.vlgmr.msra.gmra.mxu0 %vm3441_vm11, %v3425_v35 }
 0xab5   : > { %9831 = vmatprep.mubr.msk.f32.mxu0 %vm11763_vm1, %v11762_v8 }
 0xb74   : > { %v3511_v37 = vpop.f32.mrf.mxu0 }
 0xb75   : > { %v3512_v38 = vadd.f32 %v9374_v36, %v3511_v37 }
 0xb76   : > { %v9807_v39 = vpop.f32.mrf.mxu0 }
 0xb77   : > { %v12581_v40 = vadd.f32 %v3512_v38, %v12544_v61 }
 0xb79   : > { %v3518_v41 = vsel %vm2407_vm0, %v12581_v40, 0.0 }
 0xb7a   : > { %3519 = vadd.xlane.f32.xlu0 %v3518_v41 }
 0xc03   : > { %v3520_v42 = vpop.xlane.xlu0 %3519 }
 0xc04   : > { %v3521_v44 = vmul.f32 0.03125, %v3520_v42 }
 0xc06   : > { %v3522_v45 = vsub.f32 %v12581_v40, %v3521_v44 }
 0xc08   : > { %v3523_v46 = vmul.f32 %v3522_v45, %v3522_v45  ;;  %v3543_v61 = vmul.f32 %v9376_v60, %v3522_v45 }
 0xc0a   : > { %v3524_v47 = vsel %vm2407_vm0, %v3523_v46, 0.0 }
 0xc0b   : > { %3525 = vadd.xlane.f32.xlu1 %v3524_v47 }
 0xc94   : > { %v3526_v52 = vpop.xlane.xlu1 %3525 }
 0xc95   : > { %v3527_v53 = vmul.f32 0.032258064, %v3526_v52 }
 0xc97   : > { %10669 = vrsqrt.f32 %v3527_v53  ;;  %vm3530_vm12 = vcmp.eq.f32.partialorder %v3527_v53, inf  ;;  %v3533_v56 = vand.u32 2147483648, %v3527_v53  ;;  %vm3532_vm13 = vcmp.eq.f32.partialorder %v3527_v53, 0.0 }
 0xca4   : > { %v10670_v54 = vpop.eup %10669 }
 0xca5   : > { %v3529_v55 = vmul.f32 %v10670_v54, %v3527_v53 }
 0xca7   : > { %v3531_v57 = vsel %vm3530_vm12, %v3527_v53, %v3529_v55 }
 0xca8   : > { %v3534_v58 = vsel %vm3532_vm13, %v3533_v56, %v3531_v57 }
 0xca9   : > { %v3535_v59 = vadd.f32 1e-06, %v3534_v58 }
 0xcab   : > { %10671 = vrcp.f32 %v3535_v59 }
 0xcb8   : > { %v10672_v62 = vpop.eup %10671 }
 0xcb9   : > { %v3544_v1 = vmul.f32 %v10672_v62, %v3543_v61 }
 0xcbb   : > { %v3551_v2 = vadd.f32 %v9377_v63, %v3544_v1 }
 0xcbd   : > { %9817 = vmatmul.mubr.msk.f32.vlgmr.msra.gmra.mxu1 %vm2407_vm0, %v3551_v2 }
 0xcbe   : > { %9821 = vmatprep.mubr.msk.f32.mxu1 %vm11763_vm1, %v11762_v8 }
 0xd7d   : > { %v3632_v4 = vpop.f32.mrf.mxu1 }
 0xd7e   : > { %v12598_v5 = vadd.f32 %v9378_v3, %v3632_v4 }
 0xd7f   : > { %v9818_v6 = vpop.f32.mrf.mxu1 }
 0xd80   : > { %3804 = vrot.lane.b32.xlu1 %v12598_v5, %s13380_s15  ;;  %3637 = vrot.lane.b32.xlu0 %v12598_v5, %s13378_s10  ;;  %s13534_s10 = sld [smem:[#allocation121_spill]] }
 0xd81   : > { %s13535_s15 = sld [smem:[#allocation65_spill]] }
 0xd84   : > { %3802 = vrot.lane.b32.xlu1 %v12598_v5, %s13376_s18  ;;  %3971 = vrot.lane.b32.xlu0 %v12598_v5, %s13374_s16  ;;  %s13532_s16 = smov 40   ;;  %s13533_s18 = smov 56  }
 0xd87   : > { %s2393_s5 = scalar_lea.vmem %s13535_s15, %s12417_s2  ;;  %s13540_s15 = sld [smem:[#allocation117_spill]] }
 0xd88   : > { %3969 = vrot.lane.b32.xlu1 %v12598_v5, %s13372_s19  ;;  %4138 = vrot.lane.b32.xlu0 %v12598_v5, %s13370_s23  ;;  %s13530_s23 = smov 64   ;;  %s13531_s19 = smov 48  }
 0xd89   : > { %s13554_s2 = sld [smem:[#allocation85_spill]] }
 0xd8c   : > { %4136 = vrot.lane.b32.xlu1 %v12598_v5, %s13529_s28 }
 0xdf2   : > { %v3805_v0 = vpop.permute.xlu1 %3804  ;;  %v3638_v7 = vpop.permute.xlu0 %3637 }
 0xdf3   : > { %9820 = vmatpush3.xpose.msk.msra.mxu1 %vm2532_vm4, %v3638_v7  ;;  %9830 = vmatpush3.xpose.msk.msra.mxu0 %vm2532_vm4, %v3805_v0 }
 0xdf4   : > { %9839 = vmatprep.subr.mxu0 %v11762_v8  ;;  %9824 = vmatprep.subr.mxu1 %v11762_v8 }
 0xdf6   : > { %v3803_v9 = vpop.permute.xlu1 %3802  ;;  %9822 = vmatmul.mubr.msk.f32.vlgmr.msra.gmra.mxu1 %vm2532_vm4, %v12598_v5  ;;  %v3972_v10 = vpop.permute.xlu0 %3971 }
 0xdf7   : > { %9832 = vmatmul.mubr.msk.f32.vlgmr.msra.gmra.mxu0 %vm2532_vm4, %v3803_v9  ;;  %9826 = vmatprep.mubr.msk.f32.mxu1 %vm11763_vm1, %v11762_v8  ;;  %v4321_v9 = vld [vmem:[%s13534_s10 + $0x18] sm:$0xff] }
 0xdf8   : > { %9840 = vmatpush3.xpose.msk.msra.mxu0 %vm2532_vm4, %v3972_v10  ;;  %9841 = vmatprep.mubr.msk.f32.mxu0 %vm11763_vm1, %v11762_v8  ;;  %v4320_v10 = vld [vmem:[%s13534_s10 + $0x10] sm:$0xff] }
 0xdf9   : > { %9849 = vmatprep.subr.mxu0 %v11762_v8 }
 0xdfa   : > { %v3970_v11 = vpop.permute.xlu1 %3969  ;;  %v4139_v12 = vpop.permute.xlu0 %4138 }
 0xdfb   : > { %9842 = vmatmul.mubr.msk.f32.vlgmr.msra.gmra.mxu0 %vm2532_vm4, %v3970_v11  ;;  %v4319_v11 = vld [vmem:[%s13534_s10 + $0x8] sm:$0xff] }
 0xdfc   : > { %9850 = vmatpush3.xpose.msk.msra.mxu0 %vm2532_vm4, %v4139_v12  ;;  %9851 = vmatprep.mubr.msk.f32.mxu0 %vm11763_vm1, %v11762_v8 }
 0xdfd   : > { %9859 = vmatprep.subr.mxu0 %v11762_v8 }
 0xdfe   : > { %v4137_v13 = vpop.permute.xlu1 %4136 }
 0xdff   : > { %9852 = vmatmul.mubr.msk.f32.vlgmr.msra.gmra.mxu0 %vm2532_vm4, %v4137_v13  ;;  %v4318_v13 = vld [vmem:[%s13534_s10] sm:$0xff]  ;;  %s13548_s10 = smov 80  }
 0xe00   : > { %9867 = vmatprep.mubr.msk.f32.mxu0 %vm11763_vm1, %v11762_v8  ;;  %9860 = vmatpush3.msra.mxu0 %v4321_v9 }
 0xe01   : > { %9861 = vmatprep.subr.mxu0 %v11762_v8 }
 0xe02   : > { %9862 = vmatpush3.msra.mxu0 %v4320_v10 }
 0xe03   : > { %9863 = vmatprep.subr.mxu0 %v11762_v8 }
 0xe04   : > { %9864 = vmatpush3.msra.mxu0 %v4319_v11  ;;  %v9395_v11 = vld [vmem:[#allocation40] ss:$0 sm:$0xff] }
 0xe05   : > { %9865 = vmatprep.subr.mxu0 %v11762_v8 }
 0xe06   : > { %9866 = vmatpush3.msra.mxu0 %v4318_v13 }
 0xe07   : > { %9881 = vmatprep.subr.mxu0 %v11762_v8 }
 0xeb6   : > { %v3709_v14 = vpop.f32.mrf.mxu1 }
 0xeb7   : > { %v3713_v15 = vmul.f32 0.35355338, %v3709_v14  ;;  %v3876_v16 = vpop.f32.mrf.mxu0 }
 0xeb8   : > { %v3880_v17 = vmul.f32 0.35355338, %v3876_v16  ;;  %v9823_v18 = vpop.f32.mrf.mxu1 }
 0xeb9   : > { %v9833_v19 = vpop.f32.mrf.mxu0  ;;  %v3714_v20 = vsel %vm2613_vm6, %v3713_v15, -1e+09 }
 0xeba   : > { %v3715_v21 = vsel %vm2532_vm4, %v3714_v20, -inf  ;;  %v3881_v22 = vsel %vm2613_vm6, %v3880_v17, -1e+09 }
 0xebb   : > { %v4043_v23 = vpop.f32.mrf.mxu0  ;;  %3716 = vmax.xlane.f32.xlu0 %v3715_v21  ;;  %v3882_v24 = vsel %vm2532_vm4, %v3881_v22, -inf  ;;  %v12688_v21 = vld [vmem:[%s2393_s5] sm:$0xff]  ;;  %s13539_s5 = sld [smem:[#allocation116_spill]] }
 0xebc   : > { %v4047_v25 = vmul.f32 0.35355338, %v4043_v23  ;;  %3883 = vmax.xlane.f32.xlu1 %v3882_v24 }
 0xebd   : > { %v9843_v26 = vpop.f32.mrf.mxu0 }
 0xebe   : > { %v4048_v27 = vsel %vm2613_vm6, %v4047_v25, -1e+09 }
 0xebf   : > { %v4210_v29 = vpop.f32.mrf.mxu0  ;;  %v4049_v30 = vsel %vm2532_vm4, %v4048_v27, -inf }
 0xec0   : > { %v4214_v31 = vmul.f32 0.35355338, %v4210_v29  ;;  %4050 = vmax.xlane.f32.xlu0 %v4049_v30 }
 0xec1   : > { %v9853_v32 = vpop.f32.mrf.mxu0 }
 0xec2   : > { %v4215_v33 = vsel %vm2613_vm6, %v4214_v31, -1e+09  ;;  %v9392_v32 = vld [vmem:[#allocation41] ss:$0 sm:$0xff] }
 0xec3   : > { %v4216_v28 = vsel %vm2532_vm4, %v4215_v33, -inf }
 0xec4   : > { %4217 = vmax.xlane.f32.xlu0 %v4216_v28 }
 0xecd   : > { %3726 = vrot.lane.b32.xlu1 %v12598_v5, %s13530_s23 }
 0xf44   : > { %v3717_v34 = vpop.xlane.xlu0 %3716 }
 0xf45   : > { %v3718_v35 = vsub.f32 %v3714_v20, %v3717_v34  ;;  %v3884_v36 = vpop.xlane.xlu1 %3883 }
 0xf46   : > { %v3885_v37 = vsub.f32 %v3881_v22, %v3884_v36  ;;  %v4651_v22 = vsel %vm2407_vm0, %v12688_v21, 0.0 }
 0xf47   : > { %v3719_v38 = vmul.f32 1.442695, %v3718_v35 }
 0xf48   : > { %v3886_v39 = vmul.f32 1.442695, %v3885_v37 }
 0xf49   : > { %10673 = vpow2.f32 %v3719_v38  ;;  %v3727_v41 = vpop.permute.xlu1 %3726  ;;  %v4051_v42 = vpop.xlane.xlu0 %4050 }
 0xf4a   : > { %10675 = vpow2.f32 %v3886_v39  ;;  %v4052_v44 = vsub.f32 %v4048_v27, %v4051_v42  ;;  %9825 = vmatpush3.msra.mxu1 %v3727_v41 }
 0xf4b   : > { %9834 = vmatprep.subr.mxu1 %v11762_v8 }
 0xf4c   : > { %v4053_v45 = vmul.f32 1.442695, %v4052_v44 }
 0xf4d   : > { %v4218_v46 = vpop.xlane.xlu0 %4217 }
 0xf4e   : > { %10677 = vpow2.f32 %v4053_v45  ;;  %v4219_v47 = vsub.f32 %v4215_v33, %v4218_v46  ;;  %v4442_v46 = vld [vmem:[%s13539_s5 + $0x18] sm:$0xff] }
 0xf50   : > { %v4220_v48 = vmul.f32 1.442695, %v4219_v47  ;;  %v4441_v47 = vld [vmem:[%s13539_s5 + $0x10] sm:$0xff] }
 0xf52   : > { %10679 = vpow2.f32 %v4220_v48  ;;  %v4440_v48 = vld [vmem:[%s13539_s5 + $0x8] sm:$0xff] }
 0xf56   : > { %v10674_v49 = vpop.eup %10673 }
 0xf57   : > { %v10676_v50 = vpop.eup %10675  ;;  %v3721_v51 = vsel %vm2532_vm4, %v10674_v49, 0.0 }
 0xf58   : > { %3722 = vadd.xlane.f32.xlu1 %v3721_v51  ;;  %v3888_v52 = vsel %vm2532_vm4, %v10676_v50, 0.0  ;;  %v4530_v51 = vld [vmem:[%s13540_s15 + $0x30] sm:$0xff] }
 0xf59   : > { %3889 = vadd.xlane.f32.xlu0 %v3888_v52  ;;  %v4529_v52 = vld [vmem:[%s13540_s15 + $0x28] sm:$0xff] }
 0xf5b   : > { %v10678_v53 = vpop.eup %10677 }
 0xf5c   : > { %v4055_v54 = vsel %vm2532_vm4, %v10678_v53, 0.0 }
 0xf5d   : > { %4056 = vadd.xlane.f32.xlu1 %v4055_v54  ;;  %v4527_v54 = vld [vmem:[%s13540_s15 + $0x18] sm:$0xff] }
 0xf5f   : > { %v10680_v55 = vpop.eup %10679 }
 0xf60   : > { %v4222_v56 = vsel %vm2532_vm4, %v10680_v55, 0.0 }
 0xf61   : > { %4223 = vadd.xlane.f32.xlu0 %v4222_v56 }
 0xf6e   : > { %4060 = vrot.lane.b32.xlu1 %v12598_v5, %s13531_s19 }
 0xf72   : > { %4227 = vrot.lane.b32.xlu1 %v12598_v5, %s13532_s16 }
 0xf77   : > { %3893 = vrot.lane.b32.xlu0 %v12598_v5, %s13533_s18 }
 0xfe1   : > { %v3723_v57 = vpop.xlane.xlu1 %3722 }
 0xfe2   : > { %10681 = vrcp.f32 %v3723_v57  ;;  %v3890_v58 = vpop.xlane.xlu0 %3889 }
 0xfe3   : > { %10683 = vrcp.f32 %v3890_v58 }
 0xfe6   : > { %v4057_v59 = vpop.xlane.xlu1 %4056 }
 0xfe7   : > { %10685 = vrcp.f32 %v4057_v59 }
 0xfea   : > { %v4224_v60 = vpop.xlane.xlu0 %4223  ;;  %v4061_v2 = vpop.permute.xlu1 %4060 }
 0xfeb   : > { %10687 = vrcp.f32 %v4224_v60 }
 0xfee   : > { %v3894_v1 = vpop.permute.xlu0 %3893  ;;  %v4228_v0 = vpop.permute.xlu1 %4227 }
 0xfef   : > { %v10682_v61 = vpop.eup %10681 }
 0xff0   : > { %v3725_v62 = vmul.f32 %v10682_v61, %v10674_v49  ;;  %v10684_v63 = vpop.eup %10683  ;;  %v4439_v49 = vld [vmem:[%s13539_s5] sm:$0xff]  ;;  %s13541_s5 = sld [smem:[#allocation72_spill]] }
 0xff1   : > { %v3892_v3 = vmul.f32 %v10684_v63, %v10676_v50  ;;  %v4531_v50 = vld [vmem:[%s13540_s15 + $0x38] sm:$0xff] }
 0xff2   : > { %9827 = vmatmul.mubr.msk.f32.vlgmr.msra.gmra.mxu1 %vm2532_vm4, %v3725_v62 }
 0xff3   : > { %9835 = vmatpush3.msra.mxu1 %v3894_v1  ;;  %9836 = vmatprep.mubr.msk.f32.mxu1 %vm11763_vm1, %v11762_v8 }
 0xff4   : > { %9844 = vmatprep.subr.mxu1 %v11762_v8  ;;  %v10686_v4 = vpop.eup %10685 }
 0xff5   : > { %v4059_v5 = vmul.f32 %v10686_v4, %v10678_v53  ;;  %v4528_v53 = vld [vmem:[%s13540_s15 + $0x20] sm:$0xff] }
 0xff6   : > { %9837 = vmatmul.mubr.msk.f32.vlgmr.msra.gmra.mxu1 %vm2532_vm4, %v3892_v3  ;;  %v9402_v13 = vld [vmem:[%s13541_s5] ss:$0 sm:$0xff]  ;;  %s13544_s5 = sld [smem:[#allocation80_spill]] }
 0xff7   : > { %9845 = vmatpush3.msra.mxu1 %v4061_v2  ;;  %9846 = vmatprep.mubr.msk.f32.mxu1 %vm11763_vm1, %v11762_v8 }
 0xff8   : > { %9854 = vmatprep.subr.mxu1 %v11762_v8  ;;  %v10688_v6 = vpop.eup %10687 }
 0xff9   : > { %v4226_v7 = vmul.f32 %v10688_v6, %v10680_v55 }
 0xffa   : > { %9847 = vmatmul.mubr.msk.f32.vlgmr.msra.gmra.mxu1 %vm2532_vm4, %v4059_v5 }
 0xffb   : > { %9855 = vmatpush3.msra.mxu1 %v4228_v0  ;;  %9856 = vmatprep.mubr.msk.f32.mxu1 %vm11763_vm1, %v11762_v8 }
 0xffc   : > { %9870 = vmatprep.subr.mxu1 %v11762_v8 }
 0xffe   : > { %9857 = vmatmul.mubr.msk.f32.vlgmr.msra.gmra.mxu1 %vm2532_vm4, %v4226_v7  ;;  %v9394_v7 = vld [vmem:[#allocation38] ss:$0 sm:$0xff] }
 0xfff   : > { %9878 = vmatprep.mubr.msk.f32.mxu1 %vm11763_vm1, %v11762_v8  ;;  %9871 = vmatpush3.msra.mxu1 %v4442_v46 }
0x1000   : > { %9872 = vmatprep.subr.mxu1 %v11762_v8 }
0x1001   : > { %9873 = vmatpush3.msra.mxu1 %v4441_v47 }
0x1002   : > { %9874 = vmatprep.subr.mxu1 %v11762_v8 }
0x1003   : > { %9875 = vmatpush3.msra.mxu1 %v4440_v48  ;;  %v12797_v48 = vld [vmem:[%s2400_s13] sm:$0xff]  ;;  %s13552_s13 = sld [smem:[#allocation79_spill]] }
0x1004   : > { %9876 = vmatprep.subr.mxu1 %v11762_v8  ;;  %vm4769_vm5 = vcmp.gt.f32.partialorder %v12797_v48, 0.5 }
0x1005   : > { %9877 = vmatpush3.msra.mxu1 %v4439_v49 }
0x1006   : > { %9900 = vmatprep.subr.mxu1 %v11762_v8 }
0x10b2   : > { %v3798_v12 = vpop.f32.mrf.mxu1 }
0x10b4   : > { %v9828_v14 = vpop.f32.mrf.mxu1 }
0x10b6   : > { %v3965_v15 = vpop.f32.mrf.mxu1 }
0x10b7   : > { %4304 = vrot.lane.b32.xlu0 %v3965_v15, %s13536_s1  ;;  %v4688_v15 = vld [vmem:[%s13542_s6 + $0x18] sm:$0xff] }
0x10b8   : > { %v9838_v16 = vpop.f32.mrf.mxu1 }
0x10ba   : > { %v4132_v17 = vpop.f32.mrf.mxu1 }
0x10bb   : > { %4308 = vrot.lane.b32.xlu1 %v4132_v17, %s13537_s3 }
0x10bc   : > { %v9848_v18 = vpop.f32.mrf.mxu1 }
0x10bd   : > { %v4687_v18 = vld [vmem:[%s13542_s6 + $0x10] sm:$0xff] }
0x10be   : > { %v4299_v19 = vpop.f32.mrf.mxu1 }
0x10bf   : > { %4312 = vrot.lane.b32.xlu0 %v4299_v19, %s13538_s4  ;;  %v4686_v19 = vld [vmem:[%s13542_s6 + $0x8] sm:$0xff] }
0x10c0   : > { %v9858_v20 = vpop.f32.mrf.mxu1 }
0x10de   : > { %4652 = vadd.xlane.f32.xlu0 %v4651_v22  ;;  %v9403_v22 = vld [vmem:[%s13543_s8] ss:$0 sm:$0xff]  ;;  %s13545_s8 = smov 88  }
0x1129   : > { %v4305_v23 = vpop.permute.xlu0 %4304 }
0x112a   : > { %v4315_v25 = vsel %vm2532_vm4, %v3798_v12, %v4305_v23  ;;  %v4685_v23 = vld [vmem:[%s13542_s6] sm:$0xff]  ;;  %s13546_s6 = smov 96  }
0x112d   : > { %v4309_v24 = vpop.permute.xlu1 %4308 }
0x112e   : > { %v4316_v26 = vsel %vm3216_vm7, %v4315_v25, %v4309_v24  ;;  %v4526_v25 = vld [vmem:[%s13540_s15 + $0x10] sm:$0xff] }
0x1131   : > { %v4313_v27 = vpop.permute.xlu0 %4312 }
0x1132   : > { %v4317_v29 = vsel %vm3218_vm8, %v4316_v26, %v4313_v27  ;;  %v4525_v26 = vld [vmem:[%s13540_s15 + $0x8] sm:$0xff]  ;;  %v4524_v27 = vld [vmem:[%s13540_s15] sm:$0xff]  ;;  %s13568_s15 = sld [smem:[#allocation69_spill]] }
0x1133   : > { %9868 = vmatmul.mubr.msk.f32.vlgmr.msra.gmra.mxu0 %vm2407_vm0, %v4317_v29  ;;  %v9396_v29 = vld [vmem:[#allocation32] ss:$0 sm:$0xff] }
0x1134   : > { %9897 = vmatprep.mubr.msk.f32.mxu0 %vm11763_vm1, %v11762_v8  ;;  %9882 = vmatpush3.msra.mxu0 %v4531_v50 }
0x1135   : > { %9883 = vmatprep.subr.mxu0 %v11762_v8 }
0x1136   : > { %9884 = vmatpush3.msra.mxu0 %v4530_v51 }
0x1137   : > { %9885 = vmatprep.subr.mxu0 %v11762_v8 }
0x1138   : > { %9886 = vmatpush3.msra.mxu0 %v4529_v52 }
0x1139   : > { %9887 = vmatprep.subr.mxu0 %v11762_v8 }
0x113a   : > { %9888 = vmatpush3.msra.mxu0 %v4528_v53 }
0x113b   : > { %9889 = vmatprep.subr.mxu0 %v11762_v8 }
0x113c   : > { %9890 = vmatpush3.msra.mxu0 %v4527_v54 }
0x113d   : > { %9891 = vmatprep.subr.mxu0 %v11762_v8 }
0x113e   : > { %9892 = vmatpush3.msra.mxu0 %v4526_v25 }
0x113f   : > { %9893 = vmatprep.subr.mxu0 %v11762_v8 }
0x1140   : > { %9894 = vmatpush3.msra.mxu0 %v4525_v26 }
0x1141   : > { %9895 = vmatprep.subr.mxu0 %v11762_v8 }
0x1142   : > { %9896 = vmatpush3.msra.mxu0 %v4524_v27 }
0x1143   : > { %9921 = vmatprep.subr.mxu0 %v11762_v8 }
0x1167   : > { %v4653_v30 = vpop.xlane.xlu0 %4652 }
0x1168   : > { %v4654_v31 = vmul.f32 0.03125, %v4653_v30 }
0x116a   : > { %v12699_v33 = vsub.f32 %v12688_v21, %v4654_v31 }
0x116c   : > { %v4656_v37 = vmul.f32 %v12699_v33, %v12699_v33  ;;  %v4676_v17 = vmul.f32 %v9402_v13, %v12699_v33 }
0x116e   : > { %v4657_v39 = vsel %vm2407_vm0, %v4656_v37, 0.0 }
0x11f3   : > { %v4398_v28 = vpop.f32.mrf.mxu0 }
0x11f4   : > { %v4399_v34 = vadd.f32 %v9392_v32, %v4398_v28  ;;  %v9404_v28 = vld [vmem:[%s13544_s5] ss:$0 sm:$0xff]  ;;  %s13549_s5 = smov 112  }
0x11f5   : > { %v9869_v35 = vpop.f32.mrf.mxu0 }
0x11f6   : > { %v12702_v36 = vadd.f32 %v4399_v34, %v12581_v40 }
0x11f8   : > { %v4405_v38 = vsel %vm2407_vm0, %v12702_v36, 0.0 }
0x11f9   : > { %4406 = vadd.xlane.f32.xlu1 %v4405_v38 }
0x11fd   : > { %4658 = vadd.xlane.f32.xlu1 %v4657_v39 }
0x1282   : > { %v4407_v41 = vpop.xlane.xlu1 %4406 }
0x1283   : > { %v4408_v42 = vmul.f32 0.03125, %v4407_v41 }
0x1285   : > { %v4409_v44 = vsub.f32 %v12702_v36, %v4408_v42 }
0x1286   : > { %v4659_v55 = vpop.xlane.xlu1 %4658 }
0x1287   : > { %v4410_v45 = vmul.f32 %v4409_v44, %v4409_v44  ;;  %v4660_v56 = vmul.f32 0.032258064, %v4659_v55  ;;  %v4430_v9 = vmul.f32 %v9394_v7, %v4409_v44 }
0x1289   : > { %v4411_v40 = vsel %vm2407_vm0, %v4410_v45, 0.0  ;;  %10689 = vrsqrt.f32 %v4660_v56  ;;  %vm4663_vm14 = vcmp.eq.f32.partialorder %v4660_v56, inf  ;;  %v4666_v62 = vand.u32 2147483648, %v4660_v56 }
0x128a   : > { %4412 = vadd.xlane.f32.xlu0 %v4411_v40  ;;  %vm4665_vm15 = vcmp.eq.f32.partialorder %v4660_v56, 0.0 }
0x1296   : > { %v10690_v59 = vpop.eup %10689 }
0x1297   : > { %v4662_v60 = vmul.f32 %v10690_v59, %v4660_v56 }
0x1299   : > { %v4664_v63 = vsel %vm4663_vm14, %v4660_v56, %v4662_v60 }
0x129a   : > { %v4667_v4 = vsel %vm4665_vm15, %v4666_v62, %v4664_v63 }
0x129b   : > { %v4668_v0 = vadd.f32 1e-06, %v4667_v4 }
0x1313   : > { %v4413_v57 = vpop.xlane.xlu0 %4412 }
0x1314   : > { %v4414_v58 = vmul.f32 0.032258064, %v4413_v57 }
0x1316   : > { %10691 = vrsqrt.f32 %v4414_v58  ;;  %vm4417_vm2 = vcmp.eq.f32.partialorder %v4414_v58, inf  ;;  %v4420_v2 = vand.u32 2147483648, %v4414_v58  ;;  %vm4419_vm3 = vcmp.eq.f32.partialorder %v4414_v58, 0.0 }
0x1323   : > { %v10692_v61 = vpop.eup %10691 }
0x1324   : > { %v4416_v1 = vmul.f32 %v10692_v61, %v4414_v58 }
0x1326   : > { %v4418_v3 = vsel %vm4417_vm2, %v4414_v58, %v4416_v1 }
0x1327   : > { %v4421_v5 = vsel %vm4419_vm3, %v4420_v2, %v4418_v3 }
0x1328   : > { %v4422_v6 = vadd.f32 1e-06, %v4421_v5 }
0x132a   : > { %10693 = vrcp.f32 %v4422_v6 }
0x132b   : > { %10695 = vrcp.f32 %v4668_v0 }
0x1337   : > { %v10694_v10 = vpop.eup %10693 }
0x1338   : > { %v4431_v12 = vmul.f32 %v10694_v10, %v4430_v9  ;;  %v10696_v16 = vpop.eup %10695 }
0x1339   : > { %v4677_v20 = vmul.f32 %v10696_v16, %v4676_v17 }
0x133a   : > { %v4438_v14 = vadd.f32 %v9395_v11, %v4431_v12 }
0x133b   : > { %v4684_v24 = vadd.f32 %v9403_v22, %v4677_v20 }
0x133c   : > { %9879 = vmatmul.mubr.msk.f32.vlgmr.msra.gmra.mxu1 %vm2407_vm0, %v4438_v14 }
0x133d   : > { %9901 = vmatpush3.msra.mxu1 %v4688_v15  ;;  %9908 = vmatprep.mubr.msk.f32.mxu1 %vm11763_vm1, %v11762_v8 }
0x133e   : > { %9902 = vmatprep.subr.mxu1 %v11762_v8 }
0x133f   : > { %9903 = vmatpush3.msra.mxu1 %v4687_v18 }
0x1340   : > { %9904 = vmatprep.subr.mxu1 %v11762_v8 }
0x1341   : > { %9905 = vmatpush3.msra.mxu1 %v4686_v19 }
0x1342   : > { %9906 = vmatprep.subr.mxu1 %v11762_v8 }
0x1343   : > { %9907 = vmatpush3.msra.mxu1 %v4685_v23 }
0x1344   : > { %9909 = vmatmul.mubr.msk.f32.vlgmr.msra.gmra.mxu1 %vm2407_vm0, %v4684_v24  ;;  %9911 = vmatprep.subr.mxu1 %v11762_v8 }
0x1345   : > { %9913 = vmatprep.mubr.msk.f32.mxu1 %vm11763_vm1, %v11762_v8 }
0x13fc   : > { %v4519_v30 = vpop.f32.mrf.mxu1 }
0x13fd   : > { %v4520_v31 = vadd.f32 %v9396_v29, %v4519_v30 }
0x13fe   : > { %v9880_v32 = vpop.f32.mrf.mxu1 }
0x13ff   : > { %v4523_v33 = vmax.f32 %v4520_v31, 0.0 }
0x1401   : > { %9898 = vmatmul.mubr.msk.f32.vlgmr.msra.gmra.mxu0 %vm3441_vm11, %v4523_v33 }
0x1402   : > { %9923 = vmatprep.mubr.msk.f32.mxu0 %vm11763_vm1, %v11762_v8 }
0x1404   : > { %v4765_v34 = vpop.f32.mrf.mxu1 }
0x1405   : > { %v12756_v35 = vadd.f32 %v9404_v28, %v4765_v34 }
0x1406   : > { %v9910_v37 = vpop.f32.mrf.mxu1 }
0x1407   : > { %4938 = vrot.lane.b32.xlu1 %v12756_v35, %s13545_s8  ;;  %4771 = vrot.lane.b32.xlu0 %v12756_v35, %s13546_s6 }
0x140b   : > { %4936 = vrot.lane.b32.xlu1 %v12756_v35, %s13547_s9  ;;  %5105 = vrot.lane.b32.xlu0 %v12756_v35, %s13548_s10 }
0x140f   : > { %5103 = vrot.lane.b32.xlu1 %v12756_v35, %s13549_s5  ;;  %5272 = vrot.lane.b32.xlu0 %v12756_v35, %s13550_s11 }
0x1413   : > { %5270 = vrot.lane.b32.xlu1 %v12756_v35, %s13529_s28 }
0x1479   : > { %v4939_v38 = vpop.permute.xlu1 %4938  ;;  %v4772_v39 = vpop.permute.xlu0 %4771 }
0x147a   : > { %9912 = vmatpush3.xpose.msk.msra.mxu1 %vm2532_vm4, %v4772_v39  ;;  %9922 = vmatpush3.xpose.msk.msra.mxu0 %vm2532_vm4, %v4939_v38 }
0x147b   : > { %9931 = vmatprep.subr.mxu0 %v11762_v8  ;;  %9916 = vmatprep.subr.mxu1 %v11762_v8 }
0x147d   : > { %v4937_v41 = vpop.permute.xlu1 %4936  ;;  %9914 = vmatmul.mubr.msk.f32.vlgmr.msra.gmra.mxu1 %vm2532_vm4, %v12756_v35  ;;  %v5106_v42 = vpop.permute.xlu0 %5105 }
0x147e   : > { %9924 = vmatmul.mubr.msk.f32.vlgmr.msra.gmra.mxu0 %vm2532_vm4, %v4937_v41  ;;  %9918 = vmatprep.mubr.msk.f32.mxu1 %vm11763_vm1, %v11762_v8 }
0x147f   : > { %9932 = vmatpush3.xpose.msk.msra.mxu0 %vm2532_vm4, %v5106_v42  ;;  %9933 = vmatprep.mubr.msk.f32.mxu0 %vm11763_vm1, %v11762_v8 }
0x1480   : > { %9941 = vmatprep.subr.mxu0 %v11762_v8 }
0x1481   : > { %v5104_v44 = vpop.permute.xlu1 %5103  ;;  %v5273_v45 = vpop.permute.xlu0 %5272 }
0x1482   : > { %9934 = vmatmul.mubr.msk.f32.vlgmr.msra.gmra.mxu0 %vm2532_vm4, %v5104_v44 }
0x1483   : > { %9942 = vmatpush3.xpose.msk.msra.mxu0 %vm2532_vm4, %v5273_v45  ;;  %9943 = vmatprep.mubr.msk.f32.mxu0 %vm11763_vm1, %v11762_v8 }
0x1484   : > { %9951 = vmatprep.subr.mxu0 %v11762_v8 }
0x1485   : > { %v5271_v40 = vpop.permute.xlu1 %5270 }
0x1486   : > { %9944 = vmatmul.mubr.msk.f32.vlgmr.msra.gmra.mxu0 %vm2532_vm4, %v5271_v40  ;;  %v5455_v40 = vld [vmem:[%s13552_s13 + $0x18] sm:$0xff] }
0x1487   : > { %9959 = vmatprep.mubr.msk.f32.mxu0 %vm11763_vm1, %v11762_v8  ;;  %9952 = vmatpush3.msra.mxu0 %v5455_v40 }
0x1488   : > { %9953 = vmatprep.subr.mxu0 %v11762_v8 }
0x14c1   : > { %v12793_v46 = vpop.f32.mrf.mxu0 }
0x14c3   : > { %v9899_v47 = vpop.f32.mrf.mxu0 }
0x14c4   : > { %v5454_v47 = vld [vmem:[%s13552_s13 + $0x10] sm:$0xff] }
0x14c5   : > { %9954 = vmatpush3.msra.mxu0 %v5454_v47 }
0x14c6   : > { %9955 = vmatprep.subr.mxu0 %v11762_v8 }
0x153d   : > { %v4843_v49 = vpop.f32.mrf.mxu1 }
0x153e   : > { %v4847_v50 = vmul.f32 0.35355338, %v4843_v49  ;;  %v5010_v51 = vpop.f32.mrf.mxu0  ;;  %v5453_v49 = vld [vmem:[%s13552_s13 + $0x8] sm:$0xff] }
0x153f   : > { %v5014_v52 = vmul.f32 0.35355338, %v5010_v51  ;;  %v9915_v53 = vpop.f32.mrf.mxu1  ;;  %9956 = vmatpush3.msra.mxu0 %v5453_v49  ;;  %v5452_v51 = vld [vmem:[%s13552_s13] sm:$0xff]  ;;  %s13555_s13 = smov %s13554_s2 }
0x1540   : > { %v9925_v54 = vpop.f32.mrf.mxu0  ;;  %v4848_v55 = vsel %vm4769_vm5, %v4847_v50, -1e+09  ;;  %9957 = vmatprep.subr.mxu0 %v11762_v8 }
0x1541   : > { %v4849_v56 = vsel %vm2532_vm4, %v4848_v55, -inf  ;;  %v5015_v57 = vsel %vm4769_vm5, %v5014_v52, -1e+09  ;;  %9958 = vmatpush3.msra.mxu0 %v5452_v51 }
0x1542   : > { %v5177_v58 = vpop.f32.mrf.mxu0  ;;  %4850 = vmax.xlane.f32.xlu0 %v4849_v56  ;;  %v5016_v59 = vsel %vm2532_vm4, %v5015_v57, -inf  ;;  %9973 = vmatprep.subr.mxu0 %v11762_v8 }
0x1543   : > { %v5181_v60 = vmul.f32 0.35355338, %v5177_v58  ;;  %5017 = vmax.xlane.f32.xlu1 %v5016_v59  ;;  %v9398_v59 = vld [vmem:[#allocation34] ss:$0 sm:$0xff] }
0x1544   : > { %v9935_v61 = vpop.f32.mrf.mxu0 }
0x1545   : > { %v5182_v62 = vsel %vm4769_vm5, %v5181_v60, -1e+09  ;;  %v4609_v60 = vadd.f32 %v9398_v59, %v12793_v46 }
0x1546   : > { %v5344_v63 = vpop.f32.mrf.mxu0  ;;  %v5183_v1 = vsel %vm2532_vm4, %v5182_v62, -inf }
0x1547   : > { %v5348_v2 = vmul.f32 0.35355338, %v5344_v63  ;;  %5184 = vmax.xlane.f32.xlu0 %v5183_v1  ;;  %v4612_v61 = vadd.f32 %v4609_v60, %v12702_v36 }
0x1548   : > { %v9945_v3 = vpop.f32.mrf.mxu0 }
0x1549   : > { %v5349_v4 = vsel %vm4769_vm5, %v5348_v2, -1e+09 }
0x154a   : > { %v5350_v5 = vsel %vm2532_vm4, %v5349_v4, -inf }
0x154b   : > { %5351 = vmax.xlane.f32.xlu0 %v5350_v5 }
0x1554   : > { %4860 = vrot.lane.b32.xlu1 %v12756_v35, %s13530_s23 }
0x15cb   : > { %v4851_v6 = vpop.xlane.xlu0 %4850 }
0x15cc   : > { %v4852_v0 = vsub.f32 %v4848_v55, %v4851_v6  ;;  %v5018_v7 = vpop.xlane.xlu1 %5017  ;;  %v9418_v6 = vld [vmem:[%s13553_s12] ss:$0 sm:$0xff]  ;;  %s13556_s12 = sld [smem:[#allocation84_spill]] }
0x15cd   : > { %v5019_v9 = vsub.f32 %v5015_v57, %v5018_v7 }
0x15ce   : > { %v4853_v10 = vmul.f32 1.442695, %v4852_v0 }
0x15cf   : > { %v5020_v11 = vmul.f32 1.442695, %v5019_v9 }
0x15d0   : > { %10697 = vpow2.f32 %v4853_v10  ;;  %v4861_v12 = vpop.permute.xlu1 %4860  ;;  %v5185_v13 = vpop.xlane.xlu0 %5184 }
0x15d1   : > { %10699 = vpow2.f32 %v5020_v11  ;;  %v5186_v14 = vsub.f32 %v5182_v62, %v5185_v13  ;;  %9917 = vmatpush3.msra.mxu1 %v4861_v12  ;;  %v4615_v62 = vsel %vm2407_vm0, %v4612_v61, 0.0 }
0x15d2   : > { %9926 = vmatprep.subr.mxu1 %v11762_v8 }
0x15d3   : > { %v5187_v15 = vmul.f32 1.442695, %v5186_v14 }
0x15d4   : > { %v5352_v16 = vpop.xlane.xlu0 %5351 }
0x15d5   : > { %10701 = vpow2.f32 %v5187_v15  ;;  %v5353_v17 = vsub.f32 %v5349_v4, %v5352_v16  ;;  %v5576_v15 = vld [vmem:[%s13554_s2 + $0x18] sm:$0xff]  ;;  %v5575_v16 = vld [vmem:[%s13555_s13 + $0x10] sm:$0xff]  ;;  %s13557_s2 = sld [smem:[#allocation74_spill]] }
0x15d7   : > { %v5354_v18 = vmul.f32 1.442695, %v5353_v17  ;;  %v5573_v17 = vld [vmem:[%s13555_s13] sm:$0xff] }
0x15d9   : > { %10703 = vpow2.f32 %v5354_v18  ;;  %v5574_v18 = vld [vmem:[%s13555_s13 + $0x8] sm:$0xff]  ;;  %s13561_s13 = sld [smem:[#allocation82_spill]] }
0x15dd   : > { %v10698_v19 = vpop.eup %10697 }
0x15de   : > { %v10700_v20 = vpop.eup %10699  ;;  %v4855_v22 = vsel %vm2532_vm4, %v10698_v19, 0.0 }
0x15df   : > { %4856 = vadd.xlane.f32.xlu1 %v4855_v22  ;;  %v5022_v23 = vsel %vm2532_vm4, %v10700_v20, 0.0 }
0x15e0   : > { %5023 = vadd.xlane.f32.xlu0 %v5022_v23 }
0x15e2   : > { %v10702_v24 = vpop.eup %10701 }
0x15e3   : > { %v5189_v25 = vsel %vm2532_vm4, %v10702_v24, 0.0 }
0x15e4   : > { %5190 = vadd.xlane.f32.xlu1 %v5189_v25 }
0x15e6   : > { %v10704_v26 = vpop.eup %10703 }
0x15e7   : > { %v5356_v27 = vsel %vm2532_vm4, %v10704_v26, 0.0 }
0x15e8   : > { %5357 = vadd.xlane.f32.xlu0 %v5356_v27 }
0x15f5   : > { %5194 = vrot.lane.b32.xlu1 %v12756_v35, %s13531_s19 }
0x15f9   : > { %5361 = vrot.lane.b32.xlu1 %v12756_v35, %s13532_s16 }
0x15fe   : > { %5027 = vrot.lane.b32.xlu0 %v12756_v35, %s13533_s18 }
0x1668   : > { %v4857_v29 = vpop.xlane.xlu1 %4856 }
0x1669   : > { %10705 = vrcp.f32 %v4857_v29  ;;  %v5024_v30 = vpop.xlane.xlu0 %5023 }
0x166a   : > { %10707 = vrcp.f32 %v5024_v30 }
0x166d   : > { %v5191_v31 = vpop.xlane.xlu1 %5190 }
0x166e   : > { %10709 = vrcp.f32 %v5191_v31 }
0x1671   : > { %v5358_v32 = vpop.xlane.xlu0 %5357  ;;  %v5195_v38 = vpop.permute.xlu1 %5194 }
0x1672   : > { %10711 = vrcp.f32 %v5358_v32 }
0x1675   : > { %v5028_v37 = vpop.permute.xlu0 %5027  ;;  %v5362_v44 = vpop.permute.xlu1 %5361 }
0x1676   : > { %v10706_v33 = vpop.eup %10705 }
0x1677   : > { %v4859_v28 = vmul.f32 %v10706_v33, %v10698_v19  ;;  %v10708_v34 = vpop.eup %10707 }
0x1678   : > { %v5026_v35 = vmul.f32 %v10708_v34, %v10700_v20 }
0x1679   : > { %9919 = vmatmul.mubr.msk.f32.vlgmr.msra.gmra.mxu1 %vm2532_vm4, %v4859_v28  ;;  %v9400_v28 = vld [vmem:[#allocation44] ss:$0 sm:$0xff] }
0x167a   : > { %9927 = vmatpush3.msra.mxu1 %v5028_v37  ;;  %9928 = vmatprep.mubr.msk.f32.mxu1 %vm11763_vm1, %v11762_v8 }
0x167b   : > { %9936 = vmatprep.subr.mxu1 %v11762_v8  ;;  %v10710_v39 = vpop.eup %10709 }
0x167c   : > { %v5193_v41 = vmul.f32 %v10710_v39, %v10702_v24 }
0x167d   : > { %9929 = vmatmul.mubr.msk.f32.vlgmr.msra.gmra.mxu1 %vm2532_vm4, %v5026_v35  ;;  %v9422_v35 = vld [vmem:[%s13556_s12] ss:$0 sm:$0xff]  ;;  %s13558_s12 = sld [smem:[#allocation75_spill]] }
0x167e   : > { %9937 = vmatpush3.msra.mxu1 %v5195_v38  ;;  %9938 = vmatprep.mubr.msk.f32.mxu1 %vm11763_vm1, %v11762_v8 }
0x167f   : > { %9946 = vmatprep.subr.mxu1 %v11762_v8  ;;  %v10712_v42 = vpop.eup %10711 }
0x1680   : > { %v5360_v45 = vmul.f32 %v10712_v42, %v10704_v26 }
0x1681   : > { %9939 = vmatmul.mubr.msk.f32.vlgmr.msra.gmra.mxu1 %vm2532_vm4, %v5193_v41 }
0x1682   : > { %9947 = vmatpush3.msra.mxu1 %v5362_v44  ;;  %9948 = vmatprep.mubr.msk.f32.mxu1 %vm11763_vm1, %v11762_v8  ;;  %v9401_v44 = vld [vmem:[#allocation46] ss:$0 sm:$0xff] }
0x1683   : > { %9962 = vmatprep.subr.mxu1 %v11762_v8 }
0x1685   : > { %9949 = vmatmul.mubr.msk.f32.vlgmr.msra.gmra.mxu1 %vm2532_vm4, %v5360_v45 }
0x1686   : > { %9970 = vmatprep.mubr.msk.f32.mxu1 %vm11763_vm1, %v11762_v8  ;;  %9963 = vmatpush3.msra.mxu1 %v5576_v15 }
0x1687   : > { %9964 = vmatprep.subr.mxu1 %v11762_v8 }
0x1688   : > { %9965 = vmatpush3.msra.mxu1 %v5575_v16 }
0x1689   : > { %9966 = vmatprep.subr.mxu1 %v11762_v8 }
0x168a   : > { %9967 = vmatpush3.msra.mxu1 %v5574_v18 }
0x168b   : > { %9968 = vmatprep.subr.mxu1 %v11762_v8 }
0x168c   : > { %9969 = vmatpush3.msra.mxu1 %v5573_v17 }
0x168d   : > { %9984 = vmatprep.subr.mxu1 %v11762_v8 }
0x1739   : > { %v4932_v50 = vpop.f32.mrf.mxu1 }
0x173b   : > { %v9920_v52 = vpop.f32.mrf.mxu1 }
0x173d   : > { %v5099_v53 = vpop.f32.mrf.mxu1 }
0x173e   : > { %5438 = vrot.lane.b32.xlu0 %v5099_v53, %s13536_s1 }
0x173f   : > { %v9930_v54 = vpop.f32.mrf.mxu1 }
0x1741   : > { %v5266_v55 = vpop.f32.mrf.mxu1 }
0x1742   : > { %5442 = vrot.lane.b32.xlu1 %v5266_v55, %s13537_s3  ;;  %v9420_v55 = vld [vmem:[%s13557_s2] ss:$0 sm:$0xff]  ;;  %s13559_s2 = sld [smem:[#allocation83_spill]] }
0x1743   : > { %v9940_v56 = vpop.f32.mrf.mxu1 }
0x1745   : > { %v5433_v57 = vpop.f32.mrf.mxu1 }
0x1746   : > { %5446 = vrot.lane.b32.xlu0 %v5433_v57, %s13538_s4 }
0x1747   : > { %v9950_v58 = vpop.f32.mrf.mxu1 }
0x1748   : > { %v9421_v58 = vld [vmem:[%s13558_s12] ss:$0 sm:$0xff]  ;;  %s13560_s12 = smov %s13559_s2 }
0x1766   : > { %4616 = vadd.xlane.f32.xlu1 %v4615_v62 }
0x17b0   : > { %v5439_v63 = vpop.permute.xlu0 %5438 }
0x17b1   : > { %v5449_v2 = vsel %vm2532_vm4, %v4932_v50, %v5439_v63 }
0x17b4   : > { %v5443_v1 = vpop.permute.xlu1 %5442 }
0x17b5   : > { %v5450_v3 = vsel %vm3216_vm7, %v5449_v2, %v5443_v1 }
0x17b8   : > { %v5447_v4 = vpop.permute.xlu0 %5446 }
0x17b9   : > { %v5451_v5 = vsel %vm3218_vm8, %v5450_v3, %v5447_v4 }
0x17ba   : > { %9960 = vmatmul.mubr.msk.f32.vlgmr.msra.gmra.mxu0 %vm2407_vm0, %v5451_v5 }
0x17bb   : > { %9981 = vmatprep.mubr.msk.f32.mxu0 %vm11763_vm1, %v11762_v8 }
0x17ef   : > { %v4617_v46 = vpop.xlane.xlu1 %4616 }
0x17f0   : > { %v4618_v36 = vmul.f32 0.03125, %v4617_v46 }
0x17f2   : > { %v4619_v7 = vsub.f32 %v4612_v61, %v4618_v36 }
0x17f4   : > { %v4620_v13 = vmul.f32 %v4619_v7, %v4619_v7  ;;  %v4640_v34 = vmul.f32 %v9400_v28, %v4619_v7 }
0x17f6   : > { %v4621_v14 = vsel %vm2407_vm0, %v4620_v13, 0.0 }
0x187a   : > { %v5532_v0 = vpop.f32.mrf.mxu0 }
0x187b   : > { %v5533_v9 = vadd.f32 %v9418_v6, %v5532_v0 }
0x187c   : > { %v9961_v10 = vpop.f32.mrf.mxu0 }
0x187d   : > { %v12862_v11 = vadd.f32 %v5533_v9, %v12688_v21 }
0x187f   : > { %v5539_v12 = vsel %vm2407_vm0, %v12862_v11, 0.0 }
0x1880   : > { %5540 = vadd.xlane.f32.xlu0 %v5539_v12 }
0x1884   : > { %4622 = vadd.xlane.f32.xlu0 %v4621_v14 }
0x189a   : > { %5667 = vrot.lane.b32.xlu0 %v5576_v15, %s13546_s6 }
0x189e   : > { %5661 = vrot.lane.b32.xlu0 %v5573_v17, %s13546_s6 }
0x1909   : > { %v5541_v21 = vpop.xlane.xlu0 %5540 }
0x190a   : > { %v5542_v19 = vmul.f32 0.03125, %v5541_v21 }
0x190c   : > { %v5543_v20 = vsub.f32 %v12862_v11, %v5542_v19 }
0x190d   : > { %v4623_v22 = vpop.xlane.xlu0 %4622 }
0x190e   : > { %v4624_v23 = vmul.f32 0.032258064, %v4623_v22  ;;  %v5544_v24 = vmul.f32 %v5543_v20, %v5543_v20  ;;  %v5564_v56 = vmul.f32 %v9420_v55, %v5543_v20 }
0x1910   : > { %10713 = vrsqrt.f32 %v4624_v23  ;;  %v5545_v25 = vsel %vm2407_vm0, %v5544_v24, 0.0  ;;  %vm4627_vm9 = vcmp.eq.f32.partialorder %v4624_v23, inf  ;;  %v4630_v29 = vand.u32 2147483648, %v4624_v23 }
0x1911   : > { %5546 = vadd.xlane.f32.xlu1 %v5545_v25  ;;  %v5668_v30 = vpop.permute.xlu0 %5667  ;;  %vm4629_vm10 = vcmp.eq.f32.partialorder %v4624_v23, 0.0 }
0x1912   : > { %9974 = vmatpush3.msra.mxu0 %v5668_v30 }
0x1913   : > { %9975 = vmatprep.subr.mxu0 %v11762_v8 }
0x1915   : > { %v5662_v40 = vpop.permute.xlu0 %5661 }
0x191d   : > { %v10714_v26 = vpop.eup %10713 }
0x191e   : > { %v4626_v27 = vmul.f32 %v10714_v26, %v4624_v23 }
0x1920   : > { %v4628_v31 = vsel %vm4627_vm9, %v4624_v23, %v4626_v27 }
0x1921   : > { %v4631_v32 = vsel %vm4629_vm10, %v4630_v29, %v4628_v31 }
0x1922   : > { %v4632_v33 = vadd.f32 1e-06, %v4631_v32  ;;  %5665 = vrot.lane.b32.xlu1 %v5575_v16, %s13546_s6 }
0x1924   : > { %10715 = vrcp.f32 %v4632_v33 }
0x1926   : > { %5663 = vrot.lane.b32.xlu1 %v5574_v18, %s13546_s6 }
0x192a   : > { %5673 = vrot.lane.b32.xlu1 %v9422_v35, %s13546_s6 }
0x1931   : > { %v10716_v37 = vpop.eup %10715 }
0x1932   : > { %v4641_v38 = vmul.f32 %v10716_v37, %v4640_v34 }
0x1934   : > { %v12886_v47 = vadd.f32 %v9401_v44, %v4641_v38 }
0x199a   : > { %v5547_v39 = vpop.xlane.xlu1 %5546 }
0x199b   : > { %v5548_v41 = vmul.f32 0.032258064, %v5547_v39 }
0x199d   : > { %10717 = vrsqrt.f32 %v5548_v41  ;;  %vm5551_vm12 = vcmp.eq.f32.partialorder %v5548_v41, inf  ;;  %v5554_v51 = vand.u32 2147483648, %v5548_v41  ;;  %vm5553_vm13 = vcmp.eq.f32.partialorder %v5548_v41, 0.0 }
0x199e   : > { %v5666_v42 = vpop.permute.xlu1 %5665 }
0x199f   : > { %9976 = vmatpush3.msra.mxu0 %v5666_v42 }
0x19a0   : > { %9977 = vmatprep.subr.mxu0 %v11762_v8 }
0x19a2   : > { %v5664_v45 = vpop.permute.xlu1 %5663 }
0x19a3   : > { %9978 = vmatpush3.msra.mxu0 %v5664_v45 }
0x19a4   : > { %9979 = vmatprep.subr.mxu0 %v11762_v8 }
0x19a5   : > { %9980 = vmatpush3.msra.mxu0 %v5662_v40 }
0x19a6   : > { %9982 = vmatmul.mubr.msk.f32.vlgmr.msra.gmra.mxu0 %vm2407_vm0, %v12886_v47  ;;  %9994 = vmatprep.subr.mxu0 %v11762_v8  ;;  %v5674_v61 = vpop.permute.xlu1 %5673 }
0x19a7   : > { %9996 = vmatprep.mubr.msk.f32.mxu0 %vm11763_vm1, %v11762_v8 }
0x19aa   : > { %v10718_v49 = vpop.eup %10717 }
0x19ab   : > { %v5550_v50 = vmul.f32 %v10718_v49, %v5548_v41 }
0x19ad   : > { %v5552_v52 = vsel %vm5551_vm12, %v5548_v41, %v5550_v50 }
0x19ae   : > { %v5555_v53 = vsel %vm5553_vm13, %v5554_v51, %v5552_v52 }
0x19af   : > { %v5556_v54 = vadd.f32 1e-06, %v5555_v53 }
0x19b1   : > { %10719 = vrcp.f32 %v5556_v54 }
0x19be   : > { %v10720_v57 = vpop.eup %10719 }
0x19bf   : > { %v5565_v59 = vmul.f32 %v10720_v57, %v5564_v56 }
0x19c1   : > { %v5572_v60 = vadd.f32 %v9421_v58, %v5565_v59 }
0x19c3   : > { %9971 = vmatmul.mubr.msk.f32.vlgmr.msra.gmra.mxu1 %vm2407_vm0, %v5572_v60 }
0x19c4   : > { %9986 = vmatprep.mubr.msk.f32.mxu1 %vm11763_vm1, %v11762_v8 }
0x1a66   : > { %v5745_v62 = vpop.f32.mrf.mxu0 }
0x1a67   : > { %v12898_v63 = vadd.f32 %v5745_v62, %v5674_v61 }
0x1a68   : > { %v9983_v1 = vpop.f32.mrf.mxu0 }
0x1a69   : > { %5916 = vrot.lane.b32.xlu0 %v12898_v63, %s13547_s9  ;;  %9985 = vmatpush3.xpose.msk.msra.mxu1 %vm2532_vm4, %v12898_v63 }
0x1a6a   : > { %9989 = vmatprep.subr.mxu1 %v11762_v8 }
0x1a6d   : > { %6083 = vrot.lane.b32.xlu0 %v12898_v63, %s13549_s5 }
0x1a71   : > { %6250 = vrot.lane.b32.xlu0 %v12898_v63, %s13529_s28 }
0x1a83   : > { %v5653_v2 = vpop.f32.mrf.mxu1 }
0x1a84   : > { %v5654_v3 = vadd.f32 %v9422_v35, %v5653_v2 }
0x1a85   : > { %v9972_v4 = vpop.f32.mrf.mxu1 }
0x1a86   : > { %5914 = vrot.lane.b32.xlu1 %v5654_v3, %s13547_s9  ;;  %9987 = vmatmul.mubr.msk.f32.vlgmr.msra.gmra.mxu1 %vm2532_vm4, %v5654_v3 }
0x1a87   : > { %9991 = vmatprep.mubr.msk.f32.mxu1 %vm11763_vm1, %v11762_v8 }
0x1a8a   : > { %6081 = vrot.lane.b32.xlu1 %v5654_v3, %s13549_s5 }
0x1a8e   : > { %6248 = vrot.lane.b32.xlu1 %v5654_v3, %s13529_s28 }
0x1adb   : > { %v5917_v5 = vpop.permute.xlu0 %5916 }
0x1adc   : > { %9995 = vmatpush3.xpose.msk.msra.mxu0 %vm2532_vm4, %v5917_v5 }
0x1add   : > { %10004 = vmatprep.subr.mxu0 %v11762_v8 }
0x1adf   : > { %v6084_v46 = vpop.permute.xlu0 %6083 }
0x1ae3   : > { %v6251_v0 = vpop.permute.xlu0 %6250 }
0x1af8   : > { %v5915_v36 = vpop.permute.xlu1 %5914 }
0x1af9   : > { %9997 = vmatmul.mubr.msk.f32.vlgmr.msra.gmra.mxu0 %vm2532_vm4, %v5915_v36 }
0x1afa   : > { %10005 = vmatpush3.xpose.msk.msra.mxu0 %vm2532_vm4, %v6084_v46  ;;  %10006 = vmatprep.mubr.msk.f32.mxu0 %vm11763_vm1, %v11762_v8 }
0x1afb   : > { %10014 = vmatprep.subr.mxu0 %v11762_v8 }
0x1afc   : > { %v6082_v6 = vpop.permute.xlu1 %6081 }
0x1afd   : > { %10007 = vmatmul.mubr.msk.f32.vlgmr.msra.gmra.mxu0 %vm2532_vm4, %v6082_v6 }
0x1afe   : > { %10015 = vmatpush3.xpose.msk.msra.mxu0 %vm2532_vm4, %v6251_v0  ;;  %10016 = vmatprep.mubr.msk.f32.mxu0 %vm11763_vm1, %v11762_v8 }
0x1aff   : > { %10024 = vmatprep.subr.mxu0 %v11762_v8 }
0x1b00   : > { %v6249_v7 = vpop.permute.xlu1 %6248 }
0x1b01   : > { %10017 = vmatmul.mubr.msk.f32.vlgmr.msra.gmra.mxu0 %vm2532_vm4, %v6249_v7  ;;  %v6433_v7 = vld [vmem:[%s13559_s2 + $0x18] sm:$0xff]  ;;  %s13562_s2 = sld [smem:[#allocation70_spill]] }
0x1b02   : > { %10032 = vmatprep.mubr.msk.f32.mxu0 %vm11763_vm1, %v11762_v8  ;;  %10025 = vmatpush3.msra.mxu0 %v6433_v7 }
0x1b03   : > { %10026 = vmatprep.subr.mxu0 %v11762_v8 }
0x1b46   : > { %v5821_v9 = vpop.f32.mrf.mxu1 }
0x1b47   : > { %v5825_v10 = vmul.f32 0.35355338, %v5821_v9  ;;  %v6432_v9 = vld [vmem:[%s13560_s12 + $0x10] sm:$0xff] }
0x1b48   : > { %v9988_v12 = vpop.f32.mrf.mxu1  ;;  %10027 = vmatpush3.msra.mxu0 %v6432_v9 }
0x1b49   : > { %v5826_v13 = vsel %vm2613_vm6, %v5825_v10, -1e+09  ;;  %v6431_v10 = vld [vmem:[%s13560_s12 + $0x8] sm:$0xff]  ;;  %10028 = vmatprep.subr.mxu0 %v11762_v8  ;;  %v6430_v12 = vld [vmem:[%s13560_s12] sm:$0xff]  ;;  %s13563_s12 = smov %s13562_s2 }
0x1b4a   : > { %v5827_v14 = vsel %vm2532_vm4, %v5826_v13, -inf  ;;  %10029 = vmatpush3.msra.mxu0 %v6431_v10 }
0x1b4b   : > { %5828 = vmax.xlane.f32.xlu0 %v5827_v14  ;;  %10030 = vmatprep.subr.mxu0 %v11762_v8 }
0x1b4c   : > { %10031 = vmatpush3.msra.mxu0 %v6430_v12 }
0x1b4d   : > { %10046 = vmatprep.subr.mxu0 %v11762_v8 }
0x1bb9   : > { %v5988_v15 = vpop.f32.mrf.mxu0 }
0x1bba   : > { %v5992_v16 = vmul.f32 0.35355338, %v5988_v15 }
0x1bbb   : > { %v9998_v17 = vpop.f32.mrf.mxu0 }
0x1bbc   : > { %v5993_v18 = vsel %vm2613_vm6, %v5992_v16, -1e+09 }
0x1bbd   : > { %v6155_v21 = vpop.f32.mrf.mxu0  ;;  %v5994_v19 = vsel %vm2532_vm4, %v5993_v18, -inf }
0x1bbe   : > { %v6159_v20 = vmul.f32 0.35355338, %v6155_v21  ;;  %5995 = vmax.xlane.f32.xlu1 %v5994_v19 }
0x1bbf   : > { %v10008_v22 = vpop.f32.mrf.mxu0 }
0x1bc0   : > { %v6160_v23 = vsel %vm2613_vm6, %v6159_v20, -1e+09 }
0x1bc1   : > { %v6322_v24 = vpop.f32.mrf.mxu0  ;;  %v6161_v25 = vsel %vm2532_vm4, %v6160_v23, -inf }
0x1bc2   : > { %v6326_v26 = vmul.f32 0.35355338, %v6322_v24  ;;  %6162 = vmax.xlane.f32.xlu0 %v6161_v25  ;;  %v9437_v25 = vld [vmem:[%s13561_s13] ss:$0 sm:$0xff]  ;;  %s13565_s13 = sld [smem:[#allocation76_spill]] }
0x1bc3   : > { %v10018_v27 = vpop.f32.mrf.mxu0 }
0x1bc4   : > { %v6327_v29 = vsel %vm2613_vm6, %v6326_v26, -1e+09 }
0x1bc5   : > { %v6328_v30 = vsel %vm2532_vm4, %v6327_v29, -inf }
0x1bc6   : > { %6329 = vmax.xlane.f32.xlu0 %v6328_v30 }
0x1bcf   : > { %5838 = vrot.lane.b32.xlu1 %v12898_v63, %s13546_s6 }
0x1bd4   : > { %v5829_v31 = vpop.xlane.xlu0 %5828 }
0x1bd5   : > { %v5830_v32 = vsub.f32 %v5826_v13, %v5829_v31 }
0x1bd7   : > { %v5831_v33 = vmul.f32 1.442695, %v5830_v32 }
0x1bd9   : > { %10721 = vpow2.f32 %v5831_v33 }
0x1be6   : > { %v10722_v28 = vpop.eup %10721 }
0x1be7   : > { %v5833_v34 = vsel %vm2532_vm4, %v10722_v28, 0.0 }
0x1bf3   : > { %5834 = vadd.xlane.f32.xlu1 %v5833_v34 }
0x1c47   : > { %v5996_v37 = vpop.xlane.xlu1 %5995 }
0x1c48   : > { %v5997_v38 = vsub.f32 %v5993_v18, %v5996_v37 }
0x1c4a   : > { %v5998_v35 = vmul.f32 1.442695, %v5997_v38  ;;  %v6554_v38 = vld [vmem:[%s13562_s2 + $0x18] sm:$0xff]  ;;  %s13566_s2 = sld [smem:[#allocation77_spill]] }
0x1c4b   : > { %v5839_v39 = vpop.permute.xlu1 %5838  ;;  %v6163_v41 = vpop.xlane.xlu0 %6162 }
0x1c4c   : > { %10723 = vpow2.f32 %v5998_v35  ;;  %v6164_v42 = vsub.f32 %v6160_v23, %v6163_v41  ;;  %9990 = vmatpush3.msra.mxu1 %v5839_v39  ;;  %v6553_v35 = vld [vmem:[%s13563_s12 + $0x10] sm:$0xff]  ;;  %v6551_v39 = vld [vmem:[%s13563_s12] sm:$0xff]  ;;  %v6643_v41 = vld [vmem:[%s13564_s14 + $0x38] sm:$0xff] }
0x1c4d   : > { %9999 = vmatprep.subr.mxu1 %v11762_v8 }
0x1c4e   : > { %v6165_v44 = vmul.f32 1.442695, %v6164_v42  ;;  %v6642_v42 = vld [vmem:[%s13564_s14 + $0x30] sm:$0xff] }
0x1c4f   : > { %v6330_v45 = vpop.xlane.xlu0 %6329 }
0x1c50   : > { %10725 = vpow2.f32 %v6165_v44  ;;  %v6331_v40 = vsub.f32 %v6327_v29, %v6330_v45  ;;  %v6641_v44 = vld [vmem:[%s13564_s14 + $0x28] sm:$0xff]  ;;  %v6640_v45 = vld [vmem:[%s13564_s14 + $0x20] sm:$0xff] }
0x1c52   : > { %v6332_v49 = vmul.f32 1.442695, %v6331_v40  ;;  %v6639_v40 = vld [vmem:[%s13564_s14 + $0x18] sm:$0xff] }
0x1c54   : > { %10727 = vpow2.f32 %v6332_v49 }
0x1c59   : > { %v10724_v50 = vpop.eup %10723 }
0x1c5a   : > { %v6000_v51 = vsel %vm2532_vm4, %v10724_v50, 0.0 }
0x1c5b   : > { %6001 = vadd.xlane.f32.xlu0 %v6000_v51 }
0x1c5d   : > { %v10726_v52 = vpop.eup %10725 }
0x1c5e   : > { %v6167_v53 = vsel %vm2532_vm4, %v10726_v52, 0.0 }
0x1c5f   : > { %6168 = vadd.xlane.f32.xlu1 %v6167_v53 }
0x1c61   : > { %v10728_v54 = vpop.eup %10727 }
0x1c62   : > { %v6334_v55 = vsel %vm2532_vm4, %v10728_v54, 0.0 }
0x1c63   : > { %6335 = vadd.xlane.f32.xlu0 %v6334_v55 }
0x1c70   : > { %6172 = vrot.lane.b32.xlu1 %v12898_v63, %s13548_s10 }
0x1c74   : > { %6339 = vrot.lane.b32.xlu1 %v12898_v63, %s13550_s11 }
0x1c79   : > { %6005 = vrot.lane.b32.xlu0 %v12898_v63, %s13545_s8 }
0x1c7c   : > { %v5835_v56 = vpop.xlane.xlu1 %5834 }
0x1c7d   : > { %10729 = vrcp.f32 %v5835_v56 }
0x1c8a   : > { %v10730_v57 = vpop.eup %10729 }
0x1c8b   : > { %v5837_v58 = vmul.f32 %v10730_v57, %v10722_v28  ;;  %v9439_v57 = vld [vmem:[%s13565_s13] ss:$0 sm:$0xff]  ;;  %s13569_s13 = sld [smem:[#allocation97_spill]] }
0x1c8d   : > { %9992 = vmatmul.mubr.msk.f32.vlgmr.msra.gmra.mxu1 %vm2532_vm4, %v5837_v58 }
0x1c8e   : > { %10001 = vmatprep.mubr.msk.f32.mxu1 %vm11763_vm1, %v11762_v8 }
0x1ce4   : > { %v6002_v59 = vpop.xlane.xlu0 %6001 }
0x1ce5   : > { %10731 = vrcp.f32 %v6002_v59 }
0x1ce8   : > { %v6169_v60 = vpop.xlane.xlu1 %6168 }
0x1ce9   : > { %10733 = vrcp.f32 %v6169_v60  ;;  %v9440_v60 = vld [vmem:[%s13566_s2] ss:$0 sm:$0xff]  ;;  %s11779_s2 = smov [#allocation47]  }
0x1cec   : > { %v6336_v61 = vpop.xlane.xlu0 %6335  ;;  %v6173_v63 = vpop.permute.xlu1 %6172 }
0x1ced   : > { %10735 = vrcp.f32 %v6336_v61 }
0x1cf0   : > { %v6006_v62 = vpop.permute.xlu0 %6005  ;;  %v6340_v5 = vpop.permute.xlu1 %6339 }
0x1cf1   : > { %10000 = vmatpush3.msra.mxu1 %v6006_v62 }
0x1cf2   : > { %v10732_v1 = vpop.eup %10731  ;;  %10009 = vmatprep.subr.mxu1 %v11762_v8 }
0x1cf3   : > { %v6004_v2 = vmul.f32 %v10732_v1, %v10724_v50  ;;  %v6638_v1 = vld [vmem:[%s13564_s14 + $0x10] sm:$0xff] }
0x1cf5   : > { %10002 = vmatmul.mubr.msk.f32.vlgmr.msra.gmra.mxu1 %vm2532_vm4, %v6004_v2  ;;  %v6636_v2 = vld [vmem:[%s13564_s14] sm:$0xff] }
0x1cf6   : > { %v10734_v3 = vpop.eup %10733  ;;  %10010 = vmatpush3.msra.mxu1 %v6173_v63  ;;  %10011 = vmatprep.mubr.msk.f32.mxu1 %vm11763_vm1, %v11762_v8  ;;  %v6637_v63 = vld [vmem:[%s13564_s14 + $0x8] sm:$0xff] }
0x1cf7   : > { %10019 = vmatprep.subr.mxu1 %v11762_v8  ;;  %v6171_v4 = vmul.f32 %v10734_v3, %v10726_v52 }
0x1cf9   : > { %10012 = vmatmul.mubr.msk.f32.vlgmr.msra.gmra.mxu1 %vm2532_vm4, %v6171_v4 }
0x1cfa   : > { %v10736_v46 = vpop.eup %10735  ;;  %10020 = vmatpush3.msra.mxu1 %v6340_v5  ;;  %10021 = vmatprep.mubr.msk.f32.mxu1 %vm11763_vm1, %v11762_v8 }
0x1cfb   : > { %v6338_v36 = vmul.f32 %v10736_v46, %v10728_v54  ;;  %10035 = vmatprep.subr.mxu1 %v11762_v8 }
0x1cfd   : > { %10022 = vmatmul.mubr.msk.f32.vlgmr.msra.gmra.mxu1 %vm2532_vm4, %v6338_v36 }
0x1cfe   : > { %10043 = vmatprep.mubr.msk.f32.mxu1 %vm11763_vm1, %v11762_v8  ;;  %10036 = vmatpush3.msra.mxu1 %v6554_v38  ;;  %v9447_v38 = vld [vmem:[#allocation13] ss:$0 sm:$0xff] }
0x1cff   : > { %10037 = vmatprep.subr.mxu1 %v11762_v8 }
0x1d00   : > { %10038 = vmatpush3.msra.mxu1 %v6553_v35 }
0x1d01   : > { %10039 = vmatprep.subr.mxu1 %v11762_v8 }
0x1d4d   : > { %v5910_v6 = vpop.f32.mrf.mxu1 }
0x1d4f   : > { %v9993_v0 = vpop.f32.mrf.mxu1 }
0x1db5   : > { %v6077_v13 = vpop.f32.mrf.mxu1 }
0x1db6   : > { %6416 = vrot.lane.b32.xlu0 %v6077_v13, %s13536_s1 }
0x1db7   : > { %v10003_v14 = vpop.f32.mrf.mxu1 }
0x1db9   : > { %v6244_v15 = vpop.f32.mrf.mxu1 }
0x1dba   : > { %6420 = vrot.lane.b32.xlu1 %v6244_v15, %s13537_s3 }
0x1dbb   : > { %v10013_v16 = vpop.f32.mrf.mxu1 }
0x1dbd   : > { %v6411_v17 = vpop.f32.mrf.mxu1 }
0x1dbe   : > { %6424 = vrot.lane.b32.xlu0 %v6411_v17, %s13538_s4 }
0x1dbf   : > { %v10023_v18 = vpop.f32.mrf.mxu1 }
0x1dc0   : > { %v6764_v18 = vld [vmem:[%s13569_s13 + $0x18] sm:$0xff] }
0x1e28   : > { %v6417_v21 = vpop.permute.xlu0 %6416 }
0x1e29   : > { %v6427_v20 = vsel %vm2532_vm4, %v5910_v6, %v6417_v21  ;;  %v9443_v6 = vld [vmem:[%s13568_s15] ss:$0 sm:$0xff]  ;;  %v6763_v21 = vld [vmem:[%s13569_s13 + $0x10] sm:$0xff]  ;;  %s13570_s15 = sld [smem:[#allocation90_spill]] }
0x1e2c   : > { %v6421_v19 = vpop.permute.xlu1 %6420 }
0x1e2d   : > { %v6428_v22 = vsel %vm3216_vm7, %v6427_v20, %v6421_v19  ;;  %v6762_v19 = vld [vmem:[%s13569_s13 + $0x8] sm:$0xff]  ;;  %v6761_v20 = vld [vmem:[%s13569_s13] sm:$0xff] }
0x1e30   : > { %v6425_v23 = vpop.permute.xlu0 %6424 }
0x1e31   : > { %v6429_v24 = vsel %vm3218_vm8, %v6428_v22, %v6425_v23 }
0x1e32   : > { %10033 = vmatmul.mubr.msk.f32.vlgmr.msra.gmra.mxu0 %vm2407_vm0, %v6429_v24 }
0x1e33   : > { %10062 = vmatprep.mubr.msk.f32.mxu0 %vm11763_vm1, %v11762_v8  ;;  %10047 = vmatpush3.msra.mxu0 %v6643_v41 }
0x1e34   : > { %10048 = vmatprep.subr.mxu0 %v11762_v8 }
0x1e35   : > { %10049 = vmatpush3.msra.mxu0 %v6642_v42 }
0x1e36   : > { %10050 = vmatprep.subr.mxu0 %v11762_v8 }
0x1e37   : > { %10051 = vmatpush3.msra.mxu0 %v6641_v44 }
0x1e38   : > { %10052 = vmatprep.subr.mxu0 %v11762_v8 }
0x1e39   : > { %10053 = vmatpush3.msra.mxu0 %v6640_v45 }
0x1e3a   : > { %10054 = vmatprep.subr.mxu0 %v11762_v8 }
0x1e3b   : > { %10055 = vmatpush3.msra.mxu0 %v6639_v40 }
0x1e3c   : > { %10056 = vmatprep.subr.mxu0 %v11762_v8 }
0x1e3d   : > { %10057 = vmatpush3.msra.mxu0 %v6638_v1 }
0x1e3e   : > { %10058 = vmatprep.subr.mxu0 %v11762_v8 }
0x1e3f   : > { %10059 = vmatpush3.msra.mxu0 %v6637_v63 }
0x1e40   : > { %10060 = vmatprep.subr.mxu0 %v11762_v8 }
0x1e41   : > { %10061 = vmatpush3.msra.mxu0 %v6636_v2 }
0x1e42   : > { %10086 = vmatprep.subr.mxu0 %v11762_v8 }
0x1ef2   : > { %v6510_v26 = vpop.f32.mrf.mxu0 }
0x1ef3   : > { %v6511_v27 = vadd.f32 %v9437_v25, %v6510_v26 }
0x1ef4   : > { %v10034_v29 = vpop.f32.mrf.mxu0 }
0x1ef5   : > { %v12989_v30 = vadd.f32 %v6511_v27, %v12862_v11  ;;  %v6552_v11 = vld [vmem:[%s13563_s12 + $0x8] sm:$0xff]  ;;  %s13567_s12 = sld [smem:[#allocation68_spill]] }
0x1ef6   : > { %10040 = vmatpush3.msra.mxu1 %v6552_v11 }
0x1ef7   : > { %v6517_v31 = vsel %vm2407_vm0, %v12989_v30, 0.0  ;;  %10041 = vmatprep.subr.mxu1 %v11762_v8 }
0x1ef8   : > { %6518 = vadd.xlane.f32.xlu1 %v6517_v31  ;;  %10042 = vmatpush3.msra.mxu1 %v6551_v39  ;;  %v9445_v31 = vld [vmem:[%s13570_s15] ss:$0 sm:$0xff]  ;;  %s11547_s15 = sshll.u32 %s11779_s2, 4  ;;  %s11548_s15 = int_to_ptr.vmem [resolvable:$false] %s11547_s15 }
0x1ef9   : > { %10065 = vmatprep.subr.mxu1 %v11762_v8 }
0x1efb   : > { %v9441_v3 = vld [vmem:[%s13567_s12] ss:$0 sm:$0xff] }
0x1f81   : > { %v6519_v32 = vpop.xlane.xlu1 %6518 }
0x1f82   : > { %v6520_v33 = vmul.f32 0.03125, %v6519_v32 }
0x1f84   : > { %v6521_v28 = vsub.f32 %v12989_v30, %v6520_v33 }
0x1f86   : > { %v6522_v34 = vmul.f32 %v6521_v28, %v6521_v28  ;;  %v6542_v58 = vmul.f32 %v9439_v57, %v6521_v28  ;;  %v9446_v28 = vld [vmem:[#allocation2] ss:$0 sm:$0xff] }
0x1f88   : > { %v6523_v37 = vsel %vm2407_vm0, %v6522_v34, 0.0 }
0x1f89   : > { %6524 = vadd.xlane.f32.xlu0 %v6523_v37 }
0x2012   : > { %v6525_v49 = vpop.xlane.xlu0 %6524 }
0x2013   : > { %v6526_v50 = vmul.f32 0.032258064, %v6525_v49 }
0x2015   : > { %10737 = vrsqrt.f32 %v6526_v50  ;;  %vm6529_vm14 = vcmp.eq.f32.partialorder %v6526_v50, inf  ;;  %v6532_v53 = vand.u32 2147483648, %v6526_v50  ;;  %vm6531_vm15 = vcmp.eq.f32.partialorder %v6526_v50, 0.0 }
0x2022   : > { %v10738_v51 = vpop.eup %10737 }
0x2023   : > { %v6528_v52 = vmul.f32 %v10738_v51, %v6526_v50 }
0x2025   : > { %v6530_v54 = vsel %vm6529_vm14, %v6526_v50, %v6528_v52 }
0x2026   : > { %v6533_v55 = vsel %vm6531_vm15, %v6532_v53, %v6530_v54 }
0x2027   : > { %v6534_v56 = vadd.f32 1e-06, %v6533_v55 }
0x2029   : > { %10739 = vrcp.f32 %v6534_v56 }
0x2036   : > { %v10740_v59 = vpop.eup %10739 }
0x2037   : > { %v6543_v61 = vmul.f32 %v10740_v59, %v6542_v58 }
0x2039   : > { %v6550_v62 = vadd.f32 %v9440_v60, %v6543_v61 }
0x203b   : > { %10044 = vmatmul.mubr.msk.f32.vlgmr.msra.gmra.mxu1 %vm2407_vm0, %v6550_v62 }
0x203c   : > { %10073 = vmatprep.mubr.msk.f32.mxu1 %vm11763_vm1, %v11762_v8  ;;  %10066 = vmatpush3.msra.mxu1 %v6764_v18 }
0x203d   : > { %10067 = vmatprep.subr.mxu1 %v11762_v8 }
0x203e   : > { %10068 = vmatpush3.msra.mxu1 %v6763_v21 }
0x203f   : > { %10069 = vmatprep.subr.mxu1 %v11762_v8 }
0x2040   : > { %10070 = vmatpush3.msra.mxu1 %v6762_v19 }
0x2041   : > { %10071 = vmatprep.subr.mxu1 %v11762_v8 }
0x2042   : > { %10072 = vmatpush3.msra.mxu1 %v6761_v20 }
0x2043   : > { %10076 = vmatprep.subr.mxu1 %v11762_v8 }
0x20fb   : > { %v6631_v4 = vpop.f32.mrf.mxu1 }
0x20fc   : > { %v6632_v5 = vadd.f32 %v9441_v3, %v6631_v4 }
0x20fd   : > { %v10045_v46 = vpop.f32.mrf.mxu1 }
0x20fe   : > { %v6635_v36 = vmax.f32 %v6632_v5, 0.0 }
0x2100   : > { %10063 = vmatmul.mubr.msk.f32.vlgmr.msra.gmra.mxu0 %vm3441_vm11, %v6635_v36 }
0x2101   : > { %10088 = vmatprep.mubr.msk.f32.mxu0 %vm11763_vm1, %v11762_v8 }
0x21c0   : > { %v6720_v0 = vpop.f32.mrf.mxu0 }
0x21c1   : > { %v6721_v7 = vadd.f32 %v9443_v6, %v6720_v0 }
0x21c2   : > { %v10064_v9 = vpop.f32.mrf.mxu0 }
0x21c3   : > { %v13030_v10 = vadd.f32 %v6721_v7, %v12989_v30 }
0x21c5   : > { %v6727_v12 = vsel %vm2407_vm0, %v13030_v10, 0.0 }
0x21c6   : > { %6728 = vadd.xlane.f32.xlu0 %v6727_v12 }
0x224f   : > { %v6729_v13 = vpop.xlane.xlu0 %6728 }
0x2250   : > { %v6730_v14 = vmul.f32 0.03125, %v6729_v13 }
0x2252   : > { %v6731_v15 = vsub.f32 %v13030_v10, %v6730_v14 }
0x2254   : > { %v6732_v16 = vmul.f32 %v6731_v15, %v6731_v15  ;;  %v6752_v32 = vmul.f32 %v9445_v31, %v6731_v15 }
0x2256   : > { %v6733_v17 = vsel %vm2407_vm0, %v6732_v16, 0.0 }
0x2257   : > { %6734 = vadd.xlane.f32.xlu1 %v6733_v17 }
0x22e0   : > { %v6735_v22 = vpop.xlane.xlu1 %6734 }
0x22e1   : > { %v6736_v23 = vmul.f32 0.032258064, %v6735_v22 }
0x22e3   : > { %10741 = vrsqrt.f32 %v6736_v23  ;;  %vm6739_vm2 = vcmp.eq.f32.partialorder %v6736_v23, inf  ;;  %v6742_v26 = vand.u32 2147483648, %v6736_v23  ;;  %vm6741_vm3 = vcmp.eq.f32.partialorder %v6736_v23, 0.0 }
0x22f0   : > { %v10742_v24 = vpop.eup %10741 }
0x22f1   : > { %v6738_v25 = vmul.f32 %v10742_v24, %v6736_v23 }
0x22f3   : > { %v6740_v27 = vsel %vm6739_vm2, %v6736_v23, %v6738_v25 }
0x22f4   : > { %v6743_v29 = vsel %vm6741_vm3, %v6742_v26, %v6740_v27 }
0x22f5   : > { %v6744_v30 = vadd.f32 1e-06, %v6743_v29 }
0x22f7   : > { %10743 = vrcp.f32 %v6744_v30 }
0x2304   : > { %v10744_v33 = vpop.eup %10743 }
0x2305   : > { %v6753_v34 = vmul.f32 %v10744_v33, %v6752_v32 }
0x2307   : > { %v6760_v37 = vadd.f32 %v9446_v28, %v6753_v34 }
0x2309   : > { %10074 = vmatmul.mubr.msk.f32.vlgmr.msra.gmra.mxu1 %vm2407_vm0, %v6760_v37 }
0x230a   : > { %10078 = vmatprep.mubr.msk.f32.mxu1 %vm11763_vm1, %v11762_v8 }
0x23c9   : > { %v6841_v35 = vpop.f32.mrf.mxu1 }
0x23ca   : > { %v13048_v11 = vadd.f32 %v9447_v38, %v6841_v35 }
0x23cb   : > { %v10075_v39 = vpop.f32.mrf.mxu1 }
0x23cc   : > { %7013 = vrot.lane.b32.xlu1 %v13048_v11, %s13545_s8  ;;  %6846 = vrot.lane.b32.xlu0 %v13048_v11, %s13546_s6 }
0x23d0   : > { %7011 = vrot.lane.b32.xlu1 %v13048_v11, %s13547_s9  ;;  %7180 = vrot.lane.b32.xlu0 %v13048_v11, %s13548_s10 }
0x23d4   : > { %7178 = vrot.lane.b32.xlu1 %v13048_v11, %s13549_s5  ;;  %7347 = vrot.lane.b32.xlu0 %v13048_v11, %s13550_s11 }
0x23d8   : > { %7345 = vrot.lane.b32.xlu1 %v13048_v11, %s13529_s28 }
0x243e   : > { %v7014_v41 = vpop.permute.xlu1 %7013  ;;  %v6847_v42 = vpop.permute.xlu0 %6846 }
0x243f   : > { %10077 = vmatpush3.xpose.msk.msra.mxu1 %vm2532_vm4, %v6847_v42  ;;  %10087 = vmatpush3.xpose.msk.msra.mxu0 %vm2532_vm4, %v7014_v41 }
0x2440   : > { %10096 = vmatprep.subr.mxu0 %v11762_v8  ;;  %10081 = vmatprep.subr.mxu1 %v11762_v8 }
0x2442   : > { %v7012_v44 = vpop.permute.xlu1 %7011  ;;  %10079 = vmatmul.mubr.msk.f32.vlgmr.msra.gmra.mxu1 %vm2532_vm4, %v13048_v11  ;;  %v7181_v45 = vpop.permute.xlu0 %7180 }
0x2443   : > { %10089 = vmatmul.mubr.msk.f32.vlgmr.msra.gmra.mxu0 %vm2532_vm4, %v7012_v44  ;;  %10083 = vmatprep.mubr.msk.f32.mxu1 %vm11763_vm1, %v11762_v8 }
0x2444   : > { %10097 = vmatpush3.xpose.msk.msra.mxu0 %vm2532_vm4, %v7181_v45  ;;  %10098 = vmatprep.mubr.msk.f32.mxu0 %vm11763_vm1, %v11762_v8 }
0x2445   : > { %10106 = vmatprep.subr.mxu0 %v11762_v8 }
0x2446   : > { %v7179_v40 = vpop.permute.xlu1 %7178  ;;  %v7348_v49 = vpop.permute.xlu0 %7347 }
0x2447   : > { %10099 = vmatmul.mubr.msk.f32.vlgmr.msra.gmra.mxu0 %vm2532_vm4, %v7179_v40 }
0x2448   : > { %10107 = vmatpush3.xpose.msk.msra.mxu0 %vm2532_vm4, %v7348_v49  ;;  %10108 = vmatprep.mubr.msk.f32.mxu0 %vm11763_vm1, %v11762_v8 }
0x2449   : > { %10116 = vmatprep.subr.mxu0 %v11762_v8 }
0x244a   : > { %v7346_v50 = vpop.permute.xlu1 %7345 }
0x244b   : > { %10109 = vmatmul.mubr.msk.f32.vlgmr.msra.gmra.mxu0 %vm2532_vm4, %v7346_v50 }
0x244c   : > { %10124 = vmatprep.mubr.msk.f32.mxu0 %vm11763_vm1, %v11762_v8 }
0x2502   : > { %v6918_v51 = vpop.f32.mrf.mxu1 }
0x2503   : > { %v6922_v52 = vmul.f32 0.35355338, %v6918_v51  ;;  %v7085_v53 = vpop.f32.mrf.mxu0 }
0x2504   : > { %v7089_v54 = vmul.f32 0.35355338, %v7085_v53  ;;  %v10080_v55 = vpop.f32.mrf.mxu1 }
0x2505   : > { %v6923_v56 = vsel %vm4769_vm5, %v6922_v52, -1e+09  ;;  %v10090_v57 = vpop.f32.mrf.mxu0 }
0x2506   : > { %v7090_v58 = vsel %vm4769_vm5, %v7089_v54, -1e+09  ;;  %v6924_v59 = vsel %vm2532_vm4, %v6923_v56, -inf }
0x2507   : > { %v7252_v60 = vpop.f32.mrf.mxu0  ;;  %6925 = vmax.xlane.f32.xlu0 %v6924_v59  ;;  %v7091_v61 = vsel %vm2532_vm4, %v7090_v58, -inf }
0x2508   : > { %v7256_v62 = vmul.f32 0.35355338, %v7252_v60  ;;  %7092 = vmax.xlane.f32.xlu1 %v7091_v61 }
0x2509   : > { %v10100_v1 = vpop.f32.mrf.mxu0 }
0x250a   : > { %v7257_v63 = vsel %vm4769_vm5, %v7256_v62, -1e+09 }
0x250b   : > { %v7419_v2 = vpop.f32.mrf.mxu0  ;;  %v7258_v3 = vsel %vm2532_vm4, %v7257_v63, -inf }
0x250c   : > { %v7423_v4 = vmul.f32 0.35355338, %v7419_v2  ;;  %7259 = vmax.xlane.f32.xlu0 %v7258_v3  ;;  %v9461_v2 = vld [vmem:[#allocation11] ss:$0 sm:$0xff] }
0x250d   : > { %v10110_v5 = vpop.f32.mrf.mxu0 }
0x250e   : > { %v7424_v46 = vsel %vm4769_vm5, %v7423_v4, -1e+09 }
0x250f   : > { %v7425_v36 = vsel %vm2532_vm4, %v7424_v46, -inf }
0x2510   : > { %7426 = vmax.xlane.f32.xlu0 %v7425_v36 }
0x2519   : > { %6935 = vrot.lane.b32.xlu1 %v13048_v11, %s13530_s23  ;;  %s13577_s23 = sld [smem:[#allocation87_spill]] }
0x2590   : > { %v6926_v6 = vpop.xlane.xlu0 %6925 }
0x2591   : > { %v6927_v0 = vsub.f32 %v6923_v56, %v6926_v6  ;;  %v7093_v7 = vpop.xlane.xlu1 %7092 }
0x2592   : > { %v7094_v9 = vsub.f32 %v7090_v58, %v7093_v7 }
0x2593   : > { %v6928_v12 = vmul.f32 1.442695, %v6927_v0 }
0x2594   : > { %v7095_v13 = vmul.f32 1.442695, %v7094_v9 }
0x2595   : > { %10745 = vpow2.f32 %v6928_v12  ;;  %v6936_v14 = vpop.permute.xlu1 %6935  ;;  %v7260_v15 = vpop.xlane.xlu0 %7259 }
0x2596   : > { %10747 = vpow2.f32 %v7095_v13  ;;  %v7261_v16 = vsub.f32 %v7257_v63, %v7260_v15  ;;  %10082 = vmatpush3.msra.mxu1 %v6936_v14 }
0x2597   : > { %10091 = vmatprep.subr.mxu1 %v11762_v8 }
0x2598   : > { %v7262_v48 = vmul.f32 1.442695, %v7261_v16  ;;  %v9465_v16 = vld [vmem:[#allocation16] ss:$0 sm:$0xff] }
0x2599   : > { %v7427_v17 = vpop.xlane.xlu0 %7426 }
0x259a   : > { %10749 = vpow2.f32 %v7262_v48  ;;  %v7428_v18 = vsub.f32 %v7424_v46, %v7427_v17 }
0x259c   : > { %v7429_v21 = vmul.f32 1.442695, %v7428_v18 }
0x259e   : > { %10751 = vpow2.f32 %v7429_v21 }
0x25a2   : > { %v10746_v19 = vpop.eup %10745 }
0x25a3   : > { %v10748_v20 = vpop.eup %10747  ;;  %v6930_v22 = vsel %vm2532_vm4, %v10746_v19, 0.0 }
0x25a4   : > { %6931 = vadd.xlane.f32.xlu1 %v6930_v22  ;;  %v7097_v23 = vsel %vm2532_vm4, %v10748_v20, 0.0 }
0x25a5   : > { %7098 = vadd.xlane.f32.xlu0 %v7097_v23 }
0x25a7   : > { %v10750_v24 = vpop.eup %10749 }
0x25a8   : > { %v7264_v25 = vsel %vm2532_vm4, %v10750_v24, 0.0 }
0x25a9   : > { %7265 = vadd.xlane.f32.xlu1 %v7264_v25 }
0x25ab   : > { %v10752_v26 = vpop.eup %10751 }
0x25ac   : > { %v7431_v27 = vsel %vm2532_vm4, %v10752_v26, 0.0 }
0x25ad   : > { %7432 = vadd.xlane.f32.xlu0 %v7431_v27 }
0x25ba   : > { %7269 = vrot.lane.b32.xlu1 %v13048_v11, %s13531_s19  ;;  %s13576_s19 = sld [smem:[#allocation86_spill]] }
0x25be   : > { %7436 = vrot.lane.b32.xlu1 %v13048_v11, %s13532_s16  ;;  %s13572_s16 = sld [smem:[#allocation100_spill]] }
0x25c3   : > { %7102 = vrot.lane.b32.xlu0 %v13048_v11, %s13533_s18  ;;  %s13571_s18 = sld [smem:[#allocation95_spill]] }
0x25c4   : > { %v7650_v6 = vld [vmem:[%s13572_s16 + $0x10] sm:$0xff]  ;;  %v7651_v0 = vld [vmem:[%s13572_s16 + $0x18] sm:$0xff]  ;;  %v7649_v7 = vld [vmem:[%s13572_s16 + $0x8] sm:$0xff] }
0x25c9   : > { %v7530_v45 = vld [vmem:[%s13571_s18 + $0x18] sm:$0xff]  ;;  %v7529_v40 = vld [vmem:[%s13571_s18 + $0x10] sm:$0xff]  ;;  %v7528_v49 = vld [vmem:[%s13571_s18 + $0x8] sm:$0xff] }
0x25ca   : > { %10117 = vmatpush3.msra.mxu0 %v7530_v45  ;;  %v7527_v51 = vld [vmem:[%s13571_s18] sm:$0xff] }
0x25cb   : > { %10118 = vmatprep.subr.mxu0 %v11762_v8 }
0x25cc   : > { %10119 = vmatpush3.msra.mxu0 %v7529_v40 }
0x25cd   : > { %10120 = vmatprep.subr.mxu0 %v11762_v8 }
0x25ce   : > { %10121 = vmatpush3.msra.mxu0 %v7528_v49 }
0x25cf   : > { %10122 = vmatprep.subr.mxu0 %v11762_v8 }
0x25d0   : > { %10123 = vmatpush3.msra.mxu0 %v7527_v51 }
0x25d1   : > { %10138 = vmatprep.subr.mxu0 %v11762_v8 }
0x262d   : > { %v6932_v29 = vpop.xlane.xlu1 %6931 }
0x262e   : > { %10753 = vrcp.f32 %v6932_v29  ;;  %v7099_v30 = vpop.xlane.xlu0 %7098  ;;  %v9463_v29 = vld [vmem:[#allocation5] ss:$0 sm:$0xff] }
0x262f   : > { %10755 = vrcp.f32 %v7099_v30 }
0x2632   : > { %v7266_v31 = vpop.xlane.xlu1 %7265 }
0x2633   : > { %10757 = vrcp.f32 %v7266_v31 }
0x2636   : > { %v7433_v32 = vpop.xlane.xlu0 %7432  ;;  %v7270_v38 = vpop.permute.xlu1 %7269 }
0x2637   : > { %10759 = vrcp.f32 %v7433_v32  ;;  %v9464_v32 = vld [vmem:[#allocation7] ss:$0 sm:$0xff] }
0x263a   : > { %v7103_v37 = vpop.permute.xlu0 %7102  ;;  %v7437_v42 = vpop.permute.xlu1 %7436 }
0x263b   : > { %v10754_v33 = vpop.eup %10753 }
0x263c   : > { %v6934_v28 = vmul.f32 %v10754_v33, %v10746_v19  ;;  %v10756_v34 = vpop.eup %10755 }
0x263d   : > { %v7101_v35 = vmul.f32 %v10756_v34, %v10748_v20 }
0x263e   : > { %10084 = vmatmul.mubr.msk.f32.vlgmr.msra.gmra.mxu1 %vm2532_vm4, %v6934_v28 }
0x263f   : > { %10092 = vmatpush3.msra.mxu1 %v7103_v37  ;;  %10093 = vmatprep.mubr.msk.f32.mxu1 %vm11763_vm1, %v11762_v8 }
0x2640   : > { %10101 = vmatprep.subr.mxu1 %v11762_v8  ;;  %v10758_v11 = vpop.eup %10757 }
0x2641   : > { %v7268_v39 = vmul.f32 %v10758_v11, %v10750_v24 }
0x2642   : > { %10094 = vmatmul.mubr.msk.f32.vlgmr.msra.gmra.mxu1 %vm2532_vm4, %v7101_v35 }
0x2643   : > { %10102 = vmatpush3.msra.mxu1 %v7270_v38  ;;  %10103 = vmatprep.mubr.msk.f32.mxu1 %vm11763_vm1, %v11762_v8 }
0x2644   : > { %10111 = vmatprep.subr.mxu1 %v11762_v8  ;;  %v10760_v41 = vpop.eup %10759 }
0x2645   : > { %v7435_v44 = vmul.f32 %v10760_v41, %v10752_v26 }
0x2646   : > { %10104 = vmatmul.mubr.msk.f32.vlgmr.msra.gmra.mxu1 %vm2532_vm4, %v7268_v39 }
0x2647   : > { %10112 = vmatpush3.msra.mxu1 %v7437_v42  ;;  %10113 = vmatprep.mubr.msk.f32.mxu1 %vm11763_vm1, %v11762_v8 }
0x2648   : > { %10127 = vmatprep.subr.mxu1 %v11762_v8 }
0x264a   : > { %10114 = vmatmul.mubr.msk.f32.vlgmr.msra.gmra.mxu1 %vm2532_vm4, %v7435_v44 }
0x264b   : > { %10135 = vmatprep.mubr.msk.f32.mxu1 %vm11763_vm1, %v11762_v8  ;;  %10128 = vmatpush3.msra.mxu1 %v7651_v0 }
0x264c   : > { %10129 = vmatprep.subr.mxu1 %v11762_v8 }
0x264d   : > { %10130 = vmatpush3.msra.mxu1 %v7650_v6 }
0x264e   : > { %10131 = vmatprep.subr.mxu1 %v11762_v8 }
0x264f   : > { %10132 = vmatpush3.msra.mxu1 %v7649_v7 }
0x2650   : > { %10133 = vmatprep.subr.mxu1 %v11762_v8 }
0x26fe   : > { %v7007_v50 = vpop.f32.mrf.mxu1 }
0x2700   : > { %v10085_v52 = vpop.f32.mrf.mxu1 }
0x2702   : > { %v7174_v53 = vpop.f32.mrf.mxu1 }
0x2703   : > { %7513 = vrot.lane.b32.xlu0 %v7174_v53, %s13536_s1 }
0x2704   : > { %v10095_v54 = vpop.f32.mrf.mxu1 }
0x2706   : > { %v7341_v55 = vpop.f32.mrf.mxu1 }
0x2707   : > { %7517 = vrot.lane.b32.xlu1 %v7341_v55, %s13537_s3 }
0x2708   : > { %v10105_v56 = vpop.f32.mrf.mxu1 }
0x270a   : > { %v7508_v57 = vpop.f32.mrf.mxu1 }
0x270b   : > { %7521 = vrot.lane.b32.xlu0 %v7508_v57, %s13538_s4 }
0x270c   : > { %v10115_v58 = vpop.f32.mrf.mxu1 }
0x2775   : > { %v7514_v59 = vpop.permute.xlu0 %7513 }
0x2776   : > { %v7524_v61 = vsel %vm2532_vm4, %v7007_v50, %v7514_v59 }
0x2779   : > { %v7518_v60 = vpop.permute.xlu1 %7517 }
0x277a   : > { %v7525_v62 = vsel %vm3216_vm7, %v7524_v61, %v7518_v60 }
0x277d   : > { %v7522_v1 = vpop.permute.xlu0 %7521 }
0x277e   : > { %v7526_v63 = vsel %vm3218_vm8, %v7525_v62, %v7522_v1 }
0x277f   : > { %10125 = vmatmul.mubr.msk.f32.vlgmr.msra.gmra.mxu0 %vm2407_vm0, %v7526_v63 }
0x2780   : > { %10146 = vmatprep.mubr.msk.f32.mxu0 %vm11763_vm1, %v11762_v8 }
0x283f   : > { %v7607_v3 = vpop.f32.mrf.mxu0 }
0x2840   : > { %v7608_v4 = vadd.f32 %v9461_v2, %v7607_v3 }
0x2841   : > { %v10126_v5 = vpop.f32.mrf.mxu0 }
0x2842   : > { %v13143_v46 = vadd.f32 %v7608_v4, %v13030_v10  ;;  %v7648_v10 = vld [vmem:[%s13572_s16] sm:$0xff] }
0x2843   : > { %10134 = vmatpush3.msra.mxu1 %v7648_v10 }
0x2844   : > { %v7614_v36 = vsel %vm2407_vm0, %v13143_v46, 0.0  ;;  %10149 = vmatprep.subr.mxu1 %v11762_v8 }
0x2845   : > { %7615 = vadd.xlane.f32.xlu1 %v7614_v36 }
0x2856   : > { %7740 = vrot.lane.b32.xlu1 %v7650_v6, %s13546_s6 }
0x285a   : > { %7738 = vrot.lane.b32.xlu1 %v7649_v7, %s13546_s6 }
0x285e   : > { %7748 = vrot.lane.b32.xlu1 %v9465_v16, %s13546_s6 }
0x28ce   : > { %v7616_v9 = vpop.xlane.xlu1 %7615 }
0x28cf   : > { %v7617_v12 = vmul.f32 0.03125, %v7616_v9 }
0x28d1   : > { %v7618_v13 = vsub.f32 %v13143_v46, %v7617_v12 }
0x28d2   : > { %v7741_v17 = vpop.permute.xlu1 %7740 }
0x28d3   : > { %v7619_v14 = vmul.f32 %v7618_v13, %v7618_v13  ;;  %v7639_v30 = vmul.f32 %v9463_v29, %v7618_v13 }
0x28d5   : > { %v7620_v15 = vsel %vm2407_vm0, %v7619_v14, 0.0 }
0x28d6   : > { %7621 = vadd.xlane.f32.xlu0 %v7620_v15  ;;  %v7739_v19 = vpop.permute.xlu1 %7738 }
0x28da   : > { %v7749_v28 = vpop.permute.xlu1 %7748 }
0x28ec   : > { %7742 = vrot.lane.b32.xlu0 %v7651_v0, %s13546_s6 }
0x28f0   : > { %7736 = vrot.lane.b32.xlu0 %v7648_v10, %s13546_s6 }
0x295f   : > { %v7622_v48 = vpop.xlane.xlu0 %7621 }
0x2960   : > { %v7623_v18 = vmul.f32 0.032258064, %v7622_v48 }
0x2962   : > { %10761 = vrsqrt.f32 %v7623_v18  ;;  %vm7626_vm5 = vcmp.eq.f32.partialorder %v7623_v18, inf  ;;  %v7629_v24 = vand.u32 2147483648, %v7623_v18  ;;  %vm7628_vm9 = vcmp.eq.f32.partialorder %v7623_v18, 0.0 }
0x2963   : > { %v7743_v21 = vpop.permute.xlu0 %7742 }
0x2964   : > { %10139 = vmatpush3.msra.mxu0 %v7743_v21 }
0x2965   : > { %10140 = vmatprep.subr.mxu0 %v11762_v8 }
0x2966   : > { %10141 = vmatpush3.msra.mxu0 %v7741_v17 }
0x2967   : > { %10142 = vmatprep.subr.mxu0 %v11762_v8  ;;  %v7737_v20 = vpop.permute.xlu0 %7736 }
0x2968   : > { %10143 = vmatpush3.msra.mxu0 %v7739_v19 }
0x2969   : > { %10144 = vmatprep.subr.mxu0 %v11762_v8 }
0x296a   : > { %10145 = vmatpush3.msra.mxu0 %v7737_v20 }
0x296b   : > { %10147 = vmatmul.mubr.msk.f32.vlgmr.msra.gmra.mxu0 %vm2407_vm0, %v12886_v47  ;;  %10159 = vmatprep.subr.mxu0 %v11762_v8 }
0x296c   : > { %10161 = vmatprep.mubr.msk.f32.mxu0 %vm11763_vm1, %v11762_v8 }
0x296f   : > { %v10762_v22 = vpop.eup %10761 }
0x2970   : > { %v7625_v23 = vmul.f32 %v10762_v22, %v7623_v18 }
0x2972   : > { %v7627_v25 = vsel %vm7626_vm5, %v7623_v18, %v7625_v23 }
0x2973   : > { %v7630_v26 = vsel %vm7628_vm9, %v7629_v24, %v7627_v25 }
0x2974   : > { %v7631_v27 = vadd.f32 1e-06, %v7630_v26 }
0x2976   : > { %10763 = vrcp.f32 %v7631_v27 }
0x2983   : > { %v10764_v31 = vpop.eup %10763 }
0x2984   : > { %v7640_v33 = vmul.f32 %v10764_v31, %v7639_v30 }
0x2986   : > { %v7647_v47 = vadd.f32 %v9464_v32, %v7640_v33 }
0x2988   : > { %10136 = vmatmul.mubr.msk.f32.vlgmr.msra.gmra.mxu1 %vm2407_vm0, %v7647_v47 }
0x2989   : > { %10151 = vmatprep.mubr.msk.f32.mxu1 %vm11763_vm1, %v11762_v8 }
0x2a2b   : > { %v7817_v34 = vpop.f32.mrf.mxu0 }
0x2a2c   : > { %v13173_v37 = vadd.f32 %v7817_v34, %v7749_v28 }
0x2a2d   : > { %v10148_v38 = vpop.f32.mrf.mxu0 }
0x2a2e   : > { %7988 = vrot.lane.b32.xlu0 %v13173_v37, %s13547_s9  ;;  %10150 = vmatpush3.xpose.msk.msra.mxu1 %vm2532_vm4, %v13173_v37 }
0x2a2f   : > { %10154 = vmatprep.subr.mxu1 %v11762_v8 }
0x2a32   : > { %8155 = vrot.lane.b32.xlu0 %v13173_v37, %s13549_s5 }
0x2a36   : > { %8322 = vrot.lane.b32.xlu0 %v13173_v37, %s13529_s28 }
0x2a48   : > { %v7728_v35 = vpop.f32.mrf.mxu1 }
0x2a49   : > { %v7729_v11 = vadd.f32 %v9465_v16, %v7728_v35 }
0x2a4a   : > { %v10137_v39 = vpop.f32.mrf.mxu1 }
0x2a4b   : > { %7986 = vrot.lane.b32.xlu1 %v7729_v11, %s13547_s9  ;;  %10152 = vmatmul.mubr.msk.f32.vlgmr.msra.gmra.mxu1 %vm2532_vm4, %v7729_v11  ;;  %s13573_s9 = sld [smem:[#allocation98_spill]] }
0x2a4c   : > { %10156 = vmatprep.mubr.msk.f32.mxu1 %vm11763_vm1, %v11762_v8 }
0x2a4f   : > { %8153 = vrot.lane.b32.xlu1 %v7729_v11, %s13549_s5 }
0x2a53   : > { %8320 = vrot.lane.b32.xlu1 %v7729_v11, %s13529_s28 }
0x2aa0   : > { %v7989_v41 = vpop.permute.xlu0 %7988 }
0x2aa1   : > { %10160 = vmatpush3.xpose.msk.msra.mxu0 %vm2532_vm4, %v7989_v41 }
0x2aa2   : > { %10169 = vmatprep.subr.mxu0 %v11762_v8 }
0x2aa4   : > { %v8156_v42 = vpop.permute.xlu0 %8155 }
0x2aa8   : > { %v8323_v40 = vpop.permute.xlu0 %8322 }
0x2abd   : > { %v7987_v44 = vpop.permute.xlu1 %7986 }
0x2abe   : > { %10162 = vmatmul.mubr.msk.f32.vlgmr.msra.gmra.mxu0 %vm2532_vm4, %v7987_v44  ;;  %v8505_v44 = vld [vmem:[%s13573_s9 + $0x18] sm:$0xff] }
0x2abf   : > { %10170 = vmatpush3.xpose.msk.msra.mxu0 %vm2532_vm4, %v8156_v42  ;;  %10171 = vmatprep.mubr.msk.f32.mxu0 %vm11763_vm1, %v11762_v8 }
0x2ac0   : > { %10179 = vmatprep.subr.mxu0 %v11762_v8 }
0x2ac1   : > { %v8154_v45 = vpop.permute.xlu1 %8153 }
0x2ac2   : > { %10172 = vmatmul.mubr.msk.f32.vlgmr.msra.gmra.mxu0 %vm2532_vm4, %v8154_v45  ;;  %v8504_v45 = vld [vmem:[%s13573_s9 + $0x10] sm:$0xff] }
0x2ac3   : > { %10180 = vmatpush3.xpose.msk.msra.mxu0 %vm2532_vm4, %v8323_v40  ;;  %10181 = vmatprep.mubr.msk.f32.mxu0 %vm11763_vm1, %v11762_v8  ;;  %v8503_v40 = vld [vmem:[%s13573_s9 + $0x8] sm:$0xff] }
0x2ac4   : > { %10189 = vmatprep.subr.mxu0 %v11762_v8 }
0x2ac5   : > { %v8321_v49 = vpop.permute.xlu1 %8320 }
0x2ac6   : > { %10182 = vmatmul.mubr.msk.f32.vlgmr.msra.gmra.mxu0 %vm2532_vm4, %v8321_v49  ;;  %v8502_v49 = vld [vmem:[%s13573_s9] sm:$0xff] }
0x2ac7   : > { %10197 = vmatprep.mubr.msk.f32.mxu0 %vm11763_vm1, %v11762_v8  ;;  %10190 = vmatpush3.msra.mxu0 %v8505_v44 }
0x2ac8   : > { %10191 = vmatprep.subr.mxu0 %v11762_v8 }
0x2ac9   : > { %10192 = vmatpush3.msra.mxu0 %v8504_v45 }
0x2aca   : > { %10193 = vmatprep.subr.mxu0 %v11762_v8 }
0x2acb   : > { %10194 = vmatpush3.msra.mxu0 %v8503_v40 }
0x2acc   : > { %10195 = vmatprep.subr.mxu0 %v11762_v8 }
0x2acd   : > { %10196 = vmatpush3.msra.mxu0 %v8502_v49 }
0x2ace   : > { %10211 = vmatprep.subr.mxu0 %v11762_v8 }
0x2b0b   : > { %v7893_v50 = vpop.f32.mrf.mxu1 }
0x2b0c   : > { %v7897_v51 = vmul.f32 0.35355338, %v7893_v50 }
0x2b0d   : > { %v10153_v52 = vpop.f32.mrf.mxu1 }
0x2b0e   : > { %v7898_v53 = vsel %vm2613_vm6, %v7897_v51, -1e+09 }
0x2b0f   : > { %v7899_v54 = vsel %vm2532_vm4, %v7898_v53, -inf }
0x2b10   : > { %7900 = vmax.xlane.f32.xlu0 %v7899_v54 }
0x2b7e   : > { %v8060_v55 = vpop.f32.mrf.mxu0 }
0x2b7f   : > { %v8064_v56 = vmul.f32 0.35355338, %v8060_v55 }
0x2b80   : > { %v10163_v57 = vpop.f32.mrf.mxu0 }
0x2b81   : > { %v8065_v58 = vsel %vm2613_vm6, %v8064_v56, -1e+09 }
0x2b82   : > { %v8227_v59 = vpop.f32.mrf.mxu0  ;;  %v8066_v60 = vsel %vm2532_vm4, %v8065_v58, -inf }
0x2b83   : > { %v8231_v61 = vmul.f32 0.35355338, %v8227_v59  ;;  %8067 = vmax.xlane.f32.xlu1 %v8066_v60 }
0x2b84   : > { %v10173_v62 = vpop.f32.mrf.mxu0 }
0x2b85   : > { %v8232_v1 = vsel %vm2613_vm6, %v8231_v61, -1e+09  ;;  %v9480_v62 = vld [vmem:[#allocation14] ss:$0 sm:$0xff] }
0x2b86   : > { %v8394_v63 = vpop.f32.mrf.mxu0  ;;  %v8233_v2 = vsel %vm2532_vm4, %v8232_v1, -inf }
0x2b87   : > { %v8398_v3 = vmul.f32 0.35355338, %v8394_v63  ;;  %8234 = vmax.xlane.f32.xlu0 %v8233_v2 }
0x2b88   : > { %v10183_v4 = vpop.f32.mrf.mxu0 }
0x2b89   : > { %v8399_v5 = vsel %vm2613_vm6, %v8398_v3, -1e+09 }
0x2b8a   : > { %v8400_v36 = vsel %vm2532_vm4, %v8399_v5, -inf }
0x2b8b   : > { %8401 = vmax.xlane.f32.xlu0 %v8400_v36 }
0x2b94   : > { %7910 = vrot.lane.b32.xlu1 %v13173_v37, %s13546_s6  ;;  %s13574_s6 = sld [smem:[#allocation88_spill]] }
0x2b99   : > { %v7901_v6 = vpop.xlane.xlu0 %7900 }
0x2b9a   : > { %v7902_v0 = vsub.f32 %v7898_v53, %v7901_v6 }
0x2b9c   : > { %v7903_v7 = vmul.f32 1.442695, %v7902_v0 }
0x2b9e   : > { %10765 = vpow2.f32 %v7903_v7 }
0x2bab   : > { %v10766_v10 = vpop.eup %10765 }
0x2bac   : > { %v7905_v9 = vsel %vm2532_vm4, %v10766_v10, 0.0 }
0x2bb8   : > { %7906 = vadd.xlane.f32.xlu1 %v7905_v9  ;;  %v8625_v9 = vld [vmem:[%s13574_s6 + $0x10] sm:$0xff] }
0x2c0c   : > { %v8068_v12 = vpop.xlane.xlu1 %8067 }
0x2c0d   : > { %v8069_v13 = vsub.f32 %v8065_v58, %v8068_v12  ;;  %v8623_v12 = vld [vmem:[%s13574_s6] sm:$0xff] }
0x2c0f   : > { %v8070_v14 = vmul.f32 1.442695, %v8069_v13 }
0x2c10   : > { %v7911_v15 = vpop.permute.xlu1 %7910  ;;  %v8235_v43 = vpop.xlane.xlu0 %8234 }
0x2c11   : > { %10767 = vpow2.f32 %v8070_v14  ;;  %v8236_v16 = vsub.f32 %v8232_v1, %v8235_v43  ;;  %10155 = vmatpush3.msra.mxu1 %v7911_v15 }
0x2c12   : > { %10164 = vmatprep.subr.mxu1 %v11762_v8 }
0x2c13   : > { %v8237_v48 = vmul.f32 1.442695, %v8236_v16 }
0x2c14   : > { %v8402_v17 = vpop.xlane.xlu0 %8401 }
0x2c15   : > { %10769 = vpow2.f32 %v8237_v48  ;;  %v8403_v18 = vsub.f32 %v8399_v5, %v8402_v17 }
0x2c17   : > { %v8404_v21 = vmul.f32 1.442695, %v8403_v18 }
0x2c19   : > { %10771 = vpow2.f32 %v8404_v21 }
0x2c1e   : > { %v10768_v19 = vpop.eup %10767 }
0x2c1f   : > { %v8072_v20 = vsel %vm2532_vm4, %v10768_v19, 0.0 }
0x2c20   : > { %8073 = vadd.xlane.f32.xlu0 %v8072_v20 }
0x2c22   : > { %v10770_v22 = vpop.eup %10769 }
0x2c23   : > { %v8239_v23 = vsel %vm2532_vm4, %v10770_v22, 0.0 }
0x2c24   : > { %8240 = vadd.xlane.f32.xlu1 %v8239_v23 }
0x2c26   : > { %v10772_v24 = vpop.eup %10771 }
0x2c27   : > { %v8406_v25 = vsel %vm2532_vm4, %v10772_v24, 0.0 }
0x2c28   : > { %8407 = vadd.xlane.f32.xlu0 %v8406_v25 }
0x2c35   : > { %8244 = vrot.lane.b32.xlu1 %v13173_v37, %s13548_s10  ;;  %s13575_s10 = sld [smem:[#allocation89_spill]] }
0x2c39   : > { %8411 = vrot.lane.b32.xlu1 %v13173_v37, %s13550_s11  ;;  %s9491_s11 = sshll.u32 %s12151_s7, 7 }
0x2c3b   : > { %v8715_v13 = vld [vmem:[%s13575_s10 + $0x38] sm:$0xff]  ;;  %v8714_v14 = vld [vmem:[%s13575_s10 + $0x30] sm:$0xff]  ;;  %v8713_v15 = vld [vmem:[%s13575_s10 + $0x28] sm:$0xff] }
0x2c3c   : > { %v8712_v43 = vld [vmem:[%s13575_s10 + $0x20] sm:$0xff]  ;;  %v8711_v16 = vld [vmem:[%s13575_s10 + $0x18] sm:$0xff] }
0x2c3e   : > { %8077 = vrot.lane.b32.xlu0 %v13173_v37, %s13545_s8  ;;  %s8846_s8 = scalar_lea.hbm %s12128_s24, %s9491_s11 }
0x2c41   : > { %v7907_v26 = vpop.xlane.xlu1 %7906 }
0x2c42   : > { %10773 = vrcp.f32 %v7907_v26 }
0x2c4f   : > { %v10774_v27 = vpop.eup %10773 }
0x2c50   : > { %v7909_v29 = vmul.f32 %v10774_v27, %v10766_v10  ;;  %v8626_v10 = vld [vmem:[%s13574_s6 + $0x18] sm:$0xff]  ;;  %v9483_v27 = vld [vmem:[#allocation10] ss:$0 sm:$0xff] }
0x2c52   : > { %10157 = vmatmul.mubr.msk.f32.vlgmr.msra.gmra.mxu1 %vm2532_vm4, %v7909_v29 }
0x2c53   : > { %10166 = vmatprep.mubr.msk.f32.mxu1 %vm11763_vm1, %v11762_v8 }
0x2ca9   : > { %v8074_v30 = vpop.xlane.xlu0 %8073 }
0x2caa   : > { %10775 = vrcp.f32 %v8074_v30 }
0x2cad   : > { %v8241_v31 = vpop.xlane.xlu1 %8240 }
0x2cae   : > { %10777 = vrcp.f32 %v8241_v31  ;;  %v8710_v31 = vld [vmem:[%s13575_s10 + $0x10] sm:$0xff] }
0x2cb1   : > { %v8408_v32 = vpop.xlane.xlu0 %8407  ;;  %v8245_v28 = vpop.permute.xlu1 %8244 }
0x2cb2   : > { %10779 = vrcp.f32 %v8408_v32  ;;  %v8709_v32 = vld [vmem:[%s13575_s10 + $0x8] sm:$0xff] }
0x2cb5   : > { %v8078_v33 = vpop.permute.xlu0 %8077  ;;  %v8412_v35 = vpop.permute.xlu1 %8411 }
0x2cb6   : > { %10165 = vmatpush3.msra.mxu1 %v8078_v33  ;;  %v8708_v33 = vld [vmem:[%s13575_s10] sm:$0xff] }
0x2cb7   : > { %v10776_v47 = vpop.eup %10775  ;;  %10174 = vmatprep.subr.mxu1 %v11762_v8 }
0x2cb8   : > { %v8076_v34 = vmul.f32 %v10776_v47, %v10768_v19  ;;  %v9484_v47 = vld [vmem:[%s13576_s19] ss:$0 sm:$0xff]  ;;  %s11549_s19 = scalar_lea.vmem %s11548_s15, 256 }
0x2cba   : > { %10167 = vmatmul.mubr.msk.f32.vlgmr.msra.gmra.mxu1 %vm2532_vm4, %v8076_v34 }
0x2cbb   : > { %v10778_v37 = vpop.eup %10777  ;;  %10175 = vmatpush3.msra.mxu1 %v8245_v28  ;;  %10176 = vmatprep.mubr.msk.f32.mxu1 %vm11763_vm1, %v11762_v8 }
0x2cbc   : > { %10184 = vmatprep.subr.mxu1 %v11762_v8  ;;  %v8243_v38 = vmul.f32 %v10778_v37, %v10770_v22 }
0x2cbe   : > { %10177 = vmatmul.mubr.msk.f32.vlgmr.msra.gmra.mxu1 %vm2532_vm4, %v8243_v38 }
0x2cbf   : > { %v10780_v11 = vpop.eup %10779  ;;  %10185 = vmatpush3.msra.mxu1 %v8412_v35  ;;  %10186 = vmatprep.mubr.msk.f32.mxu1 %vm11763_vm1, %v11762_v8  ;;  %v9486_v35 = vld [vmem:[%s13577_s23] ss:$0 sm:$0xff] }
0x2cc0   : > { %v8410_v39 = vmul.f32 %v10780_v11, %v10772_v24  ;;  %10200 = vmatprep.subr.mxu1 %v11762_v8  ;;  %v9482_v24 = vld [vmem:[#allocation8] ss:$0 sm:$0xff] }
0x2cc2   : > { %10187 = vmatmul.mubr.msk.f32.vlgmr.msra.gmra.mxu1 %vm2532_vm4, %v8410_v39 }
0x2cc3   : > { %10208 = vmatprep.mubr.msk.f32.mxu1 %vm11763_vm1, %v11762_v8  ;;  %10201 = vmatpush3.msra.mxu1 %v8626_v10 }
0x2cc4   : > { %10202 = vmatprep.subr.mxu1 %v11762_v8 }
0x2cc5   : > { %10203 = vmatpush3.msra.mxu1 %v8625_v9 }
0x2cc6   : > { %10204 = vmatprep.subr.mxu1 %v11762_v8 }
0x2d12   : > { %v7982_v41 = vpop.f32.mrf.mxu1 }
0x2d14   : > { %v10158_v42 = vpop.f32.mrf.mxu1 }
0x2d7a   : > { %v8149_v50 = vpop.f32.mrf.mxu1 }
0x2d7b   : > { %8488 = vrot.lane.b32.xlu0 %v8149_v50, %s13536_s1 }
0x2d7c   : > { %v10168_v51 = vpop.f32.mrf.mxu1 }
0x2d7e   : > { %v8316_v52 = vpop.f32.mrf.mxu1 }
0x2d7f   : > { %8492 = vrot.lane.b32.xlu1 %v8316_v52, %s13537_s3  ;;  %s2383_s3 = sand.u32 1, %s11655_s0  }
0x2d80   : > { %v10178_v53 = vpop.f32.mrf.mxu1  ;;  %s8835_s5 = scalar_lea.sflag [#allocation4], %s2383_s3 }
0x2d82   : > { %v8483_v54 = vpop.f32.mrf.mxu1 }
0x2d83   : > { %8496 = vrot.lane.b32.xlu0 %v8483_v54, %s13538_s4  ;;  %s9348_s4 = sshll.u32 %s2383_s3, 3 }
0x2d84   : > { %v10188_v55 = vpop.f32.mrf.mxu1  ;;  %s2385_s1 = scalar_lea.vmem [#allocation47], %s9348_s4 }
0x2d85   : > { %s8848_s28 = sshll.u32 %s2385_s1, 4  ;;  %s8849_s28 = int_to_ptr.vmem [resolvable:$true] %s8848_s28 }
0x2d86   : > { %s11543_s12 = scalar_lea.vmem %s8849_s28, 128  ;;  %p11550_p4 = scmp.lt.s32.totalorder %s8849_s28, %s11548_s15 }
0x2d87   : > { %p11544_p2 = scmp.ne.s32.totalorder %s8849_s28, %s11543_s12  ;;  %p11551_p5 = scmp.lt.s32.totalorder %s11549_s19, %s11543_s12 }
0x2d89   : > { %p11545_p12 = pnand %p11544_p2, %p13578_p3  ;;  %p11552_p6 = por %p11551_p5, %p11550_p4 }
0x2d8b   : > { %p11546_p9 = pneg %p11545_p12 }
0x2d8d   : > { %p11553_p10 = pnand %p11552_p6, %p11546_p9 }
0x2ded   : > { %v8489_v56 = vpop.permute.xlu0 %8488 }
0x2dee   : > { %v8499_v58 = vsel %vm2532_vm4, %v7982_v41, %v8489_v56 }
0x2df1   : > { %v8493_v57 = vpop.permute.xlu1 %8492 }
0x2df2   : > { %v8500_v59 = vsel %vm3216_vm7, %v8499_v58, %v8493_v57 }
0x2df5   : > { %v8497_v60 = vpop.permute.xlu0 %8496 }
0x2df6   : > { %v8501_v61 = vsel %vm3218_vm8, %v8500_v59, %v8497_v60  ;;  %v9488_v59 = vld [vmem:[#allocation17] ss:$0 sm:$0xff] }
0x2df7   : > { %10198 = vmatmul.mubr.msk.f32.vlgmr.msra.gmra.mxu0 %vm2407_vm0, %v8501_v61 }
0x2df8   : > { %10227 = vmatprep.mubr.msk.f32.mxu0 %vm11763_vm1, %v11762_v8  ;;  %10212 = vmatpush3.msra.mxu0 %v8715_v13 }
0x2df9   : > { %10213 = vmatprep.subr.mxu0 %v11762_v8 }
0x2dfa   : > { %10214 = vmatpush3.msra.mxu0 %v8714_v14 }
0x2dfb   : > { %10215 = vmatprep.subr.mxu0 %v11762_v8 }
0x2dfc   : > { %10216 = vmatpush3.msra.mxu0 %v8713_v15 }
0x2dfd   : > { %10217 = vmatprep.subr.mxu0 %v11762_v8 }
0x2dfe   : > { %10218 = vmatpush3.msra.mxu0 %v8712_v43 }
0x2dff   : > { %10219 = vmatprep.subr.mxu0 %v11762_v8 }
0x2e00   : > { %10220 = vmatpush3.msra.mxu0 %v8711_v16 }
0x2e01   : > { %10221 = vmatprep.subr.mxu0 %v11762_v8 }
0x2e02   : > { %10222 = vmatpush3.msra.mxu0 %v8710_v31 }
0x2e03   : > { %10223 = vmatprep.subr.mxu0 %v11762_v8 }
0x2e04   : > { %10224 = vmatpush3.msra.mxu0 %v8709_v32 }
0x2e05   : > { %10225 = vmatprep.subr.mxu0 %v11762_v8 }
0x2e06   : > { %10226 = vmatpush3.msra.mxu0 %v8708_v33 }
0x2eb7   : > { %v8582_v1 = vpop.f32.mrf.mxu0 }
0x2eb8   : > { %v8583_v63 = vadd.f32 %v9480_v62, %v8582_v1  ;;  %v9489_v62 = vld [vmem:[#allocation19] ss:$0 sm:$0xff] }
0x2eb9   : > { %v10199_v2 = vpop.f32.mrf.mxu0 }
0x2eba   : > { %v13263_v3 = vadd.f32 %v8583_v63, %v13143_v46  ;;  %v8624_v46 = vld [vmem:[%s13574_s6 + $0x8] sm:$0xff] }
0x2ebb   : > { %10205 = vmatpush3.msra.mxu1 %v8624_v46 }
0x2ebc   : > { %v8589_v4 = vsel %vm2407_vm0, %v13263_v3, 0.0  ;;  %10206 = vmatprep.subr.mxu1 %v11762_v8 }
0x2ebd   : > { %8590 = vadd.xlane.f32.xlu1 %v8589_v4  ;;  %10207 = vmatpush3.msra.mxu1 %v8623_v12 }
0x2f46   : > { %v8591_v5 = vpop.xlane.xlu1 %8590 }
0x2f47   : > { %v8592_v36 = vmul.f32 0.03125, %v8591_v5 }
0x2f49   : > { %v8593_v6 = vsub.f32 %v13263_v3, %v8592_v36 }
0x2f4b   : > { %v8594_v0 = vmul.f32 %v8593_v6, %v8593_v6  ;;  %v8614_v25 = vmul.f32 %v9482_v24, %v8593_v6 }
0x2f4d   : > { %v8595_v7 = vsel %vm2407_vm0, %v8594_v0, 0.0 }
0x2f4e   : > { %8596 = vadd.xlane.f32.xlu0 %v8595_v7 }
0x2fd7   : > { %v8597_v48 = vpop.xlane.xlu0 %8596 }
0x2fd8   : > { %v8598_v17 = vmul.f32 0.032258064, %v8597_v48 }
0x2fda   : > { %10781 = vrsqrt.f32 %v8598_v17  ;;  %vm8601_vm1 = vcmp.eq.f32.partialorder %v8598_v17, inf  ;;  %v8604_v19 = vand.u32 2147483648, %v8598_v17  ;;  %vm8603_vm4 = vcmp.eq.f32.partialorder %v8598_v17, 0.0 }
0x2fe7   : > { %v10782_v18 = vpop.eup %10781 }
0x2fe8   : > { %v8600_v21 = vmul.f32 %v10782_v18, %v8598_v17 }
0x2fea   : > { %v8602_v20 = vsel %vm8601_vm1, %v8598_v17, %v8600_v21 }
0x2feb   : > { %v8605_v22 = vsel %vm8603_vm4, %v8604_v19, %v8602_v20 }
0x2fec   : > { %v8606_v23 = vadd.f32 1e-06, %v8605_v22 }
0x2fee   : > { %10783 = vrcp.f32 %v8606_v23 }
0x2ffb   : > { %v10784_v26 = vpop.eup %10783 }
0x2ffc   : > { %v8615_v29 = vmul.f32 %v10784_v26, %v8614_v25 }
0x2ffe   : > { %v8622_v30 = vadd.f32 %v9483_v27, %v8615_v29 }
0x3000   : > { %10209 = vmatmul.mubr.msk.f32.vlgmr.msra.gmra.mxu1 %vm2407_vm0, %v8622_v30 }
0x30c0   : > { %v8703_v28 = vpop.f32.mrf.mxu1 }
0x30c1   : > { %v8704_v34 = vadd.f32 %v9484_v47, %v8703_v28 }
0x30c2   : > { %v10210_v37 = vpop.f32.mrf.mxu1 }
0x30c3   : > { %v8707_v38 = vmax.f32 %v8704_v34, 0.0 }
0x30c5   : > { %10228 = vmatmul.mubr.msk.f32.vlgmr.msra.gmra.mxu0 %vm3441_vm11, %v8707_v38 }
0x3185   : > { %v8792_v11 = vpop.f32.mrf.mxu0 }
0x3186   : > { %v8793_v39 = vadd.f32 %v9486_v35, %v8792_v11 }
0x3187   : > { %v10229_v41 = vpop.f32.mrf.mxu0 }
0x3188   : > { %v8796_v42 = vadd.f32 %v8793_v39, %v13263_v3 }
0x318a   : > { %v8799_v44 = vsel %vm2407_vm0, %v8796_v42, 0.0 }
0x318b   : > { %8800 = vadd.xlane.f32.xlu0 %v8799_v44 }
0x3214   : > { %v8801_v45 = vpop.xlane.xlu0 %8800 }
0x3215   : > { %v8802_v40 = vmul.f32 0.03125, %v8801_v45 }
0x3217   : > { %v8803_v8 = vsub.f32 %v8796_v42, %v8802_v40 }
0x3219   : > { %v8804_v49 = vmul.f32 %v8803_v8, %v8803_v8  ;;  %v8824_v60 = vmul.f32 %v9488_v59, %v8803_v8 }
0x321b   : > { %v8805_v50 = vsel %vm2407_vm0, %v8804_v49, 0.0 }
0x321c   : > { %8806 = vadd.xlane.f32.xlu1 %v8805_v50 }
0x32a5   : > { %v8807_v51 = vpop.xlane.xlu1 %8806 }
0x32a6   : > { %v8808_v52 = vmul.f32 0.032258064, %v8807_v51 }
0x32a8   : > { %10785 = vrsqrt.f32 %v8808_v52  ;;  %vm8811_vm6 = vcmp.eq.f32.partialorder %v8808_v52, inf  ;;  %v8814_v55 = vand.u32 2147483648, %v8808_v52  ;;  %vm8813_vm7 = vcmp.eq.f32.partialorder %v8808_v52, 0.0 }
0x32b5   : > { %v10786_v53 = vpop.eup %10785 }
0x32b6   : > { %v8810_v54 = vmul.f32 %v10786_v53, %v8808_v52 }
0x32b8   : > { %v8812_v56 = vsel %vm8811_vm6, %v8808_v52, %v8810_v54 }
0x32b9   : > { %v8815_v57 = vsel %vm8813_vm7, %v8814_v55, %v8812_v56 }
0x32ba   : > { %v8816_v58 = vadd.f32 1e-06, %v8815_v57 }
0x32bc   : > { %10787 = vrcp.f32 %v8816_v58 }
0x32c9   : > { %v10788_v61 = vpop.eup %10787 }
0x32ca   : > { %v8825_v1 = vmul.f32 %v10788_v61, %v8824_v60 }
0x32cc   : > { %v8832_v63 = vadd.f32 %v9489_v62, %v8825_v1 }
0x32ce   : > { %8833 = vst.msk [vmem:[%s2385_s1] sm:$0xff] %vm2407_vm0, %v8832_v63 }
0x32cf   : > { %11556 = shalt.err (!%p11553_p10)
}
0x32d0   : > { %s11557_s7 = scalar_lea.hbm %s8846_s8, 128  ;;  %s11561_s23 = scalar_lea.hbm %s12128_s24, 256 }
0x32d1   : > { %p11558_p7 = scmp.ne.s32.totalorder %s8846_s8, %s11557_s7  ;;  %p11562_p0 = scmp.lt.s32.totalorder %s8846_s8, %s12128_s24 }
0x32d2   : > { %p11563_p1 = scmp.lt.s32.totalorder %s11561_s23, %s11557_s7 }
0x32d3   : > { %p11559_p8 = pnand %p11558_p7, %p13578_p3 }
0x32d4   : > { %p11564_p13 = por %p11563_p1, %p11562_p0 }
0x32d5   : > { %p11560_p11 = pneg %p11559_p8 }
0x32d7   : > { %p11565_p2 = pnand %p11564_p13, %p11560_p11 }
0x32d9   : > { %11568 = shalt.err (!%p11565_p2)
}
0x32da   : > { %10346 = dma.vmem_to_hbm [thread:$0]  (%p13578_p3), %s8849_s28, 128, %s8846_s8, %s8835_s5  }
0x32db PF: > { %s13579_s3 = sld [smem:[#allocation127_spill]] }
0x32dc   : > { %s13580_s4 = sld [smem:[#allocation125_spill]] }
0x32dd   : > { %s13581_s11 = sld [smem:[#allocation130_spill]] }
0x32e1   : > { %p10498_p12 = scmp.ge.s32.totalorder %s13579_s3, 2 }
0x32e2   : > { %s8860_s1 = sand.u32 1, %s13580_s4  }
0x32e3   : > { %p13582_p9 = scmp.ne.s32.totalorder %s13581_s11, 0  ;;  %s8861_s12 = scalar_lea.sflag [#allocation4], %s8860_s1 }
0x32e5   : > { %p10437_p4 = pnand %p10498_p12, %p13582_p9 }
0x32e7   : > { %p10438_p5 = pneg %p10437_p4 }
0x32e9   : > { %11646 = dma.done.wait (%p10438_p5), %s8861_s12, 128  }
0x32ea   : > { %11648 = vsyncadd (%p10438_p5), %s8861_s12, 4294967168  ;;  %s13583_s2 = sld [smem:[#allocation128_spill]]  ;;  %s13586_s28 = smov %s11655_s0 }
0x32eb   : > { %s13584_s15 = sld [smem:[#allocation126_spill]] }
0x32ec   : > { %s13585_s1 = sld [smem:[#allocation129_spill]] }
0x32f0   : > { %p162_p6 = scmp.ge.s32.totalorder %s13583_s2, 4  }
0x32f1   : > { %s13587_s0 = smov %s13584_s15 }
0x32f2   :  { %164 = sbr.rel (!%p162_p6) target bundleno = 151 (0x97), region = 521 }
0x32f7   :  { %8866 = vsyncpa [#allocation3], 1 }
0x32f8   :  { %8868 = vsyncpa [#allocation3 + $0x1], 1 }
0x32f9   :  { %8869 = vsyncpa [#allocation6], 1 }
0x32fa   :  { %8870 = vsyncpa [#allocation9], 1 }
0x32fb   :  { %8871 = vsyncpa [#allocation12], 1 }
0x32fc   :  { %8872 = vsyncpa [#allocation15], 1 }
0x32fd   :  { %8873 = vsyncpa [#allocation18], 1 }
0x32fe   :  { %8874 = vsyncpa [#allocation21], 1 }
0x32ff   :  { %8875 = vsyncpa [#allocation24], 1 }
0x3300   :  { %8876 = vsyncpa [#allocation27], 1 }
0x3301   :  { %8877 = vsyncpa [#allocation30], 1 }
0x3302   :  { %8878 = vsyncpa [#allocation33], 1 }
0x3303   :  { %8879 = vsyncpa [#allocation36], 1 }
0x3304   :  { %8880 = vsyncpa [#allocation39], 1 }
0x3305   :  { %8881 = vsyncpa [#allocation42], 1 }
0x3306   :  { %8882 = vsyncpa [#allocation45], 1 }
0x3307   :  { %8883 = vsyncpa [#allocation4], 1 }
0x3308   :  { %8885 = vsyncpa [#allocation4 + $0x1], 1 }

</bundles_post_ra>
